<compile_context>
chip_gen: v5e
topology: v5e:2x2
jax: 0.10.0
libtpu: 0.0.40
codegen_flags: <defaults>
</compile_context>

<pallas_src>
import functools

import jax
import jax.numpy as jnp
from jax import lax
from jax.experimental import pallas as pl
from jax.experimental.pallas import tpu as pltpu

NEG_SLOPE = 0.2
BN_EPS = 1e-5


# ----------------------------------------------------------------------------
# kNN neighbour indices (stays in plain JAX / XLA).
# ----------------------------------------------------------------------------
def knn_indices(pos, k):
    # pos: (B, N, 3) -> idx (B, N, k); idx[b, p, :] = k nearest neighbours of p
    # (self included, same as the PyTorch knn()).  PointTransformerConv then does
    # remove_self_loops + add_self_loops; the kernel forces self loops anyway.
    g = jnp.einsum("bic,bjc->bij", pos, pos)
    sq = jnp.sum(pos * pos, axis=-1)
    neg_d = 2.0 * g - sq[:, :, None] - sq[:, None, :]           # -||pi - pj||^2
    # TODO(synk): top_k has no clean Pallas equivalent; kNN selection stays in XLA.
    _, idx = jax.lax.top_k(neg_d, k)                            # (B, N, k)
    return idx.astype(jnp.int32)


# ----------------------------------------------------------------------------
# Fused kernel: 4x PointTransformerConv (+BN+LeakyReLU) -> pool -> 3-layer head,
# processing B_TILE point clouds per grid step.
# ----------------------------------------------------------------------------
def _fused_kernel(idx_ref, pos_ref,
                  wf1, st1, wf2, st2, wf3, st3, wf4, st4,
                  w1f, bn6, w2h, bn7, w3h, sh8,
                  o_ref, *, b_tile, n_points, k):
    btn = b_tile * n_points

    pos = pos_ref[0]                                    # (BTN, 3) f32 coords
    px, py, pz = pos[:, 0:1], pos[:, 1:2], pos[:, 2:3]

    # ---- block-diagonal 0/1 mask from the kNN index table (no N^2 HBM stream).
    # adj[i, j] = 1 iff i is a neighbour of query j (same sample) or i == j.
    # Neighbour indices already carry the per-sample offset b_local*N, so
    # cross-sample entries can never match -> block-diagonal for free.
    nbr = idx_ref[0]                                    # (k, BTN) int32
    row_i = lax.broadcasted_iota(jnp.int32, (btn, btn), 0)
    col_j = lax.broadcasted_iota(jnp.int32, (btn, btn), 1)
    mask = row_i == col_j                               # forced self loops
    for kk in range(k):                                 # k static -> unrolled VPU compares
        mask = jnp.logical_or(mask, row_i == nbr[kk:kk + 1, :])
    adj = mask.astype(jnp.bfloat16)                     # 0/1 exact in bf16

    def mm3(m):
        # (BTN, 3) @ (3, C) as 3 broadcast FMAs on the VPU: a K=3 contraction
        # would waste an MXU pass and give lane-sparse operands.
        return px * m[0:1, :] + py * m[1:2, :] + pz * m[2:3, :]

    def conv(x_cat, w_feat_ref, stack_ref):
        # PointTransformerConv per edge (j -> i), attn_nn=None, pos_nn affine:
        #   attn_ij = softmax_j(-(lin_src(x)[j] + pp[j]))   (i-only terms cancel)
        #   out[i]  = sum_j attn_ij * (lin(x)[j] - pp[j]) + pp[i] + b_pos
        st = stack_ref[...]                             # (6, C): w_pos|b_pos|scale|shift
        c = st.shape[1]
        pp = mm3(st[0:3, :])                            # pos_nn weight part   (BTN, C)
        bp, scale, shift = st[3:4, :], st[4:5, :], st[5:6, :]

        if x_cat is None:                               # conv1: features = coords (Cin=3)
            hv = mm3(w_feat_ref[...])                   # f32 VPU path
        else:                                           # bf16 MXU operands, f32 acc
            hv = jnp.dot(x_cat, w_feat_ref[...], preferred_element_type=jnp.float32)
        h = hv[:, :c]                                   # lin(x)       (BTN, C)
        a_src = hv[:, c:]                               # lin_src(x)   (BTN, C)

        v = a_src + pp                                  # source-side score
        wv = h - pp                                     # source-side value
        # Stabilisation constant is per-channel only -> cancels exactly in num/den.
        # (Per-target masked max would be more robust to >88 score spreads.)
        e = jnp.exp(-(v - jnp.min(v, axis=0, keepdims=True)))          # (BTN, C) in (0,1]

        # Fused masked-softmax aggregation: ONE bf16 matmul for num and den.
        cat = jnp.concatenate([e * wv, e], axis=-1).astype(jnp.bfloat16)   # (BTN, 2C)
        agg = jnp.dot(adj, cat, preferred_element_type=jnp.float32)        # (BTN, 2C)
        num, den = agg[:, :c], agg[:, c:]
        out = num * pl.reciprocal(den + 1e-30, approx=True) + pp + bp
        y = out * scale + shift                          # folded BatchNorm (eval)
        return jnp.maximum(y, NEG_SLOPE * y)             # LeakyReLU(0.2), f32 epilogue

    x1 = conv(None, wf1, st1)                            # (BTN,  64)
    x1b = x1.astype(jnp.bfloat16)
    x2 = conv(x1b, wf2, st2)                             # (BTN,  64)
    x2b = x2.astype(jnp.bfloat16)
    x3 = conv(x2b, wf3, st3)                             # (BTN, 128)
    # conv4 input is cat(x1, x2, x3): one lane concat + single K=256 MXU pass.
    xcat = jnp.concatenate([x1b, x2b, x3.astype(jnp.bfloat16)], axis=-1)   # (BTN, 256)
    x4 = conv(xcat, wf4, st4)                            # (BTN, 256)

    # Per-sample global_add_pool; global_mean_pool (= sum / N) is folded into w1f.
    s = jnp.concatenate(
        [jnp.sum(x4[b * n_points:(b + 1) * n_points, :], axis=0, keepdims=True)
         for b in range(b_tile)],
        axis=0)                                          # (B_TILE, 256) f32

    bn6v, bn7v = bn6[...], bn7[...]
    h = jnp.dot(s.astype(jnp.bfloat16), w1f[...], preferred_element_type=jnp.float32)
    h = h * bn6v[0:1, :] + bn6v[1:2, :]                  # bn6
    h = jnp.maximum(h, NEG_SLOPE * h)
    # dropout: identity in eval mode
    h = jnp.dot(h.astype(jnp.bfloat16), w2h[...], preferred_element_type=jnp.float32)
    h = h * bn7v[0:1, :] + bn7v[1:2, :]                  # linear2 bias + bn7
    h = jnp.maximum(h, NEG_SLOPE * h)
    y = jnp.dot(h.astype(jnp.bfloat16), w3h[...], preferred_element_type=jnp.float32)
    o_ref[0] = y + sh8[...]                              # linear3 bias  (B_TILE, n_out)


# ----------------------------------------------------------------------------
# Parameter flattening / wrapper
# ----------------------------------------------------------------------------
def _flatten_params(params, n_points):
    """Flat (args, BlockSpecs): packs small per-layer params into row stacks,
    lane-concatenates lin|lin_src, folds mean-pool into w1, casts MXU weights
    to bf16 (accumulation stays f32 in-kernel)."""
    args, specs = [], []

    def add(a):
        a = jnp.asarray(a)
        args.append(a)
        specs.append(pl.BlockSpec(a.shape, lambda t: (0, 0)))   # resident weights
        # TODO(synk): single-buffering these constants (pl.Buffered(1)) would save
        # a little more VMEM; skipped to keep lowering maximally portable.

    for li, c in enumerate(params["convs"]):
        w_feat = jnp.concatenate([c["w_lin"], c["w_src"]], axis=1)   # (Cin, 2*Cout)
        add(w_feat.astype(jnp.float32 if li == 0 else jnp.bfloat16))  # conv1 runs on VPU
        # NOTE: c["w_dst"] (lin_dst) cancels inside the per-target softmax when
        # attn_nn is None, so it is intentionally not shipped to the kernel.
        add(jnp.concatenate([c["w_pos"], c["b_pos"], c["scale"], c["shift"]],
                            axis=0).astype(jnp.float32))             # (6, Cout)

    head = params["head"]
    emb = head["w1"].shape[0] // 2
    # cat([mean, sum]) @ w1 == sum @ (w1[:emb]/N + w1[emb:])   (mean = sum / N)
    w1f = head["w1"][:emb, :] / float(n_points) + head["w1"][emb:, :]
    add(w1f.astype(jnp.bfloat16))
    add(jnp.concatenate([head["scale6"], head["shift6"]], axis=0))    # (2, 512)
    add(head["w2"].astype(jnp.bfloat16))
    add(jnp.concatenate([head["scale7"], head["shift7"]], axis=0))    # (2, 256)
    add(head["w3"].astype(jnp.bfloat16))
    add(head["shift8"])
    return args, specs


def _choose_b_tile(batch, n_points, max_tile=8, adj_budget_bytes=8 << 20):
    """Largest divisor of `batch` (<= max_tile) whose block-diag bf16 mask fits the
    budget AND keeps the grid length even (>=2) so v7x's two TensorCores balance."""
    best = 1
    for t in range(1, min(batch, max_tile) + 1):
        if batch % t:
            continue
        if (t * n_points) ** 2 * 2 > adj_budget_bytes:   # (BTN, BTN) bf16 mask
            continue
        steps = batch // t
        if steps >= 2 and steps % 2 == 0:
            best = t
    return best


def point_transformer_forward(params, x, b_tile=None):
    # x: (B, 3, N), same layout as the PyTorch module input.
    B, _, N = x.shape
    k = params["k"]
    pos = jnp.transpose(x, (0, 2, 1)).astype(jnp.float32)       # (B, N, 3)
    idx = knn_indices(pos, k)                                   # (B, N, k) int32

    if b_tile is None:
        b_tile = _choose_b_tile(B, N)
    assert B % b_tile == 0, (B, b_tile)
    T = B // b_tile
    BTN = b_tile * N

    # Neighbour table per tile: values carry the in-tile sample offset so the
    # kernel's iota-compare mask is block-diagonal for free.  (indices only:
    # ~k*N*4 bytes per sample vs the old N^2*4-byte dense mask.)
    off = (jnp.arange(B, dtype=jnp.int32) % b_tile) * N
    idx_g = idx + off[:, None, None]                            # (B, N, k)
    idx_t = jnp.transpose(idx_g, (0, 2, 1))                     # (B, k, N)
    idx_t = jnp.transpose(idx_t.reshape(T, b_tile, k, N),
                          (0, 2, 1, 3)).reshape(T, k, BTN)      # (T, k, BTN)
    pos_t = pos.reshape(T, BTN, 3)                              # (T, BTN, 3)

    w_args, w_specs = _flatten_params(params, N)
    n_out = params["head"]["w3"].shape[1]

    out = pl.pallas_call(
        functools.partial(_fused_kernel, b_tile=b_tile, n_points=N, k=k),
        out_shape=jax.ShapeDtypeStruct((T, b_tile, n_out), jnp.float32),
        grid=(T,),
        in_specs=[
            pl.BlockSpec((1, k, BTN), lambda t: (t, 0, 0)),     # kNN index table
            pl.BlockSpec((1, BTN, 3), lambda t: (t, 0, 0)),     # coords / conv1 input
            *w_specs,
        ],
        out_specs=pl.BlockSpec((1, b_tile, n_out), lambda t: (t, 0, 0)),
        compiler_params=pltpu.CompilerParams(
            dimension_semantics=("parallel",),   # v7x: tiles split across TensorCores
        ),
    )(idx_t, pos_t, *w_args)
    return out.reshape(B, n_out)


# ----------------------------------------------------------------------------
# Deterministic synthetic parameters (BN running stats / biases folded)
# ----------------------------------------------------------------------------
def _bn_fold(key, c, bias=None):
    k1, k2, k3, k4 = jax.random.split(key, 4)
    gamma = 1.0 + 0.1 * jax.random.normal(k1, (c,), jnp.float32)
    beta = 0.1 * jax.random.normal(k2, (c,), jnp.float32)
    mean = 0.1 * jax.random.normal(k3, (c,), jnp.float32)
    var = jax.random.uniform(k4, (c,), jnp.float32, minval=0.5, maxval=1.5)
    scale = gamma * jax.lax.rsqrt(var + BN_EPS)
    shift = beta - mean * scale
    if bias is not None:
        shift = shift + bias * scale
    return scale[None, :], shift[None, :]


def init_params(key, k=8, output_channels=40):
    conv_dims = [(3, 64), (64, 64), (64, 128), (256, 256)]
    params = {"k": k, "convs": [], "head": {}}
    for cin, cout in conv_dims:
        key, kl, ks, kd, kp, kb, kbn = jax.random.split(key, 7)
        g = 1.0 / float(cin) ** 0.5
        conv = {
            "w_lin": g * jax.random.normal(kl, (cin, cout), jnp.float32),   # lin (no bias)
            "w_src": g * jax.random.normal(ks, (cin, cout), jnp.float32),   # lin_src
            # lin_dst: kept for parity with the module's parameter set; it cancels
            # in the softmax (attn_nn=None) so the kernel never reads it.
            "w_dst": g * jax.random.normal(kd, (cin, cout), jnp.float32),
            "w_pos": (1.0 / 3.0 ** 0.5) * jax.random.normal(kp, (3, cout), jnp.float32),
            "b_pos": 0.1 * jax.random.normal(kb, (1, cout), jnp.float32),
        }
        conv["scale"], conv["shift"] = _bn_fold(kbn, cout)                  # bn1..bn4
        params["convs"].append(conv)

    key, k1, kbn6, k2, kb2, kbn7, k3, kb3 = jax.random.split(key, 8)
    head = params["head"]
    head["w1"] = jax.random.normal(k1, (512, 512), jnp.float32) / 512.0 ** 0.5  # linear1 (no bias)
    head["scale6"], head["shift6"] = _bn_fold(kbn6, 512)                        # bn6
    head["w2"] = jax.random.normal(k2, (512, 256), jnp.float32) / 512.0 ** 0.5  # linear2
    b2 = 0.1 * jax.random.normal(kb2, (256,), jnp.float32)
    head["scale7"], head["shift7"] = _bn_fold(kbn7, 256, bias=b2)               # bn7 (+ bias2)
    head["w3"] = jax.random.normal(k3, (256, output_channels), jnp.float32) / 256.0 ** 0.5
    head["shift8"] = 0.1 * jax.random.normal(kb3, (1, output_channels), jnp.float32)
    return params


if __name__ == "__main__":
    B, C, N = 4, 3, 64
    K = 8
    key = jax.random.PRNGKey(0)
    key, kx, kp = jax.random.split(key, 3)
    x = jax.random.normal(kx, (B, C, N), jnp.float32)          # point cloud (B, 3, N)
    params = init_params(kp, k=K, output_channels=40)

    fwd = jax.jit(functools.partial(point_transformer_forward, params))
    out = fwd(x)
    jax.block_until_ready(out)
    assert out.shape == (B, 40), out.shape
    assert bool(jnp.all(jnp.isfinite(out))), "non-finite output"
    print("KERNEL_OK")
</pallas_src>

<mosaic_0001>
module attributes {stable_mosaic.version = 11 : i64} {
  func.func @_fused_kernel(%arg0: i32, %arg1: memref<1x8x128xi32, #tpu.memory_space<vmem>>, %arg2: memref<1x128x3xf32, #tpu.memory_space<vmem>>, %arg3: memref<3x128xf32, #tpu.memory_space<vmem>>, %arg4: memref<6x64xf32, #tpu.memory_space<vmem>>, %arg5: memref<64x128xbf16, #tpu.memory_space<vmem>>, %arg6: memref<6x64xf32, #tpu.memory_space<vmem>>, %arg7: memref<64x256xbf16, #tpu.memory_space<vmem>>, %arg8: memref<6x128xf32, #tpu.memory_space<vmem>>, %arg9: memref<256x512xbf16, #tpu.memory_space<vmem>>, %arg10: memref<6x256xf32, #tpu.memory_space<vmem>>, %arg11: memref<256x512xbf16, #tpu.memory_space<vmem>>, %arg12: memref<2x512xf32, #tpu.memory_space<vmem>>, %arg13: memref<512x256xbf16, #tpu.memory_space<vmem>>, %arg14: memref<2x256xf32, #tpu.memory_space<vmem>>, %arg15: memref<256x40xbf16, #tpu.memory_space<vmem>>, %arg16: memref<1x40xf32, #tpu.memory_space<vmem>>, %arg17: memref<1x2x40xf32, #tpu.memory_space<vmem>>) attributes {dimension_semantics = [#tpu.dimension_semantics<parallel>], iteration_bounds = array<i64: 2>, scalar_prefetch = 0 : i64, scratch_operands = 0 : i64, tpu.core_type = #tpu.core_type<tc>, window_params = [{transform_indices = @transform_0, window_bounds = array<i64: 1, 8, 128>}, {transform_indices = @transform_1, window_bounds = array<i64: 1, 128, 3>}, {pipeline_mode = #tpu.pipeline_mode<synchronous>, transform_indices = @transform_2, window_bounds = array<i64: 3, 128>}, {pipeline_mode = #tpu.pipeline_mode<synchronous>, transform_indices = @transform_3, window_bounds = array<i64: 6, 64>}, {pipeline_mode = #tpu.pipeline_mode<synchronous>, transform_indices = @transform_4, window_bounds = array<i64: 64, 128>}, {pipeline_mode = #tpu.pipeline_mode<synchronous>, transform_indices = @transform_5, window_bounds = array<i64: 6, 64>}, {pipeline_mode = #tpu.pipeline_mode<synchronous>, transform_indices = @transform_6, window_bounds = array<i64: 64, 256>}, {pipeline_mode = #tpu.pipeline_mode<synchronous>, transform_indices = @transform_7, window_bounds = array<i64: 6, 128>}, {pipeline_mode = #tpu.pipeline_mode<synchronous>, transform_indices = @transform_8, window_bounds = array<i64: 256, 512>}, {pipeline_mode = #tpu.pipeline_mode<synchronous>, transform_indices = @transform_9, window_bounds = array<i64: 6, 256>}, {pipeline_mode = #tpu.pipeline_mode<synchronous>, transform_indices = @transform_10, window_bounds = array<i64: 256, 512>}, {pipeline_mode = #tpu.pipeline_mode<synchronous>, transform_indices = @transform_11, window_bounds = array<i64: 2, 512>}, {pipeline_mode = #tpu.pipeline_mode<synchronous>, transform_indices = @transform_12, window_bounds = array<i64: 512, 256>}, {pipeline_mode = #tpu.pipeline_mode<synchronous>, transform_indices = @transform_13, window_bounds = array<i64: 2, 256>}, {pipeline_mode = #tpu.pipeline_mode<synchronous>, transform_indices = @transform_14, window_bounds = array<i64: 256, 40>}, {pipeline_mode = #tpu.pipeline_mode<synchronous>, transform_indices = @transform_15, window_bounds = array<i64: 1, 40>}, {transform_indices = @transform_16, window_bounds = array<i64: 1, 2, 40>}]} {
    %c0 = arith.constant 0 : index
    %c0_0 = arith.constant 0 : index
    %c0_1 = arith.constant 0 : index
    %0 = vector.load %arg2[%c0, %c0_0, %c0_1] : memref<1x128x3xf32, #tpu.memory_space<vmem>>, vector<1x128x3xf32>
    %1 = vector.shape_cast %0 : vector<1x128x3xf32> to vector<128x3xf32>
    %2 = vector.extract_strided_slice %1 {offsets = [0, 0], sizes = [128, 1], strides = [1, 1]} : vector<128x3xf32> to vector<128x1xf32>
    %3 = vector.extract_strided_slice %1 {offsets = [0, 1], sizes = [128, 1], strides = [1, 1]} : vector<128x3xf32> to vector<128x1xf32>
    %4 = vector.extract_strided_slice %1 {offsets = [0, 2], sizes = [128, 1], strides = [1, 1]} : vector<128x3xf32> to vector<128x1xf32>
    %c0_2 = arith.constant 0 : index
    %c0_3 = arith.constant 0 : index
    %c0_4 = arith.constant 0 : index
    %5 = vector.load %arg1[%c0_2, %c0_3, %c0_4] : memref<1x8x128xi32, #tpu.memory_space<vmem>>, vector<1x8x128xi32>
    %6 = vector.shape_cast %5 : vector<1x8x128xi32> to vector<8x128xi32>
    %7 = tpu.iota {dimensions = array<i32: 0>} : vector<128x128xi32>
    %8 = tpu.iota {dimensions = array<i32: 1>} : vector<128x128xi32>
    %9 = arith.cmpi eq, %7, %8 : vector<128x128xi32>
    %10 = vector.extract_strided_slice %6 {offsets = [0, 0], sizes = [1, 128], strides = [1, 1]} : vector<8x128xi32> to vector<1x128xi32>
    %11 = vector.broadcast %10 : vector<1x128xi32> to vector<128x128xi32>
    %12 = arith.cmpi eq, %7, %11 : vector<128x128xi32>
    %13 = arith.ori %9, %12 : vector<128x128xi1>
    %14 = vector.extract_strided_slice %6 {offsets = [1, 0], sizes = [1, 128], strides = [1, 1]} : vector<8x128xi32> to vector<1x128xi32>
    %15 = vector.broadcast %14 : vector<1x128xi32> to vector<128x128xi32>
    %16 = arith.cmpi eq, %7, %15 : vector<128x128xi32>
    %17 = arith.ori %13, %16 : vector<128x128xi1>
    %18 = vector.extract_strided_slice %6 {offsets = [2, 0], sizes = [1, 128], strides = [1, 1]} : vector<8x128xi32> to vector<1x128xi32>
    %19 = vector.broadcast %18 : vector<1x128xi32> to vector<128x128xi32>
    %20 = arith.cmpi eq, %7, %19 : vector<128x128xi32>
    %21 = arith.ori %17, %20 : vector<128x128xi1>
    %22 = vector.extract_strided_slice %6 {offsets = [3, 0], sizes = [1, 128], strides = [1, 1]} : vector<8x128xi32> to vector<1x128xi32>
    %23 = vector.broadcast %22 : vector<1x128xi32> to vector<128x128xi32>
    %24 = arith.cmpi eq, %7, %23 : vector<128x128xi32>
    %25 = arith.ori %21, %24 : vector<128x128xi1>
    %26 = vector.extract_strided_slice %6 {offsets = [4, 0], sizes = [1, 128], strides = [1, 1]} : vector<8x128xi32> to vector<1x128xi32>
    %27 = vector.broadcast %26 : vector<1x128xi32> to vector<128x128xi32>
    %28 = arith.cmpi eq, %7, %27 : vector<128x128xi32>
    %29 = arith.ori %25, %28 : vector<128x128xi1>
    %30 = vector.extract_strided_slice %6 {offsets = [5, 0], sizes = [1, 128], strides = [1, 1]} : vector<8x128xi32> to vector<1x128xi32>
    %31 = vector.broadcast %30 : vector<1x128xi32> to vector<128x128xi32>
    %32 = arith.cmpi eq, %7, %31 : vector<128x128xi32>
    %33 = arith.ori %29, %32 : vector<128x128xi1>
    %34 = vector.extract_strided_slice %6 {offsets = [6, 0], sizes = [1, 128], strides = [1, 1]} : vector<8x128xi32> to vector<1x128xi32>
    %35 = vector.broadcast %34 : vector<1x128xi32> to vector<128x128xi32>
    %36 = arith.cmpi eq, %7, %35 : vector<128x128xi32>
    %37 = arith.ori %33, %36 : vector<128x128xi1>
    %38 = vector.extract_strided_slice %6 {offsets = [7, 0], sizes = [1, 128], strides = [1, 1]} : vector<8x128xi32> to vector<1x128xi32>
    %39 = vector.broadcast %38 : vector<1x128xi32> to vector<128x128xi32>
    %40 = arith.cmpi eq, %7, %39 : vector<128x128xi32>
    %41 = arith.ori %37, %40 : vector<128x128xi1>
    %42 = arith.extui %41 : vector<128x128xi1> to vector<128x128xi32>
    %43 = arith.sitofp %42 : vector<128x128xi32> to vector<128x128xf32>
    %44 = arith.truncf %43 : vector<128x128xf32> to vector<128x128xbf16>
    %c0_5 = arith.constant 0 : index
    %c0_6 = arith.constant 0 : index
    %45 = vector.load %arg4[%c0_5, %c0_6] : memref<6x64xf32, #tpu.memory_space<vmem>>, vector<6x64xf32>
    %46 = vector.extract_strided_slice %45 {offsets = [0, 0], sizes = [3, 64], strides = [1, 1]} : vector<6x64xf32> to vector<3x64xf32>
    %47 = vector.extract_strided_slice %46 {offsets = [0, 0], sizes = [1, 64], strides = [1, 1]} : vector<3x64xf32> to vector<1x64xf32>
    %48 = vector.broadcast %2 : vector<128x1xf32> to vector<128x64xf32>
    %49 = vector.broadcast %47 : vector<1x64xf32> to vector<128x64xf32>
    %50 = arith.mulf %48, %49 : vector<128x64xf32>
    %51 = vector.extract_strided_slice %46 {offsets = [1, 0], sizes = [1, 64], strides = [1, 1]} : vector<3x64xf32> to vector<1x64xf32>
    %52 = vector.broadcast %3 : vector<128x1xf32> to vector<128x64xf32>
    %53 = vector.broadcast %51 : vector<1x64xf32> to vector<128x64xf32>
    %54 = arith.mulf %52, %53 : vector<128x64xf32>
    %55 = arith.addf %50, %54 : vector<128x64xf32>
    %56 = vector.extract_strided_slice %46 {offsets = [2, 0], sizes = [1, 64], strides = [1, 1]} : vector<3x64xf32> to vector<1x64xf32>
    %57 = vector.broadcast %4 : vector<128x1xf32> to vector<128x64xf32>
    %58 = vector.broadcast %56 : vector<1x64xf32> to vector<128x64xf32>
    %59 = arith.mulf %57, %58 : vector<128x64xf32>
    %60 = arith.addf %55, %59 : vector<128x64xf32>
    %61 = vector.extract_strided_slice %45 {offsets = [3, 0], sizes = [1, 64], strides = [1, 1]} : vector<6x64xf32> to vector<1x64xf32>
    %62 = vector.extract_strided_slice %45 {offsets = [4, 0], sizes = [1, 64], strides = [1, 1]} : vector<6x64xf32> to vector<1x64xf32>
    %63 = vector.extract_strided_slice %45 {offsets = [5, 0], sizes = [1, 64], strides = [1, 1]} : vector<6x64xf32> to vector<1x64xf32>
    %c0_7 = arith.constant 0 : index
    %c0_8 = arith.constant 0 : index
    %64 = vector.load %arg3[%c0_7, %c0_8] : memref<3x128xf32, #tpu.memory_space<vmem>>, vector<3x128xf32>
    %65 = vector.extract_strided_slice %64 {offsets = [0, 0], sizes = [1, 128], strides = [1, 1]} : vector<3x128xf32> to vector<1x128xf32>
    %66 = vector.broadcast %2 : vector<128x1xf32> to vector<128x128xf32>
    %67 = vector.broadcast %65 : vector<1x128xf32> to vector<128x128xf32>
    %68 = arith.mulf %66, %67 : vector<128x128xf32>
    %69 = vector.extract_strided_slice %64 {offsets = [1, 0], sizes = [1, 128], strides = [1, 1]} : vector<3x128xf32> to vector<1x128xf32>
    %70 = vector.broadcast %3 : vector<128x1xf32> to vector<128x128xf32>
    %71 = vector.broadcast %69 : vector<1x128xf32> to vector<128x128xf32>
    %72 = arith.mulf %70, %71 : vector<128x128xf32>
    %73 = arith.addf %68, %72 : vector<128x128xf32>
    %74 = vector.extract_strided_slice %64 {offsets = [2, 0], sizes = [1, 128], strides = [1, 1]} : vector<3x128xf32> to vector<1x128xf32>
    %75 = vector.broadcast %4 : vector<128x1xf32> to vector<128x128xf32>
    %76 = vector.broadcast %74 : vector<1x128xf32> to vector<128x128xf32>
    %77 = arith.mulf %75, %76 : vector<128x128xf32>
    %78 = arith.addf %73, %77 : vector<128x128xf32>
    %79 = vector.extract_strided_slice %78 {offsets = [0, 0], sizes = [128, 64], strides = [1, 1]} : vector<128x128xf32> to vector<128x64xf32>
    %80 = vector.extract_strided_slice %78 {offsets = [0, 64], sizes = [128, 64], strides = [1, 1]} : vector<128x128xf32> to vector<128x64xf32>
    %81 = arith.addf %80, %60 : vector<128x64xf32>
    %82 = arith.subf %79, %60 : vector<128x64xf32>
    %cst = arith.constant dense<0x7F800000> : vector<64xf32>
    %83 = vector.multi_reduction <minimumf>, %81, %cst [0] : vector<128x64xf32> to vector<64xf32>
    %84 = vector.shape_cast %83 : vector<64xf32> to vector<1x64xf32>
    %85 = vector.broadcast %84 : vector<1x64xf32> to vector<128x64xf32>
    %86 = arith.subf %81, %85 : vector<128x64xf32>
    %cst_9 = arith.constant 0.000000e+00 : f32
    %87 = vector.broadcast %cst_9 : f32 to vector<128x64xf32>
    %88 = arith.subf %87, %86 : vector<128x64xf32>
    %89 = math.exp %88 : vector<128x64xf32>
    %90 = arith.mulf %89, %82 : vector<128x64xf32>
    %91 = tpu.concatenate %90, %89 in 1 : vector<128x64xf32>, vector<128x64xf32> -> vector<128x128xf32>
    %92 = arith.truncf %91 : vector<128x128xf32> to vector<128x128xbf16>
    %cst_10 = arith.constant dense<0.000000e+00> : vector<128x128xf32>
    %93 = tpu.matmul %44, %92, %cst_10 {dimension_numbers = #tpu.dot_dimension_numbers<[1], [0], [0], [1], [0, 0, 1, 1], [], []>} : vector<128x128xbf16>, vector<128x128xbf16>, vector<128x128xf32> -> vector<128x128xf32>
    %94 = vector.extract_strided_slice %93 {offsets = [0, 0], sizes = [128, 64], strides = [1, 1]} : vector<128x128xf32> to vector<128x64xf32>
    %95 = vector.extract_strided_slice %93 {offsets = [0, 64], sizes = [128, 64], strides = [1, 1]} : vector<128x128xf32> to vector<128x64xf32>
    %cst_11 = arith.constant 1.000000e-30 : f32
    %96 = vector.broadcast %cst_11 : f32 to vector<128x64xf32>
    %97 = arith.addf %95, %96 : vector<128x64xf32>
    %98 = tpu.reciprocal %97 {approx = true} : vector<128x64xf32> -> vector<128x64xf32>
    %99 = arith.mulf %94, %98 : vector<128x64xf32>
    %100 = arith.addf %99, %60 : vector<128x64xf32>
    %101 = vector.broadcast %61 : vector<1x64xf32> to vector<128x64xf32>
    %102 = arith.addf %100, %101 : vector<128x64xf32>
    %103 = vector.broadcast %62 : vector<1x64xf32> to vector<128x64xf32>
    %104 = arith.mulf %102, %103 : vector<128x64xf32>
    %105 = vector.broadcast %63 : vector<1x64xf32> to vector<128x64xf32>
    %106 = arith.addf %104, %105 : vector<128x64xf32>
    %cst_12 = arith.constant 2.000000e-01 : f32
    %107 = vector.broadcast %cst_12 : f32 to vector<128x64xf32>
    %108 = arith.mulf %107, %106 : vector<128x64xf32>
    %109 = arith.maximumf %106, %108 : vector<128x64xf32>
    %110 = arith.truncf %109 : vector<128x64xf32> to vector<128x64xbf16>
    %c0_13 = arith.constant 0 : index
    %c0_14 = arith.constant 0 : index
    %111 = vector.load %arg6[%c0_13, %c0_14] : memref<6x64xf32, #tpu.memory_space<vmem>>, vector<6x64xf32>
    %112 = vector.extract_strided_slice %111 {offsets = [0, 0], sizes = [3, 64], strides = [1, 1]} : vector<6x64xf32> to vector<3x64xf32>
    %113 = vector.extract_strided_slice %112 {offsets = [0, 0], sizes = [1, 64], strides = [1, 1]} : vector<3x64xf32> to vector<1x64xf32>
    %114 = vector.broadcast %2 : vector<128x1xf32> to vector<128x64xf32>
    %115 = vector.broadcast %113 : vector<1x64xf32> to vector<128x64xf32>
    %116 = arith.mulf %114, %115 : vector<128x64xf32>
    %117 = vector.extract_strided_slice %112 {offsets = [1, 0], sizes = [1, 64], strides = [1, 1]} : vector<3x64xf32> to vector<1x64xf32>
    %118 = vector.broadcast %3 : vector<128x1xf32> to vector<128x64xf32>
    %119 = vector.broadcast %117 : vector<1x64xf32> to vector<128x64xf32>
    %120 = arith.mulf %118, %119 : vector<128x64xf32>
    %121 = arith.addf %116, %120 : vector<128x64xf32>
    %122 = vector.extract_strided_slice %112 {offsets = [2, 0], sizes = [1, 64], strides = [1, 1]} : vector<3x64xf32> to vector<1x64xf32>
    %123 = vector.broadcast %4 : vector<128x1xf32> to vector<128x64xf32>
    %124 = vector.broadcast %122 : vector<1x64xf32> to vector<128x64xf32>
    %125 = arith.mulf %123, %124 : vector<128x64xf32>
    %126 = arith.addf %121, %125 : vector<128x64xf32>
    %127 = vector.extract_strided_slice %111 {offsets = [3, 0], sizes = [1, 64], strides = [1, 1]} : vector<6x64xf32> to vector<1x64xf32>
    %128 = vector.extract_strided_slice %111 {offsets = [4, 0], sizes = [1, 64], strides = [1, 1]} : vector<6x64xf32> to vector<1x64xf32>
    %129 = vector.extract_strided_slice %111 {offsets = [5, 0], sizes = [1, 64], strides = [1, 1]} : vector<6x64xf32> to vector<1x64xf32>
    %c0_15 = arith.constant 0 : index
    %c0_16 = arith.constant 0 : index
    %130 = vector.load %arg5[%c0_15, %c0_16] : memref<64x128xbf16, #tpu.memory_space<vmem>>, vector<64x128xbf16>
    %cst_17 = arith.constant dense<0.000000e+00> : vector<128x128xf32>
    %131 = tpu.matmul %110, %130, %cst_17 {dimension_numbers = #tpu.dot_dimension_numbers<[1], [0], [0], [1], [0, 0, 1, 1], [], []>} : vector<128x64xbf16>, vector<64x128xbf16>, vector<128x128xf32> -> vector<128x128xf32>
    %132 = vector.extract_strided_slice %131 {offsets = [0, 0], sizes = [128, 64], strides = [1, 1]} : vector<128x128xf32> to vector<128x64xf32>
    %133 = vector.extract_strided_slice %131 {offsets = [0, 64], sizes = [128, 64], strides = [1, 1]} : vector<128x128xf32> to vector<128x64xf32>
    %134 = arith.addf %133, %126 : vector<128x64xf32>
    %135 = arith.subf %132, %126 : vector<128x64xf32>
    %cst_18 = arith.constant dense<0x7F800000> : vector<64xf32>
    %136 = vector.multi_reduction <minimumf>, %134, %cst_18 [0] : vector<128x64xf32> to vector<64xf32>
    %137 = vector.shape_cast %136 : vector<64xf32> to vector<1x64xf32>
    %138 = vector.broadcast %137 : vector<1x64xf32> to vector<128x64xf32>
    %139 = arith.subf %134, %138 : vector<128x64xf32>
    %cst_19 = arith.constant 0.000000e+00 : f32
    %140 = vector.broadcast %cst_19 : f32 to vector<128x64xf32>
    %141 = arith.subf %140, %139 : vector<128x64xf32>
    %142 = math.exp %141 : vector<128x64xf32>
    %143 = arith.mulf %142, %135 : vector<128x64xf32>
    %144 = tpu.concatenate %143, %142 in 1 : vector<128x64xf32>, vector<128x64xf32> -> vector<128x128xf32>
    %145 = arith.truncf %144 : vector<128x128xf32> to vector<128x128xbf16>
    %cst_20 = arith.constant dense<0.000000e+00> : vector<128x128xf32>
    %146 = tpu.matmul %44, %145, %cst_20 {dimension_numbers = #tpu.dot_dimension_numbers<[1], [0], [0], [1], [0, 0, 1, 1], [], []>} : vector<128x128xbf16>, vector<128x128xbf16>, vector<128x128xf32> -> vector<128x128xf32>
    %147 = vector.extract_strided_slice %146 {offsets = [0, 0], sizes = [128, 64], strides = [1, 1]} : vector<128x128xf32> to vector<128x64xf32>
    %148 = vector.extract_strided_slice %146 {offsets = [0, 64], sizes = [128, 64], strides = [1, 1]} : vector<128x128xf32> to vector<128x64xf32>
    %cst_21 = arith.constant 1.000000e-30 : f32
    %149 = vector.broadcast %cst_21 : f32 to vector<128x64xf32>
    %150 = arith.addf %148, %149 : vector<128x64xf32>
    %151 = tpu.reciprocal %150 {approx = true} : vector<128x64xf32> -> vector<128x64xf32>
    %152 = arith.mulf %147, %151 : vector<128x64xf32>
    %153 = arith.addf %152, %126 : vector<128x64xf32>
    %154 = vector.broadcast %127 : vector<1x64xf32> to vector<128x64xf32>
    %155 = arith.addf %153, %154 : vector<128x64xf32>
    %156 = vector.broadcast %128 : vector<1x64xf32> to vector<128x64xf32>
    %157 = arith.mulf %155, %156 : vector<128x64xf32>
    %158 = vector.broadcast %129 : vector<1x64xf32> to vector<128x64xf32>
    %159 = arith.addf %157, %158 : vector<128x64xf32>
    %cst_22 = arith.constant 2.000000e-01 : f32
    %160 = vector.broadcast %cst_22 : f32 to vector<128x64xf32>
    %161 = arith.mulf %160, %159 : vector<128x64xf32>
    %162 = arith.maximumf %159, %161 : vector<128x64xf32>
    %163 = arith.truncf %162 : vector<128x64xf32> to vector<128x64xbf16>
    %c0_23 = arith.constant 0 : index
    %c0_24 = arith.constant 0 : index
    %164 = vector.load %arg8[%c0_23, %c0_24] : memref<6x128xf32, #tpu.memory_space<vmem>>, vector<6x128xf32>
    %165 = vector.extract_strided_slice %164 {offsets = [0, 0], sizes = [3, 128], strides = [1, 1]} : vector<6x128xf32> to vector<3x128xf32>
    %166 = vector.extract_strided_slice %165 {offsets = [0, 0], sizes = [1, 128], strides = [1, 1]} : vector<3x128xf32> to vector<1x128xf32>
    %167 = vector.broadcast %2 : vector<128x1xf32> to vector<128x128xf32>
    %168 = vector.broadcast %166 : vector<1x128xf32> to vector<128x128xf32>
    %169 = arith.mulf %167, %168 : vector<128x128xf32>
    %170 = vector.extract_strided_slice %165 {offsets = [1, 0], sizes = [1, 128], strides = [1, 1]} : vector<3x128xf32> to vector<1x128xf32>
    %171 = vector.broadcast %3 : vector<128x1xf32> to vector<128x128xf32>
    %172 = vector.broadcast %170 : vector<1x128xf32> to vector<128x128xf32>
    %173 = arith.mulf %171, %172 : vector<128x128xf32>
    %174 = arith.addf %169, %173 : vector<128x128xf32>
    %175 = vector.extract_strided_slice %165 {offsets = [2, 0], sizes = [1, 128], strides = [1, 1]} : vector<3x128xf32> to vector<1x128xf32>
    %176 = vector.broadcast %4 : vector<128x1xf32> to vector<128x128xf32>
    %177 = vector.broadcast %175 : vector<1x128xf32> to vector<128x128xf32>
    %178 = arith.mulf %176, %177 : vector<128x128xf32>
    %179 = arith.addf %174, %178 : vector<128x128xf32>
    %180 = vector.extract_strided_slice %164 {offsets = [3, 0], sizes = [1, 128], strides = [1, 1]} : vector<6x128xf32> to vector<1x128xf32>
    %181 = vector.extract_strided_slice %164 {offsets = [4, 0], sizes = [1, 128], strides = [1, 1]} : vector<6x128xf32> to vector<1x128xf32>
    %182 = vector.extract_strided_slice %164 {offsets = [5, 0], sizes = [1, 128], strides = [1, 1]} : vector<6x128xf32> to vector<1x128xf32>
    %c0_25 = arith.constant 0 : index
    %c0_26 = arith.constant 0 : index
    %183 = vector.load %arg7[%c0_25, %c0_26] : memref<64x256xbf16, #tpu.memory_space<vmem>>, vector<64x256xbf16>
    %cst_27 = arith.constant dense<0.000000e+00> : vector<128x256xf32>
    %184 = tpu.matmul %163, %183, %cst_27 {dimension_numbers = #tpu.dot_dimension_numbers<[1], [0], [0], [1], [0, 0, 1, 1], [], []>} : vector<128x64xbf16>, vector<64x256xbf16>, vector<128x256xf32> -> vector<128x256xf32>
    %185 = vector.extract_strided_slice %184 {offsets = [0, 0], sizes = [128, 128], strides = [1, 1]} : vector<128x256xf32> to vector<128x128xf32>
    %186 = vector.extract_strided_slice %184 {offsets = [0, 128], sizes = [128, 128], strides = [1, 1]} : vector<128x256xf32> to vector<128x128xf32>
    %187 = arith.addf %186, %179 : vector<128x128xf32>
    %188 = arith.subf %185, %179 : vector<128x128xf32>
    %cst_28 = arith.constant dense<0x7F800000> : vector<128xf32>
    %189 = vector.multi_reduction <minimumf>, %187, %cst_28 [0] : vector<128x128xf32> to vector<128xf32>
    %190 = vector.shape_cast %189 : vector<128xf32> to vector<1x128xf32>
    %191 = vector.broadcast %190 : vector<1x128xf32> to vector<128x128xf32>
    %192 = arith.subf %187, %191 : vector<128x128xf32>
    %cst_29 = arith.constant 0.000000e+00 : f32
    %193 = vector.broadcast %cst_29 : f32 to vector<128x128xf32>
    %194 = arith.subf %193, %192 : vector<128x128xf32>
    %195 = math.exp %194 : vector<128x128xf32>
    %196 = arith.mulf %195, %188 : vector<128x128xf32>
    %197 = tpu.concatenate %196, %195 in 1 : vector<128x128xf32>, vector<128x128xf32> -> vector<128x256xf32>
    %198 = arith.truncf %197 : vector<128x256xf32> to vector<128x256xbf16>
    %cst_30 = arith.constant dense<0.000000e+00> : vector<128x256xf32>
    %199 = tpu.matmul %44, %198, %cst_30 {dimension_numbers = #tpu.dot_dimension_numbers<[1], [0], [0], [1], [0, 0, 1, 1], [], []>} : vector<128x128xbf16>, vector<128x256xbf16>, vector<128x256xf32> -> vector<128x256xf32>
    %200 = vector.extract_strided_slice %199 {offsets = [0, 0], sizes = [128, 128], strides = [1, 1]} : vector<128x256xf32> to vector<128x128xf32>
    %201 = vector.extract_strided_slice %199 {offsets = [0, 128], sizes = [128, 128], strides = [1, 1]} : vector<128x256xf32> to vector<128x128xf32>
    %cst_31 = arith.constant 1.000000e-30 : f32
    %202 = vector.broadcast %cst_31 : f32 to vector<128x128xf32>
    %203 = arith.addf %201, %202 : vector<128x128xf32>
    %204 = tpu.reciprocal %203 {approx = true} : vector<128x128xf32> -> vector<128x128xf32>
    %205 = arith.mulf %200, %204 : vector<128x128xf32>
    %206 = arith.addf %205, %179 : vector<128x128xf32>
    %207 = vector.broadcast %180 : vector<1x128xf32> to vector<128x128xf32>
    %208 = arith.addf %206, %207 : vector<128x128xf32>
    %209 = vector.broadcast %181 : vector<1x128xf32> to vector<128x128xf32>
    %210 = arith.mulf %208, %209 : vector<128x128xf32>
    %211 = vector.broadcast %182 : vector<1x128xf32> to vector<128x128xf32>
    %212 = arith.addf %210, %211 : vector<128x128xf32>
    %cst_32 = arith.constant 2.000000e-01 : f32
    %213 = vector.broadcast %cst_32 : f32 to vector<128x128xf32>
    %214 = arith.mulf %213, %212 : vector<128x128xf32>
    %215 = arith.maximumf %212, %214 : vector<128x128xf32>
    %216 = arith.truncf %215 : vector<128x128xf32> to vector<128x128xbf16>
    %217 = tpu.concatenate %110, %163, %216 in 1 : vector<128x64xbf16>, vector<128x64xbf16>, vector<128x128xbf16> -> vector<128x256xbf16>
    %c0_33 = arith.constant 0 : index
    %c0_34 = arith.constant 0 : index
    %218 = vector.load %arg10[%c0_33, %c0_34] : memref<6x256xf32, #tpu.memory_space<vmem>>, vector<6x256xf32>
    %219 = vector.extract_strided_slice %218 {offsets = [0, 0], sizes = [3, 256], strides = [1, 1]} : vector<6x256xf32> to vector<3x256xf32>
    %220 = vector.extract_strided_slice %219 {offsets = [0, 0], sizes = [1, 256], strides = [1, 1]} : vector<3x256xf32> to vector<1x256xf32>
    %221 = vector.broadcast %2 : vector<128x1xf32> to vector<128x256xf32>
    %222 = vector.broadcast %220 : vector<1x256xf32> to vector<128x256xf32>
    %223 = arith.mulf %221, %222 : vector<128x256xf32>
    %224 = vector.extract_strided_slice %219 {offsets = [1, 0], sizes = [1, 256], strides = [1, 1]} : vector<3x256xf32> to vector<1x256xf32>
    %225 = vector.broadcast %3 : vector<128x1xf32> to vector<128x256xf32>
    %226 = vector.broadcast %224 : vector<1x256xf32> to vector<128x256xf32>
    %227 = arith.mulf %225, %226 : vector<128x256xf32>
    %228 = arith.addf %223, %227 : vector<128x256xf32>
    %229 = vector.extract_strided_slice %219 {offsets = [2, 0], sizes = [1, 256], strides = [1, 1]} : vector<3x256xf32> to vector<1x256xf32>
    %230 = vector.broadcast %4 : vector<128x1xf32> to vector<128x256xf32>
    %231 = vector.broadcast %229 : vector<1x256xf32> to vector<128x256xf32>
    %232 = arith.mulf %230, %231 : vector<128x256xf32>
    %233 = arith.addf %228, %232 : vector<128x256xf32>
    %234 = vector.extract_strided_slice %218 {offsets = [3, 0], sizes = [1, 256], strides = [1, 1]} : vector<6x256xf32> to vector<1x256xf32>
    %235 = vector.extract_strided_slice %218 {offsets = [4, 0], sizes = [1, 256], strides = [1, 1]} : vector<6x256xf32> to vector<1x256xf32>
    %236 = vector.extract_strided_slice %218 {offsets = [5, 0], sizes = [1, 256], strides = [1, 1]} : vector<6x256xf32> to vector<1x256xf32>
    %c0_35 = arith.constant 0 : index
    %c0_36 = arith.constant 0 : index
    %237 = vector.load %arg9[%c0_35, %c0_36] : memref<256x512xbf16, #tpu.memory_space<vmem>>, vector<256x512xbf16>
    %cst_37 = arith.constant dense<0.000000e+00> : vector<128x512xf32>
    %238 = tpu.matmul %217, %237, %cst_37 {dimension_numbers = #tpu.dot_dimension_numbers<[1], [0], [0], [1], [0, 0, 1, 1], [], []>} : vector<128x256xbf16>, vector<256x512xbf16>, vector<128x512xf32> -> vector<128x512xf32>
    %239 = vector.extract_strided_slice %238 {offsets = [0, 0], sizes = [128, 256], strides = [1, 1]} : vector<128x512xf32> to vector<128x256xf32>
    %240 = vector.extract_strided_slice %238 {offsets = [0, 256], sizes = [128, 256], strides = [1, 1]} : vector<128x512xf32> to vector<128x256xf32>
    %241 = arith.addf %240, %233 : vector<128x256xf32>
    %242 = arith.subf %239, %233 : vector<128x256xf32>
    %cst_38 = arith.constant dense<0x7F800000> : vector<256xf32>
    %243 = vector.multi_reduction <minimumf>, %241, %cst_38 [0] : vector<128x256xf32> to vector<256xf32>
    %244 = vector.shape_cast %243 : vector<256xf32> to vector<1x256xf32>
    %245 = vector.broadcast %244 : vector<1x256xf32> to vector<128x256xf32>
    %246 = arith.subf %241, %245 : vector<128x256xf32>
    %cst_39 = arith.constant 0.000000e+00 : f32
    %247 = vector.broadcast %cst_39 : f32 to vector<128x256xf32>
    %248 = arith.subf %247, %246 : vector<128x256xf32>
    %249 = math.exp %248 : vector<128x256xf32>
    %250 = arith.mulf %249, %242 : vector<128x256xf32>
    %251 = tpu.concatenate %250, %249 in 1 : vector<128x256xf32>, vector<128x256xf32> -> vector<128x512xf32>
    %252 = arith.truncf %251 : vector<128x512xf32> to vector<128x512xbf16>
    %cst_40 = arith.constant dense<0.000000e+00> : vector<128x512xf32>
    %253 = tpu.matmul %44, %252, %cst_40 {dimension_numbers = #tpu.dot_dimension_numbers<[1], [0], [0], [1], [0, 0, 1, 1], [], []>} : vector<128x128xbf16>, vector<128x512xbf16>, vector<128x512xf32> -> vector<128x512xf32>
    %254 = vector.extract_strided_slice %253 {offsets = [0, 0], sizes = [128, 256], strides = [1, 1]} : vector<128x512xf32> to vector<128x256xf32>
    %255 = vector.extract_strided_slice %253 {offsets = [0, 256], sizes = [128, 256], strides = [1, 1]} : vector<128x512xf32> to vector<128x256xf32>
    %cst_41 = arith.constant 1.000000e-30 : f32
    %256 = vector.broadcast %cst_41 : f32 to vector<128x256xf32>
    %257 = arith.addf %255, %256 : vector<128x256xf32>
    %258 = tpu.reciprocal %257 {approx = true} : vector<128x256xf32> -> vector<128x256xf32>
    %259 = arith.mulf %254, %258 : vector<128x256xf32>
    %260 = arith.addf %259, %233 : vector<128x256xf32>
    %261 = vector.broadcast %234 : vector<1x256xf32> to vector<128x256xf32>
    %262 = arith.addf %260, %261 : vector<128x256xf32>
    %263 = vector.broadcast %235 : vector<1x256xf32> to vector<128x256xf32>
    %264 = arith.mulf %262, %263 : vector<128x256xf32>
    %265 = vector.broadcast %236 : vector<1x256xf32> to vector<128x256xf32>
    %266 = arith.addf %264, %265 : vector<128x256xf32>
    %cst_42 = arith.constant 2.000000e-01 : f32
    %267 = vector.broadcast %cst_42 : f32 to vector<128x256xf32>
    %268 = arith.mulf %267, %266 : vector<128x256xf32>
    %269 = arith.maximumf %266, %268 : vector<128x256xf32>
    %270 = vector.extract_strided_slice %269 {offsets = [0, 0], sizes = [64, 256], strides = [1, 1]} : vector<128x256xf32> to vector<64x256xf32>
    %cst_43 = arith.constant dense<0.000000e+00> : vector<256xf32>
    %271 = vector.multi_reduction <add>, %270, %cst_43 [0] : vector<64x256xf32> to vector<256xf32>
    %272 = vector.shape_cast %271 : vector<256xf32> to vector<1x256xf32>
    %273 = vector.extract_strided_slice %269 {offsets = [64, 0], sizes = [64, 256], strides = [1, 1]} : vector<128x256xf32> to vector<64x256xf32>
    %cst_44 = arith.constant dense<0.000000e+00> : vector<256xf32>
    %274 = vector.multi_reduction <add>, %273, %cst_44 [0] : vector<64x256xf32> to vector<256xf32>
    %275 = vector.shape_cast %274 : vector<256xf32> to vector<1x256xf32>
    %276 = tpu.concatenate %272, %275 in 0 : vector<1x256xf32>, vector<1x256xf32> -> vector<2x256xf32>
    %c0_45 = arith.constant 0 : index
    %c0_46 = arith.constant 0 : index
    %277 = vector.load %arg12[%c0_45, %c0_46] : memref<2x512xf32, #tpu.memory_space<vmem>>, vector<2x512xf32>
    %c0_47 = arith.constant 0 : index
    %c0_48 = arith.constant 0 : index
    %278 = vector.load %arg14[%c0_47, %c0_48] : memref<2x256xf32, #tpu.memory_space<vmem>>, vector<2x256xf32>
    %279 = arith.truncf %276 : vector<2x256xf32> to vector<2x256xbf16>
    %c0_49 = arith.constant 0 : index
    %c0_50 = arith.constant 0 : index
    %280 = vector.load %arg11[%c0_49, %c0_50] : memref<256x512xbf16, #tpu.memory_space<vmem>>, vector<256x512xbf16>
    %cst_51 = arith.constant dense<0.000000e+00> : vector<2x512xf32>
    %281 = tpu.matmul %279, %280, %cst_51 {dimension_numbers = #tpu.dot_dimension_numbers<[1], [0], [0], [1], [0, 0, 1, 1], [], []>} : vector<2x256xbf16>, vector<256x512xbf16>, vector<2x512xf32> -> vector<2x512xf32>
    %282 = vector.extract_strided_slice %277 {offsets = [0, 0], sizes = [1, 512], strides = [1, 1]} : vector<2x512xf32> to vector<1x512xf32>
    %283 = vector.broadcast %282 : vector<1x512xf32> to vector<2x512xf32>
    %284 = arith.mulf %281, %283 : vector<2x512xf32>
    %285 = vector.extract_strided_slice %277 {offsets = [1, 0], sizes = [1, 512], strides = [1, 1]} : vector<2x512xf32> to vector<1x512xf32>
    %286 = vector.broadcast %285 : vector<1x512xf32> to vector<2x512xf32>
    %287 = arith.addf %284, %286 : vector<2x512xf32>
    %cst_52 = arith.constant 2.000000e-01 : f32
    %288 = vector.broadcast %cst_52 : f32 to vector<2x512xf32>
    %289 = arith.mulf %288, %287 : vector<2x512xf32>
    %290 = arith.maximumf %287, %289 : vector<2x512xf32>
    %291 = arith.truncf %290 : vector<2x512xf32> to vector<2x512xbf16>
    %c0_53 = arith.constant 0 : index
    %c0_54 = arith.constant 0 : index
    %292 = vector.load %arg13[%c0_53, %c0_54] : memref<512x256xbf16, #tpu.memory_space<vmem>>, vector<512x256xbf16>
    %cst_55 = arith.constant dense<0.000000e+00> : vector<2x256xf32>
    %293 = tpu.matmul %291, %292, %cst_55 {dimension_numbers = #tpu.dot_dimension_numbers<[1], [0], [0], [1], [0, 0, 1, 1], [], []>} : vector<2x512xbf16>, vector<512x256xbf16>, vector<2x256xf32> -> vector<2x256xf32>
    %294 = vector.extract_strided_slice %278 {offsets = [0, 0], sizes = [1, 256], strides = [1, 1]} : vector<2x256xf32> to vector<1x256xf32>
    %295 = vector.broadcast %294 : vector<1x256xf32> to vector<2x256xf32>
    %296 = arith.mulf %293, %295 : vector<2x256xf32>
    %297 = vector.extract_strided_slice %278 {offsets = [1, 0], sizes = [1, 256], strides = [1, 1]} : vector<2x256xf32> to vector<1x256xf32>
    %298 = vector.broadcast %297 : vector<1x256xf32> to vector<2x256xf32>
    %299 = arith.addf %296, %298 : vector<2x256xf32>
    %cst_56 = arith.constant 2.000000e-01 : f32
    %300 = vector.broadcast %cst_56 : f32 to vector<2x256xf32>
    %301 = arith.mulf %300, %299 : vector<2x256xf32>
    %302 = arith.maximumf %299, %301 : vector<2x256xf32>
    %303 = arith.truncf %302 : vector<2x256xf32> to vector<2x256xbf16>
    %c0_57 = arith.constant 0 : index
    %c0_58 = arith.constant 0 : index
    %304 = vector.load %arg15[%c0_57, %c0_58] : memref<256x40xbf16, #tpu.memory_space<vmem>>, vector<256x40xbf16>
    %cst_59 = arith.constant dense<0.000000e+00> : vector<2x40xf32>
    %305 = tpu.matmul %303, %304, %cst_59 {dimension_numbers = #tpu.dot_dimension_numbers<[1], [0], [0], [1], [0, 0, 1, 1], [], []>} : vector<2x256xbf16>, vector<256x40xbf16>, vector<2x40xf32> -> vector<2x40xf32>
    %c0_60 = arith.constant 0 : index
    %c0_61 = arith.constant 0 : index
    %306 = vector.load %arg16[%c0_60, %c0_61] : memref<1x40xf32, #tpu.memory_space<vmem>>, vector<1x40xf32>
    %307 = vector.broadcast %306 : vector<1x40xf32> to vector<2x40xf32>
    %308 = arith.addf %305, %307 : vector<2x40xf32>
    %c0_62 = arith.constant 0 : index
    %c0_63 = arith.constant 0 : index
    %c0_64 = arith.constant 0 : index
    %309 = vector.load %arg17[%c0_62, %c0_63, %c0_64] : memref<1x2x40xf32, #tpu.memory_space<vmem>>, vector<1x2x40xf32>
    %310 = vector.shape_cast %309 : vector<1x2x40xf32> to vector<2x40xf32>
    %311 = vector.shape_cast %308 : vector<2x40xf32> to vector<1x2x40xf32>
    tpu.vector_store %arg17[%c0_62, %c0_63, %c0_64], %311 {strides = array<i32>} : memref<1x2x40xf32, #tpu.memory_space<vmem>>, vector<1x2x40xf32>,
    return
  }
  func.func @transform_0(%arg0: i32) -> (i32, i32, i32) {
    %c0_i32 = arith.constant 0 : i32
    %c0_i32_0 = arith.constant 0 : i32
    %c0_i32_1 = arith.constant 0 : i32
    return %arg0, %c0_i32, %c0_i32_0 : i32, i32, i32
  }
  func.func @transform_1(%arg0: i32) -> (i32, i32, i32) {
    %c0_i32 = arith.constant 0 : i32
    %c0_i32_0 = arith.constant 0 : i32
    %c0_i32_1 = arith.constant 0 : i32
    return %arg0, %c0_i32, %c0_i32_0 : i32, i32, i32
  }
  func.func @transform_2(%arg0: i32) -> (i32, i32) {
    %c0_i32 = arith.constant 0 : i32
    %c0_i32_0 = arith.constant 0 : i32
    %c0_i32_1 = arith.constant 0 : i32
    return %c0_i32, %c0_i32_0 : i32, i32
  }
  func.func @transform_3(%arg0: i32) -> (i32, i32) {
    %c0_i32 = arith.constant 0 : i32
    %c0_i32_0 = arith.constant 0 : i32
    %c0_i32_1 = arith.constant 0 : i32
    return %c0_i32, %c0_i32_0 : i32, i32
  }
  func.func @transform_4(%arg0: i32) -> (i32, i32) {
    %c0_i32 = arith.constant 0 : i32
    %c0_i32_0 = arith.constant 0 : i32
    %c0_i32_1 = arith.constant 0 : i32
    return %c0_i32, %c0_i32_0 : i32, i32
  }
  func.func @transform_5(%arg0: i32) -> (i32, i32) {
    %c0_i32 = arith.constant 0 : i32
    %c0_i32_0 = arith.constant 0 : i32
    %c0_i32_1 = arith.constant 0 : i32
    return %c0_i32, %c0_i32_0 : i32, i32
  }
  func.func @transform_6(%arg0: i32) -> (i32, i32) {
    %c0_i32 = arith.constant 0 : i32
    %c0_i32_0 = arith.constant 0 : i32
    %c0_i32_1 = arith.constant 0 : i32
    return %c0_i32, %c0_i32_0 : i32, i32
  }
  func.func @transform_7(%arg0: i32) -> (i32, i32) {
    %c0_i32 = arith.constant 0 : i32
    %c0_i32_0 = arith.constant 0 : i32
    %c0_i32_1 = arith.constant 0 : i32
    return %c0_i32, %c0_i32_0 : i32, i32
  }
  func.func @transform_8(%arg0: i32) -> (i32, i32) {
    %c0_i32 = arith.constant 0 : i32
    %c0_i32_0 = arith.constant 0 : i32
    %c0_i32_1 = arith.constant 0 : i32
    return %c0_i32, %c0_i32_0 : i32, i32
  }
  func.func @transform_9(%arg0: i32) -> (i32, i32) {
    %c0_i32 = arith.constant 0 : i32
    %c0_i32_0 = arith.constant 0 : i32
    %c0_i32_1 = arith.constant 0 : i32
    return %c0_i32, %c0_i32_0 : i32, i32
  }
  func.func @transform_10(%arg0: i32) -> (i32, i32) {
    %c0_i32 = arith.constant 0 : i32
    %c0_i32_0 = arith.constant 0 : i32
    %c0_i32_1 = arith.constant 0 : i32
    return %c0_i32, %c0_i32_0 : i32, i32
  }
  func.func @transform_11(%arg0: i32) -> (i32, i32) {
    %c0_i32 = arith.constant 0 : i32
    %c0_i32_0 = arith.constant 0 : i32
    %c0_i32_1 = arith.constant 0 : i32
    return %c0_i32, %c0_i32_0 : i32, i32
  }
  func.func @transform_12(%arg0: i32) -> (i32, i32) {
    %c0_i32 = arith.constant 0 : i32
    %c0_i32_0 = arith.constant 0 : i32
    %c0_i32_1 = arith.constant 0 : i32
    return %c0_i32, %c0_i32_0 : i32, i32
  }
  func.func @transform_13(%arg0: i32) -> (i32, i32) {
    %c0_i32 = arith.constant 0 : i32
    %c0_i32_0 = arith.constant 0 : i32
    %c0_i32_1 = arith.constant 0 : i32
    return %c0_i32, %c0_i32_0 : i32, i32
  }
  func.func @transform_14(%arg0: i32) -> (i32, i32) {
    %c0_i32 = arith.constant 0 : i32
    %c0_i32_0 = arith.constant 0 : i32
    %c0_i32_1 = arith.constant 0 : i32
    return %c0_i32, %c0_i32_0 : i32, i32
  }
  func.func @transform_15(%arg0: i32) -> (i32, i32) {
    %c0_i32 = arith.constant 0 : i32
    %c0_i32_0 = arith.constant 0 : i32
    %c0_i32_1 = arith.constant 0 : i32
    return %c0_i32, %c0_i32_0 : i32, i32
  }
  func.func @transform_16(%arg0: i32) -> (i32, i32, i32) {
    %c0_i32 = arith.constant 0 : i32
    %c0_i32_0 = arith.constant 0 : i32
    %c0_i32_1 = arith.constant 0 : i32
    return %arg0, %c0_i32, %c0_i32_0 : i32, i32, i32
  }
}

</mosaic_0001>

<bundles_post_ra>
// kernel: point_transformer_forward.1
= control target key start
LH: loop header
LB: loop body
LE: loop exit
PB: predicated region body
PF: predicated region fallthrough
CT: control target
= control target key end

     0   :  { %s13386_s0 = inlined_call_operand.vmem [shape: s32[2,8,128], index: 0, kind: input, shape index: {}]   ;;  %s13387_s1 = inlined_call_operand.vmem [shape: f32[2,128,3], index: 1, kind: input, shape index: {}]   ;;  %s13388_s2 = inlined_call_operand.vmem [shape: f32[3,128], index: 2, kind: input, shape index: {}]   ;;  %s13389_s3 = inlined_call_operand.vmem [shape: f32[6,64], index: 3, kind: input, shape index: {}]   ;;  %s13390_s4 = inlined_call_operand.vmem [shape: bf16[64,128], index: 4, kind: input, shape index: {}]   ;;  %s13391_s5 = inlined_call_operand.vmem [shape: f32[6,64], index: 5, kind: input, shape index: {}]   ;;  %s13392_s6 = inlined_call_operand.vmem [shape: bf16[64,256], index: 6, kind: input, shape index: {}]   ;;  %s13393_s7 = inlined_call_operand.vmem [shape: f32[6,128], index: 7, kind: input, shape index: {}]   ;;  %s13394_s8 = inlined_call_operand.vmem [shape: bf16[256,512], index: 8, kind: input, shape index: {}]   ;;  %s13395_s9 = inlined_call_operand.vmem [shape: f32[6,256], index: 9, kind: input, shape index: {}]   ;;  %s13396_s10 = inlined_call_operand.vmem [shape: bf16[256,512], index: 10, kind: input, shape index: {}]   ;;  %s13397_s11 = inlined_call_operand.vmem [shape: f32[2,512], index: 11, kind: input, shape index: {}]   ;;  %s13398_s12 = inlined_call_operand.vmem [shape: bf16[512,256], index: 12, kind: input, shape index: {}]   ;;  %s13399_s13 = inlined_call_operand.vmem [shape: f32[2,256], index: 13, kind: input, shape index: {}]   ;;  %s13400_s14 = inlined_call_operand.vmem [shape: bf16[256,40], index: 14, kind: input, shape index: {}]   ;;  %s13401_s15 = inlined_call_operand.vmem [shape: f32[1,40], index: 15, kind: input, shape index: {}]   ;;  %s13402_s16 = inlined_call_operand.hbm [shape: f32[2,2,40], index: 16, kind: output, shape index: {}]  }
   0x1   :  { %13659 = sst [smem:[#allocation120_spill]] %s13386_s0 }
   0x2   :  { %13660 = sst [smem:[#allocation121_spill]] %s13387_s1 }
   0x3   :  { %13661 = sst [smem:[#allocation122_spill]] %s13388_s2 }
   0x4   :  { %13662 = sst [smem:[#allocation123_spill]] %s13389_s3 }
   0x5   :  { %13663 = sst [smem:[#allocation124_spill]] %s13390_s4 }
   0x6   :  { %21 = vsyncpa [#allocation3], 0 }
   0x7   :  { %23 = vsyncpa [#allocation3 + $0x1], 0  ;;  %s8433_s21 = smov 0   ;;  %s8435_s22 = smov 0  }
   0x8   :  { %s8437_s23 = smov 0   ;;  %s8439_s24 = smov 0  }
   0x9 LB: > { %13664 = sst [smem:[#allocation5_spill]] %s8337_s23  ;;  %s8454_s25 = sadd.s32 4294967295, %s8341_s24   ;;  %s8341_s24 = sphi %s8439_s24, %s14301_s24   ;;  %s8337_s23 = sphi %s8437_s23, %s14298_s23   ;;  %s8333_s22 = sphi %s8435_s22, %s14300_s22   ;;  %s8329_s21 = sphi %s8433_s21, %s14299_s21  }
   0xa   : > { %s6657_s26 = sadd.s32 4294967294, %s8341_s24   ;;  %s8458_s27 = sadd.s32 1, %s8341_s24  }
   0xb   : > { %s382_s28 = sadd.s32 1, %s8337_s23  ;;  %s379_s29 = ssub.s32 %s8341_s24, %s8458_s27 }
   0xc   : > { %p392_p0 = scmp.ne.s32.totalorder %s8337_s23, %s8333_s22  ;;  %p380_p1 = scmp.eq.s32.totalorder %s379_s29, 0 }
   0xd   : > { %p393_p2 = scmp.eq.s32.totalorder %s8454_s25, 1  ;;  %p398_p3 = scmp.ne.s32.totalorder %s8333_s22, %s8329_s21 }
   0xe   : > { %p399_p4 = scmp.eq.s32.totalorder %s6657_s26, 1  ;;  %p6660_p7 = scmp.ge.s32.totalorder %s8341_s24, 1 }
   0xf   : > { %s8469_s30 = scalar_select %p380_p1, %s8337_s23, %s382_s28  }
  0x10   : > { %p8471_p5 = por %p393_p2, %p392_p0  ;;  %p8475_p6 = por %p399_p4, %p398_p3 }
  0x11   : > { %13665 = sst [smem:[#allocation6_spill]] %s8469_s30  ;;  %p474_p8 = scmp.lt.s32.totalorder %s8341_s24, 3 }
  0x13   : > { %p475_p9 = pnand %p6660_p7, %p474_p8 }
  0x15   : > { %478 = sbr.rel (%p475_p9) target bundleno = 3444 (0xd74), region = 84 }
  0x1a   : > { %p528_p10 = scmp.lt.s32.totalorder %s8454_s25, 1  ;;  %v8343_v0 = vmov 0   ;;  %s13668_s1 = sld [smem:[#allocation121_spill]]  ;;  %v8344_v9 = vmov 1   ;;  %v8345_v16 = vmov 2   ;;  %vm13528_vm0 = vcmask 1048064  }
  0x1b   : > { %7856 = vset.pattern.permute.xlu2 %v8343_v0  ;;  %7855 = vset.pattern.permute.xlu1 %v8343_v0  ;;  %s13682_s3 = sld [smem:[#allocation123_spill]]  ;;  %vm13529_vm1 = vcmask 523264   ;;  %s7586_s30 = sshll.u32 %s8454_s25, 1 }
  0x1c   : > { %7854 = vset.pattern.permute.xlu0 %v8343_v0  ;;  %s8486_s18 = scalar_select %p528_p10, %s8454_s25, 1 }
  0x1d   : > { %s13683_s2 = sld [smem:[#allocation122_spill]]  ;;  %s6581_s23 = scalar_lea.hbm %s13402_s16, %s7586_s30 }
  0x1e   : > { %s7589_s19 = sshll.u32 %s8486_s18, 7  ;;  %s13788_s29 = sld [smem:[#allocation120_spill]] }
  0x1f   : > { %s13827_s4 = sld [smem:[#allocation124_spill]]  ;;  %s6585_s20 = sshll.u32 %s6581_s23, 4  ;;  %s6586_s20 = int_to_ptr.hbm [resolvable:$true] %s6585_s20 }
  0x20   : > { %s8492_s28 = scalar_lea.vmem %s13668_s1, %s7589_s19  ;;  %s13709_s1 = smov 64  }
  0x21   : > { %v542_v1 = vld [vmem:[%s8492_s28 + $0x20] sm:$0xff]  ;;  %v540_v2 = vld [vmem:[%s8492_s28 + $0x10] sm:$0xff]  ;;  %v543_v4 = vld [vmem:[%s8492_s28 + $0x28] sm:$0xff]  ;;  %s8293_s26 = sshra.s32 %s6586_s20, 4  ;;  %s8294_s26 = int_to_ptr.hbm [resolvable:$true] %s8293_s26 }
  0x22   : > { %917 = vperm.xlu2 %7856, %v542_v1   ;;  %907 = vperm.xlu1 %7855, %v540_v2   ;;  %v538_v3 = vld [vmem:[%s8492_s28] sm:$0xff]  ;;  %v541_v5 = vld [vmem:[%s8492_s28 + $0x18] sm:$0xff]  ;;  %v539_v6 = vld [vmem:[%s8492_s28 + $0x8] sm:$0xff]  ;;  %p8300_p0 = scmp.lt.s32.totalorder %s8294_s26, %s13402_s16 }
  0x23   : > { %897 = vperm.xlu0 %7854, %v538_v3   ;;  %v545_v7 = vld [vmem:[%s8492_s28 + $0x38] sm:$0xff]  ;;  %v544_v8 = vld [vmem:[%s8492_s28 + $0x30] sm:$0xff]  ;;  %v8503_v10 = vld [vmem:[%s8492_s28 + $0x48] sm:$0xff] }
  0x24   : > { %v8507_v11 = vld [vmem:[%s8492_s28 + $0x60] sm:$0xff]  ;;  %v548_v13 = vld [vmem:[%s8492_s28 + $0x50] sm:$0xff]  ;;  %v549_v14 = vld [vmem:[%s8492_s28 + $0x58] sm:$0xff] }
  0x25   : > { %v546_v12 = vld [vmem:[%s8492_s28 + $0x40] sm:$0xff]  ;;  %v551_v15 = vld [vmem:[%s8492_s28 + $0x68] sm:$0xff]  ;;  %v553_v18 = vld [vmem:[%s8492_s28 + $0x78] sm:$0xff] }
  0x26   : > { %v552_v20 = vld [vmem:[%s8492_s28 + $0x70] sm:$0xff]  ;;  %v894_v37 = vld [vmem:[%s13682_s3] sm:$0x3f]  ;;  %s13403_s28 = smov 64  }
  0x27   : > { %v1186_v38 = vld [vmem:[%s13683_s2] sm:$0x7]  ;;  %v8566_v39 = vperm.slane %v894_v37, 0  ;;  %v8568_v40 = vperm.slane %v894_v37, 1  ;;  %v8580_v47 = vperm.slane %v894_v37, 2  ;;  %s6662_s2 = sshll.u32 %s8486_s18, 3 }
  0x28   : > { %v8572_v42 = vperm.slane %v1186_v38, 0  ;;  %v8574_v43 = vperm.slane %v1186_v38, 1  ;;  %s531_s19 = scalar_lea.vmem %s13788_s29, %s6662_s2  ;;  %s525_s2 = sand.u32 1, %s8333_s22  }
  0x29   : > { %s6571_s25 = scalar_lea.sflag [#allocation3], %s525_s2 }
  0x2a   : > { %922 = vperm.xlu2 %7856, %v543_v4   ;;  %912 = vperm.xlu1 %7855, %v541_v5  }
  0x2b   : > { %902 = vperm.xlu0 %7854, %v539_v6  }
  0x32   : > { %7857 = vset.pattern.permute.xlu2 %v8344_v9  ;;  %932 = vperm.xlu1 %7855, %v545_v7  }
  0x33   : > { %927 = vperm.xlu0 %7854, %v544_v8   ;;  %993 = vperm.xlu2 %7857, %v538_v3  }
  0x3a   : > { %7858 = vset.pattern.permute.xlu1 %v8344_v9 }
  0x3b   : > { %942 = vperm.xlu0 %7854, %v8503_v10   ;;  %1001 = vperm.xlu1 %7858, %v540_v2  }
  0x3c   : > { %1005 = vperm.xlu2 %7857, %v541_v5  }
  0x43   : > { %957 = vperm.xlu0 %7854, %v8507_v11   ;;  %1009 = vperm.xlu1 %7858, %v542_v1  }
  0x44   : > { %1013 = vperm.xlu2 %7857, %v543_v4  }
  0x4b   : > { %7865 = vset.pattern.permute.xlu0 %v8344_v9  ;;  %1021 = vperm.xlu1 %7858, %v545_v7  }
  0x4c   : > { %7859 = vset.pattern.permute.xlu2 %v8343_v0  ;;  %997 = vperm.xlu0 %7865, %v539_v6  }
  0x4d   : > { %937 = vperm.xlu2 %7859, %v546_v12  }
  0x53   : > { %7860 = vset.pattern.permute.xlu1 %v8343_v0 }
  0x54   : > { %1017 = vperm.xlu0 %7865, %v544_v8   ;;  %947 = vperm.xlu1 %7860, %v548_v13  }
  0x55   : > { %952 = vperm.xlu2 %7859, %v549_v14  }
  0x5c   : > { %1033 = vperm.xlu0 %7865, %v548_v13   ;;  %7861 = vset.pattern.permute.xlu1 %v8344_v9 }
  0x5d   : > { %7862 = vset.pattern.permute.xlu2 %v8344_v9  ;;  %1025 = vperm.xlu1 %7861, %v546_v12  }
  0x5e   : > { %1029 = vperm.xlu2 %7862, %v8503_v10  }
  0x64   : > { %1045 = vperm.xlu0 %7865, %v551_v15  }
  0x65   : > { %1037 = vperm.xlu1 %7861, %v549_v14  }
  0x66   : > { %7863 = vset.pattern.permute.xlu2 %v8345_v16 }
  0x67   : > { %1090 = vperm.xlu2 %7863, %v538_v3  }
  0x6c   : > { %7869 = vset.pattern.permute.xlu0 %v8345_v16 }
  0x6d   : > { %1102 = vperm.xlu0 %7869, %v541_v5   ;;  %7864 = vset.pattern.permute.xlu1 %v8345_v16 }
  0x6e   : > { %1094 = vperm.xlu1 %7864, %v539_v6  }
  0x6f   : > { %1098 = vperm.xlu2 %7863, %v540_v2  }
  0x75   : > { %1130 = vperm.xlu0 %7869, %v548_v13   ;;  %v1913_v13 = vld [vmem:[%s13391_s5] sm:$0x3f] }
  0x76   : > { %1106 = vperm.xlu1 %7864, %v542_v1  }
  0x77   : > { %1110 = vperm.xlu2 %7863, %v543_v4  }
  0x7c   : > { %v8517_v17 = vpop.permute.xlu2 %917 }
  0x7d   : > { %13669 = vst [vmem:[#allocation7_spill] sm:$0xff] %v8517_v17  ;;  %1150 = vperm.xlu0 %7869, %v553_v18  }
  0x7e   : > { %1114 = vperm.xlu1 %7864, %v544_v8  }
  0x7f   : > { %1118 = vperm.xlu2 %7863, %v545_v7  }
  0x84   : > { %v8520_v19 = vpop.permute.xlu2 %922 }
  0x85   : > { %13670 = vst [vmem:[#allocation8_spill] sm:$0xff] %v8520_v19  ;;  %v981_v2 = vmul.f32 %v8566_v39, %v8520_v19 }
  0x86   : > { %7866 = vset.pattern.permute.xlu1 %v8343_v0 }
  0x87   : > { %7867 = vset.pattern.permute.xlu2 %v8343_v0  ;;  %962 = vperm.xlu1 %7866, %v551_v15  }
  0x88   : > { %967 = vperm.xlu2 %7867, %v552_v20  }
  0x8d   : > { %v8525_v21 = vpop.permute.xlu2 %993 }
  0x8e   : > { %13671 = vst [vmem:[#allocation9_spill] sm:$0xff] %v8525_v21  ;;  %v1057_v46 = vmul.f32 %v8568_v40, %v8525_v21 }
  0x8f   : > { %972 = vperm.xlu1 %7866, %v553_v18  }
  0x90   : > { %7868 = vset.pattern.permute.xlu2 %v8344_v9 }
  0x91   : > { %1041 = vperm.xlu2 %7868, %v8507_v11  }
  0x94   : > { %v8528_v22 = vpop.permute.xlu1 %907 }
  0x95   : > { %13672 = vst [vmem:[#allocation10_spill] sm:$0xff] %v8528_v22  ;;  %v8530_v23 = vpop.permute.xlu0 %897  ;;  %v978_v58 = vmul.f32 %v8566_v39, %v8528_v22 }
  0x96   : > { %13673 = vst [vmem:[#allocation11_spill] sm:$0xff] %v8530_v23  ;;  %v8532_v24 = vpop.permute.xlu2 %1005  ;;  %v976_v45 = vmul.f32 %v8566_v39, %v8530_v23 }
  0x97   : > { %13674 = vst [vmem:[#allocation12_spill] sm:$0xff] %v8532_v24  ;;  %7870 = vset.pattern.permute.xlu1 %v8344_v9  ;;  %v3575_v9 = vld [vmem:[%s13395_s9] sm:$0x3f] }
  0x98   : > { %1049 = vperm.xlu1 %7870, %v552_v20   ;;  %v1073_v52 = vadd.f32 %v1057_v46, %v976_v45  ;;  %v8658_v46 = vperm.slane %v1913_v13, 0  ;;  %v8698_v23 = vperm.slane %v3575_v9, 2 }
  0x99   : > { %1053 = vperm.xlu2 %7868, %v553_v18  }
  0x9a   : > { %13698 = vst [vmem:[#allocation34_spill] sm:$0xff] %v8658_v46 }
  0x9b   : > { %13705 = vst [vmem:[#allocation41_spill] sm:$0xff] %v8698_v23 }
  0x9c   : > { %v8534_v25 = vpop.permute.xlu1 %912 }
  0x9d   : > { %13675 = vst [vmem:[#allocation13_spill] sm:$0xff] %v8534_v25  ;;  %v8536_v26 = vpop.permute.xlu0 %902 }
  0x9e   : > { %v8538_v27 = vpop.permute.xlu2 %1013  ;;  %v1189_v48 = vmul.f32 %v8572_v42, %v8536_v26 }
  0x9f   : > { %13676 = vst [vmem:[#allocation14_spill] sm:$0xff] %v8538_v27  ;;  %v1062_v0 = vmul.f32 %v8568_v40, %v8538_v27 }
  0xa0   : > { %7871 = vset.pattern.permute.xlu1 %v8345_v16 }
  0xa1   : > { %7872 = vset.pattern.permute.xlu2 %v8345_v16  ;;  %1122 = vperm.xlu1 %7871, %v546_v12   ;;  %v1078_v4 = vadd.f32 %v1062_v0, %v981_v2  ;;  %v1060_v12 = vmul.f32 %v8568_v40, %v8532_v24  ;;  %v8649_v16 = vperm.slane %v3575_v9, 0 }
  0xa2   : > { %1126 = vperm.xlu2 %7872, %v8503_v10   ;;  %v3576_v10 = vld [vmem:[%s13395_s9 + $0x8] sm:$0x3f] }
  0xa3   : > { %13694 = vst [vmem:[#allocation30_spill] sm:$0xff] %v8649_v16  ;;  %v8651_v18 = vperm.slane %v3576_v10, 0  ;;  %v8655_v37 = vperm.slane %v3576_v10, 1 }
  0xa4   : > { %v8541_v28 = vpop.permute.xlu1 %932 }
  0xa5   : > { %13677 = vst [vmem:[#allocation15_spill] sm:$0xff] %v8541_v28  ;;  %v8543_v29 = vpop.permute.xlu0 %927  ;;  %v3582_v24 = vmul.f32 %v8651_v18, %v8536_v26 }
  0xa6   : > { %13695 = vst [vmem:[#allocation31_spill] sm:$0xff] %v8651_v18 }
  0xa7   : > { %v8545_v30 = vpop.permute.xlu2 %937  ;;  %13697 = vst [vmem:[#allocation33_spill] sm:$0xff] %v8655_v37 }
  0xa8   : > { %13678 = vst [vmem:[#allocation16_spill] sm:$0xff] %v8545_v30 }
  0xa9   : > { %1134 = vperm.xlu1 %7871, %v549_v14  }
  0xaa   : > { %1138 = vperm.xlu2 %7872, %v8507_v11   ;;  %v979_v11 = vmul.f32 %v8566_v39, %v8534_v25 }
  0xad   : > { %v8548_v31 = vpop.permute.xlu1 %1001  ;;  %v8550_v32 = vpop.permute.xlu0 %942 }
  0xae   : > { %13679 = vst [vmem:[#allocation17_spill] sm:$0xff] %v8548_v31  ;;  %v1059_v57 = vmul.f32 %v8568_v40, %v8548_v31 }
  0xaf   : > { %v8552_v33 = vpop.permute.xlu2 %952 }
  0xb0   : > { %13680 = vst [vmem:[#allocation18_spill] sm:$0xff] %v8552_v33  ;;  %v1075_v60 = vadd.f32 %v1059_v57, %v978_v58  ;;  %v8666_v57 = vperm.slane %v1186_v38, 2 }
  0xb1   : > { %1142 = vperm.xlu1 %7871, %v551_v15   ;;  %v2783_v15 = vld [vmem:[%s13393_s7] sm:$0x3f] }
  0xb2   : > { %1146 = vperm.xlu2 %7872, %v552_v20   ;;  %v8653_v20 = vperm.slane %v3575_v9, 1  ;;  %v8668_v58 = vperm.slane %v2783_v15, 0 }
  0xb4   : > { %13696 = vst [vmem:[#allocation32_spill] sm:$0xff] %v8653_v20  ;;  %v2786_v38 = vmul.f32 %v8668_v58, %v8536_v26 }
  0xb5   : > { %v8554_v34 = vpop.permute.xlu1 %1009  ;;  %v8556_v35 = vpop.permute.xlu0 %957  ;;  %13701 = vst [vmem:[#allocation37_spill] sm:$0xff] %v8668_v58 }
  0xb6   : > { %13681 = vst [vmem:[#allocation19_spill] sm:$0xff] %v8554_v34 }
  0xb8   : > { %v8558_v36 = vpop.permute.xlu2 %1029 }
  0xbd   : > { %v8570_v41 = vpop.permute.xlu1 %1021 }
  0xbe   : > { %13684 = vst [vmem:[#allocation20_spill] sm:$0xff] %v8570_v41  ;;  %v998_v44 = vpop.permute.xlu0 %997 }
  0xbf   : > { %v1206_v49 = vmul.f32 %v8574_v43, %v998_v44  ;;  %v1058_v45 = vmul.f32 %v8568_v40, %v998_v44 }
  0xc1   : > { %v8585_v50 = vpop.permute.xlu2 %1090  ;;  %v8587_v51 = vadd.f32 %v1206_v49, %v1189_v48  ;;  %v8660_v48 = vperm.slane %v1913_v13, 1  ;;  %v8662_v49 = vperm.slane %v2783_v15, 1 }
  0xc2   : > { %13685 = vst [vmem:[#allocation21_spill] sm:$0xff] %v8585_v50  ;;  %v1154_v53 = vmul.f32 %v8580_v47, %v8585_v50 }
  0xc3   : > { %13699 = vst [vmem:[#allocation35_spill] sm:$0xff] %v8660_v48  ;;  %v1933_v0 = vmul.f32 %v8660_v48, %v998_v44  ;;  %v2803_v2 = vmul.f32 %v8662_v49, %v998_v44 }
  0xc4   : > { %v8591_v54 = vadd.f32 %v1154_v53, %v1073_v52  ;;  %13700 = vst [vmem:[#allocation36_spill] sm:$0xff] %v8662_v49  ;;  %v1076_v52 = vadd.f32 %v1060_v12, %v979_v11  ;;  %v977_v53 = vmul.f32 %v8566_v39, %v8536_v26  ;;  %v8679_v11 = vperm.slane %v2783_v15, 2 }
  0xc5   : > { %v3581_v12 = vmul.f32 %v8649_v16, %v8536_v26  ;;  %v2819_v21 = vadd.f32 %v2803_v2, %v2786_v38 }
  0xc6   : > { %13686 = vst [vmem:[#allocation22_spill] sm:$0xff] %v8591_v54  ;;  %1286 = vrot.lane.b32.xlu1 %v8591_v54, %s13403_s28  ;;  %v8595_v55 = vpop.permute.xlu0 %1017  ;;  %v8597_v56 = vpop.permute.xlu1 %947  ;;  %v1074_v22 = vadd.f32 %v1058_v45, %v977_v53  ;;  %v8705_v53 = vperm.slane %v3576_v10, 2 }
  0xc7   : > { %13703 = vst [vmem:[#allocation39_spill] sm:$0xff] %v8679_v11  ;;  %v1925_v10 = vmul.f32 %v8658_v46, %v8597_v56 }
  0xc8   : > { %13708 = vst [vmem:[#allocation44_spill] sm:$0xff] %v8705_v53 }
  0xc9   : > { %v8603_v59 = vpop.permute.xlu2 %1098 }
  0xca   : > { %13687 = vst [vmem:[#allocation23_spill] sm:$0xff] %v8603_v59  ;;  %v1156_v61 = vmul.f32 %v8580_v47, %v8603_v59 }
  0xcc   : > { %v8607_v62 = vadd.f32 %v1156_v61, %v1075_v60  ;;  %v8670_v60 = vperm.slane %v1913_v13, 2  ;;  %v1916_v61 = vmul.f32 %v8658_v46, %v8536_v26  ;;  %v3616_v13 = vmul.f32 %v8655_v37, %v998_v44 }
  0xce   : > { %13688 = vst [vmem:[#allocation24_spill] sm:$0xff] %v8607_v62  ;;  %1290 = vrot.lane.b32.xlu0 %v8607_v62, %s13403_s28  ;;  %v8611_v63 = vpop.permute.xlu0 %1033 }
  0xcf   : > { %v8615_v1 = vpop.permute.xlu1 %1025 }
  0xd0   : > { %13689 = vst [vmem:[#allocation25_spill] sm:$0xff] %v8615_v1 }
  0xd1   : > { %v8619_v3 = vpop.permute.xlu2 %1110 }
  0xd2   : > { %13690 = vst [vmem:[#allocation26_spill] sm:$0xff] %v8619_v3  ;;  %v1159_v5 = vmul.f32 %v8580_v47, %v8619_v3 }
  0xd4   : > { %v8623_v6 = vadd.f32 %v1159_v5, %v1078_v4  ;;  %v3615_v4 = vmul.f32 %v8653_v20, %v998_v44  ;;  %v1949_v44 = vadd.f32 %v1933_v0, %v1916_v61  ;;  %v2795_v0 = vmul.f32 %v8668_v58, %v8597_v56 }
  0xd6   : > { %13691 = vst [vmem:[#allocation27_spill] sm:$0xff] %v8623_v6  ;;  %1296 = vrot.lane.b32.xlu0 %v8623_v6, %s13403_s28  ;;  %v8627_v7 = vpop.permute.xlu0 %1045  ;;  %s8295_s28 = scalar_lea.hbm %s8294_s26, 2 }
  0xd7   : > { %v8629_v8 = vpop.permute.xlu1 %1037  ;;  %p8296_p11 = scmp.ne.s32.totalorder %s8294_s26, %s8295_s28 }
  0xd8   : > { %13692 = vst [vmem:[#allocation28_spill] sm:$0xff] %v8629_v8 }
  0xd9   : > { %v8644_v14 = vpop.permute.xlu2 %1118  ;;  %p8297_p12 = pnand %p8296_p11, %p8471_p5 }
  0xda   : > { %13693 = vst [vmem:[#allocation29_spill] sm:$0xff] %v8644_v14 }
  0xdb   : > { %p8298_p13 = pneg %p8297_p12 }
  0xdf   : > { %v8677_v5 = vpop.permute.xlu0 %1102 }
  0xe0   : > { %13702 = vst [vmem:[#allocation38_spill] sm:$0xff] %v8677_v5  ;;  %v1095_v62 = vpop.permute.xlu1 %1094  ;;  %v1157_v59 = vmul.f32 %v8580_v47, %v8677_v5  ;;  %v3647_v5 = vadd.f32 %v3615_v4, %v3581_v12 }
  0xe1   : > { %v1155_v25 = vmul.f32 %v8580_v47, %v1095_v62  ;;  %v1239_v15 = vmul.f32 %v8666_v57, %v1095_v62  ;;  %v1966_v31 = vmul.f32 %v8670_v60, %v1095_v62  ;;  %v2836_v54 = vmul.f32 %v8679_v11, %v1095_v62 }
  0xe2   : > { %v8694_v6 = vpop.permute.xlu2 %967  ;;  %v8696_v50 = vadd.f32 %v1157_v59, %v1076_v52  ;;  %v1942_v59 = vmul.f32 %v8660_v48, %v8611_v63  ;;  %v3681_v9 = vmul.f32 %v8698_v23, %v1095_v62 }
  0xe3   : > { %v8700_v45 = vadd.f32 %v1155_v25, %v1074_v22  ;;  %v8703_v26 = vadd.f32 %v1239_v15, %v8587_v51  ;;  %v8709_v3 = vadd.f32 %v1966_v31, %v1949_v44  ;;  %v8713_v52 = vadd.f32 %v2836_v54, %v2819_v21 }
  0xe4   : > { %13704 = vst [vmem:[#allocation40_spill] sm:$0xff] %v8696_v50  ;;  %1292 = vrot.lane.b32.xlu1 %v8696_v50, %s13709_s1  ;;  %v1061_v22 = vmul.f32 %v8568_v40, %v8554_v34  ;;  %v2812_v25 = vmul.f32 %v8662_v49, %v8611_v63  ;;  %v3648_v51 = vadd.f32 %v3616_v13, %v3582_v24 }
  0xe5   : > { %13706 = vst [vmem:[#allocation42_spill] sm:$0xff] %v8700_v45  ;;  %1288 = vrot.lane.b32.xlu2 %v8700_v45, %s13709_s1  ;;  %v3682_v31 = vmul.f32 %v8705_v53, %v1095_v62  ;;  %v8725_v61 = vadd.f32 %v3681_v9, %v3647_v5  ;;  %v980_v54 = vmul.f32 %v8566_v39, %v8517_v17 }
  0xe6   : > { %13707 = vst [vmem:[#allocation43_spill] sm:$0xff] %v8703_v26  ;;  %v1958_v24 = vadd.f32 %v1942_v59, %v1925_v10  ;;  %v2828_v13 = vadd.f32 %v2812_v25, %v2795_v0  ;;  %v1064_v15 = vmul.f32 %v8568_v40, %v8570_v41  ;;  %v983_v59 = vmul.f32 %v8566_v39, %v8541_v28 }
  0xe7   : > { %13710 = vst [vmem:[#allocation45_spill] sm:$0xff] %v8709_v3  ;;  %v8727_v21 = vpop.permute.xlu0 %1130  ;;  %v8733_v2 = vadd.f32 %v3682_v31, %v3648_v51  ;;  %v1077_v38 = vadd.f32 %v1061_v22, %v980_v54  ;;  %v1063_v31 = vmul.f32 %v8568_v40, %v8595_v55  ;;  %v982_v25 = vmul.f32 %v8566_v39, %v8543_v29 }
  0xe8   : > { %13711 = vst [vmem:[#allocation46_spill] sm:$0xff] %v8713_v52  ;;  %v8735_v4 = vpop.permute.xlu1 %1106  ;;  %v1975_v62 = vmul.f32 %v8670_v60, %v8727_v21  ;;  %v2845_v5 = vmul.f32 %v8679_v11, %v8727_v21  ;;  %v1921_v10 = vmul.f32 %v8658_v46, %v8543_v29  ;;  %v3633_v54 = vmul.f32 %v8653_v20, %v8611_v63 }
  0xe9   : > { %13712 = vst [vmem:[#allocation47_spill] sm:$0xff] %v8725_v61  ;;  %v1158_v12 = vmul.f32 %v8580_v47, %v8735_v4  ;;  %v3634_v0 = vmul.f32 %v8655_v37, %v8611_v63  ;;  %v3600_v61 = vmul.f32 %v8651_v18, %v8597_v56  ;;  %v1079_v52 = vadd.f32 %v1063_v31, %v982_v25 }
  0xea   : > { %13713 = vst [vmem:[#allocation48_spill] sm:$0xff] %v8733_v2  ;;  %v8745_v44 = vadd.f32 %v1975_v62, %v1958_v24  ;;  %v8755_v22 = vadd.f32 %v2845_v5, %v2828_v13  ;;  %v1938_v24 = vmul.f32 %v8660_v48, %v8595_v55  ;;  %v2791_v62 = vmul.f32 %v8668_v58, %v8543_v29 }
  0xeb   : > { %13714 = vst [vmem:[#allocation49_spill] sm:$0xff] %v8735_v4  ;;  %v8747_v9 = vpop.permute.xlu2 %1041  ;;  %v8749_v51 = vadd.f32 %v1158_v12, %v1077_v38  ;;  %v3591_v5 = vmul.f32 %v8649_v16, %v8543_v29  ;;  %v3592_v38 = vmul.f32 %v8651_v18, %v8543_v29  ;;  %v1080_v12 = vadd.f32 %v1064_v15, %v983_v59 }
  0xec   : > { %13715 = vst [vmem:[#allocation50_spill] sm:$0xff] %v8745_v44  ;;  %v2808_v13 = vmul.f32 %v8662_v49, %v8595_v55  ;;  %v3599_v2 = vmul.f32 %v8649_v16, %v8597_v56  ;;  %v3699_v44 = vmul.f32 %v8698_v23, %v8727_v21  ;;  %v3700_v3 = vmul.f32 %v8705_v53, %v8727_v21 }
  0xed   : > { %13716 = vst [vmem:[#allocation51_spill] sm:$0xff] %v8749_v51  ;;  %1294 = vrot.lane.b32.xlu2 %v8749_v51, %s13709_s1  ;;  %v3625_v59 = vmul.f32 %v8653_v20, %v8595_v55  ;;  %v3626_v26 = vmul.f32 %v8655_v37, %v8595_v55  ;;  %v3666_v50 = vadd.f32 %v3634_v0, %v3600_v61 }
  0xee   : > { %13717 = vst [vmem:[#allocation52_spill] sm:$0xff] %v8755_v22  ;;  %v1161_v22 = vmul.f32 %v8580_v47, %v8644_v14  ;;  %v3665_v45 = vadd.f32 %v3633_v54, %v3599_v2  ;;  %v1954_v31 = vadd.f32 %v1938_v24, %v1921_v10  ;;  %v2824_v24 = vadd.f32 %v2808_v13, %v2791_v62 }
  0xef   : > { %v8805_v2 = vadd.f32 %v3700_v3, %v3666_v50  ;;  %v3657_v41 = vadd.f32 %v3625_v59, %v3591_v5  ;;  %v3658_v34 = vadd.f32 %v3626_v26, %v3592_v38  ;;  %v1067_v50 = vmul.f32 %v8568_v40, %v8611_v63 }
  0xf0   : > { %v8787_v15 = vpop.permute.xlu1 %1114  ;;  %v8803_v17 = vadd.f32 %v3699_v44, %v3665_v45  ;;  %v8809_v54 = vadd.f32 %v1161_v22, %v1080_v12  ;;  %v986_v44 = vmul.f32 %v8566_v39, %v8597_v56  ;;  %v1164_v26 = vmul.f32 %v8580_v47, %v8727_v21 }
  0xf1   : > { %v1160_v51 = vmul.f32 %v8580_v47, %v8787_v15  ;;  %v1971_v25 = vmul.f32 %v8670_v60, %v8787_v15  ;;  %v2841_v14 = vmul.f32 %v8679_v11, %v8787_v15  ;;  %v3691_v4 = vmul.f32 %v8698_v23, %v8787_v15  ;;  %13719 = vst [vmem:[#allocation54_spill] sm:$0xff] %v8805_v2 }
  0xf2   : > { %v3692_v28 = vmul.f32 %v8705_v53, %v8787_v15  ;;  %13718 = vst [vmem:[#allocation53_spill] sm:$0xff] %v8803_v17  ;;  %v1066_v22 = vmul.f32 %v8568_v40, %v8558_v36  ;;  %v2811_v62 = vmul.f32 %v8662_v49, %v8558_v36  ;;  %v3597_v5 = vmul.f32 %v8649_v16, %v8550_v32 }
  0xf3   : > { %v8807_v61 = vpop.permute.xlu2 %1053  ;;  %13720 = vst [vmem:[#allocation55_spill] sm:$0xff] %v8809_v54  ;;  %v8811_v10 = vadd.f32 %v1160_v51, %v1079_v52  ;;  %v8813_v0 = vadd.f32 %v1971_v25, %v1954_v31  ;;  %v8821_v3 = vadd.f32 %v2841_v14, %v2824_v24  ;;  %v8823_v45 = vadd.f32 %v3691_v4, %v3657_v41 }
  0xf4   : > { %v8825_v52 = vadd.f32 %v3692_v28, %v3658_v34  ;;  %v985_v51 = vmul.f32 %v8566_v39, %v8550_v32  ;;  %v1924_v14 = vmul.f32 %v8658_v46, %v8550_v32  ;;  %v1941_v41 = vmul.f32 %v8660_v48, %v8558_v36 }
  0xf5   : > { %13721 = vst [vmem:[#allocation56_spill] sm:$0xff] %v8811_v10  ;;  %1300 = vrot.lane.b32.xlu2 %v8809_v54, %s13709_s1  ;;  %1298 = vrot.lane.b32.xlu1 %v8811_v10, %s13709_s1  ;;  %v1083_v34 = vadd.f32 %v1067_v50, %v986_v44  ;;  %v2794_v4 = vmul.f32 %v8668_v58, %v8550_v32 }
  0xf6   : > { %13722 = vst [vmem:[#allocation57_spill] sm:$0xff] %v8813_v0  ;;  %v3598_v38 = vmul.f32 %v8651_v18, %v8550_v32  ;;  %v3631_v12 = vmul.f32 %v8653_v20, %v8558_v36  ;;  %v3632_v13 = vmul.f32 %v8655_v37, %v8558_v36  ;;  %v1945_v25 = vmul.f32 %v8660_v48, %v8627_v7 }
  0xf7   : > { %13723 = vst [vmem:[#allocation58_spill] sm:$0xff] %v8821_v3  ;;  %v8853_v59 = vadd.f32 %v1164_v26, %v1083_v34  ;;  %v1082_v44 = vadd.f32 %v1066_v22, %v985_v51  ;;  %v1957_v2 = vadd.f32 %v1941_v41, %v1924_v14  ;;  %v2815_v17 = vmul.f32 %v8662_v49, %v8627_v7 }
  0xf8   : > { %13724 = vst [vmem:[#allocation59_spill] sm:$0xff] %v8823_v45  ;;  %v2827_v45 = vadd.f32 %v2811_v62, %v2794_v4  ;;  %v3663_v22 = vadd.f32 %v3631_v12, %v3597_v5  ;;  %v3664_v54 = vadd.f32 %v3632_v13, %v3598_v38  ;;  %v1069_v4 = vmul.f32 %v8568_v40, %v8747_v9 }
  0xf9   : > { %13725 = vst [vmem:[#allocation60_spill] sm:$0xff] %v8825_v52  ;;  %v8839_v28 = vpop.permute.xlu1 %962  ;;  %v1947_v5 = vmul.f32 %v8660_v48, %v8807_v61  ;;  %v988_v12 = vmul.f32 %v8566_v39, %v8556_v35  ;;  %v1927_v13 = vmul.f32 %v8658_v46, %v8556_v35 }
  0xfa   : > { %13726 = vst [vmem:[#allocation61_spill] sm:$0xff] %v8853_v59  ;;  %v1928_v31 = vmul.f32 %v8658_v46, %v8839_v28  ;;  %v2798_v24 = vmul.f32 %v8668_v58, %v8839_v28 }
  0xfc   : > { %v8861_v50 = vpop.permute.xlu2 %1126  ;;  %v8871_v52 = vadd.f32 %v1945_v25, %v1928_v31  ;;  %v8875_v51 = vadd.f32 %v2815_v17, %v2798_v24 }
  0xfd   : > { %1306 = vrot.lane.b32.xlu2 %v8853_v59, %s13709_s1  ;;  %v1163_v26 = vmul.f32 %v8580_v47, %v8861_v50  ;;  %v1974_v34 = vmul.f32 %v8670_v60, %v8861_v50  ;;  %v2844_v3 = vmul.f32 %v8679_v11, %v8861_v50  ;;  %v3697_v14 = vmul.f32 %v8698_v23, %v8861_v50 }
  0xfe   : > { %v3698_v59 = vmul.f32 %v8705_v53, %v8861_v50 }
  0xff   : > { %v8879_v41 = vadd.f32 %v1163_v26, %v1082_v44  ;;  %v8881_v0 = vadd.f32 %v1974_v34, %v1957_v2  ;;  %v8887_v62 = vadd.f32 %v2844_v3, %v2827_v45  ;;  %v8889_v31 = vadd.f32 %v3697_v14, %v3663_v22 }
 0x100   : > { %v1944_v2 = vmul.f32 %v8660_v48, %v8747_v9  ;;  %v8899_v38 = vadd.f32 %v3698_v59, %v3664_v54  ;;  %v2814_v3 = vmul.f32 %v8662_v49, %v8747_v9  ;;  %v2817_v45 = vmul.f32 %v8662_v49, %v8807_v61 }
 0x101   : > { %13727 = vst [vmem:[#allocation62_spill] sm:$0xff] %v8879_v41  ;;  %1304 = vrot.lane.b32.xlu1 %v8879_v41, %s13709_s1  ;;  %v8893_v17 = vpop.permute.xlu1 %972  ;;  %v1085_v59 = vadd.f32 %v1069_v4, %v988_v12  ;;  %v2797_v44 = vmul.f32 %v8668_v58, %v8556_v35  ;;  %v1072_v12 = vmul.f32 %v8568_v40, %v8807_v61 }
 0x102   : > { %13728 = vst [vmem:[#allocation63_spill] sm:$0xff] %v8881_v0  ;;  %v1930_v25 = vmul.f32 %v8658_v46, %v8893_v17  ;;  %v2800_v24 = vmul.f32 %v8668_v58, %v8893_v17  ;;  %v1960_v34 = vadd.f32 %v1944_v2, %v1927_v13  ;;  %v991_v4 = vmul.f32 %v8566_v39, %v8893_v17  ;;  %v8935_v13 = vpop.permute.xlu0 %1150 }
 0x103   : > { %13729 = vst [vmem:[#allocation64_spill] sm:$0xff] %v8887_v62 }
 0x104   : > { %13730 = vst [vmem:[#allocation65_spill] sm:$0xff] %v8889_v31  ;;  %v8913_v54 = vpop.permute.xlu2 %1138  ;;  %v8921_v14 = vadd.f32 %v1947_v5, %v1930_v25  ;;  %v8925_v62 = vadd.f32 %v2817_v45, %v2800_v24  ;;  %v1088_v45 = vadd.f32 %v1072_v12, %v991_v4  ;;  %v1169_v25 = vmul.f32 %v8580_v47, %v8935_v13 }
 0x105   : > { %13731 = vst [vmem:[#allocation66_spill] sm:$0xff] %v8899_v38  ;;  %v1166_v26 = vmul.f32 %v8580_v47, %v8913_v54  ;;  %v1977_v22 = vmul.f32 %v8670_v60, %v8913_v54  ;;  %v2830_v38 = vadd.f32 %v2814_v3, %v2797_v44  ;;  %v2847_v31 = vmul.f32 %v8679_v11, %v8913_v54 }
 0x106   : > { %13732 = vst [vmem:[#allocation67_spill] sm:$0xff] %v8921_v14 }
 0x107   : > { %13733 = vst [vmem:[#allocation68_spill] sm:$0xff] %v8925_v62  ;;  %v8927_v0 = vadd.f32 %v1166_v26, %v1085_v59  ;;  %v8933_v2 = vadd.f32 %v1977_v22, %v1960_v34  ;;  %v8937_v5 = vadd.f32 %v2847_v31, %v2830_v38  ;;  %v1929_v31 = vmul.f32 %v8658_v46, %v8694_v6 }
 0x108   : > { %13736 = vst [vmem:[#allocation71_spill] sm:$0xff] %v8935_v13  ;;  %v2799_v38 = vmul.f32 %v8668_v58, %v8694_v6  ;;  %v1217_v26 = vmul.f32 %v8574_v43, %v8747_v9  ;;  %v1200_v62 = vmul.f32 %v8572_v42, %v8556_v35  ;;  %v1065_v58 = vmul.f32 %v8568_v40, %v8615_v1 }
 0x109   : > { %13734 = vst [vmem:[#allocation69_spill] sm:$0xff] %v8927_v0  ;;  %1310 = vrot.lane.b32.xlu1 %v8927_v0, %s13709_s1  ;;  %v3643_v46 = vmul.f32 %v8653_v20, %v8807_v61 }
 0x10a   : > { %13735 = vst [vmem:[#allocation70_spill] sm:$0xff] %v8933_v2  ;;  %v8941_v3 = vpop.permute.xlu1 %1049 }
 0x10b   : > { %13737 = vst [vmem:[#allocation72_spill] sm:$0xff] %v8937_v5  ;;  %v1946_v24 = vmul.f32 %v8660_v48, %v8941_v3  ;;  %v2816_v59 = vmul.f32 %v8662_v49, %v8941_v3  ;;  %v8961_v5 = vadd.f32 %v1169_v25, %v1088_v45  ;;  %v1250_v49 = vmul.f32 %v8666_v57, %v8913_v54 }
 0x10c   : > { %v8949_v44 = vpop.permute.xlu2 %1146  ;;  %v984_v45 = vmul.f32 %v8566_v39, %v8545_v30 }
 0x10d   : > { %v1962_v34 = vadd.f32 %v1946_v24, %v1929_v31  ;;  %v1979_v22 = vmul.f32 %v8670_v60, %v8949_v44  ;;  %v2832_v4 = vadd.f32 %v2816_v59, %v2799_v38  ;;  %v2849_v12 = vmul.f32 %v8679_v11, %v8949_v44  ;;  %13738 = vst [vmem:[#allocation73_spill] sm:$0xff] %v8961_v5 }
 0x10e   : > { %v1233_v59 = vadd.f32 %v1217_v26, %v1200_v62  ;;  %v1081_v38 = vadd.f32 %v1065_v58, %v984_v45  ;;  %v3639_v62 = vmul.f32 %v8653_v20, %v8627_v7  ;;  %v1199_v45 = vmul.f32 %v8572_v42, %v8552_v33 }
 0x10f   : > { %v8969_v14 = vadd.f32 %v1979_v22, %v1962_v34  ;;  %v8971_v24 = vadd.f32 %v2849_v12, %v2832_v4  ;;  %v3605_v34 = vmul.f32 %v8649_v16, %v8839_v28  ;;  %v3606_v22 = vmul.f32 %v8651_v18, %v8839_v28 }
 0x110   : > { %v8979_v31 = vadd.f32 %v1250_v49, %v1233_v59  ;;  %v1211_v4 = vmul.f32 %v8574_v43, %v8595_v55  ;;  %v3640_v49 = vmul.f32 %v8655_v37, %v8627_v7  ;;  %v1068_v12 = vmul.f32 %v8568_v40, %v8629_v8 }
 0x111   : > { %13739 = vst [vmem:[#allocation74_spill] sm:$0xff] %v8969_v14  ;;  %1316 = vrot.lane.b32.xlu1 %v8961_v5, %s13709_s1  ;;  %v1216_v59 = vmul.f32 %v8574_v43, %v8629_v8  ;;  %v987_v55 = vmul.f32 %v8566_v39, %v8552_v33  ;;  %v1203_v33 = vmul.f32 %v8572_v42, %v8893_v17 }
 0x112   : > { %13740 = vst [vmem:[#allocation75_spill] sm:$0xff] %v8971_v24  ;;  %v1362_v58 = vsub.f32 %v8979_v31, %v8927_v0  ;;  %v9012_v24 = vadd.f32 %v3640_v49, %v3606_v22  ;;  %v3609_v49 = vmul.f32 %v8649_v16, %v8893_v17 }
 0x113   : > { %v8977_v25 = vpop.permute.xlu1 %1122  ;;  %13742 = vst [vmem:[#allocation77_spill] sm:$0xff] %v8979_v31  ;;  %v1084_v8 = vadd.f32 %v1068_v12, %v987_v55  ;;  %v1232_v48 = vadd.f32 %v1216_v59, %v1199_v45  ;;  %v3638_v12 = vmul.f32 %v8655_v37, %v8747_v9  ;;  %v1071_v55 = vmul.f32 %v8568_v40, %v8941_v3 }
 0x114   : > { %13741 = vst [vmem:[#allocation76_spill] sm:$0xff] %v8977_v25  ;;  %v1162_v2 = vmul.f32 %v8580_v47, %v8977_v25  ;;  %v3603_v45 = vmul.f32 %v8649_v16, %v8556_v35  ;;  %v1220_v31 = vmul.f32 %v8574_v43, %v8807_v61 }
 0x115   : > { %13744 = vst [vmem:[#allocation79_spill] sm:$0xff] %v9012_v24 }
 0x116   : > { %v8989_v26 = vadd.f32 %v1162_v2, %v1081_v38  ;;  %v1194_v2 = vmul.f32 %v8572_v42, %v8543_v29  ;;  %v9010_v38 = vadd.f32 %v3639_v62, %v3605_v34  ;;  %v990_v29 = vmul.f32 %v8566_v39, %v8694_v6 }
 0x117   : > { %v3637_v62 = vmul.f32 %v8653_v20, %v8747_v9  ;;  %v1219_v9 = vmul.f32 %v8574_v43, %v8941_v3 }
 0x118   : > { %13743 = vst [vmem:[#allocation78_spill] sm:$0xff] %v8989_v26  ;;  %1302 = vrot.lane.b32.xlu0 %v8989_v26, %s13709_s1  ;;  %v1227_v0 = vadd.f32 %v1211_v4, %v1194_v2  ;;  %v3644_v4 = vmul.f32 %v8655_v37, %v8807_v61  ;;  %v3704_v61 = vmul.f32 %v8705_v53, %v8913_v54 }
 0x119   : > { %1508 = vrot.lane.b32.xlu1 %v1362_v58, %s13709_s1  ;;  %v1244_v58 = vmul.f32 %v8666_v57, %v8787_v15  ;;  %v3610_v15 = vmul.f32 %v8651_v18, %v8893_v17  ;;  %v1087_v24 = vadd.f32 %v1071_v55, %v990_v29  ;;  %v1236_v55 = vadd.f32 %v1220_v31, %v1203_v33  ;;  %v13756_v33 = vld [vmem:[#allocation26_spill] sm:$0xff] }
 0x11a   : > { %v1243_v31 = vmul.f32 %v8666_v57, %v13756_v33 }
 0x11b   : > { %v9014_v14 = vpop.permute.xlu1 %1134 }
 0x11c   : > { %13745 = vst [vmem:[#allocation80_spill] sm:$0xff] %v9014_v14  ;;  %v1165_v34 = vmul.f32 %v8580_v47, %v9014_v14  ;;  %v1249_v22 = vmul.f32 %v8666_v57, %v9014_v14  ;;  %v989_v14 = vmul.f32 %v8566_v39, %v8839_v28  ;;  %v3703_v39 = vmul.f32 %v8698_v23, %v8913_v54 }
 0x11d   : > { %v1210_v54 = vmul.f32 %v8574_v43, %v8538_v27 }
 0x11e   : > { %v9036_v59 = vadd.f32 %v1165_v34, %v1084_v8  ;;  %v9038_v2 = vadd.f32 %v1249_v22, %v1232_v48  ;;  %v3604_v8 = vmul.f32 %v8651_v18, %v8556_v35  ;;  %v3669_v34 = vadd.f32 %v3637_v62, %v3603_v45 }
 0x11f   : > { %v9062_v22 = vadd.f32 %v3643_v46, %v3609_v49  ;;  %v9064_v35 = vadd.f32 %v3644_v4, %v3610_v15  ;;  %v1070_v62 = vmul.f32 %v8568_v40, %v8627_v7  ;;  %v1202_v46 = vmul.f32 %v8572_v42, %v8694_v6 }
 0x120   : > { %13746 = vst [vmem:[#allocation81_spill] sm:$0xff] %v9036_v59  ;;  %1308 = vrot.lane.b32.xlu0 %v9036_v59, %s13709_s1  ;;  %v1361_v48 = vsub.f32 %v9038_v2, %v9036_v59  ;;  %v3670_v17 = vadd.f32 %v3638_v12, %v3604_v8  ;;  %v1168_v59 = vmul.f32 %v8580_v47, %v8949_v44 }
 0x121   : > { %13747 = vst [vmem:[#allocation82_spill] sm:$0xff] %v9038_v2  ;;  %v9071_v45 = vadd.f32 %v3703_v39, %v3669_v34  ;;  %v9075_v12 = vadd.f32 %v1244_v58, %v1227_v0  ;;  %v1086_v29 = vadd.f32 %v1070_v62, %v989_v14  ;;  %v1235_v0 = vadd.f32 %v1219_v9, %v1202_v46 }
 0x122   : > { %13748 = vst [vmem:[#allocation83_spill] sm:$0xff] %v9062_v22  ;;  %1506 = vrot.lane.b32.xlu1 %v1361_v48, %s13709_s1  ;;  %v9081_v4 = vadd.f32 %v3704_v61, %v3670_v17  ;;  %v1252_v58 = vmul.f32 %v8666_v57, %v8949_v44  ;;  %v1253_v8 = vmul.f32 %v8666_v57, %v8935_v13 }
 0x123   : > { %13749 = vst [vmem:[#allocation84_spill] sm:$0xff] %v9064_v35  ;;  %v9073_v2 = vpop.permute.xlu1 %1142  ;;  %v9093_v48 = vadd.f32 %v1168_v59, %v1087_v24  ;;  %v1356_v9 = vsub.f32 %v9075_v12, %v8811_v10  ;;  %v1193_v39 = vmul.f32 %v8572_v42, %v8520_v19  ;;  %v3607_v24 = vmul.f32 %v8649_v16, %v8694_v6  ;;  %v13783_v16 = vld [vmem:[#allocation40_spill] sm:$0xff] }
 0x124   : > { %13750 = vst [vmem:[#allocation85_spill] sm:$0xff] %v9071_v45  ;;  %v1167_v49 = vmul.f32 %v8580_v47, %v9073_v2  ;;  %v1978_v40 = vmul.f32 %v8670_v60, %v9073_v2  ;;  %v2848_v15 = vmul.f32 %v8679_v11, %v9073_v2  ;;  %v3642_v59 = vmul.f32 %v8655_v37, %v8941_v3  ;;  %v13784_v11 = vld [vmem:[#allocation42_spill] sm:$0xff] }
 0x125   : > { %13751 = vst [vmem:[#allocation86_spill] sm:$0xff] %v9081_v4  ;;  %v9121_v17 = vadd.f32 %v1252_v58, %v1235_v0  ;;  %v9123_v61 = vadd.f32 %v1253_v8, %v1236_v55  ;;  %v1226_v62 = vadd.f32 %v1210_v54, %v1193_v39  ;;  %v13759_v58 = vld [vmem:[#allocation11_spill] sm:$0xff]  ;;  %v13760_v8 = vld [vmem:[#allocation9_spill] sm:$0xff]  ;;  %v3706_v35 = vmul.f32 %v8705_v53, %v9073_v2 }
 0x126   : > { %13752 = vst [vmem:[#allocation87_spill] sm:$0xff] %v9093_v48  ;;  %v9095_v14 = vadd.f32 %v1167_v49, %v1086_v29  ;;  %v9098_v47 = vadd.f32 %v1978_v40, %v8871_v52  ;;  %v9101_v34 = vadd.f32 %v2848_v15, %v8875_v51  ;;  %v3641_v52 = vmul.f32 %v8653_v20, %v8941_v3  ;;  %v13774_v20 = vld [vmem:[#allocation17_spill] sm:$0xff] }
 0x127   : > { %v3608_v51 = vmul.f32 %v8651_v18, %v8694_v6  ;;  %v3707_v29 = vmul.f32 %v8698_v23, %v8949_v44  ;;  %v3708_v40 = vmul.f32 %v8705_v53, %v8949_v44  ;;  %v1215_v6 = vmul.f32 %v8574_v43, %v8611_v63  ;;  %v13772_v18 = vld [vmem:[#allocation79_spill] sm:$0xff] }
 0x128   : > { %13753 = vst [vmem:[#allocation88_spill] sm:$0xff] %v9095_v14  ;;  %1314 = vrot.lane.b32.xlu0 %v9093_v48, %s13709_s1  ;;  %1312 = vrot.lane.b32.xlu2 %v9095_v14, %s13709_s1  ;;  %v3673_v46 = vadd.f32 %v3641_v52, %v3607_v24  ;;  %v9132_v15 = vadd.f32 %v1243_v31, %v1226_v62  ;;  %v13761_v52 = vld [vmem:[#allocation21_spill] sm:$0xff] }
 0x129   : > { %13754 = vst [vmem:[#allocation89_spill] sm:$0xff] %v9098_v47  ;;  %v3674_v49 = vadd.f32 %v3642_v59, %v3608_v51  ;;  %v1201_v3 = vmul.f32 %v8572_v42, %v8839_v28  ;;  %v1188_v55 = vmul.f32 %v8572_v42, %v13759_v58  ;;  %v1218_v44 = vmul.f32 %v8574_v43, %v8627_v7 }
 0x12a   : > { %13755 = vst [vmem:[#allocation90_spill] sm:$0xff] %v9101_v34  ;;  %1496 = vrot.lane.b32.xlu1 %v1356_v9, %s13709_s1  ;;  %v9136_v0 = vadd.f32 %v3707_v29, %v3673_v46  ;;  %v1205_v9 = vmul.f32 %v8574_v43, %v13760_v8  ;;  %v1198_v63 = vmul.f32 %v8572_v42, %v8597_v56  ;;  %v13762_v56 = vld [vmem:[#allocation27_spill] sm:$0xff] }
 0x12b   : > { %v9138_v54 = vadd.f32 %v3708_v40, %v3674_v49  ;;  %v1364_v39 = vsub.f32 %v9121_v17, %v9093_v48  ;;  %v1365_v28 = vsub.f32 %v9123_v61, %v8961_v5  ;;  %v1251_v31 = vmul.f32 %v8666_v57, %v9073_v2  ;;  %v13785_v48 = vld [vmem:[#allocation43_spill] sm:$0xff] }
 0x12c   : > { %13757 = vst [vmem:[#allocation91_spill] sm:$0xff] %v9136_v0  ;;  %v1248_v24 = vmul.f32 %v8666_v57, %v8727_v21  ;;  %v1238_v51 = vmul.f32 %v8666_v57, %v13761_v52  ;;  %v1355_v7 = vsub.f32 %v9132_v15, %v13762_v56  ;;  %v1234_v59 = vadd.f32 %v1218_v44, %v1201_v3 }
 0x12d   : > { %13758 = vst [vmem:[#allocation92_spill] sm:$0xff] %v9138_v54  ;;  %v1231_v62 = vadd.f32 %v1215_v6, %v1198_v63  ;;  %v1221_v46 = vadd.f32 %v1205_v9, %v1188_v55  ;;  %v1213_v40 = vmul.f32 %v8574_v43, %v8615_v1  ;;  %v1196_v6 = vmul.f32 %v8572_v42, %v8545_v30  ;;  %v13763_v55 = vld [vmem:[#allocation61_spill] sm:$0xff]  ;;  %v13767_v54 = vld [vmem:[#allocation7_spill] sm:$0xff] }
 0x12e   : > { %v9163_v29 = vadd.f32 %v1251_v31, %v1234_v59  ;;  %v1246_v44 = vmul.f32 %v8666_v57, %v8977_v25  ;;  %v1247_v63 = vmul.f32 %v8666_v57, %v8861_v50  ;;  %v13765_v59 = vld [vmem:[#allocation19_spill] sm:$0xff]  ;;  %v9217_v37 = vadd.f32 %v3706_v35, %v13772_v18  ;;  %v13781_v35 = vld [vmem:[#allocation38_spill] sm:$0xff] }
 0x12f   : > { %v9165_v49 = vadd.f32 %v1248_v24, %v1231_v62  ;;  %v9167_v21 = vadd.f32 %v1238_v51, %v1221_v46  ;;  %v1229_v31 = vadd.f32 %v1213_v40, %v1196_v6  ;;  %v1209_v62 = vmul.f32 %v8574_v43, %v13765_v59  ;;  %v13766_v46 = vld [vmem:[#allocation20_spill] sm:$0xff] }
 0x130   : > { %1512 = vrot.lane.b32.xlu2 %v1364_v39, %s13709_s1  ;;  %1514 = vrot.lane.b32.xlu0 %v1365_v28, %s13709_s1  ;;  %v1197_v39 = vmul.f32 %v8572_v42, %v8550_v32  ;;  %v1214_v28 = vmul.f32 %v8574_v43, %v8558_v36  ;;  %v1363_v3 = vsub.f32 %v9163_v29, %v9095_v14  ;;  %v13764_v32 = vld [vmem:[#allocation22_spill] sm:$0xff] }
 0x131   : > { %v1360_v9 = vsub.f32 %v9165_v49, %v13763_v55  ;;  %v1350_v36 = vsub.f32 %v9167_v21, %v13764_v32  ;;  %v1262_v51 = vadd.f32 %v1246_v44, %v1229_v31  ;;  %v1212_v50 = vmul.f32 %v8574_v43, %v13766_v46  ;;  %v13770_v44 = vld [vmem:[#allocation29_spill] sm:$0xff]  ;;  %13773 = vst [vmem:[#allocation79_spill] sm:$0xff] %v9217_v37 }
 0x132   : > { %1494 = vrot.lane.b32.xlu1 %v1355_v7, %s13709_s1  ;;  %v1230_v24 = vadd.f32 %v1214_v28, %v1197_v39  ;;  %v13769_v28 = vld [vmem:[#allocation49_spill] sm:$0xff]  ;;  %v1351_v5 = vsub.f32 %v13785_v48, %v13784_v11 }
 0x133   : > { %v1358_v40 = vsub.f32 %v1262_v51, %v8989_v26  ;;  %v1242_v6 = vmul.f32 %v8666_v57, %v13769_v28 }
 0x134   : > { %v9190_v7 = vadd.f32 %v1247_v63, %v1230_v24  ;;  %v1245_v63 = vmul.f32 %v8666_v57, %v13770_v44  ;;  %v3705_v24 = vmul.f32 %v8698_v23, %v9073_v2  ;;  %v13782_v23 = vld [vmem:[#allocation24_spill] sm:$0xff] }
 0x136   : > { %v1359_v39 = vsub.f32 %v9190_v7, %v8879_v41  ;;  %v9214_v45 = vadd.f32 %v3705_v24, %v9010_v38  ;;  %v13779_v38 = vld [vmem:[#allocation55_spill] sm:$0xff]  ;;  %v1241_v24 = vmul.f32 %v8666_v57, %v13781_v35 }
 0x138   : > { %1510 = vrot.lane.b32.xlu2 %v1363_v3, %s13709_s1  ;;  %1504 = vrot.lane.b32.xlu0 %v1360_v9, %s13709_s1  ;;  %v1192_v3 = vmul.f32 %v8572_v42, %v13767_v54  ;;  %v13768_v9 = vld [vmem:[#allocation15_spill] sm:$0xff]  ;;  %13771 = vst [vmem:[#allocation22_spill] sm:$0xff] %v9214_v45 }
 0x139   : > { %v1195_v0 = vmul.f32 %v8572_v42, %v13768_v9 }
 0x13a   : > { %1484 = vrot.lane.b32.xlu1 %v1350_v36, %s13709_s1  ;;  %v1225_v36 = vadd.f32 %v1209_v62, %v1192_v3  ;;  %v13776_v62 = vld [vmem:[#allocation12_spill] sm:$0xff]  ;;  %v13777_v3 = vld [vmem:[#allocation10_spill] sm:$0xff] }
 0x13b   : > { %v1228_v31 = vadd.f32 %v1212_v50, %v1195_v0  ;;  %v1208_v50 = vmul.f32 %v8574_v43, %v13776_v62  ;;  %v1190_v2 = vmul.f32 %v8572_v42, %v13777_v3 }
 0x13c   : > { %v1258_v22 = vadd.f32 %v1242_v6, %v1225_v36  ;;  %v13778_v6 = vld [vmem:[#allocation23_spill] sm:$0xff] }
 0x13d   : > { %v1261_v4 = vadd.f32 %v1245_v63, %v1228_v31  ;;  %v1240_v63 = vmul.f32 %v8666_v57, %v13778_v6  ;;  %v13780_v31 = vld [vmem:[#allocation51_spill] sm:$0xff]  ;;  %v1287_v57 = vpop.permute.xlu1 %1286 }
 0x13e   : > { %v1354_v18 = vsub.f32 %v1258_v22, %v13780_v31 }
 0x13f   : > { %v1357_v36 = vsub.f32 %v1261_v4, %v13779_v38 }
 0x140   : > { %1500 = vrot.lane.b32.xlu2 %v1358_v40, %s13709_s1  ;;  %1502 = vrot.lane.b32.xlu0 %v1359_v39, %s13709_s1  ;;  %v1207_v40 = vmul.f32 %v8574_v43, %v13774_v20  ;;  %v13775_v39 = vld [vmem:[#allocation13_spill] sm:$0xff] }
 0x141   : > { %v1191_v0 = vmul.f32 %v8572_v42, %v13775_v39 }
 0x142   : > { %v1223_v37 = vadd.f32 %v1207_v40, %v1190_v2  ;;  %v1289_v40 = vpop.permute.xlu2 %1288 }
 0x143   : > { %v1224_v45 = vadd.f32 %v1208_v50, %v1191_v0 }
 0x144   : > { %v1256_v43 = vadd.f32 %v1240_v63, %v1223_v37 }
 0x145   : > { %v1257_v53 = vadd.f32 %v1241_v24, %v1224_v45 }
 0x146   : > { %v1352_v42 = vsub.f32 %v1256_v43, %v13782_v23 }
 0x147   : > { %v1353_v34 = vsub.f32 %v1257_v53, %v13783_v16 }
 0x148   : > { %1498 = vrot.lane.b32.xlu2 %v1357_v36, %s13709_s1  ;;  %1492 = vrot.lane.b32.xlu0 %v1354_v18, %s13709_s1  ;;  %v1291_v36 = vpop.permute.xlu0 %1290 }
 0x149   : > { %v9254_v41 = vadd.f32 %v1291_v36, %v1256_v43 }
 0x14a   : > { %v1295_v0 = vpop.permute.xlu2 %1294 }
 0x14b   : > { %v1369_v36 = vsel %vm13528_vm0, %v9254_v41, inf }
 0x150   : > { %1488 = vrot.lane.b32.xlu2 %v1352_v42, %s13709_s1  ;;  %1490 = vrot.lane.b32.xlu0 %v1353_v34, %s13709_s1  ;;  %v1297_v45 = vpop.permute.xlu0 %1296  ;;  %v9242_v42 = vadd.f32 %v1295_v0, %v1258_v22  ;;  %v9245_v34 = vadd.f32 %v1287_v57, %v9167_v21  ;;  %v13786_v57 = vld [vmem:[#allocation82_spill] sm:$0xff] }
 0x151   : > { %v9257_v38 = vadd.f32 %v1297_v45, %v9132_v15 }
 0x152   : > { %v1301_v50 = vpop.permute.xlu2 %1300  ;;  %v1371_v21 = vsel %vm13528_vm0, %v9242_v42, inf }
 0x153   : > { %v9259_v10 = vadd.f32 %v1301_v50, %v1261_v4 }
 0x156   : > { %v1293_v2 = vpop.permute.xlu1 %1292 }
 0x157   : > { %v9247_v55 = vadd.f32 %v1293_v2, %v1257_v53  ;;  %v1367_v53 = vsel %vm13528_vm0, %v9245_v34, inf }
 0x158   : > { %1486 = vrot.lane.b32.xlu2 %v1351_v5, %s13709_s1 }
 0x159   : > { %v1370_v15 = vsel %vm13528_vm0, %v9247_v55, inf }
 0x15a   : > { %v1307_v24 = vpop.permute.xlu2 %1306 }
 0x15b   : > { %v1344_v50 = vadd.f32 %v1307_v24, %v9165_v49 }
 0x167   : > { %v1299_v37 = vpop.permute.xlu1 %1298 }
 0x168   : > { %v9250_v5 = vadd.f32 %v1299_v37, %v9075_v12  ;;  %v9269_v12 = vadd.f32 %v1289_v40, %v13785_v48  ;;  %v1372_v37 = vmin.f32 %v1367_v53, %v1371_v21  ;;  %v1373_v48 = vsel %vm13528_vm0, %v9257_v38, inf }
 0x169   : > { %v1377_v40 = vsel %vm13528_vm0, %v9259_v10, inf }
 0x16a   : > { %v1375_v4 = vsel %vm13528_vm0, %v9250_v5, inf  ;;  %v1368_v56 = vsel %vm13528_vm0, %v9269_v12, inf }
 0x16b   : > { %v1376_v21 = vmin.f32 %v1369_v36, %v1375_v4  ;;  %v1374_v24 = vmin.f32 %v1368_v56, %v1373_v48 }
 0x173   : > { %v1305_v63 = vpop.permute.xlu1 %1304 }
 0x174   : > { %v9276_v43 = vadd.f32 %v1305_v63, %v9190_v7 }
 0x176   : > { %v1381_v47 = vsel %vm13528_vm0, %v9276_v43, inf }
 0x17b   : > { %v1311_v14 = vpop.permute.xlu1 %1310 }
 0x183   : > { %v1317_v45 = vpop.permute.xlu1 %1316 }
 0x184   : > { %v1349_v49 = vadd.f32 %v1317_v45, %v9123_v61 }
 0x18a   : > { %v1303_v18 = vpop.permute.xlu0 %1302 }
 0x18b   : > { %v9252_v26 = vadd.f32 %v1303_v18, %v1262_v51  ;;  %v1313_v51 = vpop.permute.xlu2 %1312  ;;  %v13787_v18 = vld [vmem:[#allocation77_spill] sm:$0xff] }
 0x18c   : > { %v9291_v7 = vadd.f32 %v1313_v51, %v9163_v29  ;;  %v1383_v29 = vsel %vm13528_vm0, %v1344_v50, inf }
 0x18d   : > { %v1379_v2 = vsel %vm13528_vm0, %v9252_v26, inf }
 0x18e   : > { %v1380_v53 = vmin.f32 %v1372_v37, %v1379_v2  ;;  %v1382_v2 = vmin.f32 %v1374_v24, %v1381_v47  ;;  %v1384_v37 = vmin.f32 %v1376_v21, %v1383_v29  ;;  %v9308_v47 = vpop.permute.xlu1 %1508 }
 0x192   : > { %v1309_v22 = vpop.permute.xlu0 %1308 }
 0x193   : > { %v9264_v0 = vadd.f32 %v1309_v22, %v13786_v57  ;;  %v9288_v22 = vadd.f32 %v1311_v14, %v13787_v18  ;;  %v1378_v57 = vmin.f32 %v1370_v15, %v1377_v40  ;;  %v1389_v15 = vsel %vm13528_vm0, %v9291_v7, inf  ;;  %v1513_v30 = vpop.permute.xlu2 %1512 }
 0x194   : > { %v1393_v40 = vsel %vm13528_vm0, %v1349_v49, inf  ;;  %v1390_v56 = vmin.f32 %v1382_v2, %v1389_v15 }
 0x195   : > { %v1385_v63 = vsel %vm13528_vm0, %v9264_v0, inf  ;;  %v1387_v51 = vsel %vm13528_vm0, %v9288_v22, inf }
 0x196   : > { %v1386_v14 = vmin.f32 %v1378_v57, %v1385_v63  ;;  %v1388_v36 = vmin.f32 %v1380_v53, %v1387_v51 }
 0x198   : > { %v1394_v48 = vmin.f32 %v1386_v14, %v1393_v40  ;;  %v1395_v63 = vmin.f32 %v1388_v36, %v1390_v56 }
 0x19a   : > { %v1315_v18 = vpop.permute.xlu0 %1314 }
 0x19b   : > { %v1348_v4 = vadd.f32 %v1315_v18, %v9121_v17  ;;  %v9314_v24 = vpop.permute.xlu2 %1510 }
 0x19d   : > { %v1391_v61 = vsel %vm13528_vm0, %v1348_v4, inf }
 0x19e   : > { %v1392_v45 = vmin.f32 %v1384_v37, %v1391_v61 }
 0x1a0   : > { %v1396_v57 = vmin.f32 %v1392_v45, %v1394_v48 }
 0x1a2   : > { %v1397_v31 = vmin.f32 %v1395_v63, %v1396_v57  ;;  %v1515_v13 = vpop.permute.xlu0 %1514 }
 0x1a4   : > { %v1398_v25 = vrot.slane %v1397_v31, 4 }
 0x1a6   : > { %v1399_v1 = vmin.f32 %v1397_v31, %v1398_v25 }
 0x1a8   : > { %v1400_v23 = vrot.slane %v1399_v1, 2 }
 0x1aa   : > { %v1401_v33 = vmin.f32 %v1399_v1, %v1400_v23  ;;  %v9310_v21 = vpop.permute.xlu0 %1504 }
 0x1ac   : > { %v1402_v17 = vrot.slane %v1401_v33, 1 }
 0x1ae   : > { %v9312_v53 = vmin.f32 %v1401_v33, %v1402_v17  ;;  %v1507_v33 = vpop.permute.xlu1 %1506 }
 0x1b0   : > { %v1418_v14 = vsub.f32 %v1348_v4, %v9312_v53  ;;  %v1419_v18 = vsub.f32 %v1349_v49, %v9312_v53  ;;  %v1414_v29 = vsub.f32 %v1344_v50, %v9312_v53  ;;  %v1415_v25 = vsub.f32 %v9264_v0, %v9312_v53 }
 0x1b1   : > { %v1409_v1 = vsub.f32 %v9257_v38, %v9312_v53  ;;  %v1412_v49 = vsub.f32 %v9252_v26, %v9312_v53  ;;  %v1413_v50 = vsub.f32 %v9276_v43, %v9312_v53  ;;  %v1410_v0 = vsub.f32 %v9250_v5, %v9312_v53  ;;  %v1501_v26 = vpop.permute.xlu2 %1500 }
 0x1b2   : > { %v1434_v31 = vsub.f32 0.0, %v1418_v14  ;;  %v1435_v23 = vsub.f32 0.0, %v1419_v18  ;;  %v1430_v15 = vsub.f32 0.0, %v1414_v29  ;;  %v1431_v36 = vsub.f32 0.0, %v1415_v25  ;;  %v9327_v4 = vpop.permute.xlu0 %1502 }
 0x1b3   : > { %v1425_v37 = vsub.f32 0.0, %v1409_v1  ;;  %v1408_v38 = vsub.f32 %v9242_v42, %v9312_v53  ;;  %v1416_v61 = vsub.f32 %v9288_v22, %v9312_v53  ;;  %v1428_v48 = vsub.f32 0.0, %v1412_v49 }
 0x1b4   : > { %v1464_v51 = vmul.f32 1.442695, %v1434_v31  ;;  %v1466_v2 = vmul.f32 1.442695, %v1435_v23  ;;  %v1456_v40 = vmul.f32 1.442695, %v1430_v15  ;;  %v1406_v43 = vsub.f32 %v9254_v41, %v9312_v53 }
 0x1b5   : > { %v1458_v56 = vmul.f32 1.442695, %v1431_v36  ;;  %v1429_v45 = vsub.f32 0.0, %v1413_v50  ;;  %v1424_v63 = vsub.f32 0.0, %v1408_v38  ;;  %v1417_v57 = vsub.f32 %v9291_v7, %v9312_v53 }
 0x1b6   : > { %7954 = vpow2.f32 %v1464_v51  ;;  %v1446_v5 = vmul.f32 1.442695, %v1425_v37  ;;  %v1432_v17 = vsub.f32 0.0, %v1416_v61  ;;  %v1407_v42 = vsub.f32 %v9247_v55, %v9312_v53  ;;  %v9348_v51 = vpop.permute.xlu1 %1496 }
 0x1b7   : > { %7956 = vpow2.f32 %v1466_v2  ;;  %v1411_v22 = vsub.f32 %v9259_v10, %v9312_v53  ;;  %v1452_v18 = vmul.f32 1.442695, %v1428_v48  ;;  %v1433_v29 = vsub.f32 0.0, %v1417_v57 }
 0x1b8   : > { %7958 = vpow2.f32 %v1456_v40  ;;  %v1426_v25 = vsub.f32 0.0, %v1410_v0  ;;  %v1454_v41 = vmul.f32 1.442695, %v1429_v45  ;;  %v1422_v23 = vsub.f32 0.0, %v1406_v43 }
 0x1b9   : > { %7960 = vpow2.f32 %v1458_v56  ;;  %v1444_v7 = vmul.f32 1.442695, %v1424_v63  ;;  %v1460_v55 = vmul.f32 1.442695, %v1432_v17  ;;  %v1423_v15 = vsub.f32 0.0, %v1407_v42  ;;  %v1499_v56 = vpop.permute.xlu2 %1498 }
 0x1ba   : > { %7962 = vpow2.f32 %v1446_v5  ;;  %v1427_v2 = vsub.f32 0.0, %v1411_v22  ;;  %v1462_v36 = vmul.f32 1.442695, %v1433_v29  ;;  %v1448_v37 = vmul.f32 1.442695, %v1426_v25  ;;  %v1493_v49 = vpop.permute.xlu0 %1492 }
 0x1bb   : > { %7964 = vpow2.f32 %v1452_v18  ;;  %v1440_v0 = vmul.f32 1.442695, %v1422_v23  ;;  %v1404_v61 = vsub.f32 %v9245_v34, %v9312_v53  ;;  %v1405_v43 = vsub.f32 %v9269_v12, %v9312_v53 }
 0x1bc   : > { %v9341_v14 = vpop.eup %7954  ;;  %7966 = vpow2.f32 %v1454_v41  ;;  %v1450_v48 = vmul.f32 1.442695, %v1427_v2 }
 0x1bd   : > { %v1546_v31 = vmul.f32 %v9341_v14, %v1513_v30  ;;  %v9346_v1 = vpop.eup %7956  ;;  %7968 = vpow2.f32 %v1444_v7  ;;  %v1420_v5 = vsub.f32 0.0, %v1404_v61  ;;  %v1421_v12 = vsub.f32 0.0, %v1405_v43 }
 0x1be   : > { %v1547_v10 = vmul.f32 %v9346_v1, %v1515_v13  ;;  %v9351_v50 = vpop.eup %7958  ;;  %7970 = vpow2.f32 %v1460_v55  ;;  %v1442_v13 = vmul.f32 1.442695, %v1423_v15  ;;  %v1495_v22 = vpop.permute.xlu1 %1494 }
 0x1bf   : > { %v9353_v40 = vpop.eup %7960  ;;  %v1542_v38 = vmul.f32 %v9351_v50, %v9310_v21  ;;  %7972 = vpow2.f32 %v1462_v36  ;;  %v1436_v23 = vmul.f32 1.442695, %v1420_v5  ;;  %v1438_v15 = vmul.f32 1.442695, %v1421_v12 }
 0x1c0   : > { %v7873_v30 = vpack.i.bf16 %v1547_v10, %v1546_v31  ;;  %v1543_v45 = vmul.f32 %v9353_v40, %v1507_v33  ;;  %v9363_v63 = vpop.eup %7962  ;;  %7974 = vpow2.f32 %v1448_v37 }
 0x1c1   : > { %v9365_v57 = vpop.eup %7964  ;;  %7976 = vpow2.f32 %v1440_v0  ;;  %v1537_v29 = vmul.f32 %v9363_v63, %v1495_v22  ;;  %v1489_v37 = vpop.permute.xlu2 %1488 }
 0x1c2   : > { %7874 = vrot.lane.b32.xlu0 %v7873_v30, %s13709_s1  ;;  %v7883_v21 = vpack.i.bf16 %v1543_v45, %v1542_v38  ;;  %v9367_v34 = vpop.eup %7966  ;;  %v1540_v17 = vmul.f32 %v9365_v57, %v1501_v26  ;;  %7978 = vpow2.f32 %v1442_v13  ;;  %v1491_v7 = vpop.permute.xlu0 %1490 }
 0x1c3   : > { %v9370_v33 = vpop.eup %7968  ;;  %7980 = vpow2.f32 %v1450_v48  ;;  %v1541_v53 = vmul.f32 %v9367_v34, %v9327_v4 }
 0x1c4   : > { %7884 = vrot.lane.b32.xlu2 %v7883_v21, %s13709_s1  ;;  %v9375_v42 = vpop.eup %7970  ;;  %v1536_v26 = vmul.f32 %v9370_v33, %v1493_v49  ;;  %7982 = vpow2.f32 %v1436_v23 }
 0x1c5   : > { %v9377_v18 = vpop.eup %7972  ;;  %v7888_v25 = vpack.i.bf16 %v1541_v53, %v1540_v17  ;;  %v1544_v41 = vmul.f32 %v9375_v42, %v9308_v47  ;;  %7984 = vpow2.f32 %v1438_v15 }
 0x1c6   : > { %v9383_v31 = vpop.eup %7974  ;;  %v1545_v4 = vmul.f32 %v9377_v18, %v9314_v24  ;;  %v7898_v49 = vpack.i.bf16 %v1537_v29, %v1536_v26  ;;  %v1485_v45 = vpop.permute.xlu1 %1484 }
 0x1c7   : > { %v9387_v55 = vpop.eup %7976  ;;  %v1538_v30 = vmul.f32 %v9383_v31, %v9348_v51  ;;  %v9414_v51 = vld [vmem:[%s531_s19] sm:$0xff] }
 0x1c8   : > { %v9390_v2 = vpop.eup %7978  ;;  %v7878_v10 = vpack.i.bf16 %v1545_v4, %v1544_v41  ;;  %v1534_v24 = vmul.f32 %v9387_v55, %v1489_v37  ;;  %v9417_v53 = vperm.slane %v9414_v51, 0  ;;  %v9422_v26 = vperm.slane %v9414_v51, 1 }
 0x1c9   : > { %v9392_v36 = vpop.eup %7980  ;;  %v1535_v47 = vmul.f32 %v9390_v2, %v1491_v7  ;;  %v1487_v43 = vpop.permute.xlu2 %1486  ;;  %v9425_v41 = vperm.slane %v9414_v51, 2 }
 0x1ca   : > { %7889 = vrot.lane.b32.xlu0 %v7888_v25, %s13709_s1  ;;  %7879 = vrot.lane.b32.xlu1 %v7878_v10, %s13709_s1  ;;  %v1539_v0 = vmul.f32 %v9392_v36, %v1499_v56  ;;  %v9402_v61 = vpop.eup %7982  ;;  %v555_v56 = vlaneseq  ;;  %v9437_v10 = vperm.slane %v9414_v51, 3 }
 0x1cb   : > { %v7903_v38 = vpack.i.bf16 %v1535_v47, %v1534_v24  ;;  %v9404_v48 = vpop.eup %7984  ;;  %v1532_v21 = vmul.f32 %v9402_v61, %v1485_v45  ;;  %v9461_v24 = vperm.slane %v9414_v51, 5  ;;  %v9470_v45 = vperm.slane %v9414_v51, 6 }
 0x1cc   : > { %7899 = vrot.lane.b32.xlu2 %v7898_v49, %s13709_s1  ;;  %v7893_v13 = vpack.i.bf16 %v1539_v0, %v1538_v30  ;;  %v1533_v5 = vmul.f32 %v9404_v48, %v1487_v43  ;;  %v9419_v25 = vshrl.u32 %v555_v56, 7  ;;  %v9434_v15 = vand.u32 127, %v555_v56 }
 0x1ce   : > { %v7908_v17 = vpack.i.bf16 %v1533_v5, %v1532_v21  ;;  %v9432_v7 = vadd.s32 8, %v9419_v25  ;;  %vm574_vm2 = vcmp.eq.s32.totalorder %v9419_v25, %v9434_v15  ;;  %vm591_vm4 = vcmp.eq.s32.totalorder %v9419_v25, %v9417_v53 }
 0x1cf   : > { %vm607_vm6 = vmor %vm574_vm2, %vm591_vm4  ;;  %vm624_vm7 = vcmp.eq.s32.totalorder %v9419_v25, %v9422_v26  ;;  %vm657_vm10 = vcmp.eq.s32.totalorder %v9419_v25, %v9425_v41  ;;  %vm690_vm14 = vcmp.eq.s32.totalorder %v9419_v25, %v9437_v10 }
 0x1d0   : > { %vm575_vm3 = vcmp.eq.s32.totalorder %v9432_v7, %v9434_v15  ;;  %vm592_vm5 = vcmp.eq.s32.totalorder %v9432_v7, %v9417_v53  ;;  %vm625_vm8 = vcmp.eq.s32.totalorder %v9432_v7, %v9422_v26  ;;  %vm640_vm11 = vmor %vm607_vm6, %vm624_vm7  ;;  %vm658_vm12 = vcmp.eq.s32.totalorder %v9432_v7, %v9425_v41 }
 0x1d1   : > { %vm608_vm9 = vmor %vm575_vm3, %vm592_vm5  ;;  %vm691_vm2 = vcmp.eq.s32.totalorder %v9432_v7, %v9437_v10 }
 0x1d2   : > { %7904 = vrot.lane.b32.xlu0 %v7903_v38, %s13709_s1  ;;  %7894 = vrot.lane.b32.xlu1 %v7893_v13, %s13709_s1  ;;  %vm641_vm13 = vmor %vm608_vm9, %vm625_vm8  ;;  %vm756_vm9 = vcmp.eq.s32.totalorder %v9419_v25, %v9461_v24 }
 0x1d3   : > { %vm673_vm15 = vmor %vm640_vm11, %vm657_vm10  ;;  %vm757_vm11 = vcmp.eq.s32.totalorder %v9432_v7, %v9461_v24 }
 0x1d4   : > { %vm674_vm3 = vmor %vm641_vm13, %vm658_vm12  ;;  %vm789_vm13 = vcmp.eq.s32.totalorder %v9419_v25, %v9470_v45 }
 0x1d5   : > { %vm706_vm5 = vmor %vm673_vm15, %vm690_vm14  ;;  %vm790_vm15 = vcmp.eq.s32.totalorder %v9432_v7, %v9470_v45 }
 0x1d6   : > { %vm707_vm7 = vmor %vm674_vm3, %vm691_vm2 }
 0x1da   : > { %7909 = vrot.lane.b32.xlu1 %v7908_v17, %s13709_s1 }
 0x234   : > { %v7875_v12 = vpop.permute.xlu0 %7874 }
 0x235   : > { %v7877_v22 = vunpack.i.h.bf16 %v7875_v12  ;;  %v7876_v29 = vunpack.i.l.bf16 %v7875_v12 }
 0x237   : > { %v1627_v23 = vsel %vm13529_vm1, %v7876_v29, %v9341_v14  ;;  %v1628_v4 = vsel %vm13529_vm1, %v7877_v22, %v9346_v1  ;;  %v7885_v14 = vpop.permute.xlu2 %7884  ;;  %v9452_v1 = vperm.slane %v9414_v51, 4 }
 0x238   : > { %v1636_v37 = vpack.c.bf16 %v1628_v4, %v1627_v23  ;;  %v7887_v49 = vunpack.i.h.bf16 %v7885_v14  ;;  %v7886_v47 = vunpack.i.l.bf16 %v7885_v14 }
 0x239   : > { %vm723_vm4 = vcmp.eq.s32.totalorder %v9419_v25, %v9452_v1  ;;  %vm724_vm6 = vcmp.eq.s32.totalorder %v9432_v7, %v9452_v1 }
 0x23a   : > { %1637 = vmatpush.bf16.msra.mxu0 %v1636_v37  ;;  %v1623_v43 = vsel %vm13529_vm1, %v7886_v47, %v9351_v50  ;;  %v1624_v21 = vsel %vm13529_vm1, %v7887_v49, %v9353_v40  ;;  %vm739_vm8 = vmor %vm706_vm5, %vm723_vm4  ;;  %v9485_v50 = vadd.s32 16, %v9419_v25  ;;  %v9488_v40 = vadd.s32 24, %v9419_v25 }
 0x23b   : > { %vm740_vm10 = vmor %vm707_vm7, %vm724_vm6 }
 0x23c   : > { %v7880_v30 = vpop.permute.xlu1 %7879  ;;  %v7890_v0 = vpop.permute.xlu0 %7889  ;;  %vm772_vm12 = vmor %vm739_vm8, %vm756_vm9  ;;  %vm576_vm2 = vcmp.eq.s32.totalorder %v9485_v50, %v9434_v15  ;;  %vm593_vm3 = vcmp.eq.s32.totalorder %v9485_v50, %v9417_v53  ;;  %vm577_vm5 = vcmp.eq.s32.totalorder %v9488_v40, %v9434_v15  ;;  %vm594_vm6 = vcmp.eq.s32.totalorder %v9488_v40, %v9417_v53 }
 0x23d   : > { %v7882_v38 = vunpack.i.h.bf16 %v7880_v30  ;;  %v7881_v13 = vunpack.i.l.bf16 %v7880_v30  ;;  %v7892_v5 = vunpack.i.h.bf16 %v7890_v0  ;;  %v7891_v12 = vunpack.i.l.bf16 %v7890_v0  ;;  %vm773_vm14 = vmor %vm740_vm10, %vm757_vm11 }
 0x23e   : > { %vm9505_vm4 = vmor %vm772_vm12, %vm789_vm13  ;;  %vm626_vm8 = vcmp.eq.s32.totalorder %v9485_v50, %v9422_v26  ;;  %vm627_vm10 = vcmp.eq.s32.totalorder %v9488_v40, %v9422_v26  ;;  %vm659_vm13 = vcmp.eq.s32.totalorder %v9485_v50, %v9425_v41  ;;  %vm693_vm0 = vcmp.eq.s32.totalorder %v9488_v40, %v9437_v10 }
 0x23f   : > { %v1625_v17 = vsel %vm13529_vm1, %v7881_v13, %v9375_v42  ;;  %v1626_v56 = vsel %vm13529_vm1, %v7882_v38, %v9377_v18  ;;  %v9493_v42 = vperm.slane %v9414_v51, 7  ;;  %v1634_v18 = vpack.c.bf16 %v1624_v21, %v1623_v43  ;;  %v7900_v51 = vpop.permute.xlu2 %7899  ;;  %vm9513_vm7 = vmor %vm773_vm14, %vm790_vm15 }
 0x240   : > { %v1635_v22 = vpack.c.bf16 %v1626_v56, %v1625_v17  ;;  %v1621_v23 = vsel %vm13529_vm1, %v7891_v12, %v9365_v57  ;;  %v1622_v4 = vsel %vm13529_vm1, %v7892_v5, %v9367_v34  ;;  %vm609_vm9 = vmor %vm576_vm2, %vm593_vm3  ;;  %v7902_v34 = vunpack.i.h.bf16 %v7900_v51 }
 0x241   : > { %v1633_v47 = vpack.c.bf16 %v1622_v4, %v1621_v23  ;;  %vm822_vm11 = vcmp.eq.s32.totalorder %v9419_v25, %v9493_v42  ;;  %vm610_vm12 = vmor %vm577_vm5, %vm594_vm6  ;;  %v7901_v30 = vunpack.i.l.bf16 %v7900_v51  ;;  %vm660_vm15 = vcmp.eq.s32.totalorder %v9488_v40, %v9425_v41 }
 0x242   : > { %1638 = vmatpush.bf16.msra.mxu0 %v1635_v22  ;;  %vm642_vm14 = vmor %vm609_vm9, %vm626_vm8  ;;  %vm692_vm3 = vcmp.eq.s32.totalorder %v9485_v50, %v9437_v10  ;;  %vm725_vm9 = vcmp.eq.s32.totalorder %v9485_v50, %v9452_v1  ;;  %v1618_v17 = vsel %vm13529_vm1, %v7902_v34, %v9363_v63  ;;  %v9558_v63 = vadd.s32 32, %v9419_v25 }
 0x243   : > { %vm643_vm2 = vmor %vm610_vm12, %vm627_vm10  ;;  %v1617_v5 = vsel %vm13529_vm1, %v7901_v30, %v9370_v33  ;;  %vm726_vm10 = vcmp.eq.s32.totalorder %v9488_v40, %v9452_v1  ;;  %v570_v34 = vadd.s32 112, %v9419_v25 }
 0x244   : > { %v7895_v29 = vpop.permute.xlu1 %7894  ;;  %v7905_v0 = vpop.permute.xlu0 %7904  ;;  %vm9535_vm5 = vmor %vm9505_vm4, %vm822_vm11  ;;  %vm823_vm11 = vcmp.eq.s32.totalorder %v9432_v7, %v9493_v42  ;;  %v1631_v12 = vpack.c.bf16 %v1618_v17, %v1617_v5 }
 0x245   : > { %v7897_v37 = vunpack.i.h.bf16 %v7895_v29  ;;  %v7896_v14 = vunpack.i.l.bf16 %v7895_v29  ;;  %vm675_vm6 = vmor %vm642_vm14, %vm659_vm13  ;;  %v7907_v21 = vunpack.i.h.bf16 %v7905_v0  ;;  %vm758_vm14 = vcmp.eq.s32.totalorder %v9485_v50, %v9461_v24 }
 0x246   : > { %1639 = vmatpush.bf16.msra.mxu0 %v1634_v18  ;;  %vm676_vm8 = vmor %vm643_vm2, %vm660_vm15  ;;  %vm759_vm2 = vcmp.eq.s32.totalorder %v9488_v40, %v9461_v24 }
 0x247   : > { %v1619_v38 = vsel %vm13529_vm1, %v7896_v14, %v9383_v31  ;;  %v1620_v13 = vsel %vm13529_vm1, %v7897_v37, %v9392_v36  ;;  %v7906_v31 = vunpack.i.l.bf16 %v7905_v0  ;;  %vm708_vm4 = vmor %vm675_vm6, %vm692_vm3  ;;  %v1616_v7 = vsel %vm13529_vm1, %v7907_v21, %v9390_v2 }
 0x248   : > { %v1632_v36 = vpack.c.bf16 %v1620_v13, %v1619_v38  ;;  %vm709_vm12 = vmor %vm676_vm8, %vm693_vm0  ;;  %vm791_vm6 = vcmp.eq.s32.totalorder %v9485_v50, %v9470_v45  ;;  %v8347_v37 = vmov 0.0  }
 0x249   : > { %vm741_vm13 = vmor %vm708_vm4, %vm725_vm9  ;;  %v1615_v33 = vsel %vm13529_vm1, %v7906_v31, %v9387_v55  ;;  %v9569_v55 = vadd.s32 40, %v9419_v25  ;;  %vm792_vm9 = vcmp.eq.s32.totalorder %v9488_v40, %v9470_v45  ;;  %vm578_vm4 = vcmp.eq.s32.totalorder %v9558_v63, %v9434_v15 }
 0x24a   : > { %1640 = vmatpush.bf16.msra.mxu0 %v1633_v47  ;;  %vm742_vm15 = vmor %vm709_vm12, %vm726_vm10  ;;  %v1630_v23 = vpack.c.bf16 %v1616_v7, %v1615_v33  ;;  %v6665_v14 = vsel %vm9535_vm5, 1.0, %v8347_v37  ;;  %v9640_v47 = vadd.s32 56, %v9419_v25  ;;  %v9698_v31 = vadd.s32 64, %v9419_v25 }
 0x24b   : > { %vm9564_vm0 = vmor %vm9513_vm7, %vm823_vm11  ;;  %vm595_vm7 = vcmp.eq.s32.totalorder %v9558_v63, %v9417_v53  ;;  %vm579_vm11 = vcmp.eq.s32.totalorder %v9569_v55, %v9434_v15  ;;  %vm596_vm12 = vcmp.eq.s32.totalorder %v9569_v55, %v9417_v53 }
 0x24c   : > { %v7910_v56 = vpop.permute.xlu1 %7909  ;;  %vm774_vm3 = vmor %vm741_vm13, %vm758_vm14  ;;  %vm628_vm14 = vcmp.eq.s32.totalorder %v9558_v63, %v9422_v26 }
 0x24d   : > { %v7912_v22 = vunpack.i.h.bf16 %v7910_v56  ;;  %v7911_v18 = vunpack.i.l.bf16 %v7910_v56  ;;  %vm775_vm8 = vmor %vm742_vm15, %vm759_vm2  ;;  %vm629_vm2 = vcmp.eq.s32.totalorder %v9569_v55, %v9422_v26 }
 0x24e   : > { %1641 = vmatpush.bf16.msra.mxu0 %v1632_v36  ;;  %vm9583_vm10 = vmor %vm774_vm3, %vm791_vm6  ;;  %vm824_vm3 = vcmp.eq.s32.totalorder %v9485_v50, %v9493_v42  ;;  %vm661_vm6 = vcmp.eq.s32.totalorder %v9558_v63, %v9425_v41  ;;  %v9635_v50 = vadd.s32 48, %v9419_v25  ;;  %v9703_v36 = vadd.s32 72, %v9419_v25 }
 0x24f   : > { %v1613_v2 = vsel %vm13529_vm1, %v7911_v18, %v9402_v61  ;;  %v1614_v4 = vsel %vm13529_vm1, %v7912_v22, %v9404_v48  ;;  %v6666_v61 = vsel %vm9564_vm0, 1.0, %v8347_v37  ;;  %vm9597_vm13 = vmor %vm775_vm8, %vm792_vm9  ;;  %vm662_vm8 = vcmp.eq.s32.totalorder %v9569_v55, %v9425_v41 }
 0x250   : > { %vm611_vm15 = vmor %vm578_vm4, %vm595_vm7  ;;  %v1629_v49 = vpack.c.bf16 %v1614_v4, %v1613_v2  ;;  %v9609_v57 = vpack.c.bf16 %v6666_v61, %v6665_v14  ;;  %vm694_vm4 = vcmp.eq.s32.totalorder %v9558_v63, %v9437_v10  ;;  %v9766_v22 = vadd.s32 88, %v9419_v25 }
 0x251   : > { %vm612_vm5 = vmor %vm579_vm11, %vm596_vm12  ;;  %vm695_vm12 = vcmp.eq.s32.totalorder %v9569_v55, %v9437_v10  ;;  %v9826_v2 = vadd.s32 96, %v9419_v25  ;;  %v9829_v4 = vadd.s32 104, %v9419_v25 }
 0x252   : > { %1642 = vmatpush.bf16.msra.mxu0 %v1631_v12  ;;  %13801 = vst [vmem:[#allocation40_spill] sm:$0xff] %v9609_v57  ;;  %vm644_vm0 = vmor %vm611_vm15, %vm628_vm14  ;;  %vm727_vm14 = vcmp.eq.s32.totalorder %v9558_v63, %v9452_v1 }
 0x253   : > { %vm645_vm9 = vmor %vm612_vm5, %vm629_vm2  ;;  %vm728_vm2 = vcmp.eq.s32.totalorder %v9569_v55, %v9452_v1 }
 0x254   : > { %vm9617_vm7 = vmor %vm9583_vm10, %vm824_vm3  ;;  %vm825_vm10 = vcmp.eq.s32.totalorder %v9488_v40, %v9493_v42 }
 0x255   : > { %vm677_vm11 = vmor %vm644_vm0, %vm661_vm6  ;;  %vm760_vm6 = vcmp.eq.s32.totalorder %v9558_v63, %v9461_v24  ;;  %v6667_v30 = vsel %vm9617_vm7, 1.0, %v8347_v37 }
 0x256   : > { %1643 = vmatpush.bf16.msra.mxu0 %v1630_v23  ;;  %vm678_vm1 = vmor %vm645_vm9, %vm662_vm8  ;;  %vm761_vm8 = vcmp.eq.s32.totalorder %v9569_v55, %v9461_v24 }
 0x257   : > { %vm710_vm15 = vmor %vm677_vm11, %vm694_vm4 }
 0x258   : > { %vm711_vm3 = vmor %vm678_vm1, %vm695_vm12  ;;  %vm793_vm1 = vcmp.eq.s32.totalorder %v9558_v63, %v9470_v45  ;;  %vm794_vm12 = vcmp.eq.s32.totalorder %v9569_v55, %v9470_v45 }
 0x259   : > { %vm743_vm5 = vmor %vm710_vm15, %vm727_vm14  ;;  %vm580_vm14 = vcmp.eq.s32.totalorder %v9635_v50, %v9434_v15  ;;  %vm597_vm15 = vcmp.eq.s32.totalorder %v9635_v50, %v9417_v53 }
 0x25a   : > { %1644 = vmatpush.bf16.msra.mxu0 %v1629_v49  ;;  %vm744_vm0 = vmor %vm711_vm3, %vm728_vm2 }
 0x25b   : > { %vm841_vm9 = vmor %vm9597_vm13, %vm825_vm10  ;;  %vm581_vm13 = vcmp.eq.s32.totalorder %v9640_v47, %v9434_v15  ;;  %vm598_vm10 = vcmp.eq.s32.totalorder %v9640_v47, %v9417_v53 }
 0x25c   : > { %vm776_vm4 = vmor %vm743_vm5, %vm760_vm6  ;;  %v6668_v0 = vsel %vm841_vm9, 1.0, %v8347_v37  ;;  %vm630_vm5 = vcmp.eq.s32.totalorder %v9635_v50, %v9422_v26  ;;  %vm664_vm9 = vcmp.eq.s32.totalorder %v9640_v47, %v9425_v41 }
 0x25d   : > { %1645 = vmatmul.bf16.vlgmr.msra.gmra.mxu0 %v9609_v57  ;;  %vm777_vm11 = vmor %vm744_vm0, %vm761_vm8  ;;  %vm631_vm0 = vcmp.eq.s32.totalorder %v9640_v47, %v9422_v26  ;;  %v9672_v13 = vpack.c.bf16 %v6668_v0, %v6667_v30 }
 0x25e   : > { %vm9650_vm2 = vmor %vm776_vm4, %vm793_vm1  ;;  %vm663_vm4 = vcmp.eq.s32.totalorder %v9635_v50, %v9425_v41 }
 0x25f   : > { %vm9662_vm3 = vmor %vm777_vm11, %vm794_vm12  ;;  %13808 = vst [vmem:[#allocation42_spill] sm:$0xff] %v9672_v13  ;;  %vm696_vm11 = vcmp.eq.s32.totalorder %v9635_v50, %v9437_v10  ;;  %vm826_vm12 = vcmp.eq.s32.totalorder %v9558_v63, %v9493_v42  ;;  %v9763_v63 = vadd.s32 80, %v9419_v25 }
 0x260   : > { %vm613_vm6 = vmor %vm580_vm14, %vm597_vm15 }
 0x261   : > { %vm614_vm8 = vmor %vm581_vm13, %vm598_vm10  ;;  %vm697_vm13 = vcmp.eq.s32.totalorder %v9640_v47, %v9437_v10 }
 0x262   : > { %vm646_vm7 = vmor %vm613_vm6, %vm630_vm5  ;;  %vm729_vm5 = vcmp.eq.s32.totalorder %v9635_v50, %v9452_v1  ;;  %vm827_vm6 = vcmp.eq.s32.totalorder %v9569_v55, %v9493_v42 }
 0x263   : > { %vm647_vm1 = vmor %vm614_vm8, %vm631_vm0 }
 0x264   : > { %vm679_vm14 = vmor %vm646_vm7, %vm663_vm4  ;;  %vm730_vm4 = vcmp.eq.s32.totalorder %v9640_v47, %v9452_v1 }
 0x265   : > { %vm680_vm15 = vmor %vm647_vm1, %vm664_vm9  ;;  %vm762_vm9 = vcmp.eq.s32.totalorder %v9635_v50, %v9461_v24 }
 0x266   : > { %vm712_vm10 = vmor %vm679_vm14, %vm696_vm11  ;;  %vm763_vm11 = vcmp.eq.s32.totalorder %v9640_v47, %v9461_v24  ;;  %vm795_vm14 = vcmp.eq.s32.totalorder %v9635_v50, %v9470_v45 }
 0x267   : > { %vm9689_vm0 = vmor %vm9650_vm2, %vm826_vm12 }
 0x268   : > { %vm713_vm8 = vmor %vm680_vm15, %vm697_vm13  ;;  %vm582_vm15 = vcmp.eq.s32.totalorder %v9698_v31, %v9434_v15  ;;  %vm599_vm13 = vcmp.eq.s32.totalorder %v9698_v31, %v9417_v53  ;;  %v6669_v5 = vsel %vm9689_vm0, 1.0, %v8347_v37 }
 0x269   : > { %vm745_vm7 = vmor %vm712_vm10, %vm729_vm5  ;;  %vm600_vm5 = vcmp.eq.s32.totalorder %v9703_v36, %v9417_v53 }
 0x26a   : > { %vm843_vm1 = vmor %vm9662_vm3, %vm827_vm6  ;;  %vm583_vm3 = vcmp.eq.s32.totalorder %v9703_v36, %v9434_v15 }
 0x26b   : > { %vm746_vm2 = vmor %vm713_vm8, %vm730_vm4  ;;  %v6670_v17 = vsel %vm843_vm1, 1.0, %v8347_v37  ;;  %vm632_vm8 = vcmp.eq.s32.totalorder %v9698_v31, %v9422_v26  ;;  %vm665_vm1 = vcmp.eq.s32.totalorder %v9698_v31, %v9425_v41 }
 0x26c   : > { %vm778_vm12 = vmor %vm745_vm7, %vm762_vm9  ;;  %vm633_vm7 = vcmp.eq.s32.totalorder %v9703_v36, %v9422_v26  ;;  %vm796_vm9 = vcmp.eq.s32.totalorder %v9640_v47, %v9470_v45  ;;  %v9735_v12 = vpack.c.bf16 %v6670_v17, %v6669_v5 }
 0x26d   : > { %1650 = vmatmul.bf16.gmra.mxu0 %v9672_v13  ;;  %vm9713_vm10 = vmor %vm746_vm2, %vm763_vm11 }
 0x26e   : > { %vm9725_vm6 = vmor %vm778_vm12, %vm795_vm14  ;;  %13815 = vst [vmem:[#allocation43_spill] sm:$0xff] %v9735_v12  ;;  %vm666_vm12 = vcmp.eq.s32.totalorder %v9703_v36, %v9425_v41 }
 0x26f   : > { %vm615_vm4 = vmor %vm582_vm15, %vm599_vm13  ;;  %vm828_vm15 = vcmp.eq.s32.totalorder %v9635_v50, %v9493_v42  ;;  %v571_v50 = vadd.s32 120, %v9419_v25 }
 0x270   : > { %vm616_vm2 = vmor %vm583_vm3, %vm600_vm5  ;;  %vm698_vm3 = vcmp.eq.s32.totalorder %v9698_v31, %v9437_v10 }
 0x271   : > { %vm648_vm0 = vmor %vm615_vm4, %vm632_vm8  ;;  %vm699_vm8 = vcmp.eq.s32.totalorder %v9703_v36, %v9437_v10  ;;  %vm829_vm4 = vcmp.eq.s32.totalorder %v9640_v47, %v9493_v42 }
 0x272   : > { %vm649_vm11 = vmor %vm616_vm2, %vm633_vm7 }
 0x273   : > { %vm812_vm14 = vmor %vm9713_vm10, %vm796_vm9  ;;  %vm731_vm9 = vcmp.eq.s32.totalorder %v9698_v31, %v9452_v1 }
 0x274   : > { %vm681_vm13 = vmor %vm648_vm0, %vm665_vm1  ;;  %vm732_vm0 = vcmp.eq.s32.totalorder %v9703_v36, %v9452_v1 }
 0x275   : > { %vm682_vm5 = vmor %vm649_vm11, %vm666_vm12 }
 0x276   : > { %vm9754_vm7 = vmor %vm9725_vm6, %vm828_vm15  ;;  %vm764_vm6 = vcmp.eq.s32.totalorder %v9698_v31, %v9461_v24  ;;  %vm765_vm15 = vcmp.eq.s32.totalorder %v9703_v36, %v9461_v24 }
 0x277   : > { %vm714_vm10 = vmor %vm681_vm13, %vm698_vm3  ;;  %vm584_vm13 = vcmp.eq.s32.totalorder %v9763_v63, %v9434_v15  ;;  %vm601_vm3 = vcmp.eq.s32.totalorder %v9763_v63, %v9417_v53  ;;  %v6671_v7 = vsel %vm9754_vm7, 1.0, %v8347_v37 }
 0x278   : > { %vm715_vm2 = vmor %vm682_vm5, %vm699_vm8  ;;  %vm602_vm8 = vcmp.eq.s32.totalorder %v9766_v22, %v9417_v53 }
 0x279   : > { %vm845_vm1 = vmor %vm812_vm14, %vm829_vm4  ;;  %vm585_vm14 = vcmp.eq.s32.totalorder %v9766_v22, %v9434_v15 }
 0x27a   : > { %vm747_vm11 = vmor %vm714_vm10, %vm731_vm9  ;;  %v6672_v29 = vsel %vm845_vm1, 1.0, %v8347_v37  ;;  %vm634_vm10 = vcmp.eq.s32.totalorder %v9763_v63, %v9422_v26  ;;  %vm797_vm9 = vcmp.eq.s32.totalorder %v9698_v31, %v9470_v45  ;;  %vm667_vm1 = vcmp.eq.s32.totalorder %v9763_v63, %v9425_v41 }
 0x27b   : > { %vm748_vm12 = vmor %vm715_vm2, %vm732_vm0  ;;  %v9798_v23 = vpack.c.bf16 %v6672_v29, %v6671_v7 }
 0x27c   : > { %vm9776_vm5 = vmor %vm747_vm11, %vm764_vm6  ;;  %vm635_vm11 = vcmp.eq.s32.totalorder %v9766_v22, %v9422_v26  ;;  %vm798_vm6 = vcmp.eq.s32.totalorder %v9703_v36, %v9470_v45 }
 0x27d   : > { %1655 = vmatmul.bf16.gmra.mxu0 %v9735_v12  ;;  %vm9788_vm4 = vmor %vm748_vm12, %vm765_vm15  ;;  %13822 = vst [vmem:[#allocation82_spill] sm:$0xff] %v9798_v23 }
 0x27e   : > { %vm617_vm2 = vmor %vm584_vm13, %vm601_vm3  ;;  %vm668_vm13 = vcmp.eq.s32.totalorder %v9766_v22, %v9425_v41 }
 0x27f   : > { %vm618_vm0 = vmor %vm585_vm14, %vm602_vm8  ;;  %vm700_vm14 = vcmp.eq.s32.totalorder %v9763_v63, %v9437_v10 }
 0x280   : > { %vm650_vm7 = vmor %vm617_vm2, %vm634_vm10  ;;  %vm830_vm10 = vcmp.eq.s32.totalorder %v9698_v31, %v9493_v42 }
 0x281   : > { %vm813_vm12 = vmor %vm9776_vm5, %vm797_vm9  ;;  %vm701_vm5 = vcmp.eq.s32.totalorder %v9766_v22, %v9437_v10 }
 0x282   : > { %vm651_vm15 = vmor %vm618_vm0, %vm635_vm11  ;;  %vm733_vm0 = vcmp.eq.s32.totalorder %v9763_v63, %v9452_v1  ;;  %vm831_vm11 = vcmp.eq.s32.totalorder %v9703_v36, %v9493_v42 }
 0x283   : > { %vm683_vm3 = vmor %vm650_vm7, %vm667_vm1 }
 0x284   : > { %vm814_vm8 = vmor %vm9788_vm4, %vm798_vm6  ;;  %vm734_vm4 = vcmp.eq.s32.totalorder %v9766_v22, %v9452_v1 }
 0x285   : > { %vm684_vm2 = vmor %vm651_vm15, %vm668_vm13  ;;  %vm766_vm13 = vcmp.eq.s32.totalorder %v9763_v63, %v9461_v24 }
 0x286   : > { %vm716_vm9 = vmor %vm683_vm3, %vm700_vm14  ;;  %vm767_vm14 = vcmp.eq.s32.totalorder %v9766_v22, %v9461_v24 }
 0x287   : > { %vm846_vm7 = vmor %vm813_vm12, %vm830_vm10  ;;  %vm799_vm10 = vcmp.eq.s32.totalorder %v9763_v63, %v9470_v45 }
 0x288   : > { %vm717_vm1 = vmor %vm684_vm2, %vm701_vm5  ;;  %v6673_v51 = vsel %vm846_vm7, 1.0, %v8347_v37  ;;  %vm586_vm2 = vcmp.eq.s32.totalorder %v9826_v2, %v9434_v15 }
 0x289   : > { %vm749_vm6 = vmor %vm716_vm9, %vm733_vm0  ;;  %vm587_vm9 = vcmp.eq.s32.totalorder %v9829_v4, %v9434_v15  ;;  %vm604_vm0 = vcmp.eq.s32.totalorder %v9829_v4, %v9417_v53 }
 0x28a   : > { %vm847_vm15 = vmor %vm814_vm8, %vm831_vm11  ;;  %vm603_vm8 = vcmp.eq.s32.totalorder %v9826_v2, %v9417_v53  ;;  %vm800_vm11 = vcmp.eq.s32.totalorder %v9766_v22, %v9470_v45 }
 0x28b   : > { %vm750_vm3 = vmor %vm717_vm1, %vm734_vm4  ;;  %v6674_v14 = vsel %vm847_vm15, 1.0, %v8347_v37  ;;  %vm636_vm4 = vcmp.eq.s32.totalorder %v9826_v2, %v9422_v26 }
 0x28c   : > { %vm782_vm12 = vmor %vm749_vm6, %vm766_vm13  ;;  %v9847_v61 = vpack.c.bf16 %v6674_v14, %v6673_v51  ;;  %vm637_vm13 = vcmp.eq.s32.totalorder %v9829_v4, %v9422_v26 }
 0x28d   : > { %1660 = vmatmul.bf16.gmra.mxu0 %v9798_v23  ;;  %vm783_vm5 = vmor %vm750_vm3, %vm767_vm14  ;;  %vm832_vm3 = vcmp.eq.s32.totalorder %v9763_v63, %v9493_v42 }
 0x28e   : > { %vm815_vm1 = vmor %vm782_vm12, %vm799_vm10  ;;  %13823 = vst [vmem:[#allocation77_spill] sm:$0xff] %v9847_v61  ;;  %vm669_vm10 = vcmp.eq.s32.totalorder %v9826_v2, %v9425_v41 }
 0x28f   : > { %vm619_vm7 = vmor %vm586_vm2, %vm603_vm8  ;;  %vm670_vm2 = vcmp.eq.s32.totalorder %v9829_v4, %v9425_v41  ;;  %vm833_vm8 = vcmp.eq.s32.totalorder %v9766_v22, %v9493_v42 }
 0x290   : > { %vm620_vm6 = vmor %vm587_vm9, %vm604_vm0 }
 0x291   : > { %vm816_vm15 = vmor %vm783_vm5, %vm800_vm11  ;;  %vm702_vm5 = vcmp.eq.s32.totalorder %v9826_v2, %v9437_v10 }
 0x292   : > { %vm652_vm14 = vmor %vm619_vm7, %vm636_vm4  ;;  %vm703_vm7 = vcmp.eq.s32.totalorder %v9829_v4, %v9437_v10 }
 0x293   : > { %vm653_vm12 = vmor %vm620_vm6, %vm637_vm13  ;;  %vm735_vm13 = vcmp.eq.s32.totalorder %v9826_v2, %v9452_v1 }
 0x294   : > { %vm848_vm9 = vmor %vm815_vm1, %vm832_vm3  ;;  %vm736_vm3 = vcmp.eq.s32.totalorder %v9829_v4, %v9452_v1 }
 0x295   : > { %vm685_vm0 = vmor %vm652_vm14, %vm669_vm10  ;;  %vm768_vm14 = vcmp.eq.s32.totalorder %v9826_v2, %v9461_v24  ;;  %v6675_v48 = vsel %vm848_vm9, 1.0, %v8347_v37  ;;  %vm802_vm9 = vcmp.eq.s32.totalorder %v9829_v4, %v9470_v45 }
 0x296   : > { %vm686_vm11 = vmor %vm653_vm12, %vm670_vm2 }
 0x297   : > { %vm849_vm4 = vmor %vm816_vm15, %vm833_vm8  ;;  %vm769_vm15 = vcmp.eq.s32.totalorder %v9829_v4, %v9461_v24  ;;  %vm801_vm8 = vcmp.eq.s32.totalorder %v9826_v2, %v9470_v45 }
 0x298   : > { %vm718_vm6 = vmor %vm685_vm0, %vm702_vm5  ;;  %v6676_v49 = vsel %vm849_vm4, 1.0, %v8347_v37  ;;  %vm588_vm5 = vcmp.eq.s32.totalorder %v570_v34, %v9434_v15  ;;  %vm589_vm4 = vcmp.eq.s32.totalorder %v571_v50, %v9434_v15 }
 0x299   : > { %vm719_vm1 = vmor %vm686_vm11, %vm703_vm7  ;;  %v9880_v47 = vpack.c.bf16 %v6676_v49, %v6675_v48  ;;  %vm605_vm11 = vcmp.eq.s32.totalorder %v570_v34, %v9417_v53 }
 0x29a   : > { %vm751_vm10 = vmor %vm718_vm6, %vm735_vm13  ;;  %vm606_vm6 = vcmp.eq.s32.totalorder %v571_v50, %v9417_v53 }
 0x29b   : > { %vm752_vm12 = vmor %vm719_vm1, %vm736_vm3  ;;  %13824 = vst [vmem:[#allocation93_spill] sm:$0xff] %v9880_v47  ;;  %vm834_vm1 = vcmp.eq.s32.totalorder %v9826_v2, %v9493_v42 }
 0x29c   : > { %vm784_vm2 = vmor %vm751_vm10, %vm768_vm14  ;;  %vm638_vm10 = vcmp.eq.s32.totalorder %v570_v34, %v9422_v26 }
 0x29d   : > { %1665 = vmatmul.bf16.gmra.mxu0 %v9847_v61  ;;  %vm785_vm0 = vmor %vm752_vm12, %vm769_vm15  ;;  %vm639_vm12 = vcmp.eq.s32.totalorder %v571_v50, %v9422_v26  ;;  %vm835_vm15 = vcmp.eq.s32.totalorder %v9829_v4, %v9493_v42 }
 0x29e   : > { %vm817_vm7 = vmor %vm784_vm2, %vm801_vm8 }
 0x29f   : > { %vm818_vm13 = vmor %vm785_vm0, %vm802_vm9  ;;  %vm671_vm0 = vcmp.eq.s32.totalorder %v570_v34, %v9425_v41 }
 0x2a0   : > { %vm621_vm3 = vmor %vm588_vm5, %vm605_vm11  ;;  %vm672_vm5 = vcmp.eq.s32.totalorder %v571_v50, %v9425_v41 }
 0x2a1   : > { %vm622_vm14 = vmor %vm589_vm4, %vm606_vm6  ;;  %vm704_vm6 = vcmp.eq.s32.totalorder %v570_v34, %v9437_v10 }
 0x2a2   : > { %vm850_vm2 = vmor %vm817_vm7, %vm834_vm1  ;;  %vm705_vm7 = vcmp.eq.s32.totalorder %v571_v50, %v9437_v10 }
 0x2a3   : > { %vm654_vm8 = vmor %vm621_vm3, %vm638_vm10  ;;  %v6677_v53 = vsel %vm850_vm2, 1.0, %v8347_v37  ;;  %vm737_vm10 = vcmp.eq.s32.totalorder %v570_v34, %v9452_v1 }
 0x2a4   : > { %vm655_vm9 = vmor %vm622_vm14, %vm639_vm12  ;;  %vm738_vm14 = vcmp.eq.s32.totalorder %v571_v50, %v9452_v1 }
 0x2a5   : > { %vm851_vm11 = vmor %vm818_vm13, %vm835_vm15  ;;  %vm770_vm15 = vcmp.eq.s32.totalorder %v570_v34, %v9461_v24 }
 0x2a6   : > { %vm687_vm4 = vmor %vm654_vm8, %vm671_vm0  ;;  %v6678_v25 = vsel %vm851_vm11, 1.0, %v8347_v37  ;;  %vm771_vm0 = vcmp.eq.s32.totalorder %v571_v50, %v9461_v24  ;;  %vm804_vm11 = vcmp.eq.s32.totalorder %v571_v50, %v9470_v45 }
 0x2a7   : > { %vm688_vm1 = vmor %vm655_vm9, %vm672_vm5  ;;  %v9903_v26 = vpack.c.bf16 %v6678_v25, %v6677_v53  ;;  %vm803_vm5 = vcmp.eq.s32.totalorder %v570_v34, %v9470_v45 }
 0x2a8   : > { %vm720_vm3 = vmor %vm687_vm4, %vm704_vm6  ;;  %vm836_vm6 = vcmp.eq.s32.totalorder %v570_v34, %v9493_v42 }
 0x2a9   : > { %vm721_vm12 = vmor %vm688_vm1, %vm705_vm7  ;;  %13825 = vst [vmem:[#allocation94_spill] sm:$0xff] %v9903_v26  ;;  %vm837_vm7 = vcmp.eq.s32.totalorder %v571_v50, %v9493_v42 }
 0x2aa   : > { %vm753_vm13 = vmor %vm720_vm3, %vm737_vm10 }
 0x2ab   : > { %vm754_vm8 = vmor %vm721_vm12, %vm738_vm14  ;;  %vm13839_vm12 = vcmask 523264  }
 0x2ac   : > { %vm786_vm9 = vmor %vm753_vm13, %vm770_vm15 }
 0x2ad   : > { %1670 = vmatmul.bf16.gmra.mxu0 %v9880_v47  ;;  %vm787_vm2 = vmor %vm754_vm8, %vm771_vm0 }
 0x2ae   : > { %vm819_vm4 = vmor %vm786_vm9, %vm803_vm5 }
 0x2af   : > { %vm820_vm1 = vmor %vm787_vm2, %vm804_vm11  ;;  %vm13876_vm2 = vcmask 1048064  }
 0x2b0   : > { %vm852_vm3 = vmor %vm819_vm4, %vm836_vm6 }
 0x2b1   : > { %vm853_vm10 = vmor %vm820_vm1, %vm837_vm7  ;;  %v6679_v41 = vsel %vm852_vm3, 1.0, %v8347_v37 }
 0x2b2   : > { %v6680_v15 = vsel %vm853_vm10, 1.0, %v8347_v37  ;;  %vm13853_vm14 = vmmov %vm13839_vm12 }
 0x2b3   : > { %v9914_v10 = vpack.c.bf16 %v6680_v15, %v6679_v41  ;;  %vm13858_vm13 = vmmov %vm13839_vm12 }
 0x2b4   : > { %vm13861_vm15 = vmmov %vm13839_vm12 }
 0x2b5   : > { %13826 = vst [vmem:[#allocation95_spill] sm:$0xff] %v9914_v10  ;;  %vm13866_vm8 = vmmov %vm13839_vm12 }
 0x2b6   : > { %vm13870_vm0 = vmmov %vm13866_vm8 }
 0x2b7   : > { %vm13873_vm9 = vmmov %vm13870_vm0 }
 0x2b8   : > { %vm13875_vm5 = vmmov %vm13870_vm0 }
 0x2b9   : > { %vm13877_vm11 = vmmov %vm13876_vm2 }
 0x2ba   : > { %vm13878_vm4 = vmmov %vm13876_vm2 }
 0x2bb   : > { %vm13879_vm6 = vmmov %vm13876_vm2 }
 0x2bc   : > { %vm13880_vm1 = vmmov %vm13876_vm2 }
 0x2bd   : > { %1675 = vmatmul.bf16.gmra.mxu0 %v9903_v26  ;;  %vm13881_vm7 = vmmov %vm13880_vm1 }
 0x2be   : > { %vm13882_vm3 = vmmov %vm13880_vm1 }
 0x2bf   : > { %vm13883_vm10 = vmmov %vm13880_vm1 }
 0x2cd   : > { %1680 = vmatmul.bf16.gmra.mxu0 %v9914_v10 }
 0x2da   : > { %v9917_v1 = vpop.f32.mrf.mxu0 }
 0x2db   : > { %v1686_v24 = vadd.f32 1e-30, %v9917_v1 }
 0x2dd   : > { %7986 = vrcp.f32 %v1686_v24 }
 0x2e2   : > { %v9920_v45 = vpop.f32.mrf.mxu0 }
 0x2e3   : > { %v7987_v40 = vpop.eup %7986  ;;  %v1687_v42 = vadd.f32 1e-30, %v9920_v45 }
 0x2e4   : > { %1734 = vrot.lane.b32.xlu2 %v7987_v40, %s13709_s1 }
 0x2e5   : > { %7988 = vrcp.f32 %v1687_v42 }
 0x2ea   : > { %v9924_v30 = vpop.f32.mrf.mxu0 }
 0x2eb   : > { %v7989_v37 = vpop.eup %7988  ;;  %v1688_v0 = vadd.f32 1e-30, %v9924_v30 }
 0x2ec   : > { %1736 = vrot.lane.b32.xlu0 %v7989_v37, %s13709_s1 }
 0x2ed   : > { %7990 = vrcp.f32 %v1688_v0 }
 0x2f2   : > { %v9928_v38 = vpop.f32.mrf.mxu0 }
 0x2f3   : > { %v7991_v43 = vpop.eup %7990  ;;  %v1689_v31 = vadd.f32 1e-30, %v9928_v38 }
 0x2f4   : > { %1738 = vrot.lane.b32.xlu1 %v7991_v43, %s13709_s1 }
 0x2f5   : > { %7992 = vrcp.f32 %v1689_v31  ;;  %v7593_v31 = vld [vmem:[%s13827_s4 + $0x18] sm:$0xff] }
 0x2f6   : > { %2097 = vmatpush.bf16.msra.mxu1 %v7593_v31 }
 0x2fa   : > { %v9932_v36 = vpop.f32.mrf.mxu0 }
 0x2fb   : > { %v7993_v21 = vpop.eup %7992  ;;  %v1690_v5 = vadd.f32 1e-30, %v9932_v36 }
 0x2fc   : > { %1740 = vrot.lane.b32.xlu2 %v7993_v21, %s13709_s1 }
 0x2fd   : > { %7994 = vrcp.f32 %v1690_v5 }
 0x302   : > { %v9936_v17 = vpop.f32.mrf.mxu0 }
 0x303   : > { %v7995_v56 = vpop.eup %7994  ;;  %v1691_v33 = vadd.f32 1e-30, %v9936_v17 }
 0x304   : > { %1742 = vrot.lane.b32.xlu0 %v7995_v56, %s13709_s1 }
 0x305   : > { %7996 = vrcp.f32 %v1691_v33  ;;  %v7592_v33 = vld [vmem:[%s13827_s4 + $0x10] sm:$0xff] }
 0x306   : > { %2098 = vmatpush.bf16.msra.mxu1 %v7592_v33 }
 0x30a   : > { %v9940_v63 = vpop.f32.mrf.mxu0 }
 0x30b   : > { %v7997_v22 = vpop.eup %7996  ;;  %v1692_v18 = vadd.f32 1e-30, %v9940_v63 }
 0x30c   : > { %1744 = vrot.lane.b32.xlu1 %v7997_v22, %s13709_s1 }
 0x30d   : > { %7998 = vrcp.f32 %v1692_v18  ;;  %v13828_v18 = vld [vmem:[#allocation34_spill] sm:$0xff] }
 0x30e   : > { %v1918_v31 = vmul.f32 %v13828_v18, %v13775_v39 }
 0x312   : > { %v9944_v7 = vpop.f32.mrf.mxu0 }
 0x313   : > { %v7999_v29 = vpop.eup %7998  ;;  %v1693_v55 = vadd.f32 1e-30, %v9944_v7 }
 0x314   : > { %1746 = vrot.lane.b32.xlu2 %v7999_v29, %s13709_s1  ;;  %v1915_v29 = vmul.f32 %v13828_v18, %v13759_v58 }
 0x315   : > { %8000 = vrcp.f32 %v1693_v55  ;;  %v13829_v55 = vld [vmem:[#allocation35_spill] sm:$0xff] }
 0x31a   : > { %v9948_v2 = vpop.f32.mrf.mxu0 }
 0x31b   : > { %v8001_v4 = vpop.eup %8000  ;;  %v1694_v51 = vadd.f32 1e-30, %v9948_v2 }
 0x31c   : > { %1748 = vrot.lane.b32.xlu0 %v8001_v4, %s13709_s1  ;;  %v1932_v4 = vmul.f32 %v13829_v55, %v13760_v8 }
 0x31d   : > { %8002 = vrcp.f32 %v1694_v51  ;;  %v1965_v51 = vmul.f32 %v8670_v60, %v13761_v52 }
 0x322   : > { %v9952_v14 = vpop.f32.mrf.mxu0 }
 0x323   : > { %v8003_v48 = vpop.eup %8002  ;;  %v1695_v49 = vadd.f32 1e-30, %v9952_v14 }
 0x324   : > { %1750 = vrot.lane.b32.xlu1 %v8003_v48, %s13709_s1 }
 0x325   : > { %8004 = vrcp.f32 %v1695_v49  ;;  %v7591_v49 = vld [vmem:[%s13827_s4 + $0x8] sm:$0xff] }
 0x326   : > { %2099 = vmatpush.bf16.msra.mxu1 %v7591_v49 }
 0x32a   : > { %v9956_v34 = vpop.f32.mrf.mxu0 }
 0x32b   : > { %v8005_v50 = vpop.eup %8004  ;;  %v1696_v53 = vadd.f32 1e-30, %v9956_v34 }
 0x32c   : > { %1752 = vrot.lane.b32.xlu2 %v8005_v50, %s13709_s1  ;;  %v1948_v50 = vadd.f32 %v1932_v4, %v1915_v29 }
 0x32d   : > { %8006 = vrcp.f32 %v1696_v53 }
 0x332   : > { %v9960_v25 = vpop.f32.mrf.mxu0 }
 0x333   : > { %v8007_v41 = vpop.eup %8006  ;;  %v1697_v15 = vadd.f32 1e-30, %v9960_v25 }
 0x334   : > { %1754 = vrot.lane.b32.xlu0 %v8007_v41, %s13709_s1  ;;  %v9994_v41 = vadd.f32 %v1965_v51, %v1948_v50  ;;  %v13830_v50 = vld [vmem:[#allocation45_spill] sm:$0xff] }
 0x335   : > { %8008 = vrcp.f32 %v1697_v15 }
 0x33a   : > { %v9964_v24 = vpop.f32.mrf.mxu0 }
 0x33b   : > { %v8009_v40 = vpop.eup %8008  ;;  %v1698_v42 = vadd.f32 1e-30, %v9964_v24 }
 0x33c   : > { %1756 = vrot.lane.b32.xlu1 %v8009_v40, %s13709_s1  ;;  %v8274_v40 = vld [vmem:[%s13682_s3] sm:$0x3f] }
 0x33d   : > { %8010 = vrcp.f32 %v1698_v42  ;;  %v9999_v42 = vperm.slane %v8274_v40, 3  ;;  %v10020_v51 = vperm.slane %v8274_v40, 5 }
 0x33e   : > { %v1735_v22 = vpop.permute.xlu2 %1734 }
 0x33f   : > { %v1782_v48 = vmul.f32 %v1735_v22, %v9917_v1 }
 0x342   : > { %v9968_v37 = vpop.f32.mrf.mxu0 }
 0x343   : > { %v8011_v0 = vpop.eup %8010  ;;  %v1699_v43 = vadd.f32 1e-30, %v9968_v37 }
 0x344   : > { %1758 = vrot.lane.b32.xlu2 %v8011_v0, %s13709_s1  ;;  %v1798_v0 = vadd.f32 %v1782_v48, %v13764_v32  ;;  %v1968_v32 = vmul.f32 %v8670_v60, %v13781_v35 }
 0x345   : > { %8012 = vrcp.f32 %v1699_v43  ;;  %v7590_v43 = vld [vmem:[%s13827_s4] sm:$0xff] }
 0x346   : > { %2100 = vmatpush.bf16.msra.mxu1 %v7590_v43  ;;  %v1815_v33 = vadd.f32 %v9999_v42, %v1798_v0  ;;  %v1934_v0 = vmul.f32 %v13829_v55, %v13774_v20  ;;  %v1969_v43 = vmul.f32 %v8670_v60, %v13769_v28 }
 0x34a   : > { %v9975_v21 = vpop.f32.mrf.mxu0 }
 0x34b   : > { %v8013_v5 = vpop.eup %8012  ;;  %v1700_v56 = vadd.f32 1e-30, %v9975_v21 }
 0x34c   : > { %1760 = vrot.lane.b32.xlu0 %v8013_v5, %s13709_s1  ;;  %v1935_v5 = vmul.f32 %v13829_v55, %v13776_v62 }
 0x34d   : > { %8014 = vrcp.f32 %v1700_v56  ;;  %v10015_v56 = vperm.slane %v8274_v40, 4  ;;  %v1919_v40 = vmul.f32 %v13828_v18, %v13767_v54  ;;  %v13847_v54 = vld [vmem:[#allocation67_spill] sm:$0xff] }
 0x34e   : > { %v1951_v22 = vadd.f32 %v1935_v5, %v1918_v31  ;;  %v1917_v31 = vmul.f32 %v13828_v18, %v13777_v3 }
 0x34f   : > { %v1832_v48 = vmul.f32 %v10015_v56, %v1815_v33 }
 0x350   : > { %v10018_v29 = vadd.f32 %v1968_v32, %v1951_v22  ;;  %v1967_v22 = vmul.f32 %v8670_v60, %v13778_v6  ;;  %v1950_v62 = vadd.f32 %v1934_v0, %v1917_v31  ;;  %v13832_v0 = vld [vmem:[#allocation26_spill] sm:$0xff] }
 0x351   : > { %v1849_v5 = vadd.f32 %v10020_v51, %v1832_v48 }
 0x352   : > { %v9992_v53 = vpop.f32.mrf.mxu0  ;;  %v10048_v3 = vadd.f32 %v1967_v22, %v1950_v62  ;;  %v1922_v62 = vmul.f32 %v13828_v18, %v13768_v9  ;;  %v13833_v22 = vld [vmem:[#allocation24_spill] sm:$0xff] }
 0x353   : > { %v8015_v15 = vpop.eup %8014  ;;  %v1701_v1 = vadd.f32 1e-30, %v9992_v53  ;;  %v1865_v48 = vmul.f32 0.2, %v1849_v5 }
 0x354   : > { %2158 = vrot.lane.b32.xlu0 %v9994_v41, %s13709_s1  ;;  %1762 = vrot.lane.b32.xlu1 %v8015_v15, %s13709_s1  ;;  %v1936_v15 = vmul.f32 %v13829_v55, %v13765_v59 }
 0x355   : > { %8016 = vrcp.f32 %v1701_v1  ;;  %v1881_v31 = vmax.f32 %v1849_v5, %v1865_v48  ;;  %v13835_v48 = vld [vmem:[#allocation25_spill] sm:$0xff] }
 0x356   : > { %v1741_v49 = vpop.permute.xlu2 %1740 }
 0x357   : > { %v1785_v32 = vmul.f32 %v1741_v49, %v9928_v38  ;;  %v13831_v38 = vld [vmem:[#allocation57_spill] sm:$0xff] }
 0x359   : > { %v1801_v20 = vadd.f32 %v1785_v32, %v13783_v16 }
 0x35b   : > { %v8017_v4 = vpop.eup %8016 }
 0x35c   : > { %2164 = vrot.lane.b32.xlu0 %v10018_v29, %s13709_s1  ;;  %2160 = vrot.lane.b32.xlu1 %v13830_v50, %s13709_s1 }
 0x35d   : > { %1764 = vrot.lane.b32.xlu2 %v8017_v4, %s13709_s1  ;;  %v1952_v4 = vadd.f32 %v1936_v15, %v1919_v40  ;;  %v1920_v15 = vmul.f32 %v13828_v18, %v8520_v19  ;;  %v1818_v40 = vadd.f32 %v9999_v42, %v1801_v20  ;;  %v1897_v20 = vpack.c.bf16 %v1881_v31, %v1881_v31 }
 0x35e   : > { %v1737_v1 = vpop.permute.xlu0 %1736 }
 0x35f   : > { %v1783_v33 = vmul.f32 %v1737_v1, %v9920_v45  ;;  %v10044_v39 = vadd.f32 %v1969_v43, %v1952_v4  ;;  %v1939_v45 = vmul.f32 %v13829_v55, %v13766_v46  ;;  %v1970_v1 = vmul.f32 %v8670_v60, %v13832_v0 }
 0x360   : > { %v1835_v19 = vmul.f32 %v10015_v56, %v1818_v40 }
 0x361   : > { %v1799_v35 = vadd.f32 %v1783_v33, %v13784_v11  ;;  %v1937_v11 = vmul.f32 %v13829_v55, %v8538_v27  ;;  %v1955_v32 = vadd.f32 %v1939_v45, %v1922_v62  ;;  %v1940_v45 = vmul.f32 %v13829_v55, %v13835_v48 }
 0x363   : > { %v1816_v28 = vadd.f32 %v9999_v42, %v1799_v35  ;;  %v1972_v35 = vmul.f32 %v8670_v60, %v13770_v44  ;;  %v1953_v33 = vadd.f32 %v1937_v11, %v1920_v15  ;;  %v13836_v11 = vld [vmem:[#allocation16_spill] sm:$0xff] }
 0x364   : > { %2170 = vrot.lane.b32.xlu0 %v13831_v38, %s13709_s1  ;;  %2166 = vrot.lane.b32.xlu1 %v10044_v39, %s13709_s1 }
 0x365   : > { %v1833_v49 = vmul.f32 %v10015_v56, %v1816_v28  ;;  %2162 = vrot.lane.b32.xlu2 %v10048_v3, %s13709_s1  ;;  %v10073_v46 = vadd.f32 %v1972_v35, %v1955_v32  ;;  %v10075_v44 = vadd.f32 %v1970_v1, %v1953_v33  ;;  %v1852_v35 = vadd.f32 %v10020_v51, %v1835_v19  ;;  %v13840_v32 = vld [vmem:[#allocation70_spill] sm:$0xff]  ;;  %v13842_v19 = vld [vmem:[#allocation28_spill] sm:$0xff] }
 0x366   : > { %v1739_v16 = vpop.permute.xlu1 %1738  ;;  %v2021_v1 = vunpack.c.l.b16 %v1897_v20  ;;  %v13841_v33 = vld [vmem:[#allocation50_spill] sm:$0xff] }
 0x367   : > { %v1850_v28 = vadd.f32 %v10020_v51, %v1833_v49  ;;  %v1784_v43 = vmul.f32 %v1739_v16, %v9924_v30  ;;  %v13834_v49 = vld [vmem:[#allocation63_spill] sm:$0xff]  ;;  %v1923_v16 = vmul.f32 %v13828_v18, %v13836_v11  ;;  %v1868_v31 = vmul.f32 0.2, %v1852_v35 }
 0x369   : > { %v1800_v4 = vadd.f32 %v1784_v43, %v13833_v22  ;;  %v1866_v9 = vmul.f32 0.2, %v1850_v28  ;;  %v1943_v22 = vmul.f32 %v13829_v55, %v13842_v19 }
 0x36b   : > { %v1817_v0 = vadd.f32 %v9999_v42, %v1800_v4  ;;  %v1882_v27 = vmax.f32 %v1850_v28, %v1866_v9  ;;  %v13837_v9 = vld [vmem:[#allocation76_spill] sm:$0xff]  ;;  %v1956_v28 = vadd.f32 %v1940_v45, %v1923_v16  ;;  %v13844_v16 = vld [vmem:[#allocation18_spill] sm:$0xff] }
 0x36c   : > { %2176 = vrot.lane.b32.xlu0 %v13834_v49, %s13709_s1  ;;  %2172 = vrot.lane.b32.xlu1 %v10073_v46, %s13709_s1  ;;  %v1973_v62 = vmul.f32 %v8670_v60, %v13837_v9  ;;  %v13846_v9 = vld [vmem:[#allocation51_spill] sm:$0xff] }
 0x36d   : > { %v1834_v30 = vmul.f32 %v10015_v56, %v1817_v0  ;;  %2168 = vrot.lane.b32.xlu2 %v10075_v44, %s13709_s1  ;;  %v1898_v5 = vpack.c.bf16 %v1882_v27, %v1882_v27 }
 0x36e   : > { %v10098_v27 = vadd.f32 %v1973_v62, %v1956_v28  ;;  %v1926_v62 = vmul.f32 %v13828_v18, %v13844_v16  ;;  %v1884_v28 = vmax.f32 %v1852_v35, %v1868_v31  ;;  %v13849_v18 = vld [vmem:[#allocation89_spill] sm:$0xff] }
 0x36f   : > { %v1851_v15 = vadd.f32 %v10020_v51, %v1834_v30  ;;  %v2022_v40 = vunpack.c.l.b16 %v1898_v5  ;;  %v13843_v30 = vld [vmem:[#allocation71_spill] sm:$0xff] }
 0x370   : > { %v1980_v5 = vmul.f32 %v8670_v60, %v13843_v30  ;;  %v1959_v48 = vadd.f32 %v1943_v22, %v1926_v62  ;;  %v13850_v22 = vld [vmem:[#allocation27_spill] sm:$0xff] }
 0x371   : > { %v10094_v0 = vpack.c.b16 %v2022_v40, %v2021_v1  ;;  %v1867_v43 = vmul.f32 0.2, %v1851_v15  ;;  %v13845_v1 = vld [vmem:[#allocation80_spill] sm:$0xff] }
 0x372   : > { %v1976_v40 = vmul.f32 %v8670_v60, %v13845_v1  ;;  %v10117_v55 = vadd.f32 %v1980_v5, %v13847_v54  ;;  %v13852_v5 = vld [vmem:[#allocation56_spill] sm:$0xff] }
 0x373   : > { %13838 = vst [vmem:[#allocation34_spill] sm:$0xff] %v10094_v0  ;;  %6697 = vmatmul.msk.bf16.vlgmr.msra.gmra.mxu1 %vm13839_vm12, %v10094_v0  ;;  %v1883_v4 = vmax.f32 %v1851_v15, %v1867_v43  ;;  %v1747_v15 = vpop.permute.xlu2 %1746  ;;  %vm13884_vm12 = vmmov %vm13880_vm1 }
 0x374   : > { %2182 = vrot.lane.b32.xlu0 %v13840_v32, %s13709_s1  ;;  %2178 = vrot.lane.b32.xlu1 %v13841_v33, %s13709_s1  ;;  %v10120_v30 = vadd.f32 %v1976_v40, %v1959_v48  ;;  %v1788_v54 = vmul.f32 %v1747_v15, %v9940_v63  ;;  %v13854_v40 = vld [vmem:[#allocation74_spill] sm:$0xff] }
 0x375   : > { %2174 = vrot.lane.b32.xlu2 %v10098_v27, %s13709_s1  ;;  %v1899_v6 = vpack.c.bf16 %v1883_v4, %v1883_v4 }
 0x376   : > { %v1743_v20 = vpop.permute.xlu0 %1742  ;;  %13848 = vst [vmem:[#allocation35_spill] sm:$0xff] %v10120_v30 }
 0x377   : > { %v1786_v45 = vmul.f32 %v1743_v20, %v9932_v36  ;;  %v1900_v36 = vpack.c.bf16 %v1884_v28, %v1884_v28 }
 0x379   : > { %v1802_v11 = vadd.f32 %v1786_v45, %v13846_v9  ;;  %v2023_v9 = vunpack.c.l.b16 %v1899_v6  ;;  %v2024_v31 = vunpack.c.l.b16 %v1900_v36  ;;  %v1804_v45 = vadd.f32 %v1788_v54, %v13852_v5 }
 0x37b   : > { %v1819_v43 = vadd.f32 %v9999_v42, %v1802_v11  ;;  %v10133_v20 = vpack.c.b16 %v2024_v31, %v2023_v9 }
 0x37c   : > { %2188 = vrot.lane.b32.xlu0 %v10117_v55, %s13709_s1  ;;  %2184 = vrot.lane.b32.xlu1 %v13849_v18, %s13709_s1 }
 0x37d   : > { %v1836_v60 = vmul.f32 %v10015_v56, %v1819_v43  ;;  %2180 = vrot.lane.b32.xlu2 %v10120_v30, %s13709_s1  ;;  %13851 = vst [vmem:[#allocation45_spill] sm:$0xff] %v10133_v20 }
 0x37e   : > { %v1745_v35 = vpop.permute.xlu1 %1744 }
 0x37f   : > { %v1853_v11 = vadd.f32 %v10020_v51, %v1836_v60  ;;  %v1787_v48 = vmul.f32 %v1745_v35, %v9936_v17  ;;  %v1821_v17 = vadd.f32 %v9999_v42, %v1804_v45  ;;  %v13855_v45 = vld [vmem:[#allocation55_spill] sm:$0xff] }
 0x381   : > { %v1803_v4 = vadd.f32 %v1787_v48, %v13850_v22  ;;  %v1869_v6 = vmul.f32 0.2, %v1853_v11  ;;  %v1838_v36 = vmul.f32 %v10015_v56, %v1821_v17 }
 0x383   : > { %v1820_v62 = vadd.f32 %v9999_v42, %v1803_v4  ;;  %6698 = vmatmul.msk.bf16.gmra.mxu1 %vm13853_vm14, %v10133_v20  ;;  %v1885_v15 = vmax.f32 %v1853_v11, %v1869_v6  ;;  %v1855_v48 = vadd.f32 %v10020_v51, %v1838_v36  ;;  %v13857_v11 = vld [vmem:[#allocation62_spill] sm:$0xff]  ;;  %vm13885_vm14 = vmmov %vm13880_vm1 }
 0x385   : > { %v1837_v63 = vmul.f32 %v10015_v56, %v1820_v62  ;;  %2186 = vrot.lane.b32.xlu2 %v13854_v40, %s13709_s1  ;;  %v1901_v9 = vpack.c.bf16 %v1885_v15, %v1885_v15 }
 0x386   : > { %v1753_v54 = vpop.permute.xlu2 %1752 }
 0x387   : > { %v1854_v28 = vadd.f32 %v10020_v51, %v1837_v63  ;;  %v1791_v22 = vmul.f32 %v1753_v54, %v9952_v14  ;;  %v2025_v5 = vunpack.c.l.b16 %v1901_v9  ;;  %v13859_v9 = vld [vmem:[#allocation78_spill] sm:$0xff] }
 0x389   : > { %v1870_v43 = vmul.f32 0.2, %v1854_v28  ;;  %v1807_v6 = vadd.f32 %v1791_v22, %v13857_v11 }
 0x38b   : > { %v1886_v60 = vmax.f32 %v1854_v28, %v1870_v43  ;;  %v1871_v28 = vmul.f32 0.2, %v1855_v48  ;;  %v1824_v14 = vadd.f32 %v9999_v42, %v1807_v6 }
 0x38d   : > { %v1902_v35 = vpack.c.bf16 %v1886_v60, %v1886_v60  ;;  %v1887_v60 = vmax.f32 %v1855_v48, %v1871_v28 }
 0x38e   : > { %v1749_v31 = vpop.permute.xlu0 %1748 }
 0x38f   : > { %v1789_v4 = vmul.f32 %v1749_v31, %v9944_v7  ;;  %v2026_v62 = vunpack.c.l.b16 %v1902_v35  ;;  %v1841_v31 = vmul.f32 %v10015_v56, %v1824_v14 }
 0x391   : > { %v1805_v1 = vadd.f32 %v1789_v4, %v13855_v45  ;;  %v10149_v63 = vpack.c.b16 %v2026_v62, %v2025_v5  ;;  %v1903_v4 = vpack.c.bf16 %v1887_v60, %v1887_v60  ;;  %v1858_v45 = vadd.f32 %v10020_v51, %v1841_v31 }
 0x393   : > { %13856 = vst [vmem:[#allocation57_spill] sm:$0xff] %v10149_v63  ;;  %v1822_v17 = vadd.f32 %v9999_v42, %v1805_v1  ;;  %6699 = vmatmul.msk.bf16.gmra.mxu1 %vm13858_vm13, %v10149_v63  ;;  %v2027_v6 = vunpack.c.l.b16 %v1903_v4  ;;  %v1874_v28 = vmul.f32 0.2, %v1858_v45  ;;  %vm13886_vm13 = vmmov %vm13880_vm1 }
 0x395   : > { %v1839_v15 = vmul.f32 %v10015_v56, %v1822_v17 }
 0x396   : > { %v1751_v43 = vpop.permute.xlu1 %1750 }
 0x397   : > { %v1856_v7 = vadd.f32 %v10020_v51, %v1839_v15  ;;  %v1790_v36 = vmul.f32 %v1751_v43, %v9948_v2 }
 0x399   : > { %v1806_v54 = vadd.f32 %v1790_v36, %v13859_v9  ;;  %v1872_v35 = vmul.f32 0.2, %v1856_v7  ;;  %v13862_v36 = vld [vmem:[#allocation61_spill] sm:$0xff] }
 0x39b   : > { %v1823_v1 = vadd.f32 %v9999_v42, %v1806_v54  ;;  %v1888_v22 = vmax.f32 %v1856_v7, %v1872_v35  ;;  %v1890_v7 = vmax.f32 %v1858_v45, %v1874_v28 }
 0x39d   : > { %v1840_v5 = vmul.f32 %v10015_v56, %v1823_v1  ;;  %v1904_v62 = vpack.c.bf16 %v1888_v22, %v1888_v22  ;;  %v1906_v31 = vpack.c.bf16 %v1890_v7, %v1890_v7 }
 0x39e   : > { %v1759_v54 = vpop.permute.xlu2 %1758 }
 0x39f   : > { %v1857_v11 = vadd.f32 %v10020_v51, %v1840_v5  ;;  %v2028_v17 = vunpack.c.l.b16 %v1904_v62  ;;  %v1794_v4 = vmul.f32 %v1759_v54, %v9964_v24 }
 0x3a1   : > { %v10165_v2 = vpack.c.b16 %v2028_v17, %v2027_v6  ;;  %v1873_v48 = vmul.f32 0.2, %v1857_v11  ;;  %v2030_v6 = vunpack.c.l.b16 %v1906_v31 }
 0x3a3   : > { %13860 = vst [vmem:[#allocation24_spill] sm:$0xff] %v10165_v2  ;;  %6700 = vmatmul.msk.bf16.gmra.mxu1 %vm13861_vm15, %v10165_v2  ;;  %v1889_v15 = vmax.f32 %v1857_v11, %v1873_v48  ;;  %v13865_v48 = vld [vmem:[#allocation69_spill] sm:$0xff]  ;;  %vm13887_vm15 = vmmov %vm13880_vm1 }
 0x3a4   : > { %v1810_v28 = vadd.f32 %v1794_v4, %v13865_v48 }
 0x3a5   : > { %v1905_v9 = vpack.c.bf16 %v1889_v15, %v1889_v15 }
 0x3a6   : > { %v1755_v43 = vpop.permute.xlu0 %1754 }
 0x3a7   : > { %v1792_v14 = vmul.f32 %v1755_v43, %v9956_v34  ;;  %v2029_v22 = vunpack.c.l.b16 %v1905_v9  ;;  %v13863_v34 = vld [vmem:[#allocation81_spill] sm:$0xff] }
 0x3a9   : > { %v1808_v60 = vadd.f32 %v1792_v14, %v13862_v36  ;;  %v10177_v17 = vpack.c.b16 %v2030_v6, %v2029_v22  ;;  %v1827_v14 = vadd.f32 %v9999_v42, %v1810_v28 }
 0x3ab   : > { %v1825_v35 = vadd.f32 %v9999_v42, %v1808_v60  ;;  %13864 = vst [vmem:[#allocation63_spill] sm:$0xff] %v10177_v17  ;;  %v1844_v60 = vmul.f32 %v10015_v56, %v1827_v14 }
 0x3ad   : > { %v1842_v1 = vmul.f32 %v10015_v56, %v1825_v35 }
 0x3ae   : > { %v1757_v5 = vpop.permute.xlu1 %1756 }
 0x3af   : > { %v1859_v62 = vadd.f32 %v10020_v51, %v1842_v1  ;;  %v1793_v11 = vmul.f32 %v1757_v5, %v9960_v25  ;;  %v1861_v1 = vadd.f32 %v10020_v51, %v1844_v60 }
 0x3b1   : > { %v1809_v45 = vadd.f32 %v1793_v11, %v13863_v34  ;;  %v1875_v43 = vmul.f32 0.2, %v1859_v62  ;;  %v13867_v34 = vld [vmem:[#allocation88_spill] sm:$0xff] }
 0x3b3   : > { %v1826_v15 = vadd.f32 %v9999_v42, %v1809_v45  ;;  %6701 = vmatmul.msk.bf16.gmra.mxu1 %vm13866_vm8, %v10177_v17  ;;  %v1891_v25 = vmax.f32 %v1859_v62, %v1875_v43  ;;  %v13869_v62 = vld [vmem:[#allocation73_spill] sm:$0xff]  ;;  %v1877_v43 = vmul.f32 0.2, %v1861_v1  ;;  %vm13888_vm8 = vmmov %vm13880_vm1 }
 0x3b5   : > { %v1843_v24 = vmul.f32 %v10015_v56, %v1826_v15  ;;  %v1907_v54 = vpack.c.bf16 %v1891_v25, %v1891_v25  ;;  %v1893_v25 = vmax.f32 %v1861_v1, %v1877_v43 }
 0x3b7   : > { %v1860_v7 = vadd.f32 %v10020_v51, %v1843_v24  ;;  %v1765_v35 = vpop.permute.xlu2 %1764  ;;  %v2031_v11 = vunpack.c.l.b16 %v1907_v54 }
 0x3b8   : > { %v1797_v4 = vmul.f32 %v1765_v35, %v9992_v53 }
 0x3b9   : > { %v1876_v36 = vmul.f32 0.2, %v1860_v7 }
 0x3ba   : > { %v1813_v28 = vadd.f32 %v1797_v4, %v13869_v62 }
 0x3bb   : > { %v1892_v9 = vmax.f32 %v1860_v7, %v1876_v36  ;;  %v13871_v36 = vld [vmem:[#allocation87_spill] sm:$0xff] }
 0x3bc   : > { %v1830_v53 = vadd.f32 %v9999_v42, %v1813_v28 }
 0x3bd   : > { %v1908_v31 = vpack.c.bf16 %v1892_v9, %v1892_v9 }
 0x3be   : > { %v1761_v22 = vpop.permute.xlu0 %1760  ;;  %v1847_v54 = vmul.f32 %v10015_v56, %v1830_v53 }
 0x3bf   : > { %v1795_v5 = vmul.f32 %v1761_v22, %v9968_v37  ;;  %v2032_v6 = vunpack.c.l.b16 %v1908_v31  ;;  %v1909_v22 = vpack.c.bf16 %v1893_v25, %v1893_v25 }
 0x3c1   : > { %v1811_v45 = vadd.f32 %v1795_v5, %v13867_v34  ;;  %v10191_v48 = vpack.c.b16 %v2032_v6, %v2031_v11  ;;  %v1864_v11 = vadd.f32 %v10020_v51, %v1847_v54  ;;  %v2033_v34 = vunpack.c.l.b16 %v1909_v22 }
 0x3c3   : > { %13868 = vst [vmem:[#allocation50_spill] sm:$0xff] %v10191_v48  ;;  %v1828_v15 = vadd.f32 %v9999_v42, %v1811_v45  ;;  %6702 = vmatmul.msk.bf16.gmra.mxu1 %vm13870_vm0, %v10191_v48  ;;  %v1880_v62 = vmul.f32 0.2, %v1864_v11  ;;  %vm13889_vm0 = vmmov %vm13880_vm1 }
 0x3c5   : > { %v1845_v24 = vmul.f32 %v10015_v56, %v1828_v15 }
 0x3c6   : > { %v1763_v14 = vpop.permute.xlu1 %1762 }
 0x3c7   : > { %v1862_v37 = vadd.f32 %v10020_v51, %v1845_v24  ;;  %v1796_v7 = vmul.f32 %v1763_v14, %v9975_v21 }
 0x3c9   : > { %v1812_v60 = vadd.f32 %v1796_v7, %v13871_v36  ;;  %v1878_v9 = vmul.f32 0.2, %v1862_v37 }
 0x3cb   : > { %v1829_v35 = vadd.f32 %v9999_v42, %v1812_v60  ;;  %v1894_v31 = vmax.f32 %v1862_v37, %v1878_v9  ;;  %v1896_v42 = vmax.f32 %v1864_v11, %v1880_v62  ;;  %v2163_v60 = vpop.permute.xlu2 %2162 }
 0x3cd   : > { %v1846_v4 = vmul.f32 %v10015_v56, %v1829_v35  ;;  %v1910_v5 = vpack.c.bf16 %v1894_v31, %v1894_v31  ;;  %v1912_v43 = vpack.c.bf16 %v1896_v42, %v1896_v42  ;;  %v2159_v35 = vpop.permute.xlu0 %2158 }
 0x3ce   : > { %v2161_v9 = vpop.permute.xlu1 %2160 }
 0x3cf   : > { %v1863_v6 = vadd.f32 %v10020_v51, %v1846_v4  ;;  %v2034_v45 = vunpack.c.l.b16 %v1910_v5  ;;  %v2036_v56 = vunpack.c.l.b16 %v1912_v43 }
 0x3d1   : > { %v10207_v21 = vpack.c.b16 %v2034_v45, %v2033_v34  ;;  %v1879_v1 = vmul.f32 0.2, %v1863_v6 }
 0x3d3   : > { %13872 = vst [vmem:[#allocation51_spill] sm:$0xff] %v10207_v21  ;;  %6703 = vmatmul.msk.bf16.gmra.mxu1 %vm13873_vm9, %v10207_v21  ;;  %v1895_v28 = vmax.f32 %v1863_v6, %v1879_v1  ;;  %v2169_v31 = vpop.permute.xlu2 %2168  ;;  %vm13890_vm9 = vmmov %vm13889_vm0 }
 0x3d5   : > { %v1911_v15 = vpack.c.bf16 %v1895_v28, %v1895_v28  ;;  %v2165_v6 = vpop.permute.xlu0 %2164 }
 0x3d6   : > { %v2167_v4 = vpop.permute.xlu1 %2166 }
 0x3d7   : > { %v2035_v24 = vunpack.c.l.b16 %v1911_v15 }
 0x3d9   : > { %v10211_v14 = vpack.c.b16 %v2036_v56, %v2035_v24 }
 0x3db   : > { %13874 = vst [vmem:[#allocation67_spill] sm:$0xff] %v10211_v14  ;;  %v2175_v45 = vpop.permute.xlu2 %2174 }
 0x3de   : > { %v2173_v24 = vpop.permute.xlu1 %2172 }
 0x3e3   : > { %6704 = vmatmul.msk.bf16.gmra.mxu1 %vm13875_vm5, %v10211_v14  ;;  %vm13891_vm5 = vmmov %vm13889_vm0 }
 0x3f0   : > { %v10215_v51 = vpop.f32.mrf.mxu1 }
 0x3f1   : > { %v10233_v11 = vadd.f32 %v2159_v35, %v10215_v51  ;;  %v2171_v35 = vpop.permute.xlu0 %2170 }
 0x3f3   : > { %v2238_v62 = vsel %vm13877_vm11, %v10233_v11, inf }
 0x3f8   : > { %v10217_v53 = vpop.f32.mrf.mxu1 }
 0x3f9   : > { %v2177_v21 = vpop.permute.xlu0 %2176 }
 0x400   : > { %v10219_v37 = vpop.f32.mrf.mxu1 }
 0x401   : > { %v10253_v16 = vadd.f32 %v2163_v60, %v10219_v37  ;;  %v2183_v2 = vpop.permute.xlu0 %2182 }
 0x408   : > { %v10221_v7 = vpop.f32.mrf.mxu1 }
 0x410   : > { %v10223_v25 = vpop.f32.mrf.mxu1 }
 0x411   : > { %v10230_v5 = vadd.f32 %v2167_v4, %v10223_v25 }
 0x413   : > { %v2242_v34 = vsel %vm13876_vm2, %v10230_v5, inf  ;;  %vm13892_vm2 = vcmask 523264  }
 0x414   : > { %v2243_v42 = vmin.f32 %v2238_v62, %v2242_v34  ;;  %v2240_v34 = vsel %vm13880_vm1, %v10253_v16, inf  ;;  %vm13893_vm11 = vmmov %vm13892_vm2 }
 0x415   : > { %vm13896_vm1 = vmmov %vm13892_vm2 }
 0x418   : > { %v10225_v36 = vpop.f32.mrf.mxu1 }
 0x420   : > { %v2117_v54 = vpop.f32.mrf.mxu1 }
 0x421   : > { %v10250_v4 = vadd.f32 %v2171_v35, %v2117_v54 }
 0x423   : > { %v2246_v19 = vsel %vm13879_vm6, %v10250_v4, inf  ;;  %vm13895_vm6 = vmmov %vm13892_vm2 }
 0x428   : > { %v10227_v22 = vpop.f32.mrf.mxu1 }
 0x430   : > { %v10237_v1 = vpop.f32.mrf.mxu1 }
 0x431   : > { %v10242_v28 = vadd.f32 %v2175_v45, %v10237_v1  ;;  %v2179_v45 = vpop.permute.xlu1 %2178 }
 0x433   : > { %v2250_v15 = vsel %vm13878_vm4, %v10242_v28, inf  ;;  %vm13894_vm4 = vmmov %vm13892_vm2 }
 0x434   : > { %v10246_v43 = vmin.f32 %v2243_v42, %v2250_v15  ;;  %v2247_v15 = vmin.f32 %v2240_v34, %v2246_v19 }
 0x438   : > { %v10248_v56 = vpop.f32.mrf.mxu1 }
 0x440   : > { %v2127_v14 = vpop.f32.mrf.mxu1 }
 0x441   : > { %v10259_v62 = vadd.f32 %v2179_v45, %v2127_v14  ;;  %v2232_v42 = vsub.f32 %v2127_v14, %v13841_v33 }
 0x443   : > { %v2254_v35 = vsel %vm13881_vm7, %v10259_v62, inf  ;;  %2375 = vrot.lane.b32.xlu2 %v2232_v42, %s13709_s1  ;;  %v2228_v42 = vsub.f32 %v2117_v54, %v13831_v38  ;;  %v10290_v54 = vadd.f32 %v2177_v21, %v10248_v56  ;;  %vm13897_vm7 = vmmov %vm13896_vm1 }
 0x444   : > { %v2255_v60 = vmin.f32 %v2247_v15, %v2254_v35  ;;  %v2181_v35 = vpop.permute.xlu2 %2180 }
 0x448   : > { %v2129_v48 = vpop.f32.mrf.mxu1 }
 0x449   : > { %v2233_v17 = vsub.f32 %v2129_v48, %v10120_v30 }
 0x44b   : > { %2377 = vrot.lane.b32.xlu0 %v2233_v17, %s13709_s1 }
 0x450   : > { %v2132_v52 = vpop.f32.mrf.mxu1 }
 0x451   : > { %v10267_v59 = vadd.f32 %v2183_v2, %v2132_v52  ;;  %v2234_v45 = vsub.f32 %v2132_v52, %v13840_v32  ;;  %v10279_v2 = vadd.f32 %v2169_v31, %v10225_v36  ;;  %v10282_v52 = vadd.f32 %v2161_v9, %v10217_v53 }
 0x452   : > { %v2217_v31 = vadd.f32 %v2181_v35, %v2129_v48 }
 0x453   : > { %v2258_v19 = vsel %vm13882_vm3, %v10267_v59, inf  ;;  %2379 = vrot.lane.b32.xlu0 %v2234_v45, %s13709_s1  ;;  %v10287_v45 = vadd.f32 %v2173_v24, %v10227_v22  ;;  %v2244_v9 = vsel %vm13883_vm10, %v10279_v2, inf  ;;  %v2239_v21 = vsel %vm13884_vm12, %v10282_v52, inf  ;;  %vm13898_vm3 = vmmov %vm13896_vm1 }
 0x454   : > { %v2259_v14 = vmin.f32 %v10246_v43, %v2258_v19  ;;  %v2227_v43 = vsub.f32 %v10225_v36, %v10075_v44  ;;  %v2187_v36 = vpop.permute.xlu2 %2186  ;;  %v2245_v63 = vmin.f32 %v2239_v21, %v2244_v9  ;;  %vm13899_vm10 = vmmov %vm13896_vm1 }
 0x455   : > { %v2248_v24 = vsel %vm13885_vm14, %v10287_v45, inf  ;;  %vm13900_vm12 = vmmov %vm13896_vm1 }
 0x456   : > { %vm13901_vm14 = vmmov %vm13896_vm1 }
 0x458   : > { %v2134_v34 = vpop.f32.mrf.mxu1 }
 0x459   : > { %v2235_v15 = vsub.f32 %v2134_v34, %v13849_v18 }
 0x45b   : > { %2367 = vrot.lane.b32.xlu0 %v2228_v42, %s13709_s1  ;;  %2381 = vrot.lane.b32.xlu1 %v2235_v15, %s13709_s1  ;;  %v2185_v42 = vpop.permute.xlu1 %2184  ;;  %v10294_v15 = vadd.f32 %v2165_v6, %v10221_v7  ;;  %v2252_v6 = vsel %vm13886_vm13, %v10290_v54, inf  ;;  %vm13902_vm13 = vmmov %vm13896_vm1 }
 0x45c   : > { %v10298_v8 = vadd.f32 %v2185_v42, %v2134_v34  ;;  %v2256_v34 = vsel %vm13888_vm8, %v2217_v31, inf  ;;  %v2253_v20 = vmin.f32 %v2245_v63, %v2252_v6  ;;  %vm13904_vm8 = vmmov %vm13896_vm1 }
 0x45d   : > { %v2241_v48 = vsel %vm13887_vm15, %v10294_v15, inf  ;;  %vm13903_vm15 = vmmov %vm13896_vm1 }
 0x45e   : > { %v2260_v35 = vsel %vm13889_vm0, %v10298_v8, inf  ;;  %v2249_v42 = vmin.f32 %v2241_v48, %v2248_v24  ;;  %v2229_v48 = vsub.f32 %v10227_v22, %v10073_v46  ;;  %vm13905_vm0 = vmmov %vm13896_vm1 }
 0x45f   : > { %v2261_v32 = vmin.f32 %v2253_v20, %v2260_v35 }
 0x460   : > { %v2137_v17 = vpop.f32.mrf.mxu1  ;;  %v2257_v0 = vmin.f32 %v2249_v42, %v2256_v34 }
 0x461   : > { %v2236_v19 = vsub.f32 %v2137_v17, %v13854_v40  ;;  %v10308_v58 = vadd.f32 %v2187_v36, %v2137_v17  ;;  %v2230_v17 = vsub.f32 %v10237_v1, %v10098_v27  ;;  %v2266_v24 = vmin.f32 %v2259_v14, %v2261_v32 }
 0x462   : > { %v2226_v32 = vsub.f32 %v10223_v25, %v10044_v39  ;;  %v2225_v25 = vsub.f32 %v10221_v7, %v10018_v29 }
 0x463   : > { %2365 = vrot.lane.b32.xlu0 %v2227_v43, %s13709_s1  ;;  %2383 = vrot.lane.b32.xlu1 %v2236_v19, %s13709_s1  ;;  %v2189_v43 = vpop.permute.xlu0 %2188  ;;  %v2222_v19 = vsub.f32 %v10215_v51, %v9994_v41  ;;  %v2262_v9 = vsel %vm13890_vm9, %v10308_v58, inf  ;;  %vm13906_vm9 = vmmov %vm13905_vm0 }
 0x464   : > { %v2263_v51 = vmin.f32 %v2255_v60, %v2262_v9 }
 0x468   : > { %v2139_v40 = vpop.f32.mrf.mxu1 }
 0x469   : > { %v2221_v36 = vadd.f32 %v2189_v43, %v2139_v40  ;;  %v2237_v21 = vsub.f32 %v2139_v40, %v10117_v55  ;;  %v2231_v40 = vsub.f32 %v10248_v56, %v13834_v49 }
 0x46b   : > { %v2264_v30 = vsel %vm13891_vm5, %v2221_v36, inf  ;;  %2355 = vrot.lane.b32.xlu0 %v2222_v19, %s13709_s1  ;;  %2371 = vrot.lane.b32.xlu1 %v2230_v17, %s13709_s1  ;;  %vm13907_vm5 = vmmov %vm13905_vm0 }
 0x46c   : > { %v2265_v63 = vmin.f32 %v2257_v0, %v2264_v30  ;;  %2385 = vrot.lane.b32.xlu2 %v2237_v21, %s13709_s1  ;;  %v2224_v0 = vsub.f32 %v10219_v37, %v10048_v3  ;;  %v2223_v37 = vsub.f32 %v10217_v53, %v13830_v50 }
 0x46e   : > { %v2267_v1 = vmin.f32 %v2263_v51, %v2265_v63 }
 0x470   : > { %v2268_v6 = vmin.f32 %v2266_v24, %v2267_v1 }
 0x472   : > { %v2269_v20 = vrot.slane %v2268_v6, 4 }
 0x473   : > { %2369 = vrot.lane.b32.xlu1 %v2229_v48, %s13709_s1 }
 0x474   : > { %v2270_v34 = vmin.f32 %v2268_v6, %v2269_v20  ;;  %2373 = vrot.lane.b32.xlu2 %v2231_v40, %s13709_s1 }
 0x476   : > { %v2271_v35 = vrot.slane %v2270_v34, 2 }
 0x478   : > { %v2272_v60 = vmin.f32 %v2270_v34, %v2271_v35 }
 0x47a   : > { %v2273_v30 = vrot.slane %v2272_v60, 1 }
 0x47b   : > { %2359 = vrot.lane.b32.xlu1 %v2224_v0, %s13709_s1 }
 0x47c   : > { %v10337_v22 = vmin.f32 %v2272_v60, %v2273_v30  ;;  %2363 = vrot.lane.b32.xlu2 %v2226_v32, %s13709_s1 }
 0x47e   : > { %v2285_v56 = vsub.f32 %v10259_v62, %v10337_v22  ;;  %v2287_v14 = vsub.f32 %v10267_v59, %v10337_v22  ;;  %v2281_v43 = vsub.f32 %v10250_v4, %v10337_v22  ;;  %v2279_v19 = vsub.f32 %v10230_v5, %v10337_v22 }
 0x47f   : > { %v2283_v62 = vsub.f32 %v10242_v28, %v10337_v22  ;;  %v2282_v59 = vsub.f32 %v10287_v45, %v10337_v22  ;;  %v2286_v42 = vsub.f32 %v2217_v31, %v10337_v22  ;;  %v2288_v5 = vsub.f32 %v10298_v8, %v10337_v22 }
 0x480   : > { %v2301_v17 = vsub.f32 0.0, %v2285_v56  ;;  %v2303_v31 = vsub.f32 0.0, %v2287_v14  ;;  %v2290_v40 = vsub.f32 %v2221_v36, %v10337_v22  ;;  %v2280_v8 = vsub.f32 %v10279_v2, %v10337_v22 }
 0x481   : > { %v2302_v53 = vsub.f32 0.0, %v2286_v42  ;;  %v2304_v6 = vsub.f32 0.0, %v2288_v5  ;;  %v2289_v35 = vsub.f32 %v10308_v58, %v10337_v22  ;;  %v2295_v14 = vsub.f32 0.0, %v2279_v19 }
 0x482   : > { %v2327_v9 = vmul.f32 1.442695, %v2301_v17  ;;  %v2331_v20 = vmul.f32 1.442695, %v2303_v31  ;;  %v2306_v60 = vsub.f32 0.0, %v2290_v40  ;;  %v2296_v30 = vsub.f32 0.0, %v2280_v8 }
 0x483   : > { %2357 = vrot.lane.b32.xlu1 %v2223_v37, %s13709_s1  ;;  %v2329_v21 = vmul.f32 1.442695, %v2302_v53  ;;  %v2333_v34 = vmul.f32 1.442695, %v2304_v6  ;;  %v2305_v56 = vsub.f32 0.0, %v2289_v35  ;;  %v2284_v36 = vsub.f32 %v10290_v54, %v10337_v22 }
 0x484   : > { %2361 = vrot.lane.b32.xlu2 %v2225_v25, %s13709_s1  ;;  %8018 = vpow2.f32 %v2327_v9  ;;  %v2337_v37 = vmul.f32 1.442695, %v2306_v60  ;;  %v2317_v25 = vmul.f32 1.442695, %v2296_v30  ;;  %v2315_v2 = vmul.f32 1.442695, %v2295_v14 }
 0x485   : > { %8020 = vpow2.f32 %v2329_v21  ;;  %v2335_v42 = vmul.f32 1.442695, %v2305_v56  ;;  %v2300_v5 = vsub.f32 0.0, %v2284_v36  ;;  %v2297_v40 = vsub.f32 0.0, %v2281_v43 }
 0x486   : > { %8022 = vpow2.f32 %v2331_v20  ;;  %v2298_v4 = vsub.f32 0.0, %v2282_v59  ;;  %v2277_v36 = vsub.f32 %v10253_v16, %v10337_v22 }
 0x487   : > { %8024 = vpow2.f32 %v2333_v34  ;;  %v2319_v14 = vmul.f32 1.442695, %v2297_v40 }
 0x488   : > { %8026 = vpow2.f32 %v2337_v37  ;;  %v2321_v37 = vmul.f32 1.442695, %v2298_v4 }
 0x489   : > { %8028 = vpow2.f32 %v2317_v25 }
 0x48a   : > { %v10361_v51 = vpop.eup %8018  ;;  %8030 = vpow2.f32 %v2335_v42 }
 0x48b   : > { %v10363_v63 = vpop.eup %8020  ;;  %8032 = vpow2.f32 %v2315_v2 }
 0x48c   : > { %v10375_v17 = vpop.eup %8022 }
 0x48d   : > { %v10377_v53 = vpop.eup %8024 }
 0x49d   : > { %v2376_v7 = vpop.permute.xlu2 %2375 }
 0x49e   : > { %v2413_v24 = vmul.f32 %v10361_v51, %v2376_v7 }
 0x4bd   : > { %v2378_v28 = vpop.permute.xlu0 %2377 }
 0x4be   : > { %v2414_v1 = vmul.f32 %v10363_v63, %v2378_v28  ;;  %v2299_v28 = vsub.f32 0.0, %v2283_v62 }
 0x4c0   : > { %v7923_v48 = vpack.i.bf16 %v2414_v1, %v2413_v24  ;;  %v2325_v24 = vmul.f32 1.442695, %v2300_v5  ;;  %v10382_v1 = vpop.eup %8026  ;;  %v2323_v31 = vmul.f32 1.442695, %v2299_v28  ;;  %v2276_v28 = vsub.f32 %v10282_v52, %v10337_v22 }
 0x4c1   : > { %v10384_v6 = vpop.eup %8028 }
 0x4c2   : > { %7924 = vrot.lane.b32.xlu1 %v7923_v48, %s13709_s1  ;;  %v10386_v48 = vpop.eup %8030  ;;  %8034 = vpow2.f32 %v2325_v24 }
 0x4c3   : > { %v10391_v34 = vpop.eup %8032  ;;  %8036 = vpow2.f32 %v2323_v31 }
 0x4c4   : > { %8038 = vpow2.f32 %v2319_v14 }
 0x4c5   : > { %v2380_v0 = vpop.permute.xlu0 %2379  ;;  %8040 = vpow2.f32 %v2321_v37 }
 0x4c6   : > { %v2386_v32 = vpop.permute.xlu2 %2385  ;;  %v2415_v21 = vmul.f32 %v10375_v17, %v2380_v0 }
 0x4c7   : > { %v2418_v62 = vmul.f32 %v10382_v1, %v2386_v32  ;;  %v2278_v32 = vsub.f32 %v10294_v15, %v10337_v22 }
 0x4c8   : > { %v10406_v25 = vpop.eup %8034 }
 0x4c9   : > { %v10408_v42 = vpop.eup %8036 }
 0x4cd   : > { %v2368_v58 = vpop.permute.xlu0 %2367  ;;  %v2382_v9 = vpop.permute.xlu1 %2381 }
 0x4ce   : > { %v2416_v7 = vmul.f32 %v10377_v53, %v2382_v9  ;;  %v2374_v19 = vpop.permute.xlu2 %2373  ;;  %v2294_v9 = vsub.f32 0.0, %v2278_v32 }
 0x4cf   : > { %v2412_v59 = vmul.f32 %v10406_v25, %v2374_v19 }
 0x4d0   : > { %v7918_v54 = vpack.i.bf16 %v2416_v7, %v2415_v21  ;;  %v2293_v21 = vsub.f32 0.0, %v2277_v36  ;;  %v2275_v7 = vsub.f32 %v10233_v11, %v10337_v22  ;;  %v2313_v5 = vmul.f32 1.442695, %v2294_v9 }
 0x4d1   : > { %v2292_v11 = vsub.f32 0.0, %v2276_v28 }
 0x4d2   : > { %7919 = vrot.lane.b32.xlu0 %v7918_v54, %s13709_s1  ;;  %v2311_v16 = vmul.f32 1.442695, %v2293_v21  ;;  %v10417_v54 = vpop.eup %8038  ;;  %v2291_v40 = vsub.f32 0.0, %v2275_v7  ;;  %8042 = vpow2.f32 %v2313_v5 }
 0x4d3   : > { %v10419_v24 = vpop.eup %8040  ;;  %v2409_v31 = vmul.f32 %v10417_v54, %v2368_v58 }
 0x4d4   : > { %8044 = vpow2.f32 %v2311_v16 }
 0x4d5   : > { %v2366_v20 = vpop.permute.xlu0 %2365  ;;  %v2384_v8 = vpop.permute.xlu1 %2383 }
 0x4d6   : > { %v2408_v35 = vmul.f32 %v10384_v6, %v2366_v20  ;;  %v2417_v60 = vmul.f32 %v10386_v48, %v2384_v8  ;;  %v2364_v0 = vpop.permute.xlu2 %2363 }
 0x4d7   : > { %v2407_v30 = vmul.f32 %v10391_v34, %v2364_v0 }
 0x4d8   : > { %v7913_v43 = vpack.i.bf16 %v2418_v62, %v2417_v60  ;;  %v2307_v62 = vmul.f32 1.442695, %v2291_v40  ;;  %v2309_v60 = vmul.f32 1.442695, %v2292_v11  ;;  %v10424_v52 = vpop.eup %8042 }
 0x4d9   : > { %v7938_v56 = vpack.i.bf16 %v2408_v35, %v2407_v30 }
 0x4da   : > { %7914 = vrot.lane.b32.xlu2 %v7913_v43, %s13709_s1  ;;  %v8045_v22 = vpop.eup %8044  ;;  %8046 = vpow2.f32 %v2307_v62 }
 0x4db   : > { %7939 = vrot.lane.b32.xlu1 %v7938_v56, %s13709_s1  ;;  %8048 = vpow2.f32 %v2309_v60 }
 0x4dd   : > { %v2372_v45 = vpop.permute.xlu1 %2371  ;;  %v2356_v43 = vpop.permute.xlu0 %2355 }
 0x4de   : > { %v2411_v2 = vmul.f32 %v10408_v42, %v2372_v45  ;;  %v2362_v35 = vpop.permute.xlu2 %2361 }
 0x4df   : > { %v2406_v30 = vmul.f32 %v10424_v52, %v2362_v35 }
 0x4e0   : > { %v7928_v15 = vpack.i.bf16 %v2412_v59, %v2411_v2  ;;  %v8047_v56 = vpop.eup %8046 }
 0x4e1   : > { %v8049_v14 = vpop.eup %8048  ;;  %v2403_v37 = vmul.f32 %v8047_v56, %v2356_v43 }
 0x4e2   : > { %7929 = vrot.lane.b32.xlu2 %v7928_v15, %s13709_s1 }
 0x4e5   : > { %v2370_v19 = vpop.permute.xlu1 %2369 }
 0x4e6   : > { %v2410_v20 = vmul.f32 %v10419_v24, %v2370_v19 }
 0x4e8   : > { %v7933_v8 = vpack.i.bf16 %v2410_v20, %v2409_v31 }
 0x4ea   : > { %7934 = vrot.lane.b32.xlu0 %v7933_v8, %s13709_s1 }
 0x4ed   : > { %v2360_v0 = vpop.permute.xlu1 %2359 }
 0x4ee   : > { %v2405_v58 = vmul.f32 %v8045_v22, %v2360_v0 }
 0x4f0   : > { %v7943_v4 = vpack.i.bf16 %v2406_v30, %v2405_v58 }
 0x4f2   : > { %7944 = vrot.lane.b32.xlu2 %v7943_v4, %s13709_s1 }
 0x4f5   : > { %v2358_v32 = vpop.permute.xlu1 %2357 }
 0x4f6   : > { %v2404_v36 = vmul.f32 %v8049_v14, %v2358_v32 }
 0x4f8   : > { %v7948_v45 = vpack.i.bf16 %v2404_v36, %v2403_v37 }
 0x4fa   : > { %7949 = vrot.lane.b32.xlu0 %v7948_v45, %s13709_s1 }
 0x534   : > { %v7915_v59 = vpop.permute.xlu2 %7914  ;;  %v7925_v5 = vpop.permute.xlu1 %7924 }
 0x535   : > { %v7917_v2 = vunpack.i.h.bf16 %v7915_v59  ;;  %v7916_v9 = vunpack.i.l.bf16 %v7915_v59  ;;  %v7927_v28 = vunpack.i.h.bf16 %v7925_v5  ;;  %v7926_v19 = vunpack.i.l.bf16 %v7925_v5 }
 0x537   : > { %v2497_v21 = vsel %vm13892_vm2, %v7916_v9, %v10386_v48  ;;  %v2498_v15 = vsel %vm13893_vm11, %v7917_v2, %v10382_v1  ;;  %v2493_v1 = vsel %vm13896_vm1, %v7926_v19, %v10361_v51  ;;  %v2494_v60 = vsel %vm13897_vm7, %v7927_v28, %v10363_v63  ;;  %vm13908_vm2 = vmmov %vm13905_vm0 }
 0x538   : > { %v2506_v7 = vpack.c.bf16 %v2498_v15, %v2497_v21  ;;  %v2504_v0 = vpack.c.bf16 %v2494_v60, %v2493_v1  ;;  %vm13909_vm11 = vmmov %vm13905_vm0 }
 0x539   : > { %vm13912_vm1 = vmmov %vm13905_vm0 }
 0x53a   : > { %2507 = vmatpush.bf16.msra.mxu2 %v2506_v7  ;;  %vm13913_vm7 = vmmov %vm13905_vm0 }
 0x53c   : > { %v7930_v20 = vpop.permute.xlu2 %7929 }
 0x53d   : > { %v7932_v48 = vunpack.i.h.bf16 %v7930_v20  ;;  %v7931_v35 = vunpack.i.l.bf16 %v7930_v20 }
 0x53f   : > { %v2491_v30 = vsel %vm13898_vm3, %v7931_v35, %v10408_v42  ;;  %vm13914_vm3 = vmmov %vm13905_vm0 }
 0x544   : > { %v7920_v16 = vpop.permute.xlu0 %7919 }
 0x545   : > { %v7922_v31 = vunpack.i.h.bf16 %v7920_v16  ;;  %v7921_v40 = vunpack.i.l.bf16 %v7920_v16 }
 0x547   : > { %v2495_v11 = vsel %vm13894_vm4, %v7921_v40, %v10375_v17  ;;  %v2496_v8 = vsel %vm13895_vm6, %v7922_v31, %v10377_v53  ;;  %v2492_v17 = vsel %vm13899_vm10, %v7932_v48, %v10406_v25  ;;  %vm13910_vm4 = vmmov %vm13905_vm0 }
 0x548   : > { %v2505_v62 = vpack.c.bf16 %v2496_v8, %v2495_v11  ;;  %v2503_v58 = vpack.c.bf16 %v2492_v17, %v2491_v30  ;;  %vm13911_vm6 = vmmov %vm13905_vm0 }
 0x549   : > { %vm13915_vm10 = vmmov %vm13905_vm0 }
 0x54a   : > { %2508 = vmatpush.bf16.msra.mxu2 %v2505_v62 }
 0x54c   : > { %v7945_v36 = vpop.permute.xlu2 %7944 }
 0x54d   : > { %v7940_v53 = vpop.permute.xlu1 %7939  ;;  %v7947_v59 = vunpack.i.h.bf16 %v7945_v36  ;;  %v7946_v2 = vunpack.i.l.bf16 %v7945_v36 }
 0x54e   : > { %2509 = vmatpush.bf16.msra.mxu2 %v2504_v0  ;;  %v7942_v43 = vunpack.i.h.bf16 %v7940_v53  ;;  %v7941_v32 = vunpack.i.l.bf16 %v7940_v53 }
 0x54f   : > { %v2485_v15 = vsel %vm13904_vm8, %v7946_v2, %v8045_v22  ;;  %v2486_v7 = vsel %vm13905_vm0, %v7947_v59, %v10424_v52  ;;  %vm13923_vm8 = vmmov %vm13905_vm0 }
 0x550   : > { %v2487_v25 = vsel %vm13902_vm13, %v7941_v32, %v10391_v34  ;;  %v2488_v9 = vsel %vm13903_vm15, %v7942_v43, %v10384_v6  ;;  %vm13920_vm13 = vmmov %vm13905_vm0 }
 0x551   : > { %v2501_v21 = vpack.c.bf16 %v2488_v9, %v2487_v25  ;;  %vm13921_vm15 = vmmov %vm13905_vm0 }
 0x552   : > { %2510 = vmatpush.bf16.msra.mxu2 %v2503_v58 }
 0x55c   : > { %v7935_v4 = vpop.permute.xlu0 %7934 }
 0x55d   : > { %v7937_v37 = vunpack.i.h.bf16 %v7935_v4  ;;  %v7936_v51 = vunpack.i.l.bf16 %v7935_v4 }
 0x55f   : > { %v2489_v63 = vsel %vm13900_vm12, %v7936_v51, %v10417_v54  ;;  %v2490_v45 = vsel %vm13901_vm14, %v7937_v37, %v10419_v24  ;;  %v2500_v54 = vpack.c.bf16 %v2486_v7, %v2485_v15  ;;  %v7600_v7 = vld [vmem:[%s13392_s6 + $0x34] sm:$0xf]  ;;  %vm13917_vm12 = vmmov %vm13905_vm0 }
 0x560   : > { %v2502_v42 = vpack.c.bf16 %v2490_v45, %v2489_v63  ;;  %vm13918_vm14 = vmmov %vm13905_vm0 }
 0x562   : > { %2511 = vmatpush.bf16.msra.mxu2 %v2502_v42 }
 0x566   : > { %2512 = vmatpush.bf16.msra.mxu2 %v2501_v21 }
 0x56a   : > { %2513 = vmatpush.bf16.msra.mxu2 %v2500_v54  ;;  %v6733_v54 = vld [vmem:[%s13392_s6 + $0x38] sm:$0xf0] }
 0x56c   : > { %v7950_v24 = vpop.permute.xlu0 %7949 }
 0x56d   : > { %v7952_v5 = vunpack.i.h.bf16 %v7950_v24  ;;  %v7951_v16 = vunpack.i.l.bf16 %v7950_v24  ;;  %v6736_v24 = vor.u32 %v7600_v7, %v6733_v54 }
 0x56f   : > { %v2483_v28 = vsel %vm13906_vm9, %v7951_v16, %v8047_v56  ;;  %v2484_v34 = vsel %vm13907_vm5, %v7952_v5, %v8049_v14  ;;  %3032 = vmatpush.bf16.msrb.mxu1 %v6736_v24  ;;  %v6707_v24 = vld [vmem:[%s13392_s6] sm:$0xf]  ;;  %vm13926_vm9 = vmmov %vm13905_vm0 }
 0x570   : > { %v2499_v19 = vpack.c.bf16 %v2484_v34, %v2483_v28  ;;  %v6731_v34 = vld [vmem:[%s13392_s6 + $0x30] sm:$0xf]  ;;  %vm13927_vm5 = vmmov %vm13905_vm0 }
 0x572   : > { %2514 = vmatpush.bf16.msra.mxu2 %v2499_v19  ;;  %v7601_v19 = vld [vmem:[%s13392_s6 + $0x34] sm:$0xf0] }
 0x575   : > { %2515 = vmatmul.bf16.vlgmr.msra.gmra.mxu2 %v9609_v57 }
 0x585   : > { %2520 = vmatmul.bf16.gmra.mxu2 %v9672_v13 }
 0x595   : > { %2525 = vmatmul.bf16.gmra.mxu2 %v9735_v12  ;;  %v13978_v12 = vld [vmem:[#allocation80_spill] sm:$0xff] }
 0x5a5   : > { %2530 = vmatmul.bf16.gmra.mxu2 %v9798_v23 }
 0x5b5   : > { %2535 = vmatmul.bf16.gmra.mxu2 %v9847_v61 }
 0x5c5   : > { %2540 = vmatmul.bf16.gmra.mxu2 %v9880_v47 }
 0x5d5   : > { %2545 = vmatmul.bf16.gmra.mxu2 %v9903_v26 }
 0x5e5   : > { %2550 = vmatmul.bf16.gmra.mxu2 %v9914_v10 }
 0x5f8   : > { %v10466_v6 = vpop.f32.mrf.mxu2 }
 0x5f9   : > { %v2556_v52 = vadd.f32 1e-30, %v10466_v6 }
 0x5fb   : > { %8050 = vrcp.f32 %v2556_v52  ;;  %v6732_v52 = vor.u32 %v7601_v19, %v6731_v34  ;;  %v6709_v34 = vld [vmem:[%s13392_s6 + $0x8] sm:$0xf0] }
 0x5fd   : > { %2983 = vmatpush.bf16.msra.mxu3 %v6732_v52 }
 0x600   : > { %v10469_v22 = vpop.f32.mrf.mxu2 }
 0x601   : > { %v8051_v56 = vpop.eup %8050  ;;  %v2557_v14 = vadd.f32 1e-30, %v10469_v22 }
 0x602   : > { %2604 = vrot.lane.b32.xlu1 %v8051_v56, %s13709_s1 }
 0x603   : > { %8052 = vrcp.f32 %v2557_v14 }
 0x608   : > { %v10473_v31 = vpop.f32.mrf.mxu2 }
 0x609   : > { %v8053_v40 = vpop.eup %8052  ;;  %v2558_v20 = vadd.f32 1e-30, %v10473_v31 }
 0x60a   : > { %2606 = vrot.lane.b32.xlu2 %v8053_v40, %s13709_s1 }
 0x60b   : > { %8054 = vrcp.f32 %v2558_v20 }
 0x610   : > { %v10477_v11 = vpop.f32.mrf.mxu2 }
 0x611   : > { %v8055_v8 = vpop.eup %8054  ;;  %v2559_v62 = vadd.f32 1e-30, %v10477_v11 }
 0x612   : > { %2608 = vrot.lane.b32.xlu0 %v8055_v8, %s13709_s1 }
 0x613   : > { %8056 = vrcp.f32 %v2559_v62  ;;  %v6723_v62 = vld [vmem:[%s13392_s6 + $0x20] sm:$0xf] }
 0x618   : > { %v10481_v48 = vpop.f32.mrf.mxu2 }
 0x619   : > { %v8057_v35 = vpop.eup %8056  ;;  %v2560_v1 = vadd.f32 1e-30, %v10481_v48 }
 0x61a   : > { %2610 = vrot.lane.b32.xlu1 %v8057_v35, %s13709_s1  ;;  %v7599_v35 = vld [vmem:[%s13392_s6 + $0x24] sm:$0xf0] }
 0x61b   : > { %8058 = vrcp.f32 %v2560_v1  ;;  %v7598_v1 = vld [vmem:[%s13392_s6 + $0x24] sm:$0xf] }
 0x620   : > { %v10485_v60 = vpop.f32.mrf.mxu2 }
 0x621   : > { %v8059_v0 = vpop.eup %8058  ;;  %v2561_v30 = vadd.f32 1e-30, %v10485_v60 }
 0x622   : > { %2612 = vrot.lane.b32.xlu2 %v8059_v0, %s13709_s1  ;;  %v6724_v0 = vor.u32 %v7599_v35, %v6723_v62 }
 0x623   : > { %8060 = vrcp.f32 %v2561_v30  ;;  %v6725_v30 = vld [vmem:[%s13392_s6 + $0x28] sm:$0xf0] }
 0x624   : > { %2984 = vmatpush.bf16.msra.mxu3 %v6724_v0 }
 0x628   : > { %v10489_v17 = vpop.f32.mrf.mxu2 }
 0x629   : > { %v8061_v58 = vpop.eup %8060  ;;  %v2562_v53 = vadd.f32 1e-30, %v10489_v17 }
 0x62a   : > { %2614 = vrot.lane.b32.xlu0 %v8061_v58, %s13709_s1  ;;  %v7597_v58 = vld [vmem:[%s13392_s6 + $0x14] sm:$0xf0] }
 0x62b   : > { %8062 = vrcp.f32 %v2562_v53  ;;  %v6728_v53 = vor.u32 %v7598_v1, %v6725_v30 }
 0x62d   : > { %3033 = vmatpush.bf16.msrb.mxu1 %v6728_v53 }
 0x630   : > { %v10493_v4 = vpop.f32.mrf.mxu2 }
 0x631   : > { %v8063_v43 = vpop.eup %8062  ;;  %v2563_v32 = vadd.f32 1e-30, %v10493_v4 }
 0x632   : > { %2616 = vrot.lane.b32.xlu1 %v8063_v43, %s13709_s1  ;;  %v7596_v43 = vld [vmem:[%s13392_s6 + $0x14] sm:$0xf] }
 0x633   : > { %8064 = vrcp.f32 %v2563_v32  ;;  %v6717_v32 = vld [vmem:[%s13392_s6 + $0x18] sm:$0xf0] }
 0x638   : > { %v10497_v37 = vpop.f32.mrf.mxu2 }
 0x639   : > { %v8065_v51 = vpop.eup %8064  ;;  %v2564_v36 = vadd.f32 1e-30, %v10497_v37 }
 0x63a   : > { %2618 = vrot.lane.b32.xlu2 %v8065_v51, %s13709_s1 }
 0x63b   : > { %8066 = vrcp.f32 %v2564_v36 }
 0x640   : > { %v10501_v63 = vpop.f32.mrf.mxu2 }
 0x641   : > { %v8067_v45 = vpop.eup %8066  ;;  %v2565_v42 = vadd.f32 1e-30, %v10501_v63 }
 0x642   : > { %2620 = vrot.lane.b32.xlu0 %v8067_v45, %s13709_s1 }
 0x643   : > { %8068 = vrcp.f32 %v2565_v42  ;;  %v8275_v42 = vld [vmem:[%s13391_s5] sm:$0x3f] }
 0x644   : > { %v10568_v7 = vperm.slane %v8275_v42, 4 }
 0x648   : > { %v10505_v59 = vpop.f32.mrf.mxu2 }
 0x649   : > { %v8069_v2 = vpop.eup %8068  ;;  %v2566_v25 = vadd.f32 1e-30, %v10505_v59 }
 0x64a   : > { %2622 = vrot.lane.b32.xlu1 %v8069_v2, %s13709_s1  ;;  %v10563_v2 = vperm.slane %v8275_v42, 3 }
 0x64b   : > { %8070 = vrcp.f32 %v2566_v25 }
 0x650   : > { %v10509_v9 = vpop.f32.mrf.mxu2 }
 0x651   : > { %v8071_v21 = vpop.eup %8070  ;;  %v2567_v15 = vadd.f32 1e-30, %v10509_v9 }
 0x652   : > { %2624 = vrot.lane.b32.xlu2 %v8071_v21, %s13709_s1 }
 0x653   : > { %8072 = vrcp.f32 %v2567_v15  ;;  %v6720_v15 = vor.u32 %v7596_v43, %v6717_v32 }
 0x655   : > { %3034 = vmatpush.bf16.msrb.mxu1 %v6720_v15 }
 0x658   : > { %v10519_v5 = vpop.f32.mrf.mxu2 }
 0x659   : > { %v8073_v16 = vpop.eup %8072  ;;  %v2568_v28 = vadd.f32 1e-30, %v10519_v5 }
 0x65a   : > { %2626 = vrot.lane.b32.xlu0 %v8073_v16, %s13709_s1  ;;  %v7594_v16 = vld [vmem:[%s13392_s6 + $0x4] sm:$0xf] }
 0x65b   : > { %8074 = vrcp.f32 %v2568_v28  ;;  %v6712_v19 = vor.u32 %v7594_v16, %v6709_v34 }
 0x65d   : > { %3035 = vmatpush.bf16.msrb.mxu1 %v6712_v19 }
 0x660   : > { %v10529_v56 = vpop.f32.mrf.mxu2 }
 0x661   : > { %v8075_v14 = vpop.eup %8074  ;;  %v2569_v40 = vadd.f32 1e-30, %v10529_v56 }
 0x662   : > { %2628 = vrot.lane.b32.xlu1 %v8075_v14, %s13709_s1 }
 0x663   : > { %8076 = vrcp.f32 %v2569_v40  ;;  %v10585_v40 = vperm.slane %v8275_v42, 5 }
 0x664   : > { %v2607_v20 = vpop.permute.xlu2 %2606 }
 0x665   : > { %v2653_v8 = vmul.f32 %v2607_v20, %v10469_v22  ;;  %v6715_v22 = vld [vmem:[%s13392_s6 + $0x10] sm:$0xf] }
 0x666   : > { %v6716_v36 = vor.u32 %v7597_v58, %v6715_v22 }
 0x667   : > { %v2669_v25 = vadd.f32 %v2653_v8, %v13830_v50  ;;  %v7595_v50 = vld [vmem:[%s13392_s6 + $0x4] sm:$0xf0] }
 0x668   : > { %v10558_v51 = vpop.f32.mrf.mxu2  ;;  %2985 = vmatpush.bf16.msra.mxu3 %v6716_v36  ;;  %v6708_v28 = vor.u32 %v7595_v50, %v6707_v24 }
 0x669   : > { %v8077_v45 = vpop.eup %8076  ;;  %v2570_v21 = vadd.f32 1e-30, %v10558_v51  ;;  %v2686_v54 = vadd.f32 %v10563_v2, %v2669_v25 }
 0x66a   : > { %2630 = vrot.lane.b32.xlu2 %v8077_v45, %s13709_s1 }
 0x66b   : > { %8078 = vrcp.f32 %v2570_v21  ;;  %v2703_v20 = vmul.f32 %v10568_v7, %v2686_v54 }
 0x66c   : > { %2986 = vmatpush.bf16.msra.mxu3 %v6708_v28 }
 0x66d   : > { %v2720_v35 = vadd.f32 %v10585_v40, %v2703_v20 }
 0x66f   : > { %v2736_v58 = vmul.f32 0.2, %v2720_v35 }
 0x670   : > { %v10583_v52 = vpop.f32.mrf.mxu2 }
 0x671   : > { %v8079_v14 = vpop.eup %8078  ;;  %v2571_v8 = vadd.f32 1e-30, %v10583_v52  ;;  %v2752_v32 = vmax.f32 %v2720_v35, %v2736_v58 }
 0x672   : > { %2632 = vrot.lane.b32.xlu0 %v8079_v14, %s13709_s1 }
 0x673   : > { %8080 = vrcp.f32 %v2571_v8  ;;  %v2768_v42 = vpack.c.bf16 %v2752_v32, %v2752_v32 }
 0x674   : > { %v2605_v62 = vpop.permute.xlu1 %2604 }
 0x675   : > { %v2652_v1 = vmul.f32 %v2605_v62, %v10466_v6 }
 0x677   : > { %v2668_v0 = vadd.f32 %v2652_v1, %v9994_v41  ;;  %v2892_v41 = vunpack.c.l.b16 %v2768_v42 }
 0x679   : > { %v8081_v30 = vpop.eup %8080  ;;  %v2685_v22 = vadd.f32 %v10563_v2, %v2668_v0 }
 0x67a   : > { %2634 = vrot.lane.b32.xlu1 %v8081_v30, %s13709_s1 }
 0x67b   : > { %v2702_v53 = vmul.f32 %v10568_v7, %v2685_v22 }
 0x67c   : > { %v2613_v50 = vpop.permute.xlu2 %2612 }
 0x67d   : > { %v2719_v43 = vadd.f32 %v10585_v40, %v2702_v53  ;;  %v2656_v34 = vmul.f32 %v2613_v50, %v10481_v48 }
 0x67f   : > { %v2735_v36 = vmul.f32 0.2, %v2719_v43  ;;  %v2672_v20 = vadd.f32 %v2656_v34, %v10044_v39 }
 0x681   : > { %v2751_v45 = vmax.f32 %v2719_v43, %v2735_v36  ;;  %v2689_v1 = vadd.f32 %v10563_v2, %v2672_v20 }
 0x683   : > { %v2767_v25 = vpack.c.bf16 %v2751_v45, %v2751_v45 }
 0x684   : > { %v2609_v21 = vpop.permute.xlu0 %2608 }
 0x685   : > { %v2654_v6 = vmul.f32 %v2609_v21, %v10473_v31  ;;  %v2891_v15 = vunpack.c.l.b16 %v2767_v25 }
 0x687   : > { %v2670_v54 = vadd.f32 %v2654_v6, %v10048_v3  ;;  %v2907_v24 = vpack.c.b16 %v2892_v41, %v2891_v15 }
 0x689   : > { %v2687_v16 = vadd.f32 %v10563_v2, %v2670_v54  ;;  %6737 = vmatmul.msk.bf16.vlgmr.msra.gmra.mxu3 %vm13908_vm2, %v2907_v24  ;;  %6745 = vmatmul.msk.bf16.vlgmr.msrb.gmra.mxu1 %vm13909_vm11, %v2907_v24  ;;  %vm13928_vm2 = vmmov %vm13905_vm0 }
 0x68a   : > { %3487 = vrot.lane.b32.xlu2 %v2907_v24, %s13709_s1  ;;  %vm13931_vm11 = vmmov %vm13905_vm0 }
 0x68b   : > { %v2704_v28 = vmul.f32 %v10568_v7, %v2687_v16 }
 0x68c   : > { %v2611_v19 = vpop.permute.xlu1 %2610 }
 0x68d   : > { %v2721_v31 = vadd.f32 %v10585_v40, %v2704_v28  ;;  %v2655_v14 = vmul.f32 %v2611_v19, %v10477_v11  ;;  %v2706_v11 = vmul.f32 %v10568_v7, %v2689_v1 }
 0x68f   : > { %v2671_v3 = vadd.f32 %v2655_v14, %v10018_v29  ;;  %v2737_v62 = vmul.f32 0.2, %v2721_v31  ;;  %v2723_v32 = vadd.f32 %v10585_v40, %v2706_v11  ;;  %v7628_v11 = vld [vmem:[%s13394_s8 + $0xcc] sm:$0xf0] }
 0x691   : > { %v2688_v8 = vadd.f32 %v10563_v2, %v2671_v3  ;;  %v2753_v22 = vmax.f32 %v2721_v31, %v2737_v62 }
 0x693   : > { %v2705_v35 = vmul.f32 %v10568_v7, %v2688_v8  ;;  %v2769_v39 = vpack.c.bf16 %v2753_v22, %v2753_v22 }
 0x694   : > { %v2619_v0 = vpop.permute.xlu2 %2618 }
 0x695   : > { %v2722_v30 = vadd.f32 %v10585_v40, %v2705_v35  ;;  %v2659_v48 = vmul.f32 %v2619_v0, %v10493_v4  ;;  %v2893_v25 = vunpack.c.l.b16 %v2769_v39 }
 0x697   : > { %v2738_v58 = vmul.f32 0.2, %v2722_v30  ;;  %v2675_v29 = vadd.f32 %v2659_v48, %v10073_v46  ;;  %v2739_v46 = vmul.f32 0.2, %v2723_v32 }
 0x699   : > { %v2754_v53 = vmax.f32 %v2722_v30, %v2738_v58  ;;  %v2692_v45 = vadd.f32 %v10563_v2, %v2675_v29  ;;  %v2755_v16 = vmax.f32 %v2723_v32, %v2739_v46  ;;  %v6851_v58 = vld [vmem:[%s13394_s8 + $0xc0] sm:$0xf] }
 0x69a   : > { %v6852_v39 = vor.u32 %v7628_v11, %v6851_v58  ;;  %v7604_v58 = vld [vmem:[%s13394_s8 + $0xc] sm:$0xf0] }
 0x69b   : > { %v2770_v43 = vpack.c.bf16 %v2754_v53, %v2754_v53  ;;  %v2709_v15 = vmul.f32 %v10568_v7, %v2692_v45  ;;  %v2771_v3 = vpack.c.bf16 %v2755_v16, %v2755_v16 }
 0x69c   : > { %v2615_v36 = vpop.permute.xlu0 %2614 }
 0x69d   : > { %v2657_v42 = vmul.f32 %v2615_v36, %v10485_v60  ;;  %v2894_v21 = vunpack.c.l.b16 %v2770_v43  ;;  %v2726_v60 = vadd.f32 %v10585_v40, %v2709_v15  ;;  %v2895_v35 = vunpack.c.l.b16 %v2771_v3 }
 0x69f   : > { %v2673_v4 = vadd.f32 %v2657_v42, %v10075_v44  ;;  %v2908_v6 = vpack.c.b16 %v2894_v21, %v2893_v25  ;;  %v2742_v19 = vmul.f32 0.2, %v2726_v60  ;;  %v6835_v25 = vld [vmem:[%s13394_s8 + $0xa0] sm:$0xf]  ;;  %v7624_v21 = vld [vmem:[%s13394_s8 + $0xac] sm:$0xf0] }
 0x6a1   : > { %v2690_v41 = vadd.f32 %v10563_v2, %v2673_v4  ;;  %6738 = vmatmul.msk.bf16.gmra.mxu3 %vm13910_vm4, %v2908_v6  ;;  %6746 = vmatmul.msk.bf16.gmra.mxu1 %vm13911_vm6, %v2908_v6  ;;  %v2758_v0 = vmax.f32 %v2726_v60, %v2742_v19  ;;  %v6836_v4 = vor.u32 %v7624_v21, %v6835_v25  ;;  %v7616_v19 = vld [vmem:[%s13394_s8 + $0x6c] sm:$0xf0]  ;;  %vm13935_vm4 = vmmov %vm13905_vm0 }
 0x6a2   : > { %3489 = vrot.lane.b32.xlu0 %v2908_v6, %s13709_s1  ;;  %vm13946_vm6 = vmmov %vm13905_vm0 }
 0x6a3   : > { %v2707_v54 = vmul.f32 %v10568_v7, %v2690_v41  ;;  %v2774_v53 = vpack.c.bf16 %v2758_v0, %v2758_v0  ;;  %v6819_v41 = vld [vmem:[%s13394_s8 + $0x80] sm:$0xf] }
 0x6a4   : > { %v2617_v24 = vpop.permute.xlu1 %2616 }
 0x6a5   : > { %v2724_v50 = vadd.f32 %v10585_v40, %v2707_v54  ;;  %v2658_v44 = vmul.f32 %v2617_v24, %v10489_v17  ;;  %v7632_v17 = vld [vmem:[%s13394_s8 + $0xec] sm:$0xf0]  ;;  %v2898_v42 = vunpack.c.l.b16 %v2774_v53 }
 0x6a7   : > { %v2674_v28 = vadd.f32 %v2658_v44, %v13831_v38  ;;  %v2740_v34 = vmul.f32 0.2, %v2724_v50  ;;  %v6867_v38 = vld [vmem:[%s13394_s8 + $0xe0] sm:$0xf] }
 0x6a8   : > { %v6868_v22 = vor.u32 %v7632_v17, %v6867_v38 }
 0x6a9   : > { %v2691_v31 = vadd.f32 %v10563_v2, %v2674_v28  ;;  %v2756_v14 = vmax.f32 %v2724_v50, %v2740_v34  ;;  %v6803_v34 = vld [vmem:[%s13394_s8 + $0x60] sm:$0xf] }
 0x6aa   : > { %4127 = vmatpush.bf16.msrb.mxu2 %v6868_v22  ;;  %v6755_v22 = vld [vmem:[%s13394_s8] sm:$0xf] }
 0x6ab   : > { %v2708_v20 = vmul.f32 %v10568_v7, %v2691_v31  ;;  %v2772_v8 = vpack.c.bf16 %v2756_v14, %v2756_v14  ;;  %v6804_v14 = vor.u32 %v7616_v19, %v6803_v34 }
 0x6ac   : > { %v2625_v46 = vpop.permute.xlu2 %2624 }
 0x6ad   : > { %v2725_v62 = vadd.f32 %v10585_v40, %v2708_v20  ;;  %v2896_v1 = vunpack.c.l.b16 %v2772_v8  ;;  %v6771_v8 = vld [vmem:[%s13394_s8 + $0x20] sm:$0xf] }
 0x6ae   : > { %4128 = vmatpush.bf16.msrb.mxu2 %v6852_v39 }
 0x6af   : > { %v2741_v30 = vmul.f32 0.2, %v2725_v62  ;;  %v2909_v48 = vpack.c.b16 %v2896_v1, %v2895_v35 }
 0x6b1   : > { %6739 = vmatmul.msk.bf16.gmra.mxu3 %vm13912_vm1, %v2909_v48  ;;  %6747 = vmatmul.msk.bf16.gmra.mxu1 %vm13913_vm7, %v2909_v48  ;;  %v2757_v29 = vmax.f32 %v2725_v62, %v2741_v30  ;;  %v7608_v62 = vld [vmem:[%s13394_s8 + $0x2c] sm:$0xf0]  ;;  %vm13953_vm1 = vmmov %vm13905_vm0 }
 0x6b2   : > { %3491 = vrot.lane.b32.xlu1 %v2909_v48, %s13709_s1  ;;  %4129 = vmatpush.bf16.msrb.mxu2 %v6836_v4  ;;  %v6772_v38 = vor.u32 %v7608_v62, %v6771_v8  ;;  %v13916_v4 = vld [vmem:[#allocation35_spill] sm:$0xff]  ;;  %vm13956_vm7 = vmmov %vm13905_vm0 }
 0x6b3   : > { %v2773_v43 = vpack.c.bf16 %v2757_v29, %v2757_v29 }
 0x6b4   : > { %v2621_v32 = vpop.permute.xlu0 %2620 }
 0x6b5   : > { %v2660_v36 = vmul.f32 %v2621_v32, %v10497_v37  ;;  %v2897_v45 = vunpack.c.l.b16 %v2773_v43  ;;  %v7620_v37 = vld [vmem:[%s13394_s8 + $0x8c] sm:$0xf0] }
 0x6b6   : > { %v6820_v24 = vor.u32 %v7620_v37, %v6819_v41 }
 0x6b7   : > { %v2676_v6 = vadd.f32 %v2660_v36, %v10098_v27  ;;  %v2910_v15 = vpack.c.b16 %v2898_v42, %v2897_v45  ;;  %v2662_v27 = vmul.f32 %v2625_v46, %v10505_v59  ;;  %v6787_v59 = vld [vmem:[%s13394_s8 + $0x40] sm:$0xf] }
 0x6b8   : > { %4130 = vmatpush.bf16.msrb.mxu2 %v6820_v24 }
 0x6b9   : > { %v2693_v54 = vadd.f32 %v10563_v2, %v2676_v6  ;;  %3493 = vrot.lane.b32.xlu2 %v2910_v15, %s13709_s1  ;;  %v2678_v31 = vadd.f32 %v2662_v27, %v13841_v33 }
 0x6bb   : > { %v2710_v60 = vmul.f32 %v10568_v7, %v2693_v54  ;;  %v2695_v35 = vadd.f32 %v10563_v2, %v2678_v31 }
 0x6bc   : > { %v2623_v50 = vpop.permute.xlu1 %2622  ;;  %4131 = vmatpush.bf16.msrb.mxu2 %v6804_v14 }
 0x6bd   : > { %v2727_v44 = vadd.f32 %v10585_v40, %v2710_v60  ;;  %v2661_v16 = vmul.f32 %v2623_v50, %v10501_v63  ;;  %v7612_v63 = vld [vmem:[%s13394_s8 + $0x4c] sm:$0xf0]  ;;  %v2712_v11 = vmul.f32 %v10568_v7, %v2695_v35  ;;  %v13919_v50 = vld [vmem:[#allocation70_spill] sm:$0xff] }
 0x6be   : > { %v6788_v20 = vor.u32 %v7612_v63, %v6787_v59 }
 0x6bf   : > { %v2677_v28 = vadd.f32 %v2661_v16, %v13834_v49  ;;  %v2743_v3 = vmul.f32 0.2, %v2727_v44  ;;  %v2729_v32 = vadd.f32 %v10585_v40, %v2712_v11 }
 0x6c0   : > { %4132 = vmatpush.bf16.msrb.mxu2 %v6788_v20 }
 0x6c1   : > { %v2694_v49 = vadd.f32 %v10563_v2, %v2677_v28  ;;  %6740 = vmatmul.msk.bf16.gmra.mxu3 %vm13914_vm3, %v2910_v15  ;;  %6748 = vmatmul.msk.bf16.gmra.mxu1 %vm13915_vm10, %v2910_v15  ;;  %v2759_v48 = vmax.f32 %v2727_v44, %v2743_v3  ;;  %v2745_v37 = vmul.f32 0.2, %v2729_v32  ;;  %vm13959_vm3 = vmmov %vm13905_vm0 }
 0x6c2   : > { %vm13962_vm10 = vmmov %vm13905_vm0 }
 0x6c3   : > { %v2711_v33 = vmul.f32 %v10568_v7, %v2694_v49  ;;  %v2775_v39 = vpack.c.bf16 %v2759_v48, %v2759_v48  ;;  %v2761_v27 = vmax.f32 %v2729_v32, %v2745_v37 }
 0x6c4   : > { %v2631_v1 = vpop.permute.xlu2 %2630  ;;  %4133 = vmatpush.bf16.msrb.mxu2 %v6772_v38 }
 0x6c5   : > { %v2728_v0 = vadd.f32 %v10585_v40, %v2711_v33  ;;  %v2665_v30 = vmul.f32 %v2631_v1, %v10529_v56  ;;  %v6756_v56 = vor.u32 %v7604_v58, %v6755_v22  ;;  %v2899_v25 = vunpack.c.l.b16 %v2775_v39  ;;  %v13925_v58 = vld [vmem:[#allocation74_spill] sm:$0xff] }
 0x6c6   : > { %v2777_v31 = vpack.c.bf16 %v2761_v27, %v2761_v27 }
 0x6c7   : > { %v2744_v17 = vmul.f32 0.2, %v2728_v0  ;;  %v2681_v29 = vadd.f32 %v2665_v30, %v13849_v18  ;;  %v13922_v30 = vld [vmem:[#allocation34_spill] sm:$0xff] }
 0x6c8   : > { %4134 = vmatpush.bf16.msrb.mxu2 %v6756_v56  ;;  %v2901_v49 = vunpack.c.l.b16 %v2777_v31  ;;  %v13938_v31 = vld [vmem:[#allocation9_spill] sm:$0xff] }
 0x6c9   : > { %v2760_v53 = vmax.f32 %v2728_v0, %v2744_v17  ;;  %v2698_v45 = vadd.f32 %v10563_v2, %v2681_v29 }
 0x6cb   : > { %v2776_v43 = vpack.c.bf16 %v2760_v53, %v2760_v53  ;;  %v2715_v18 = vmul.f32 %v10568_v7, %v2698_v45 }
 0x6cc   : > { %v2627_v36 = vpop.permute.xlu0 %2626 }
 0x6cd   : > { %v2663_v42 = vmul.f32 %v2627_v36, %v10509_v9  ;;  %v2900_v21 = vunpack.c.l.b16 %v2776_v43  ;;  %v2732_v54 = vadd.f32 %v10585_v40, %v2715_v18 }
 0x6cf   : > { %v2679_v6 = vadd.f32 %v2663_v42, %v13916_v4  ;;  %v2911_v15 = vpack.c.b16 %v2900_v21, %v2899_v25  ;;  %v2748_v28 = vmul.f32 0.2, %v2732_v54 }
 0x6d1   : > { %v2696_v41 = vadd.f32 %v10563_v2, %v2679_v6  ;;  %6741 = vmatmul.msk.bf16.gmra.mxu3 %vm13917_vm12, %v2911_v15  ;;  %6749 = vmatmul.msk.bf16.gmra.mxu1 %vm13918_vm14, %v2911_v15  ;;  %v2764_v20 = vmax.f32 %v2732_v54, %v2748_v28  ;;  %v13936_v28 = vld [vmem:[#allocation11_spill] sm:$0xff]  ;;  %vm5359_vm12 = vcmask 1040384   ;;  %vm6568_vm14 = vcmask 320512  }
 0x6d2   : > { %3495 = vrot.lane.b32.xlu0 %v2911_v15, %s13709_s1 }
 0x6d3   : > { %v2713_v46 = vmul.f32 %v10568_v7, %v2696_v41  ;;  %v2780_v62 = vpack.c.bf16 %v2764_v20, %v2764_v20  ;;  %v13942_v20 = vld [vmem:[#allocation39_spill] sm:$0xff] }
 0x6d4   : > { %v2629_v9 = vpop.permute.xlu1 %2628 }
 0x6d5   : > { %v2730_v24 = vadd.f32 %v10585_v40, %v2713_v46  ;;  %v2664_v60 = vmul.f32 %v2629_v9, %v10519_v5  ;;  %v2904_v22 = vunpack.c.l.b16 %v2780_v62  ;;  %v13930_v46 = vld [vmem:[#allocation45_spill] sm:$0xff] }
 0x6d6   : > { %v13944_v62 = vld [vmem:[#allocation49_spill] sm:$0xff] }
 0x6d7   : > { %v2680_v44 = vadd.f32 %v2664_v60, %v13919_v50  ;;  %v2746_v16 = vmul.f32 0.2, %v2730_v24  ;;  %v13934_v50 = vld [vmem:[#allocation57_spill] sm:$0xff] }
 0x6d9   : > { %v2697_v34 = vadd.f32 %v10563_v2, %v2680_v44  ;;  %v2762_v19 = vmax.f32 %v2730_v24, %v2746_v16 }
 0x6db   : > { %v2714_v14 = vmul.f32 %v10568_v7, %v2697_v34  ;;  %v2778_v59 = vpack.c.bf16 %v2762_v19, %v2762_v19  ;;  %v13937_v34 = vld [vmem:[#allocation37_spill] sm:$0xff] }
 0x6dc   : > { %v2785_v19 = vmul.f32 %v13937_v34, %v13936_v28 }
 0x6dd   : > { %v2731_v63 = vadd.f32 %v10585_v40, %v2714_v14  ;;  %v2902_v3 = vunpack.c.l.b16 %v2778_v59  ;;  %v13939_v14 = vld [vmem:[#allocation36_spill] sm:$0xff] }
 0x6de   : > { %v2802_v59 = vmul.f32 %v13939_v14, %v13938_v31 }
 0x6df   : > { %v2747_v33 = vmul.f32 0.2, %v2731_v63  ;;  %v2912_v8 = vpack.c.b16 %v2902_v3, %v2901_v49  ;;  %v13941_v3 = vld [vmem:[#allocation21_spill] sm:$0xff] }
 0x6e1   : > { %6742 = vmatmul.msk.bf16.gmra.mxu3 %vm13920_vm13, %v2912_v8  ;;  %6750 = vmatmul.msk.bf16.gmra.mxu1 %vm13921_vm15, %v2912_v8  ;;  %v2763_v5 = vmax.f32 %v2731_v63, %v2747_v33  ;;  %v13940_v63 = vld [vmem:[#allocation19_spill] sm:$0xff]  ;;  %v2835_v33 = vmul.f32 %v13942_v20, %v13941_v3 }
 0x6e2   : > { %3497 = vrot.lane.b32.xlu1 %v2912_v8, %s13709_s1  ;;  %v2806_v49 = vmul.f32 %v13939_v14, %v13940_v63  ;;  %v13943_v8 = vld [vmem:[#allocation7_spill] sm:$0xff]  ;;  %v13965_v63 = vld [vmem:[#allocation8_spill] sm:$0xff] }
 0x6e3   : > { %v2779_v35 = vpack.c.bf16 %v2763_v5, %v2763_v5  ;;  %v2789_v5 = vmul.f32 %v13937_v34, %v13943_v8 }
 0x6e4   : > { %v3488_v1 = vpop.permute.xlu2 %3487  ;;  %v2633_v0 = vpop.permute.xlu0 %2632 }
 0x6e5   : > { %v10725_v48 = vsel %vm13923_vm8, %v13922_v30, %v3488_v1  ;;  %v2666_v38 = vmul.f32 %v2633_v0, %v10558_v51  ;;  %v2903_v17 = vunpack.c.l.b16 %v2779_v35  ;;  %v2839_v35 = vmul.f32 %v13942_v20, %v13944_v62 }
 0x6e6   : > { %13924 = vst [vmem:[#allocation89_spill] sm:$0xff] %v10725_v48  ;;  %4135 = vmatmul.bf16.vlgmr.msrb.gmra.mxu2 %v10725_v48  ;;  %v2818_v1 = vadd.f32 %v2802_v59, %v2785_v19  ;;  %v2822_v0 = vadd.f32 %v2806_v49, %v2789_v5  ;;  %v7633_v59 = vld [vmem:[%s13394_s8 + $0xf4] sm:$0xf0]  ;;  %v6859_v49 = vld [vmem:[%s13394_s8 + $0xc8] sm:$0xf] }
 0x6e7   : > { %v2682_v11 = vadd.f32 %v2666_v38, %v13925_v58  ;;  %v2913_v29 = vpack.c.b16 %v2904_v22, %v2903_v17  ;;  %v7629_v5 = vld [vmem:[%s13394_s8 + $0xd4] sm:$0xf0] }
 0x6e8   : > { %v10778_v38 = vadd.f32 %v2835_v33, %v2818_v1  ;;  %v10780_v17 = vadd.f32 %v2839_v35, %v2822_v0  ;;  %v6860_v35 = vor.u32 %v7629_v5, %v6859_v49  ;;  %v7617_v49 = vld [vmem:[%s13394_s8 + $0x74] sm:$0xf0] }
 0x6e9   : > { %v2699_v53 = vadd.f32 %v10563_v2, %v2682_v11  ;;  %3499 = vrot.lane.b32.xlu2 %v2913_v29, %s13709_s1 }
 0x6eb   : > { %v2716_v39 = vmul.f32 %v10568_v7, %v2699_v53 }
 0x6ec   : > { %v2635_v56 = vpop.permute.xlu1 %2634 }
 0x6ed   : > { %v2733_v43 = vadd.f32 %v10585_v40, %v2716_v39  ;;  %v2667_v32 = vmul.f32 %v2635_v56, %v10583_v52  ;;  %v13945_v56 = vld [vmem:[#allocation24_spill] sm:$0xff] }
 0x6ef   : > { %v2683_v51 = vadd.f32 %v2667_v32, %v10117_v55  ;;  %v2749_v36 = vmul.f32 0.2, %v2733_v43 }
 0x6f1   : > { %v2700_v45 = vadd.f32 %v10563_v2, %v2683_v51  ;;  %6743 = vmatmul.msk.bf16.gmra.mxu3 %vm13905_vm0, %v2913_v29  ;;  %6751 = vmatmul.msk.bf16.gmra.mxu1 %vm13926_vm9, %v2913_v29  ;;  %v2765_v21 = vmax.f32 %v2733_v43, %v2749_v36  ;;  %v13948_v51 = vld [vmem:[#allocation17_spill] sm:$0xff] }
 0x6f2   : > { %v2804_v36 = vmul.f32 %v13939_v14, %v13948_v51  ;;  %v13970_v51 = vld [vmem:[#allocation25_spill] sm:$0xff] }
 0x6f3   : > { %v2717_v42 = vmul.f32 %v10568_v7, %v2700_v45  ;;  %v2781_v15 = vpack.c.bf16 %v2765_v21, %v2765_v21  ;;  %v13949_v45 = vld [vmem:[#allocation10_spill] sm:$0xff]  ;;  %v2810_v31 = vmul.f32 %v13939_v14, %v13970_v51 }
 0x6f5   : > { %v2734_v25 = vadd.f32 %v10585_v40, %v2717_v42  ;;  %v2905_v41 = vunpack.c.l.b16 %v2781_v15  ;;  %v2787_v42 = vmul.f32 %v13937_v34, %v13949_v45  ;;  %v13968_v45 = vld [vmem:[#allocation13_spill] sm:$0xff] }
 0x6f7   : > { %v2750_v4 = vmul.f32 0.2, %v2734_v25 }
 0x6f9   : > { %v2766_v6 = vmax.f32 %v2734_v25, %v2750_v4  ;;  %v13950_v25 = vld [vmem:[#allocation23_spill] sm:$0xff]  ;;  %v2820_v4 = vadd.f32 %v2804_v36, %v2787_v42  ;;  %v7621_v42 = vld [vmem:[%s13394_s8 + $0x94] sm:$0xf0] }
 0x6fa   : > { %v2837_v21 = vmul.f32 %v13942_v20, %v13950_v25 }
 0x6fb   : > { %v2782_v18 = vpack.c.bf16 %v2766_v6, %v2766_v6 }
 0x6fc   : > { %v10807_v15 = vadd.f32 %v2837_v21, %v2820_v4 }
 0x6fd   : > { %v2906_v52 = vunpack.c.l.b16 %v2782_v18 }
 0x6ff   : > { %v2914_v37 = vpack.c.b16 %v2906_v52, %v2905_v41  ;;  %v13951_v52 = vld [vmem:[#allocation58_spill] sm:$0xff] }
 0x701   : > { %3501 = vrot.lane.b32.xlu0 %v2914_v37, %s13709_s1  ;;  %6744 = vmatmul.msk.bf16.gmra.mxu3 %vm13927_vm5, %v2914_v37  ;;  %s6661_s1 = sshll.u32 %s525_s2, 1 }
 0x702   : > { %6752 = vmatmul.msk.bf16.gmra.mxu1 %vm13928_vm2, %v2914_v37  ;;  %s527_s19 = scalar_lea.vmem [#allocation2], %s6661_s1  ;;  %s8299_s1 = scalar_lea.hbm %s13402_s16, 4 }
 0x703   : > { %s6583_s18 = sshll.u32 %s527_s19, 4  ;;  %p8301_p1 = scmp.lt.s32.totalorder %s8299_s1, %s8295_s28  ;;  %s6584_s18 = int_to_ptr.vmem [resolvable:$true] %s6583_s18 }
 0x705   : > { %p8302_p2 = por %p8301_p1, %p8300_p0 }
 0x706   : > { %v3037_v55 = vpop.f32.mrf.mxu1 }
 0x707   : > { %v10783_v58 = vadd.f32 %v3037_v55, %v10778_v38  ;;  %v13961_v55 = vld [vmem:[#allocation67_spill] sm:$0xff]  ;;  %p8303_p3 = pnand %p8302_p2, %p8298_p13 }
 0x70c   : > { %v10744_v2 = vpop.f32.mrf.mxu3 }
 0x70d   : > { %13929 = vst [vmem:[#allocation27_spill] sm:$0xff] %v10744_v2 }
 0x70e   : > { %v10750_v9 = vpop.f32.mrf.mxu1 }
 0x713   : > { %v3494_v53 = vpop.permute.xlu2 %3493 }
 0x714   : > { %v3490_v7 = vpop.permute.xlu0 %3489  ;;  %v10753_v54 = vpop.f32.mrf.mxu3  ;;  %v10794_v43 = vsel %vm13946_vm6, %v13945_v56, %v3494_v53  ;;  %v7625_v53 = vld [vmem:[%s13394_s8 + $0xb4] sm:$0xf0]  ;;  %v6827_v56 = vld [vmem:[%s13394_s8 + $0x88] sm:$0xf] }
 0x715   : > { %v10748_v40 = vsel %vm13931_vm11, %v13930_v46, %v3490_v7  ;;  %13933 = vst [vmem:[#allocation55_spill] sm:$0xff] %v10753_v54  ;;  %v6828_v4 = vor.u32 %v7621_v42, %v6827_v56  ;;  %v6779_v42 = vld [vmem:[%s13394_s8 + $0x28] sm:$0xf] }
 0x716   : > { %13932 = vst [vmem:[#allocation56_spill] sm:$0xff] %v10748_v40  ;;  %4140 = vmatmul.bf16.gmra.mxu2 %v10748_v40 }
 0x717   : > { %13947 = vst [vmem:[#allocation62_spill] sm:$0xff] %v10794_v43 }
 0x71e   : > { %v3042_v24 = vpop.f32.mrf.mxu1 }
 0x71f   : > { %v10810_v41 = vadd.f32 %v3042_v24, %v10807_v15  ;;  %v6875_v24 = vld [vmem:[%s13394_s8 + $0xe8] sm:$0xf] }
 0x720   : > { %v6876_v33 = vor.u32 %v7633_v59, %v6875_v24  ;;  %v6811_v59 = vld [vmem:[%s13394_s8 + $0x68] sm:$0xf] }
 0x721   : > { %v6812_v5 = vor.u32 %v7617_v49, %v6811_v59  ;;  %v7605_v59 = vld [vmem:[%s13394_s8 + $0x14] sm:$0xf0]  ;;  %v13958_v49 = vld [vmem:[#allocation51_spill] sm:$0xff] }
 0x722   : > { %4323 = vmatpush.bf16.msra.mxu2 %v6876_v33  ;;  %v6795_v33 = vld [vmem:[%s13394_s8 + $0x48] sm:$0xf] }
 0x724   : > { %v3492_v60 = vpop.permute.xlu1 %3491  ;;  %v10755_v27 = vpop.f32.mrf.mxu3 }
 0x725   : > { %v10759_v44 = vsel %vm13935_vm4, %v13934_v50, %v3492_v60  ;;  %v13952_v60 = vld [vmem:[#allocation63_spill] sm:$0xff] }
 0x726   : > { %4145 = vmatmul.bf16.gmra.mxu2 %v10759_v44  ;;  %v10762_v16 = vpop.f32.mrf.mxu1 }
 0x727   : > { %4324 = vmatpush.bf16.msra.mxu2 %v6860_v35  ;;  %v7613_v35 = vld [vmem:[%s13394_s8 + $0x54] sm:$0xf0] }
 0x72c   : > { %v10776_v30 = vpop.f32.mrf.mxu3 }
 0x72e   : > { %v3047_v22 = vpop.f32.mrf.mxu1 }
 0x72f   : > { %v10786_v11 = vadd.f32 %v3047_v22, %v10780_v17  ;;  %v6843_v22 = vld [vmem:[%s13394_s8 + $0xa8] sm:$0xf] }
 0x730   : > { %v6844_v36 = vor.u32 %v7625_v53, %v6843_v22  ;;  %v6796_v53 = vor.u32 %v7613_v35, %v6795_v33 }
 0x732   : > { %4325 = vmatpush.bf16.msra.mxu2 %v6844_v36 }
 0x734   : > { %v10790_v39 = vpop.f32.mrf.mxu3 }
 0x736   : > { %4150 = vmatmul.bf16.gmra.mxu2 %v10794_v43  ;;  %v10797_v32 = vpop.f32.mrf.mxu1 }
 0x737   : > { %4326 = vmatpush.bf16.msra.mxu2 %v6828_v4 }
 0x73b   : > { %4327 = vmatpush.bf16.msra.mxu2 %v6812_v5 }
 0x73c   : > { %v10805_v6 = vpop.f32.mrf.mxu3 }
 0x73e   : > { %v3052_v18 = vpop.f32.mrf.mxu1 }
 0x73f   : > { %v10813_v37 = vadd.f32 %v3052_v18, %v13951_v52  ;;  %v13955_v18 = vld [vmem:[#allocation50_spill] sm:$0xff]  ;;  %4328 = vmatpush.bf16.msra.mxu2 %v6796_v53 }
 0x743   : > { %v3500_v56 = vpop.permute.xlu2 %3499 }
 0x744   : > { %v3496_v7 = vpop.permute.xlu0 %3495  ;;  %v10817_v46 = vpop.f32.mrf.mxu3  ;;  %v10889_v33 = vsel %vm13959_vm3, %v13958_v49, %v3500_v56  ;;  %v13964_v49 = vld [vmem:[#allocation14_spill] sm:$0xff] }
 0x745   : > { %v10821_v50 = vsel %vm13953_vm1, %v13952_v60, %v3496_v7  ;;  %13960 = vst [vmem:[#allocation81_spill] sm:$0xff] %v10889_v33  ;;  %v2807_v8 = vmul.f32 %v13939_v14, %v13964_v49  ;;  %v13971_v49 = vld [vmem:[#allocation15_spill] sm:$0xff] }
 0x746   : > { %13954 = vst [vmem:[#allocation78_spill] sm:$0xff] %v10821_v50  ;;  %4155 = vmatmul.bf16.gmra.mxu2 %v10821_v50  ;;  %v10824_v19 = vpop.f32.mrf.mxu1  ;;  %v2792_v10 = vmul.f32 %v13937_v34, %v13971_v49 }
 0x74c   : > { %v10838_v1 = vpop.f32.mrf.mxu3 }
 0x74e   : > { %v10840_v0 = vpop.f32.mrf.mxu1 }
 0x754   : > { %v3498_v21 = vpop.permute.xlu1 %3497  ;;  %v10859_v24 = vpop.f32.mrf.mxu3 }
 0x755   : > { %v10856_v7 = vsel %vm13956_vm7, %v13955_v18, %v3498_v21  ;;  %v7609_v21 = vld [vmem:[%s13394_s8 + $0x34] sm:$0xf0]  ;;  %v6763_v18 = vld [vmem:[%s13394_s8 + $0x8] sm:$0xf] }
 0x756   : > { %13957 = vst [vmem:[#allocation61_spill] sm:$0xff] %v10856_v7  ;;  %4160 = vmatmul.bf16.gmra.mxu2 %v10856_v7  ;;  %v3059_v60 = vpop.f32.mrf.mxu1  ;;  %v6780_v4 = vor.u32 %v7609_v21, %v6779_v42  ;;  %v6764_v35 = vor.u32 %v7605_v59, %v6763_v18  ;;  %v13966_v18 = vld [vmem:[#allocation26_spill] sm:$0xff] }
 0x757   : > { %v2840_v59 = vmul.f32 %v13942_v20, %v13966_v18  ;;  %v13973_v18 = vld [vmem:[#allocation28_spill] sm:$0xff] }
 0x758   : > { %4329 = vmatpush.bf16.msra.mxu2 %v6780_v4  ;;  %v2790_v4 = vmul.f32 %v13937_v34, %v13965_v63  ;;  %v13972_v63 = vld [vmem:[#allocation29_spill] sm:$0xff]  ;;  %v2813_v47 = vmul.f32 %v13939_v14, %v13973_v18 }
 0x759   : > { %v2842_v26 = vmul.f32 %v13942_v20, %v13972_v63  ;;  %v2846_v63 = vmul.f32 %v13942_v20, %v13978_v12 }
 0x75a   : > { %v2823_v28 = vadd.f32 %v2807_v8, %v2790_v4  ;;  %v13977_v4 = vld [vmem:[#allocation18_spill] sm:$0xff] }
 0x75b   : > { %v2796_v49 = vmul.f32 %v13937_v34, %v13977_v4 }
 0x75c   : > { %v10873_v36 = vpop.f32.mrf.mxu3  ;;  %4330 = vmatpush.bf16.msra.mxu2 %v6764_v35  ;;  %v13967_v35 = vld [vmem:[#allocation20_spill] sm:$0xff]  ;;  %v10927_v51 = vadd.f32 %v2840_v59, %v2823_v28  ;;  %v13980_v59 = vld [vmem:[#allocation46_spill] sm:$0xff] }
 0x75d   : > { %v2809_v25 = vmul.f32 %v13939_v14, %v13967_v35  ;;  %v13974_v35 = vld [vmem:[#allocation38_spill] sm:$0xff]  ;;  %v2829_v13 = vadd.f32 %v2813_v47, %v2796_v49 }
 0x75e   : > { %v3062_v22 = vpop.f32.mrf.mxu1  ;;  %v2838_v61 = vmul.f32 %v13942_v20, %v13974_v35  ;;  %v10935_v35 = vadd.f32 %v10797_v32, %v10927_v51 }
 0x75f   : > { %v2825_v8 = vadd.f32 %v2809_v25, %v2792_v10  ;;  %v10956_v47 = vadd.f32 %v2846_v63, %v2829_v13  ;;  %v13985_v63 = vld [vmem:[#allocation72_spill] sm:$0xff] }
 0x764   : > { %v10892_v53 = vpop.f32.mrf.mxu3 }
 0x766   : > { %4165 = vmatmul.bf16.gmra.mxu2 %v10889_v33  ;;  %v3064_v5 = vpop.f32.mrf.mxu1 }
 0x76c   : > { %v10898_v62 = vpop.f32.mrf.mxu3 }
 0x76e   : > { %v3067_v42 = vpop.f32.mrf.mxu1 }
 0x773   : > { %v3502_v21 = vpop.permute.xlu0 %3501 }
 0x774   : > { %v10896_v29 = vsel %vm13962_vm10, %v13961_v55, %v3502_v21  ;;  %v2788_v55 = vmul.f32 %v13937_v34, %v13968_v45  ;;  %v13969_v21 = vld [vmem:[#allocation12_spill] sm:$0xff] }
 0x775   : > { %13963 = vst [vmem:[#allocation69_spill] sm:$0xff] %v10896_v29  ;;  %v2805_v3 = vmul.f32 %v13939_v14, %v13969_v21  ;;  %v13975_v45 = vld [vmem:[#allocation16_spill] sm:$0xff] }
 0x776   : > { %4170 = vmatmul.bf16.gmra.mxu2 %v10896_v29  ;;  %v3069_v56 = vpop.f32.mrf.mxu1  ;;  %v2793_v23 = vmul.f32 %v13937_v34, %v13975_v45  ;;  %v13976_v21 = vld [vmem:[#allocation76_spill] sm:$0xff]  ;;  %v10937_v45 = vadd.f32 %v2842_v26, %v2825_v8  ;;  %v13979_v34 = vld [vmem:[#allocation71_spill] sm:$0xff]  ;;  %v3089_v8 = vadd.f32 %v3067_v42, %v13985_v63 }
 0x777   : > { %v2843_v29 = vmul.f32 %v13942_v20, %v13976_v21  ;;  %v2821_v33 = vadd.f32 %v2805_v3, %v2788_v55  ;;  %v10939_v21 = vpop.f32.mrf.mxu3  ;;  %v2850_v25 = vmul.f32 %v13942_v20, %v13979_v34  ;;  %v13981_v26 = vld [vmem:[#allocation64_spill] sm:$0xff] }
 0x778   : > { %v2826_v14 = vadd.f32 %v2810_v31, %v2793_v23  ;;  %v10949_v23 = vadd.f32 %v10750_v9, %v13980_v59  ;;  %v10953_v31 = vadd.f32 %v10824_v19, %v10937_v45  ;;  %v3086_v3 = vadd.f32 %v3059_v60, %v13981_v26  ;;  %v13982_v9 = vld [vmem:[#allocation52_spill] sm:$0xff]  ;;  %v13983_v19 = vld [vmem:[#allocation90_spill] sm:$0xff] }
 0x779   : > { %v10941_v28 = vadd.f32 %v2838_v61, %v2821_v33  ;;  %v3087_v32 = vadd.f32 %v3062_v22, %v13982_v9  ;;  %v3088_v33 = vadd.f32 %v3064_v5, %v10956_v47  ;;  %v3090_v49 = vadd.f32 %v3069_v56, %v13983_v19  ;;  %v13984_v55 = vld [vmem:[#allocation68_spill] sm:$0xff] }
 0x77a   : > { %v10943_v10 = vadd.f32 %v2843_v29, %v2826_v14  ;;  %v3110_v20 = vmin.f32 %v10949_v23, %v10935_v35  ;;  %v10970_v60 = vadd.f32 %v2850_v25, %v13984_v55  ;;  %v13986_v14 = vld [vmem:[#allocation75_spill] sm:$0xff]  ;;  %v13987_v22 = vmin.f32 %v10783_v58, %v10786_v11 }
 0x77b   : > { %v10960_v61 = vadd.f32 %v10762_v16, %v10941_v28  ;;  %v13988_v56 = vmin.f32 %v10810_v41, %v10813_v37 }
 0x77c   : > { %v3085_v29 = vadd.f32 %v10840_v0, %v10943_v10  ;;  %v3114_v16 = vmin.f32 %v3110_v20, %v3086_v3 }
 0x77d   : > { %v3112_v13 = vmin.f32 %v10960_v61, %v10953_v31  ;;  %v3115_v25 = vmin.f32 %v13988_v56, %v3087_v32 }
 0x77e   : > { %v3113_v34 = vmin.f32 %v13987_v22, %v3085_v29  ;;  %v3118_v12 = vmin.f32 %v3114_v16, %v3090_v49 }
 0x77f   : > { %v3072_v18 = vpop.f32.mrf.mxu1  ;;  %v3116_v55 = vmin.f32 %v3112_v13, %v3088_v33  ;;  %v10984_v7 = vpop.f32.mrf.mxu3 }
 0x780   : > { %v3091_v0 = vadd.f32 %v3072_v18, %v13986_v14  ;;  %v3117_v20 = vmin.f32 %v3113_v34, %v3089_v8 }
 0x782   : > { %v3119_v42 = vmin.f32 %v3115_v25, %v3091_v0  ;;  %v3121_v57 = vmin.f32 %v3117_v20, %v3118_v12 }
 0x786   : > { %4331 = vmatmul.bf16.vlgmr.msra.gmra.mxu2 %v10725_v48 }
 0x787   : > { %v3074_v5 = vpop.f32.mrf.mxu1  ;;  %v10986_v22 = vpop.f32.mrf.mxu3 }
 0x788   : > { %v3092_v4 = vadd.f32 %v3074_v5, %v10970_v60 }
 0x78a   : > { %v3120_v18 = vmin.f32 %v3116_v55, %v3092_v4 }
 0x78c   : > { %v3122_v48 = vmin.f32 %v3119_v42, %v3120_v18 }
 0x78e   : > { %v3123_v50 = vmin.f32 %v3121_v57, %v3122_v48 }
 0x790   : > { %v3124_v43 = vrot.slane %v3123_v50, 4 }
 0x792   : > { %v3125_v54 = vmin.f32 %v3123_v50, %v3124_v43  ;;  %v3025_v50 = vpop.f32.mrf.mxu3 }
 0x794   : > { %v3126_v59 = vrot.slane %v3125_v54, 2 }
 0x796   : > { %v3127_v2 = vmin.f32 %v3125_v54, %v3126_v59  ;;  %4336 = vmatmul.bf16.gmra.mxu2 %v10748_v40  ;;  %v3106_v59 = vsub.f32 %v10984_v7, %v13983_v19 }
 0x798   : > { %v3128_v13 = vrot.slane %v3127_v2, 1 }
 0x79a   : > { %v3129_v16 = vmin.f32 %v3127_v2, %v3128_v13 }
 0x79c   : > { %v3145_v5 = vsub.f32 %v3092_v4, %v3129_v16  ;;  %v3144_v56 = vsub.f32 %v3091_v0, %v3129_v16  ;;  %v3142_v25 = vsub.f32 %v3089_v8, %v3129_v16  ;;  %v3143_v55 = vsub.f32 %v3090_v49, %v3129_v16 }
 0x79d   : > { %v3140_v12 = vsub.f32 %v3087_v32, %v3129_v16  ;;  %v3141_v20 = vsub.f32 %v3088_v33, %v3129_v16  ;;  %v3138_v57 = vsub.f32 %v3085_v29, %v3129_v16  ;;  %v3139_v48 = vsub.f32 %v3086_v3, %v3129_v16 }
 0x79e   : > { %v3161_v43 = vsub.f32 0.0, %v3145_v5  ;;  %v3160_v42 = vsub.f32 0.0, %v3144_v56  ;;  %v3158_v18 = vsub.f32 0.0, %v3142_v25  ;;  %v3159_v54 = vsub.f32 0.0, %v3143_v55 }
 0x79f   : > { %v3156_v2 = vsub.f32 0.0, %v3140_v12  ;;  %v3157_v13 = vsub.f32 0.0, %v3141_v20  ;;  %v3154_v40 = vsub.f32 0.0, %v3138_v57  ;;  %v3136_v49 = vsub.f32 %v10813_v37, %v3129_v16 }
 0x7a0   : > { %v3192_v34 = vmul.f32 1.442695, %v3161_v43  ;;  %v3190_v4 = vmul.f32 1.442695, %v3160_v42  ;;  %v3186_v0 = vmul.f32 1.442695, %v3158_v18  ;;  %v3108_v32 = vsub.f32 %v3025_v50, %v10970_v60 }
 0x7a1   : > { %v3188_v29 = vmul.f32 1.442695, %v3159_v54  ;;  %v3155_v3 = vsub.f32 0.0, %v3139_v48  ;;  %v3137_v33 = vsub.f32 %v10953_v31, %v3129_v16  ;;  %v3182_v8 = vmul.f32 1.442695, %v3156_v2 }
 0x7a2   : > { %8082 = vpow2.f32 %v3192_v34  ;;  %v3184_v5 = vmul.f32 1.442695, %v3157_v13  ;;  %v3152_v56 = vsub.f32 0.0, %v3136_v49  ;;  %v3134_v25 = vsub.f32 %v10786_v11, %v3129_v16 }
 0x7a3   : > { %8084 = vpow2.f32 %v3190_v4  ;;  %v3153_v7 = vsub.f32 0.0, %v3137_v33  ;;  %v3135_v55 = vsub.f32 %v10935_v35, %v3129_v16  ;;  %v3178_v12 = vmul.f32 1.442695, %v3154_v40 }
 0x7a4   : > { %8086 = vpow2.f32 %v3186_v0  ;;  %v3132_v37 = vsub.f32 %v10810_v41, %v3129_v16  ;;  %v3133_v20 = vsub.f32 %v10960_v61, %v3129_v16  ;;  %v3180_v57 = vmul.f32 1.442695, %v3155_v3 }
 0x7a5   : > { %8088 = vpow2.f32 %v3188_v29  ;;  %v3150_v48 = vsub.f32 0.0, %v3134_v25  ;;  %v3151_v31 = vsub.f32 0.0, %v3135_v55  ;;  %v3174_v34 = vmul.f32 1.442695, %v3152_v56 }
 0x7a6   : > { %4341 = vmatmul.bf16.gmra.mxu2 %v10759_v44  ;;  %8090 = vpow2.f32 %v3182_v8  ;;  %v3148_v43 = vsub.f32 0.0, %v3132_v37  ;;  %v3130_v50 = vsub.f32 %v10783_v58, %v3129_v16  ;;  %v3176_v11 = vmul.f32 1.442695, %v3153_v7 }
 0x7a7   : > { %8092 = vpow2.f32 %v3184_v5  ;;  %v3149_v35 = vsub.f32 0.0, %v3133_v20  ;;  %v3131_v40 = vsub.f32 %v10949_v23, %v3129_v16  ;;  %v3107_v41 = vsub.f32 %v10986_v22, %v13986_v14 }
 0x7a8   : > { %v8083_v42 = vpop.eup %8082  ;;  %8094 = vpow2.f32 %v3178_v12  ;;  %v3170_v61 = vmul.f32 1.442695, %v3150_v48  ;;  %v3146_v18 = vsub.f32 0.0, %v3130_v50  ;;  %v3172_v13 = vmul.f32 1.442695, %v3151_v31 }
 0x7a9   : > { %v8085_v54 = vpop.eup %8084  ;;  %v3209_v2 = vmul.f32 %v8083_v42, %v3108_v32  ;;  %8096 = vpow2.f32 %v3180_v57  ;;  %v3147_v4 = vsub.f32 0.0, %v3131_v40  ;;  %v3166_v29 = vmul.f32 1.442695, %v3148_v43 }
 0x7aa   : > { %v8087_v0 = vpop.eup %8086  ;;  %v3225_v49 = vpack.c.bf16 %v8083_v42, %v8085_v54  ;;  %v3208_v58 = vmul.f32 %v8085_v54, %v3107_v41  ;;  %8098 = vpow2.f32 %v3174_v34  ;;  %v3099_v23 = vsub.f32 %v10817_v46, %v13951_v52 }
 0x7ab   : > { %v8089_v3 = vpop.eup %8088  ;;  %8100 = vpow2.f32 %v3176_v11  ;;  %v3168_v16 = vmul.f32 1.442695, %v3149_v35  ;;  %v3162_v22 = vmul.f32 1.442695, %v3146_v18  ;;  %v13989_v32 = vsub.f32 %v10939_v21, %v13985_v63 }
 0x7ac   : > { %v8091_v33 = vpop.eup %8090  ;;  %3275 = vmatpush.bf16.msrb.mxu0 %v3225_v49  ;;  %v3224_v8 = vpack.c.bf16 %v3209_v2, %v3208_v58  ;;  %v3207_v56 = vmul.f32 %v8089_v3, %v3106_v59  ;;  %8102 = vpow2.f32 %v3170_v61  ;;  %v3101_v25 = vsub.f32 %v10859_v24, %v10943_v10 }
 0x7ad   : > { %v3206_v5 = vmul.f32 %v8087_v0, %v13989_v32  ;;  %v8093_v7 = vpop.eup %8092  ;;  %v3103_v55 = vsub.f32 %v10892_v53, %v13982_v9  ;;  %8104 = vpow2.f32 %v3172_v13  ;;  %v3164_v46 = vmul.f32 1.442695, %v3147_v4  ;;  %v13994_v32 = vld [vmem:[#allocation62_spill] sm:$0xff] }
 0x7ae   : > { %v8095_v12 = vpop.eup %8094  ;;  %v3102_v37 = vsub.f32 %v10873_v36, %v13981_v26  ;;  %v3104_v20 = vsub.f32 %v10898_v62, %v10956_v47  ;;  %3226 = vmatpush.bf16.msrb.mxu3 %v3224_v8  ;;  %v3223_v21 = vpack.c.bf16 %v8089_v3, %v8087_v0  ;;  %8106 = vpow2.f32 %v3166_v29  ;;  %v13991_v29 = vld [vmem:[#allocation27_spill] sm:$0xff] }
 0x7af   : > { %v8097_v59 = vpop.eup %8096  ;;  %v3100_v57 = vsub.f32 %v10838_v1, %v10937_v45  ;;  %v3204_v24 = vmul.f32 %v8091_v33, %v3103_v55  ;;  %v3202_v48 = vmul.f32 %v8095_v12, %v3101_v25  ;;  %8108 = vpow2.f32 %v3168_v16  ;;  %v11024_v1 = vpop.f32.mrf.mxu2  ;;  %v13993_v16 = vld [vmem:[#allocation55_spill] sm:$0xff] }
 0x7b0   : > { %v8099_v53 = vpop.eup %8098  ;;  %3276 = vmatpush.bf16.msrb.mxu0 %v3223_v21  ;;  %v3222_v31 = vpack.c.bf16 %v3207_v56, %v3206_v5  ;;  %v3205_v34 = vmul.f32 %v8093_v7, %v3104_v20  ;;  %v3203_v43 = vmul.f32 %v8097_v59, %v3102_v37  ;;  %8110 = vpow2.f32 %v3162_v22  ;;  %13990 = vst [vmem:[#allocation88_spill] sm:$0xff] %v11024_v1  ;;  %v14101_v1 = vld [vmem:[#allocation20_spill] sm:$0xff] }
 0x7b1   : > { %v8101_v36 = vpop.eup %8100  ;;  %v3097_v62 = vsub.f32 %v10790_v39, %v10780_v17  ;;  %v3098_v50 = vsub.f32 %v10805_v6, %v10927_v51  ;;  %v3200_v11 = vmul.f32 %v8099_v53, %v3099_v23  ;;  %8112 = vpow2.f32 %v3164_v46  ;;  %v13992_v23 = vld [vmem:[#allocation46_spill] sm:$0xff] }
 0x7b2   : > { %v8103_v35 = vpop.eup %8102  ;;  %3227 = vmatpush.bf16.msrb.mxu3 %v3222_v31  ;;  %v3221_v40 = vpack.c.bf16 %v8093_v7, %v8091_v33  ;;  %v3218_v42 = vpack.c.bf16 %v3203_v43, %v3202_v48  ;;  %v3217_v41 = vpack.c.bf16 %v8101_v36, %v8099_v53  ;;  %v3201_v61 = vmul.f32 %v8101_v36, %v3100_v57  ;;  %v13998_v57 = vld [vmem:[#allocation40_spill] sm:$0xff]  ;;  %v14000_v48 = vld [vmem:[#allocation61_spill] sm:$0xff]  ;;  %v14002_v31 = vld [vmem:[#allocation42_spill] sm:$0xff] }
 0x7b3   : > { %v8105_v18 = vpop.eup %8104  ;;  %v3095_v54 = vsub.f32 %v10755_v27, %v10807_v15  ;;  %v3096_v39 = vsub.f32 %v10776_v30, %v10941_v28  ;;  %v3198_v2 = vmul.f32 %v8103_v35, %v3097_v62  ;;  %v3220_v6 = vpack.c.bf16 %v3205_v34, %v3204_v24  ;;  %v14004_v43 = vld [vmem:[#allocation81_spill] sm:$0xff]  ;;  %v14005_v36 = vld [vmem:[#allocation43_spill] sm:$0xff] }
 0x7b4   : > { %v8107_v13 = vpop.eup %8106  ;;  %3277 = vmatpush.bf16.msrb.mxu0 %v3221_v40  ;;  %v3216_v4 = vpack.c.bf16 %v3201_v61, %v3200_v11  ;;  %v3215_v0 = vpack.c.bf16 %v8105_v18, %v8103_v35  ;;  %v3199_v49 = vmul.f32 %v8105_v18, %v3098_v50  ;;  %v3093_v3 = vsub.f32 %v13991_v29, %v10778_v38  ;;  %v14008_v11 = vld [vmem:[#allocation69_spill] sm:$0xff]  ;;  %v14009_v35 = vld [vmem:[#allocation82_spill] sm:$0xff]  ;;  %v7626_v61 = vld [vmem:[%s13394_s8 + $0xc4] sm:$0xf] }
 0x7b5   : > { %v8109_v58 = vpop.eup %8108  ;;  %v3094_v22 = vsub.f32 %v13993_v16, %v13992_v23  ;;  %v3219_v33 = vpack.c.bf16 %v8097_v59, %v8095_v12  ;;  %v3196_v8 = vmul.f32 %v8107_v13, %v3095_v54  ;;  %v13997_v59 = vld [vmem:[#allocation78_spill] sm:$0xff]  ;;  %v14010_v40 = vld [vmem:[#allocation77_spill] sm:$0xff]  ;;  %v7614_v29 = vld [vmem:[%s13394_s8 + $0x64] sm:$0xf] }
 0x7b6   : > { %v8111_v27 = vpop.eup %8110  ;;  %3228 = vmatpush.bf16.msrb.mxu3 %v3220_v6  ;;  %4346 = vmatmul.bf16.gmra.mxu2 %v13994_v32  ;;  %v3214_v30 = vpack.c.bf16 %v3199_v49, %v3198_v2  ;;  %v3213_v5 = vpack.c.bf16 %v8109_v58, %v8107_v13  ;;  %v3197_v56 = vmul.f32 %v8109_v58, %v3096_v39  ;;  %v6853_v54 = vld [vmem:[%s13394_s8 + $0xd0] sm:$0xf0]  ;;  %v7622_v2 = vld [vmem:[%s13394_s8 + $0xa4] sm:$0xf] }
 0x7b7   : > { %v8113_v7 = vpop.eup %8112  ;;  %v3194_v25 = vmul.f32 %v8111_v27, %v3093_v3  ;;  %v11035_v21 = vpop.f32.mrf.mxu2  ;;  %v6856_v39 = vor.u32 %v7626_v61, %v6853_v54  ;;  %v6837_v13 = vld [vmem:[%s13394_s8 + $0xb0] sm:$0xf0]  ;;  %v7610_v16 = vld [vmem:[%s13394_s8 + $0x44] sm:$0xf]  ;;  %v6979_v54 = vld [vmem:[%s13394_s8 + $0x1c0] sm:$0xf] }
 0x7b8   : > { %3278 = vmatpush.bf16.msrb.mxu0 %v3219_v33  ;;  %v3212_v55 = vpack.c.bf16 %v3197_v56, %v3196_v8  ;;  %v3211_v46 = vpack.c.bf16 %v8113_v7, %v8111_v27  ;;  %v3195_v37 = vmul.f32 %v8113_v7, %v3094_v22  ;;  %13995 = vst [vmem:[#allocation73_spill] sm:$0xff] %v11035_v21  ;;  %v14011_v58 = vld [vmem:[#allocation93_spill] sm:$0xff]  ;;  %v7606_v27 = vld [vmem:[%s13394_s8 + $0x24] sm:$0xf]  ;;  %v14012_v56 = vld [vmem:[#allocation94_spill] sm:$0xff] }
 0x7b9   : > { %v6840_v6 = vor.u32 %v7622_v2, %v6837_v13  ;;  %v6805_v3 = vld [vmem:[%s13394_s8 + $0x70] sm:$0xf0]  ;;  %v7602_v7 = vld [vmem:[%s13394_s8 + $0x4] sm:$0xf] }
 0x7ba   : > { %3229 = vmatpush.bf16.msrb.mxu3 %v3218_v42  ;;  %v3210_v20 = vpack.c.bf16 %v3195_v37, %v3194_v25  ;;  %v7630_v42 = vld [vmem:[%s13394_s8 + $0xe4] sm:$0xf]  ;;  %v6808_v22 = vor.u32 %v7614_v29, %v6805_v3  ;;  %v6789_v33 = vld [vmem:[%s13394_s8 + $0x50] sm:$0xf0]  ;;  %v7664_v37 = vld [vmem:[%s13394_s8 + $0x1ec] sm:$0xf0] }
 0x7bb   : > { %v6792_v8 = vor.u32 %v7610_v16, %v6789_v33  ;;  %v6757_v25 = vld [vmem:[%s13394_s8 + $0x10] sm:$0xf0]  ;;  %v7658_v2 = vld [vmem:[%s13394_s8 + $0x1c4] sm:$0xf]  ;;  %v6947_v33 = vld [vmem:[%s13394_s8 + $0x180] sm:$0xf] }
 0x7bc   : > { %3279 = vmatpush.bf16.msrb.mxu0 %v3217_v41  ;;  %v6869_v41 = vld [vmem:[%s13394_s8 + $0xf0] sm:$0xf0]  ;;  %v7654_v29 = vld [vmem:[%s13394_s8 + $0x1a4] sm:$0xf] }
 0x7bd   : > { %v6872_v18 = vor.u32 %v7630_v42, %v6869_v41  ;;  %v6997_v41 = vld [vmem:[%s13394_s8 + $0x1f0] sm:$0xf0] }
 0x7be   : > { %3230 = vmatpush.bf16.msrb.mxu3 %v3216_v4  ;;  %v7618_v4 = vld [vmem:[%s13394_s8 + $0x84] sm:$0xf]  ;;  %v6965_v16 = vld [vmem:[%s13394_s8 + $0x1b0] sm:$0xf0] }
 0x7bf   : > { %v11037_v12 = vpop.f32.mrf.mxu2 }
 0x7c0   : > { %3280 = vmatpush.bf16.msrb.mxu0 %v3215_v0  ;;  %13996 = vst [vmem:[#allocation87_spill] sm:$0xff] %v11037_v12  ;;  %v6821_v0 = vld [vmem:[%s13394_s8 + $0x90] sm:$0xf0] }
 0x7c1   : > { %v6824_v49 = vor.u32 %v7618_v4, %v6821_v0  ;;  %v6963_v0 = vld [vmem:[%s13394_s8 + $0x1a0] sm:$0xf] }
 0x7c2   : > { %3231 = vmatpush.bf16.msrb.mxu3 %v3214_v30  ;;  %v6773_v30 = vld [vmem:[%s13394_s8 + $0x30] sm:$0xf0] }
 0x7c4   : > { %3281 = vmatpush.bf16.msrb.mxu0 %v3213_v5  ;;  %v6776_v5 = vor.u32 %v7606_v27, %v6773_v30  ;;  %v7650_v27 = vld [vmem:[%s13394_s8 + $0x184] sm:$0xf] }
 0x7c6   : > { %3232 = vmatpush.bf16.msrb.mxu3 %v3212_v55  ;;  %4351 = vmatmul.bf16.gmra.mxu2 %v13997_v59  ;;  %v6760_v55 = vor.u32 %v7602_v7, %v6757_v25 }
 0x7c7   : > { %v11042_v24 = vpop.f32.mrf.mxu2 }
 0x7c8   : > { %3282 = vmatpush.bf16.msrb.mxu0 %v3211_v46  ;;  %13999 = vst [vmem:[#allocation35_spill] sm:$0xff] %v11042_v24  ;;  %v6995_v46 = vld [vmem:[%s13394_s8 + $0x1e0] sm:$0xf] }
 0x7c9   : > { %v6996_v42 = vor.u32 %v7664_v37, %v6995_v46  ;;  %v6931_v46 = vld [vmem:[%s13394_s8 + $0x160] sm:$0xf]  ;;  %v7648_v37 = vld [vmem:[%s13394_s8 + $0x16c] sm:$0xf0] }
 0x7ca   : > { %3233 = vmatpush.bf16.msrb.mxu3 %v3210_v20  ;;  %v7662_v20 = vld [vmem:[%s13394_s8 + $0x1e4] sm:$0xf] }
 0x7cb   : > { %3283 = vmatmul.bf16.vlgmr.msrb.gmra.mxu0 %v13998_v57  ;;  %v7000_v61 = vor.u32 %v7662_v20, %v6997_v41  ;;  %4176 = vmatpush.bf16.msra.mxu1 %v6996_v42  ;;  %v7646_v20 = vld [vmem:[%s13394_s8 + $0x164] sm:$0xf]  ;;  %v6932_v42 = vor.u32 %v7648_v37, %v6931_v46  ;;  %v6933_v41 = vld [vmem:[%s13394_s8 + $0x170] sm:$0xf0] }
 0x7cd   : > { %3234 = vmatmul.bf16.vlgmr.msrb.gmra.mxu3 %v13998_v57  ;;  %4274 = vmatpush.bf16.msra.mxu0 %v7000_v61  ;;  %v6936_v61 = vor.u32 %v7646_v20, %v6933_v41  ;;  %v6883_v20 = vld [vmem:[%s13394_s8 + $0x100] sm:$0xf]  ;;  %v7634_v41 = vld [vmem:[%s13394_s8 + $0x104] sm:$0xf] }
 0x7ce   : > { %4225 = vmatpush.bf16.msra.mxu3 %v6872_v18  ;;  %v14013_v18 = vld [vmem:[#allocation95_spill] sm:$0xff] }
 0x7cf   : > { %v11045_v53 = vpop.f32.mrf.mxu2 }
 0x7d0   : > { %14001 = vst [vmem:[#allocation70_spill] sm:$0xff] %v11045_v53 }
 0x7d2   : > { %4226 = vmatpush.bf16.msra.mxu3 %v6856_v39  ;;  %v7660_v39 = vld [vmem:[%s13394_s8 + $0x1cc] sm:$0xf0] }
 0x7d3   : > { %v6980_v13 = vor.u32 %v7660_v39, %v6979_v54  ;;  %v6915_v54 = vld [vmem:[%s13394_s8 + $0x140] sm:$0xf]  ;;  %v7644_v39 = vld [vmem:[%s13394_s8 + $0x14c] sm:$0xf0] }
 0x7d5   : > { %4177 = vmatpush.bf16.msra.mxu1 %v6980_v13  ;;  %v14014_v13 = vld [vmem:[#allocation89_spill] sm:$0xff] }
 0x7d6   : > { %4356 = vmatmul.bf16.gmra.mxu2 %v14000_v48  ;;  %4227 = vmatpush.bf16.msra.mxu3 %v6840_v6  ;;  %v6981_v6 = vld [vmem:[%s13394_s8 + $0x1d0] sm:$0xf0] }
 0x7d7   : > { %v11049_v34 = vpop.f32.mrf.mxu2  ;;  %v6984_v4 = vor.u32 %v7658_v2, %v6981_v6  ;;  %v7642_v2 = vld [vmem:[%s13394_s8 + $0x144] sm:$0xf]  ;;  %v6916_v6 = vor.u32 %v7644_v39, %v6915_v54  ;;  %v6885_v54 = vld [vmem:[%s13394_s8 + $0x110] sm:$0xf0] }
 0x7d8   : > { %14003 = vst [vmem:[#allocation34_spill] sm:$0xff] %v11049_v34 }
 0x7d9   : > { %4275 = vmatpush.bf16.msra.mxu0 %v6984_v4  ;;  %v6917_v4 = vld [vmem:[%s13394_s8 + $0x150] sm:$0xf0] }
 0x7da   : > { %4228 = vmatpush.bf16.msra.mxu3 %v6824_v49  ;;  %v7656_v49 = vld [vmem:[%s13394_s8 + $0x1ac] sm:$0xf0] }
 0x7db   : > { %3288 = vmatmul.bf16.gmra.mxu0 %v14002_v31  ;;  %v6964_v3 = vor.u32 %v7656_v49, %v6963_v0  ;;  %v6920_v0 = vor.u32 %v7642_v2, %v6917_v4  ;;  %v6899_v49 = vld [vmem:[%s13394_s8 + $0x120] sm:$0xf]  ;;  %v6888_v2 = vor.u32 %v7634_v41, %v6885_v54 }
 0x7dd   : > { %3239 = vmatmul.bf16.gmra.mxu3 %v14002_v31  ;;  %4178 = vmatpush.bf16.msra.mxu1 %v6964_v3  ;;  %v7638_v3 = vld [vmem:[%s13394_s8 + $0x124] sm:$0xf] }
 0x7de   : > { %4229 = vmatpush.bf16.msra.mxu3 %v6808_v22  ;;  %v6968_v22 = vor.u32 %v7654_v29, %v6965_v16  ;;  %v7640_v29 = vld [vmem:[%s13394_s8 + $0x12c] sm:$0xf0]  ;;  %v6901_v16 = vld [vmem:[%s13394_s8 + $0x130] sm:$0xf0] }
 0x7df   : > { %v11053_v62 = vpop.f32.mrf.mxu2 }
 0x7e0   : > { %14006 = vst [vmem:[#allocation74_spill] sm:$0xff] %v11053_v62  ;;  %4276 = vmatpush.bf16.msra.mxu0 %v6968_v22 }
 0x7e2   : > { %4230 = vmatpush.bf16.msra.mxu3 %v6792_v8  ;;  %v7652_v8 = vld [vmem:[%s13394_s8 + $0x18c] sm:$0xf0] }
 0x7e3   : > { %v6948_v30 = vor.u32 %v7652_v8, %v6947_v33 }
 0x7e5   : > { %4179 = vmatpush.bf16.msra.mxu1 %v6948_v30  ;;  %v6900_v30 = vor.u32 %v7640_v29, %v6899_v49 }
 0x7e6   : > { %4361 = vmatmul.bf16.gmra.mxu2 %v14004_v43  ;;  %4231 = vmatpush.bf16.msra.mxu3 %v6776_v5  ;;  %v6949_v5 = vld [vmem:[%s13394_s8 + $0x190] sm:$0xf0] }
 0x7e7   : > { %v11056_v50 = vpop.f32.mrf.mxu2  ;;  %v6952_v25 = vor.u32 %v7650_v27, %v6949_v5 }
 0x7e8   : > { %14007 = vst [vmem:[#allocation45_spill] sm:$0xff] %v11056_v50 }
 0x7e9   : > { %4277 = vmatpush.bf16.msra.mxu0 %v6952_v25  ;;  %4180 = vmatpush.bf16.msra.mxu1 %v6932_v42  ;;  %v7636_v42 = vld [vmem:[%s13394_s8 + $0x10c] sm:$0xf0] }
 0x7ea   : > { %4232 = vmatpush.bf16.msra.mxu3 %v6760_v55 }
 0x7eb   : > { %3293 = vmatmul.bf16.gmra.mxu0 %v14005_v36 }
 0x7ed   : > { %3244 = vmatmul.bf16.gmra.mxu3 %v14005_v36  ;;  %4278 = vmatpush.bf16.msra.mxu0 %v6936_v61  ;;  %v6884_v61 = vor.u32 %v7636_v42, %v6883_v20 }
 0x7ee   : > { %4181 = vmatpush.bf16.msra.mxu1 %v6916_v6 }
 0x7f1   : > { %4279 = vmatpush.bf16.msra.mxu0 %v6920_v0 }
 0x7f2   : > { %4182 = vmatpush.bf16.msra.mxu1 %v6900_v30 }
 0x7f6   : > { %4366 = vmatmul.bf16.gmra.mxu2 %v14008_v11  ;;  %4183 = vmatpush.bf16.msra.mxu1 %v6884_v61 }
 0x7fb   : > { %3298 = vmatmul.bf16.gmra.mxu0 %v14009_v35 }
 0x7fd   : > { %3249 = vmatmul.bf16.gmra.mxu3 %v14009_v35 }
 0x80b   : > { %3303 = vmatmul.bf16.gmra.mxu0 %v14010_v40 }
 0x80d   : > { %3254 = vmatmul.bf16.gmra.mxu3 %v14010_v40 }
 0x81b   : > { %3308 = vmatmul.bf16.gmra.mxu0 %v14011_v58 }
 0x81d   : > { %3259 = vmatmul.bf16.gmra.mxu3 %v14011_v58 }
 0x82b   : > { %3313 = vmatmul.bf16.gmra.mxu0 %v14012_v56 }
 0x82d   : > { %3264 = vmatmul.bf16.gmra.mxu3 %v14012_v56 }
 0x83b   : > { %3318 = vmatmul.bf16.gmra.mxu0 %v14013_v18 }
 0x83d   : > { %3269 = vmatmul.bf16.gmra.mxu3 %v14013_v18 }
 0x848   : > { %v3284_v7 = vpop.f32.mrf.mxu0 }
 0x849   : > { %v3324_v55 = vadd.f32 1e-30, %v3284_v7  ;;  %v8276_v7 = vld [vmem:[%s13393_s7] sm:$0x3f] }
 0x84a   : > { %v11205_v25 = vperm.slane %v8276_v7, 3  ;;  %v11207_v46 = vperm.slane %v8276_v7, 4  ;;  %v11223_v39 = vperm.slane %v8276_v7, 5 }
 0x84b   : > { %8114 = vrcp.f32 %v3324_v55  ;;  %v6904_v55 = vor.u32 %v7638_v3, %v6901_v16 }
 0x84d   : > { %4233 = vmatmul.bf16.vlgmr.msra.gmra.mxu3 %v14014_v13  ;;  %4280 = vmatpush.bf16.msra.mxu0 %v6904_v55 }
 0x850   : > { %v3235_v22 = vpop.f32.mrf.mxu3  ;;  %v3286_v33 = vpop.f32.mrf.mxu0 }
 0x851   : > { %v8115_v8 = vpop.eup %8114  ;;  %v3325_v27 = vadd.f32 1e-30, %v3286_v33  ;;  %4281 = vmatpush.bf16.msra.mxu0 %v6888_v2  ;;  %v14015_v33 = vld [vmem:[#allocation56_spill] sm:$0xff] }
 0x852   : > { %v3356_v5 = vmul.f32 %v8115_v8, %v3235_v22 }
 0x853   : > { %8116 = vrcp.f32 %v3325_v27 }
 0x854   : > { %v3372_v37 = vadd.f32 %v3356_v5, %v10778_v38 }
 0x856   : > { %v3389_v38 = vadd.f32 %v11205_v25, %v3372_v37 }
 0x858   : > { %v3406_v6 = vmul.f32 %v11207_v46, %v3389_v38  ;;  %v3237_v4 = vpop.f32.mrf.mxu3  ;;  %v3289_v0 = vpop.f32.mrf.mxu0 }
 0x859   : > { %v8117_v49 = vpop.eup %8116  ;;  %v3326_v29 = vadd.f32 1e-30, %v3289_v0 }
 0x85a   : > { %v3423_v3 = vadd.f32 %v11223_v39, %v3406_v6  ;;  %v3357_v16 = vmul.f32 %v8117_v49, %v3237_v4 }
 0x85b   : > { %8118 = vrcp.f32 %v3326_v29 }
 0x85c   : > { %v3373_v22 = vadd.f32 %v3357_v16, %v13992_v23  ;;  %v3439_v8 = vmul.f32 0.2, %v3423_v3 }
 0x85d   : > { %4238 = vmatmul.bf16.gmra.mxu3 %v14015_v33 }
 0x85e   : > { %v3390_v27 = vadd.f32 %v11205_v25, %v3373_v22  ;;  %v3455_v20 = vmax.f32 %v3423_v3, %v3439_v8 }
 0x860   : > { %v3407_v30 = vmul.f32 %v11207_v46, %v3390_v27  ;;  %v3240_v5 = vpop.f32.mrf.mxu3  ;;  %v3291_v7 = vpop.f32.mrf.mxu0  ;;  %v3471_v23 = vpack.c.bf16 %v3455_v20, %v3455_v20 }
 0x861   : > { %v8119_v55 = vpop.eup %8118  ;;  %v3327_v37 = vadd.f32 1e-30, %v3291_v7 }
 0x862   : > { %v3424_v42 = vadd.f32 %v11223_v39, %v3407_v30  ;;  %v3358_v41 = vmul.f32 %v8119_v55, %v3240_v5  ;;  %v3519_v22 = vunpack.c.l.b16 %v3471_v23 }
 0x863   : > { %8120 = vrcp.f32 %v3327_v37 }
 0x864   : > { %v3440_v61 = vmul.f32 0.2, %v3424_v42  ;;  %v3374_v54 = vadd.f32 %v3358_v41, %v10807_v15 }
 0x866   : > { %v3456_v38 = vmax.f32 %v3424_v42, %v3440_v61  ;;  %v3391_v2 = vadd.f32 %v11205_v25, %v3374_v54 }
 0x868   : > { %v3472_v6 = vpack.c.bf16 %v3456_v38, %v3456_v38  ;;  %v3408_v4 = vmul.f32 %v11207_v46, %v3391_v2  ;;  %v3242_v0 = vpop.f32.mrf.mxu3  ;;  %v3294_v49 = vpop.f32.mrf.mxu0 }
 0x869   : > { %v8121_v29 = vpop.eup %8120  ;;  %v3328_v16 = vadd.f32 1e-30, %v3294_v49 }
 0x86a   : > { %v3520_v3 = vunpack.c.l.b16 %v3472_v6  ;;  %v3425_v8 = vadd.f32 %v11223_v39, %v3408_v4  ;;  %v3359_v27 = vmul.f32 %v8121_v29, %v3242_v0 }
 0x86b   : > { %8122 = vrcp.f32 %v3328_v16 }
 0x86c   : > { %v3375_v30 = vadd.f32 %v3359_v27, %v10941_v28  ;;  %v11237_v15 = vpack.c.b16 %v3520_v3, %v3519_v22  ;;  %v3441_v5 = vmul.f32 0.2, %v3425_v8 }
 0x86d   : > { %4243 = vmatmul.bf16.gmra.mxu3 %v10759_v44 }
 0x86e   : > { %v3392_v7 = vadd.f32 %v11205_v25, %v3375_v30  ;;  %4184 = vmatmul.bf16.vlgmr.msra.gmra.mxu1 %v11237_v15  ;;  %4282 = vmatmul.bf16.vlgmr.msra.gmra.mxu0 %v11237_v15  ;;  %v3457_v54 = vmax.f32 %v3425_v8, %v3441_v5 }
 0x870   : > { %v3409_v55 = vmul.f32 %v11207_v46, %v3392_v7  ;;  %v3245_v37 = vpop.f32.mrf.mxu3  ;;  %v3296_v20 = vpop.f32.mrf.mxu0  ;;  %v3473_v4 = vpack.c.bf16 %v3457_v54, %v3457_v54 }
 0x871   : > { %v8123_v42 = vpop.eup %8122  ;;  %v3329_v41 = vadd.f32 1e-30, %v3296_v20 }
 0x872   : > { %v3426_v61 = vadd.f32 %v11223_v39, %v3409_v55  ;;  %v3360_v28 = vmul.f32 %v8123_v42, %v3245_v37  ;;  %v3521_v7 = vunpack.c.l.b16 %v3473_v4 }
 0x873   : > { %8124 = vrcp.f32 %v3329_v41 }
 0x874   : > { %v3442_v23 = vmul.f32 0.2, %v3426_v61  ;;  %v3376_v38 = vadd.f32 %v3360_v28, %v10780_v17 }
 0x876   : > { %v3393_v2 = vadd.f32 %v11205_v25, %v3376_v38  ;;  %v3458_v6 = vmax.f32 %v3426_v61, %v3442_v23 }
 0x878   : > { %v3410_v0 = vmul.f32 %v11207_v46, %v3393_v2  ;;  %v3247_v49 = vpop.f32.mrf.mxu3  ;;  %v3299_v29 = vpop.f32.mrf.mxu0  ;;  %v3474_v16 = vpack.c.bf16 %v3458_v6, %v3458_v6 }
 0x879   : > { %v8125_v22 = vpop.eup %8124  ;;  %v3330_v3 = vadd.f32 1e-30, %v3299_v29 }
 0x87a   : > { %v3427_v27 = vadd.f32 %v11223_v39, %v3410_v0  ;;  %v3361_v30 = vmul.f32 %v8125_v22, %v3247_v49  ;;  %v3522_v8 = vunpack.c.l.b16 %v3474_v16 }
 0x87b   : > { %8126 = vrcp.f32 %v3330_v3 }
 0x87c   : > { %v3377_v5 = vadd.f32 %v3361_v30, %v10927_v51  ;;  %v11250_v17 = vpack.c.b16 %v3522_v8, %v3521_v7  ;;  %v3443_v55 = vmul.f32 0.2, %v3427_v27 }
 0x87d   : > { %4248 = vmatmul.bf16.gmra.mxu3 %v13994_v32 }
 0x87e   : > { %v3394_v37 = vadd.f32 %v11205_v25, %v3377_v5  ;;  %4189 = vmatmul.bf16.gmra.mxu1 %v11250_v17  ;;  %4287 = vmatmul.bf16.gmra.mxu0 %v11250_v17  ;;  %v3459_v23 = vmax.f32 %v3427_v27, %v3443_v55 }
 0x880   : > { %v3411_v20 = vmul.f32 %v11207_v46, %v3394_v37  ;;  %v3250_v42 = vpop.f32.mrf.mxu3  ;;  %v3301_v41 = vpop.f32.mrf.mxu0  ;;  %v3475_v0 = vpack.c.bf16 %v3459_v23, %v3459_v23 }
 0x881   : > { %v8127_v61 = vpop.eup %8126  ;;  %v3331_v28 = vadd.f32 1e-30, %v3301_v41 }
 0x882   : > { %v3428_v54 = vadd.f32 %v11223_v39, %v3411_v20  ;;  %v3362_v51 = vmul.f32 %v8127_v61, %v3250_v42  ;;  %v3523_v5 = vunpack.c.l.b16 %v3475_v0 }
 0x883   : > { %8128 = vrcp.f32 %v3331_v28 }
 0x884   : > { %v3444_v38 = vmul.f32 0.2, %v3428_v54  ;;  %v3378_v2 = vadd.f32 %v3362_v51, %v13951_v52 }
 0x886   : > { %v3395_v6 = vadd.f32 %v11205_v25, %v3378_v2  ;;  %v3460_v4 = vmax.f32 %v3428_v54, %v3444_v38 }
 0x888   : > { %v3412_v49 = vmul.f32 %v11207_v46, %v3395_v6  ;;  %v3252_v29 = vpop.f32.mrf.mxu3  ;;  %v3304_v16 = vpop.f32.mrf.mxu0  ;;  %v3476_v22 = vpack.c.bf16 %v3460_v4, %v3460_v4  ;;  %v7631_v6 = vld [vmem:[%s13394_s8 + $0xec] sm:$0xf]  ;;  %v6877_v4 = vld [vmem:[%s13394_s8 + $0xf8] sm:$0xf0] }
 0x889   : > { %v8129_v3 = vpop.eup %8128  ;;  %v3332_v30 = vadd.f32 1e-30, %v3304_v16  ;;  %v6880_v0 = vor.u32 %v7631_v6, %v6877_v4 }
 0x88a   : > { %v3429_v7 = vadd.f32 %v11223_v39, %v3412_v49  ;;  %v3363_v8 = vmul.f32 %v8129_v3, %v3252_v29  ;;  %v3524_v27 = vunpack.c.l.b16 %v3476_v22 }
 0x88b   : > { %8130 = vrcp.f32 %v3332_v30  ;;  %4421 = vmatpush.bf16.msrb.mxu3 %v6880_v0 }
 0x88c   : > { %v3379_v55 = vadd.f32 %v3363_v8, %v10937_v45  ;;  %v11263_v52 = vpack.c.b16 %v3524_v27, %v3523_v5  ;;  %v3445_v37 = vmul.f32 0.2, %v3429_v7 }
 0x88d   : > { %4253 = vmatmul.bf16.gmra.mxu3 %v13997_v59 }
 0x88e   : > { %v3396_v20 = vadd.f32 %v11205_v25, %v3379_v55  ;;  %4194 = vmatmul.bf16.gmra.mxu1 %v11263_v52  ;;  %4292 = vmatmul.bf16.gmra.mxu0 %v11263_v52  ;;  %v3461_v23 = vmax.f32 %v3429_v7, %v3445_v37 }
 0x890   : > { %v3413_v42 = vmul.f32 %v11207_v46, %v3396_v20  ;;  %v3255_v41 = vpop.f32.mrf.mxu3  ;;  %v3306_v61 = vpop.f32.mrf.mxu0  ;;  %v3477_v16 = vpack.c.bf16 %v3461_v23, %v3461_v23 }
 0x891   : > { %v8131_v28 = vpop.eup %8130  ;;  %v3333_v54 = vadd.f32 1e-30, %v3306_v61  ;;  %v6861_v61 = vld [vmem:[%s13394_s8 + $0xd8] sm:$0xf0] }
 0x892   : > { %v3430_v51 = vadd.f32 %v11223_v39, %v3413_v42  ;;  %v3364_v45 = vmul.f32 %v8131_v28, %v3255_v41  ;;  %v3525_v55 = vunpack.c.l.b16 %v3477_v16  ;;  %v7627_v41 = vld [vmem:[%s13394_s8 + $0xcc] sm:$0xf] }
 0x893   : > { %8132 = vrcp.f32 %v3333_v54  ;;  %v6864_v28 = vor.u32 %v7627_v41, %v6861_v61  ;;  %v7623_v54 = vld [vmem:[%s13394_s8 + $0xac] sm:$0xf] }
 0x894   : > { %v3446_v38 = vmul.f32 0.2, %v3430_v51  ;;  %v3380_v2 = vadd.f32 %v3364_v45, %v10943_v10 }
 0x895   : > { %4422 = vmatpush.bf16.msrb.mxu3 %v6864_v28 }
 0x896   : > { %v3397_v49 = vadd.f32 %v11205_v25, %v3380_v2  ;;  %v3462_v29 = vmax.f32 %v3430_v51, %v3446_v38 }
 0x898   : > { %v3414_v22 = vmul.f32 %v11207_v46, %v3397_v49  ;;  %v3257_v3 = vpop.f32.mrf.mxu3  ;;  %v3309_v30 = vpop.f32.mrf.mxu0  ;;  %v3478_v7 = vpack.c.bf16 %v3462_v29, %v3462_v29 }
 0x899   : > { %v8133_v10 = vpop.eup %8132  ;;  %v3334_v8 = vadd.f32 1e-30, %v3309_v30  ;;  %v7619_v30 = vld [vmem:[%s13394_s8 + $0x8c] sm:$0xf] }
 0x89a   : > { %v3431_v5 = vadd.f32 %v11223_v39, %v3414_v22  ;;  %v3365_v27 = vmul.f32 %v8133_v10, %v3257_v3  ;;  %v3526_v37 = vunpack.c.l.b16 %v3478_v7  ;;  %v6829_v7 = vld [vmem:[%s13394_s8 + $0x98] sm:$0xf0] }
 0x89b   : > { %8134 = vrcp.f32 %v3334_v8  ;;  %v6832_v10 = vor.u32 %v7619_v30, %v6829_v7  ;;  %v7615_v8 = vld [vmem:[%s13394_s8 + $0x6c] sm:$0xf] }
 0x89c   : > { %v3381_v20 = vadd.f32 %v3365_v27, %v13981_v26  ;;  %v11282_v42 = vpack.c.b16 %v3526_v37, %v3525_v55  ;;  %v6845_v26 = vld [vmem:[%s13394_s8 + $0xb8] sm:$0xf0]  ;;  %v3447_v51 = vmul.f32 0.2, %v3431_v5 }
 0x89d   : > { %4258 = vmatmul.bf16.gmra.mxu3 %v14000_v48  ;;  %v6848_v23 = vor.u32 %v7623_v54, %v6845_v26 }
 0x89e   : > { %v3398_v45 = vadd.f32 %v11205_v25, %v3381_v20  ;;  %4199 = vmatmul.bf16.gmra.mxu1 %v11282_v42  ;;  %4297 = vmatmul.bf16.gmra.mxu0 %v11282_v42  ;;  %v3463_v16 = vmax.f32 %v3431_v5, %v3447_v51  ;;  %v6813_v5 = vld [vmem:[%s13394_s8 + $0x78] sm:$0xf0] }
 0x89f   : > { %4423 = vmatpush.bf16.msrb.mxu3 %v6848_v23  ;;  %v6816_v37 = vor.u32 %v7615_v8, %v6813_v5 }
 0x8a0   : > { %v3415_v38 = vmul.f32 %v11207_v46, %v3398_v45  ;;  %v3260_v2 = vpop.f32.mrf.mxu3  ;;  %v3311_v6 = vpop.f32.mrf.mxu0  ;;  %v3479_v55 = vpack.c.bf16 %v3463_v16, %v3463_v16 }
 0x8a1   : > { %v8135_v4 = vpop.eup %8134  ;;  %v3335_v0 = vadd.f32 1e-30, %v3311_v6 }
 0x8a2   : > { %v3432_v49 = vadd.f32 %v11223_v39, %v3415_v38  ;;  %v3366_v29 = vmul.f32 %v8135_v4, %v3260_v2  ;;  %v3527_v23 = vunpack.c.l.b16 %v3479_v55  ;;  %v7611_v4 = vld [vmem:[%s13394_s8 + $0x4c] sm:$0xf] }
 0x8a3   : > { %8136 = vrcp.f32 %v3335_v0  ;;  %4424 = vmatpush.bf16.msrb.mxu3 %v6832_v10  ;;  %v6797_v0 = vld [vmem:[%s13394_s8 + $0x58] sm:$0xf0] }
 0x8a4   : > { %v3448_v22 = vmul.f32 0.2, %v3432_v49  ;;  %v3382_v3 = vadd.f32 %v3366_v29, %v13982_v9  ;;  %v7607_v29 = vld [vmem:[%s13394_s8 + $0x2c] sm:$0xf] }
 0x8a6   : > { %v3399_v27 = vadd.f32 %v11205_v25, %v3382_v3  ;;  %v3464_v9 = vmax.f32 %v3432_v49, %v3448_v22  ;;  %v6800_v49 = vor.u32 %v7611_v4, %v6797_v0  ;;  %v6987_v4 = vld [vmem:[%s13394_s8 + $0x1c8] sm:$0xf]  ;;  %v7661_v0 = vld [vmem:[%s13394_s8 + $0x1d4] sm:$0xf0] }
 0x8a7   : > { %4425 = vmatpush.bf16.msrb.mxu3 %v6816_v37 }
 0x8a8   : > { %v3416_v20 = vmul.f32 %v11207_v46, %v3399_v27  ;;  %v3262_v41 = vpop.f32.mrf.mxu3  ;;  %v3314_v61 = vpop.f32.mrf.mxu0  ;;  %v3480_v28 = vpack.c.bf16 %v3464_v9, %v3464_v9 }
 0x8a9   : > { %v8137_v54 = vpop.eup %8136  ;;  %v3336_v26 = vadd.f32 1e-30, %v3314_v61  ;;  %v6765_v61 = vld [vmem:[%s13394_s8 + $0x18] sm:$0xf0] }
 0x8aa   : > { %v3433_v51 = vadd.f32 %v11223_v39, %v3416_v20  ;;  %v3367_v45 = vmul.f32 %v8137_v54, %v3262_v41  ;;  %v3528_v38 = vunpack.c.l.b16 %v3480_v28  ;;  %v7603_v41 = vld [vmem:[%s13394_s8 + $0xc] sm:$0xf]  ;;  %v7003_v54 = vld [vmem:[%s13394_s8 + $0x1e8] sm:$0xf] }
 0x8ab   : > { %8138 = vrcp.f32 %v3336_v26  ;;  %4426 = vmatpush.bf16.msrb.mxu3 %v6800_v49  ;;  %v6768_v28 = vor.u32 %v7603_v41, %v6765_v61  ;;  %v7665_v26 = vld [vmem:[%s13394_s8 + $0x1f4] sm:$0xf0]  ;;  %v7655_v61 = vld [vmem:[%s13394_s8 + $0x1ac] sm:$0xf] }
 0x8ac   : > { %v3383_v2 = vadd.f32 %v3367_v45, %v10956_v47  ;;  %v11319_v6 = vpack.c.b16 %v3528_v38, %v3527_v23  ;;  %v6781_v47 = vld [vmem:[%s13394_s8 + $0x38] sm:$0xf0]  ;;  %v3449_v16 = vmul.f32 0.2, %v3433_v51  ;;  %v7004_v38 = vor.u32 %v7665_v26, %v7003_v54 }
 0x8ad   : > { %4263 = vmatmul.bf16.gmra.mxu3 %v14004_v43  ;;  %v6784_v3 = vor.u32 %v7607_v29, %v6781_v47  ;;  %v7659_v29 = vld [vmem:[%s13394_s8 + $0x1cc] sm:$0xf]  ;;  %v6989_v47 = vld [vmem:[%s13394_s8 + $0x1d8] sm:$0xf0] }
 0x8ae   : > { %v3400_v22 = vadd.f32 %v11205_v25, %v3383_v2  ;;  %4204 = vmatmul.bf16.gmra.mxu1 %v11319_v6  ;;  %4302 = vmatmul.bf16.gmra.mxu0 %v11319_v6  ;;  %v3465_v55 = vmax.f32 %v3433_v51, %v3449_v16  ;;  %v7005_v2 = vld [vmem:[%s13394_s8 + $0x1f8] sm:$0xf0] }
 0x8af   : > { %4427 = vmatpush.bf16.msrb.mxu3 %v6784_v3  ;;  %4372 = vmatpush.bf16.msrb.mxu1 %v7004_v38 }
 0x8b0   : > { %v3417_v30 = vmul.f32 %v11207_v46, %v3400_v22  ;;  %v3265_v7 = vpop.f32.mrf.mxu3  ;;  %v3316_v10 = vpop.f32.mrf.mxu0  ;;  %v3481_v23 = vpack.c.bf16 %v3465_v55, %v3465_v55 }
 0x8b1   : > { %v8139_v8 = vpop.eup %8138  ;;  %v3337_v5 = vadd.f32 1e-30, %v3316_v10 }
 0x8b2   : > { %v3434_v27 = vadd.f32 %v11223_v39, %v3417_v30  ;;  %v3368_v9 = vmul.f32 %v8139_v8, %v3265_v7  ;;  %v6988_v7 = vor.u32 %v7661_v0, %v6987_v4  ;;  %v6957_v4 = vld [vmem:[%s13394_s8 + $0x198] sm:$0xf0] }
 0x8b3   : > { %8140 = vrcp.f32 %v3337_v5  ;;  %4428 = vmatpush.bf16.msrb.mxu3 %v6768_v28  ;;  %v6992_v5 = vor.u32 %v7659_v29, %v6989_v47  ;;  %v6973_v28 = vld [vmem:[%s13394_s8 + $0x1b8] sm:$0xf0] }
 0x8b4   : > { %v3450_v37 = vmul.f32 0.2, %v3434_v27  ;;  %v3384_v20 = vadd.f32 %v3368_v9, %v13985_v63  ;;  %v7663_v63 = vld [vmem:[%s13394_s8 + $0x1ec] sm:$0xf]  ;;  %v7657_v9 = vld [vmem:[%s13394_s8 + $0x1b4] sm:$0xf0]  ;;  %4373 = vmatpush.bf16.msrb.mxu1 %v6988_v7 }
 0x8b5   : > { %v7008_v49 = vor.u32 %v7663_v63, %v7005_v2  ;;  %v7649_v7 = vld [vmem:[%s13394_s8 + $0x174] sm:$0xf0] }
 0x8b6   : > { %v3401_v51 = vadd.f32 %v11205_v25, %v3384_v20  ;;  %v3466_v45 = vmax.f32 %v3434_v27, %v3450_v37  ;;  %v6971_v27 = vld [vmem:[%s13394_s8 + $0x1a8] sm:$0xf]  ;;  %v3529_v20 = vunpack.c.l.b16 %v3481_v23  ;;  %v7653_v23 = vld [vmem:[%s13394_s8 + $0x194] sm:$0xf0] }
 0x8b7   : > { %4470 = vmatpush.bf16.msrb.mxu0 %v7008_v49  ;;  %v6972_v63 = vor.u32 %v7657_v9, %v6971_v27  ;;  %v7647_v27 = vld [vmem:[%s13394_s8 + $0x16c] sm:$0xf]  ;;  %v6941_v9 = vld [vmem:[%s13394_s8 + $0x178] sm:$0xf0] }
 0x8b8   : > { %v3418_v16 = vmul.f32 %v11207_v46, %v3401_v51  ;;  %v3267_v22 = vpop.f32.mrf.mxu3  ;;  %v3319_v3 = vpop.f32.mrf.mxu0  ;;  %v3482_v30 = vpack.c.bf16 %v3466_v45, %v3466_v45  ;;  %v6976_v51 = vor.u32 %v7655_v61, %v6973_v28  ;;  %v6955_v45 = vld [vmem:[%s13394_s8 + $0x188] sm:$0xf]  ;;  %v6944_v61 = vor.u32 %v7647_v27, %v6941_v9  ;;  %v7645_v28 = vld [vmem:[%s13394_s8 + $0x154] sm:$0xf0] }
 0x8b9   : > { %v8141_v10 = vpop.eup %8140  ;;  %v3338_v8 = vadd.f32 1e-30, %v3319_v3  ;;  %4374 = vmatpush.bf16.msrb.mxu1 %v6972_v63  ;;  %v6956_v47 = vor.u32 %v7653_v23, %v6955_v45  ;;  %v6925_v45 = vld [vmem:[%s13394_s8 + $0x158] sm:$0xf0] }
 0x8ba   : > { %v3435_v55 = vadd.f32 %v11223_v39, %v3418_v16  ;;  %v3369_v37 = vmul.f32 %v8141_v10, %v3267_v22  ;;  %v3530_v41 = vunpack.c.l.b16 %v3482_v30  ;;  %v6939_v30 = vld [vmem:[%s13394_s8 + $0x168] sm:$0xf] }
 0x8bb   : > { %8142 = vrcp.f32 %v3338_v8  ;;  %4471 = vmatpush.bf16.msrb.mxu0 %v6992_v5 }
 0x8bc   : > { %v3385_v54 = vadd.f32 %v3369_v37, %v13983_v19  ;;  %v11386_v26 = vpack.c.b16 %v3530_v41, %v3529_v20  ;;  %v3451_v38 = vmul.f32 0.2, %v3435_v55  ;;  %v7651_v19 = vld [vmem:[%s13394_s8 + $0x18c] sm:$0xf]  ;;  %v6940_v41 = vor.u32 %v7649_v7, %v6939_v30  ;;  %v6909_v7 = vld [vmem:[%s13394_s8 + $0x138] sm:$0xf0] }
 0x8bd   : > { %4268 = vmatmul.bf16.gmra.mxu3 %v14008_v11  ;;  %v6960_v3 = vor.u32 %v7651_v19, %v6957_v4  ;;  %4375 = vmatpush.bf16.msrb.mxu1 %v6956_v47  ;;  %v7639_v30 = vld [vmem:[%s13394_s8 + $0x12c] sm:$0xf] }
 0x8be   : > { %v3402_v2 = vadd.f32 %v11205_v25, %v3385_v54  ;;  %4209 = vmatmul.bf16.gmra.mxu1 %v11386_v26  ;;  %4307 = vmatmul.bf16.gmra.mxu0 %v11386_v26  ;;  %v3467_v5 = vmax.f32 %v3435_v55, %v3451_v38  ;;  %v6923_v55 = vld [vmem:[%s13394_s8 + $0x148] sm:$0xf]  ;;  %v6912_v9 = vor.u32 %v7639_v30, %v6909_v7 }
 0x8bf   : > { %4472 = vmatpush.bf16.msrb.mxu0 %v6976_v51  ;;  %v6924_v19 = vor.u32 %v7645_v28, %v6923_v55 }
 0x8c0   : > { %v3419_v0 = vmul.f32 %v11207_v46, %v3402_v2  ;;  %v3270_v49 = vpop.f32.mrf.mxu3  ;;  %v3321_v29 = vpop.f32.mrf.mxu0  ;;  %v3483_v51 = vpack.c.bf16 %v3467_v5, %v3467_v5 }
 0x8c1   : > { %v8143_v16 = vpop.eup %8142  ;;  %v3339_v22 = vadd.f32 1e-30, %v3321_v29  ;;  %4376 = vmatpush.bf16.msrb.mxu1 %v6940_v41  ;;  %v7641_v29 = vld [vmem:[%s13394_s8 + $0x134] sm:$0xf0] }
 0x8c2   : > { %v3436_v10 = vadd.f32 %v11223_v39, %v3419_v0  ;;  %v3370_v8 = vmul.f32 %v8143_v16, %v3270_v49  ;;  %v6907_v49 = vld [vmem:[%s13394_s8 + $0x128] sm:$0xf] }
 0x8c3   : > { %8144 = vrcp.f32 %v3339_v22  ;;  %4473 = vmatpush.bf16.msrb.mxu0 %v6960_v3  ;;  %v3531_v22 = vunpack.c.l.b16 %v3483_v51  ;;  %v6908_v5 = vor.u32 %v7641_v29, %v6907_v49 }
 0x8c4   : > { %v3452_v37 = vmul.f32 0.2, %v3436_v10  ;;  %v3386_v20 = vadd.f32 %v3370_v8, %v13986_v14  ;;  %v7643_v14 = vld [vmem:[%s13394_s8 + $0x14c] sm:$0xf] }
 0x8c5   : > { %v6928_v0 = vor.u32 %v7643_v14, %v6925_v45  ;;  %4377 = vmatpush.bf16.msrb.mxu1 %v6924_v19 }
 0x8c6   : > { %v3403_v54 = vadd.f32 %v11205_v25, %v3386_v20  ;;  %v3468_v63 = vmax.f32 %v3436_v10, %v3452_v37  ;;  %v6891_v20 = vld [vmem:[%s13394_s8 + $0x108] sm:$0xf] }
 0x8c7   : > { %4474 = vmatpush.bf16.msrb.mxu0 %v6944_v61 }
 0x8c8   : > { %v3420_v23 = vmul.f32 %v11207_v46, %v3403_v54  ;;  %v3272_v38 = vpop.f32.mrf.mxu3  ;;  %v3484_v2 = vpack.c.bf16 %v3468_v63, %v3468_v63 }
 0x8c9   : > { %v8145_v4 = vpop.eup %8144  ;;  %4378 = vmatpush.bf16.msrb.mxu1 %v6908_v5 }
 0x8ca   : > { %v3437_v47 = vadd.f32 %v11223_v39, %v3420_v23  ;;  %v3371_v16 = vmul.f32 %v8145_v4, %v3272_v38  ;;  %v3532_v3 = vunpack.c.l.b16 %v3484_v2 }
 0x8cb   : > { %4475 = vmatpush.bf16.msrb.mxu0 %v6928_v0 }
 0x8cc   : > { %v3387_v10 = vadd.f32 %v3371_v16, %v10970_v60  ;;  %v11447_v8 = vpack.c.b16 %v3532_v3, %v3531_v22  ;;  %v3453_v27 = vmul.f32 0.2, %v3437_v47  ;;  %v7637_v60 = vld [vmem:[%s13394_s8 + $0x114] sm:$0xf0] }
 0x8cd   : > { %4429 = vmatmul.bf16.vlgmr.msrb.gmra.mxu3 %v14014_v13  ;;  %v7635_v13 = vld [vmem:[%s13394_s8 + $0x10c] sm:$0xf]  ;;  %v6892_v55 = vor.u32 %v7637_v60, %v6891_v20 }
 0x8ce   : > { %v3404_v37 = vadd.f32 %v11205_v25, %v3387_v10  ;;  %4214 = vmatmul.bf16.gmra.mxu1 %v11447_v8  ;;  %4312 = vmatmul.bf16.gmra.mxu0 %v11447_v8  ;;  %v6893_v25 = vld [vmem:[%s13394_s8 + $0x118] sm:$0xf0]  ;;  %v3469_v63 = vmax.f32 %v3437_v47, %v3453_v27  ;;  %v11485_v10 = vpop.f32.mrf.mxu2 }
 0x8cf   : > { %4476 = vmatpush.bf16.msrb.mxu0 %v6912_v9  ;;  %v6896_v28 = vor.u32 %v7635_v13, %v6893_v25  ;;  %4379 = vmatpush.bf16.msrb.mxu1 %v6892_v55  ;;  %14021 = vst [vmem:[#allocation58_spill] sm:$0xff] %v11485_v10 }
 0x8d0   : > { %v3421_v41 = vmul.f32 %v11207_v46, %v3404_v37  ;;  %v4234_v61 = vpop.f32.mrf.mxu3  ;;  %v3485_v45 = vpack.c.bf16 %v3469_v63, %v3469_v63 }
 0x8d2   : > { %v3438_v54 = vadd.f32 %v11223_v39, %v3421_v41  ;;  %v3533_v2 = vunpack.c.l.b16 %v3485_v45 }
 0x8d3   : > { %4477 = vmatpush.bf16.msrb.mxu0 %v6896_v28 }
 0x8d4   : > { %v3454_v51 = vmul.f32 0.2, %v3438_v54 }
 0x8d6   : > { %v3470_v14 = vmax.f32 %v3438_v54, %v3454_v51  ;;  %v11496_v37 = vpop.f32.mrf.mxu2 }
 0x8d7   : > { %14025 = vst [vmem:[#allocation67_spill] sm:$0xff] %v11496_v37 }
 0x8d8   : > { %v4236_v23 = vpop.f32.mrf.mxu3  ;;  %v3486_v38 = vpack.c.bf16 %v3470_v14, %v3470_v14 }
 0x8da   : > { %v3534_v19 = vunpack.c.l.b16 %v3486_v38 }
 0x8dc   : > { %v11467_v4 = vpack.c.b16 %v3534_v19, %v3533_v2 }
 0x8dd   : > { %4434 = vmatmul.bf16.gmra.mxu3 %v14015_v33 }
 0x8de   : > { %4219 = vmatmul.bf16.gmra.mxu1 %v11467_v4  ;;  %4317 = vmatmul.bf16.gmra.mxu0 %v11467_v4 }
 0x8e0   : > { %v4239_v46 = vpop.f32.mrf.mxu3 }
 0x8e8   : > { %v4241_v39 = vpop.f32.mrf.mxu3 }
 0x8eb   : > { %v11472_v0 = vpop.f32.mrf.mxu1  ;;  %v4283_v49 = vpop.f32.mrf.mxu0 }
 0x8ec   : > { %14016 = vst [vmem:[#allocation57_spill] sm:$0xff] %v11472_v0  ;;  %v11474_v29 = vadd.f32 %v4283_v49, %v4234_v61 }
 0x8ed   : > { %4439 = vmatmul.bf16.gmra.mxu3 %v10759_v44 }
 0x8ee   : > { %14017 = vst [vmem:[#allocation37_spill] sm:$0xff] %v11474_v29  ;;  %4380 = vmatmul.bf16.vlgmr.msrb.gmra.mxu1 %v11237_v15  ;;  %4478 = vmatmul.bf16.vlgmr.msrb.gmra.mxu0 %v11237_v15 }
 0x8f0   : > { %v4244_v47 = vpop.f32.mrf.mxu3 }
 0x8f3   : > { %v11479_v16 = vpop.f32.mrf.mxu1  ;;  %v4285_v33 = vpop.f32.mrf.mxu0 }
 0x8f4   : > { %14018 = vst [vmem:[#allocation36_spill] sm:$0xff] %v11479_v16  ;;  %v11481_v22 = vadd.f32 %v4285_v33, %v4236_v23  ;;  %v14061_v16 = vld [vmem:[#allocation30_spill] sm:$0xff] }
 0x8f6   : > { %14019 = vst [vmem:[#allocation39_spill] sm:$0xff] %v11481_v22 }
 0x8f8   : > { %v4246_v3 = vpop.f32.mrf.mxu3 }
 0x8fb   : > { %v11483_v30 = vpop.f32.mrf.mxu1  ;;  %v4288_v7 = vpop.f32.mrf.mxu0 }
 0x8fc   : > { %14020 = vst [vmem:[#allocation24_spill] sm:$0xff] %v11483_v30  ;;  %v11487_v5 = vadd.f32 %v4288_v7, %v4239_v46  ;;  %v14100_v30 = vld [vmem:[#allocation8_spill] sm:$0xff] }
 0x8fd   : > { %4444 = vmatmul.bf16.gmra.mxu3 %v13994_v32  ;;  %v11505_v32 = vpop.f32.mrf.mxu2  ;;  %v3589_v12 = vmul.f32 %v14061_v16, %v14100_v30 }
 0x8fe   : > { %14022 = vst [vmem:[#allocation63_spill] sm:$0xff] %v11487_v5  ;;  %4385 = vmatmul.bf16.gmra.mxu1 %v11250_v17  ;;  %4483 = vmatmul.bf16.gmra.mxu0 %v11250_v17 }
 0x8ff   : > { %14028 = vst [vmem:[#allocation90_spill] sm:$0xff] %v11505_v32 }
 0x900   : > { %v4249_v44 = vpop.f32.mrf.mxu3 }
 0x903   : > { %v11492_v15 = vpop.f32.mrf.mxu1  ;;  %v4290_v27 = vpop.f32.mrf.mxu0 }
 0x904   : > { %14023 = vst [vmem:[#allocation50_spill] sm:$0xff] %v11492_v15  ;;  %v11494_v9 = vadd.f32 %v4290_v27, %v4241_v39 }
 0x905   : > { %v11513_v54 = vpop.f32.mrf.mxu2 }
 0x906   : > { %14024 = vst [vmem:[#allocation51_spill] sm:$0xff] %v11494_v9 }
 0x907   : > { %14032 = vst [vmem:[#allocation27_spill] sm:$0xff] %v11513_v54 }
 0x908   : > { %v4251_v20 = vpop.f32.mrf.mxu3 }
 0x90b   : > { %v11498_v60 = vpop.f32.mrf.mxu1  ;;  %v4293_v13 = vpop.f32.mrf.mxu0 }
 0x90c   : > { %14026 = vst [vmem:[#allocation64_spill] sm:$0xff] %v11498_v60  ;;  %v11500_v25 = vadd.f32 %v4293_v13, %v4244_v47  ;;  %v14106_v60 = vld [vmem:[#allocation15_spill] sm:$0xff] }
 0x90d   : > { %4449 = vmatmul.bf16.gmra.mxu3 %v13997_v59  ;;  %v11524_v23 = vpop.f32.mrf.mxu2  ;;  %v3593_v53 = vmul.f32 %v14061_v16, %v14106_v60 }
 0x90e   : > { %14027 = vst [vmem:[#allocation52_spill] sm:$0xff] %v11500_v25  ;;  %4390 = vmatmul.bf16.gmra.mxu1 %v11263_v52  ;;  %4488 = vmatmul.bf16.gmra.mxu0 %v11263_v52 }
 0x90f   : > { %14036 = vst [vmem:[#allocation78_spill] sm:$0xff] %v11524_v23 }
 0x910   : > { %v4254_v17 = vpop.f32.mrf.mxu3 }
 0x913   : > { %v11507_v41 = vpop.f32.mrf.mxu1  ;;  %v4295_v61 = vpop.f32.mrf.mxu0 }
 0x914   : > { %14029 = vst [vmem:[#allocation68_spill] sm:$0xff] %v11507_v41  ;;  %v11509_v55 = vadd.f32 %v4295_v61, %v4246_v3 }
 0x916   : > { %14030 = vst [vmem:[#allocation72_spill] sm:$0xff] %v11509_v55  ;;  %v14097_v55 = vld [vmem:[#allocation13_spill] sm:$0xff] }
 0x917   : > { %v3585_v25 = vmul.f32 %v14061_v16, %v14097_v55 }
 0x918   : > { %v11511_v28 = vpop.f32.mrf.mxu3 }
 0x919   : > { %14031 = vst [vmem:[#allocation75_spill] sm:$0xff] %v11511_v28 }
 0x91b   : > { %v11515_v63 = vpop.f32.mrf.mxu1  ;;  %v4298_v51 = vpop.f32.mrf.mxu0 }
 0x91c   : > { %14033 = vst [vmem:[#allocation46_spill] sm:$0xff] %v11515_v63  ;;  %v11517_v59 = vadd.f32 %v4298_v51, %v4249_v44 }
 0x91d   : > { %4454 = vmatmul.bf16.gmra.mxu3 %v14000_v48  ;;  %v11535_v48 = vpop.f32.mrf.mxu2 }
 0x91e   : > { %14034 = vst [vmem:[#allocation55_spill] sm:$0xff] %v11517_v59  ;;  %4395 = vmatmul.bf16.gmra.mxu1 %v11282_v42  ;;  %4493 = vmatmul.bf16.gmra.mxu0 %v11282_v42 }
 0x91f   : > { %14041 = vst [vmem:[#allocation56_spill] sm:$0xff] %v11535_v48 }
 0x920   : > { %v4259_v52 = vpop.f32.mrf.mxu3 }
 0x923   : > { %v11522_v14 = vpop.f32.mrf.mxu1  ;;  %v4300_v45 = vpop.f32.mrf.mxu0 }
 0x924   : > { %14035 = vst [vmem:[#allocation62_spill] sm:$0xff] %v11522_v14  ;;  %v11526_v38 = vadd.f32 %v4300_v45, %v4251_v20 }
 0x925   : > { %v11543_v33 = vpop.f32.mrf.mxu2 }
 0x926   : > { %14037 = vst [vmem:[#allocation61_spill] sm:$0xff] %v11526_v38 }
 0x927   : > { %14044 = vst [vmem:[#allocation98_spill] sm:$0xff] %v11543_v33  ;;  %v14067_v33 = vld [vmem:[#allocation10_spill] sm:$0xff] }
 0x928   : > { %v11528_v2 = vpop.f32.mrf.mxu3 }
 0x929   : > { %14038 = vst [vmem:[#allocation81_spill] sm:$0xff] %v11528_v2 }
 0x92b   : > { %v11530_v19 = vpop.f32.mrf.mxu1  ;;  %v4303_v46 = vpop.f32.mrf.mxu0 }
 0x92c   : > { %14039 = vst [vmem:[#allocation69_spill] sm:$0xff] %v11530_v19  ;;  %v11532_v39 = vadd.f32 %v4303_v46, %v4254_v17  ;;  %v14099_v19 = vld [vmem:[#allocation14_spill] sm:$0xff] }
 0x92d   : > { %4459 = vmatmul.bf16.gmra.mxu3 %v14004_v43 }
 0x92e   : > { %14040 = vst [vmem:[#allocation89_spill] sm:$0xff] %v11532_v39  ;;  %4400 = vmatmul.bf16.gmra.mxu1 %v11319_v6  ;;  %4498 = vmatmul.bf16.gmra.mxu0 %v11319_v6  ;;  %v11554_v6 = vpop.f32.mrf.mxu2 }
 0x92f   : > { %14048 = vst [vmem:[#allocation102_spill] sm:$0xff] %v11554_v6  ;;  %v14066_v6 = vld [vmem:[#allocation41_spill] sm:$0xff] }
 0x930   : > { %v4264_v42 = vpop.f32.mrf.mxu3 }
 0x933   : > { %v11539_v49 = vpop.f32.mrf.mxu1  ;;  %v11541_v47 = vpop.f32.mrf.mxu0 }
 0x934   : > { %14042 = vst [vmem:[#allocation96_spill] sm:$0xff] %v11539_v49 }
 0x935   : > { %14043 = vst [vmem:[#allocation97_spill] sm:$0xff] %v11541_v47 }
 0x938   : > { %v11545_v3 = vpop.f32.mrf.mxu3 }
 0x939   : > { %14045 = vst [vmem:[#allocation99_spill] sm:$0xff] %v11545_v3 }
 0x93b   : > { %v11547_v7 = vpop.f32.mrf.mxu1  ;;  %v4308_v44 = vpop.f32.mrf.mxu0 }
 0x93c   : > { %14046 = vst [vmem:[#allocation100_spill] sm:$0xff] %v11547_v7  ;;  %v11549_v27 = vadd.f32 %v4308_v44, %v4259_v52  ;;  %v4332_v52 = vpop.f32.mrf.mxu2 }
 0x93d   : > { %4464 = vmatmul.bf16.gmra.mxu3 %v14008_v11 }
 0x93e   : > { %14047 = vst [vmem:[#allocation101_spill] sm:$0xff] %v11549_v27  ;;  %4405 = vmatmul.bf16.gmra.mxu1 %v11386_v26  ;;  %4503 = vmatmul.bf16.gmra.mxu0 %v11386_v26 }
 0x940   : > { %v4269_v43 = vpop.f32.mrf.mxu3 }
 0x943   : > { %v11556_v20 = vpop.f32.mrf.mxu1  ;;  %v11558_v13 = vpop.f32.mrf.mxu0 }
 0x944   : > { %14049 = vst [vmem:[#allocation103_spill] sm:$0xff] %v11556_v20  ;;  %v11572_v44 = vpop.f32.mrf.mxu2 }
 0x945   : > { %14050 = vst [vmem:[#allocation104_spill] sm:$0xff] %v11558_v13 }
 0x948   : > { %v11560_v17 = vpop.f32.mrf.mxu3 }
 0x949   : > { %14051 = vst [vmem:[#allocation105_spill] sm:$0xff] %v11560_v17 }
 0x94b   : > { %v11562_v61 = vpop.f32.mrf.mxu1  ;;  %v4313_v51 = vpop.f32.mrf.mxu0 }
 0x94c   : > { %14052 = vst [vmem:[#allocation106_spill] sm:$0xff] %v11562_v61  ;;  %v11564_v45 = vadd.f32 %v4313_v51, %v4264_v42  ;;  %v4337_v42 = vpop.f32.mrf.mxu2 }
 0x94e   : > { %14053 = vst [vmem:[#allocation107_spill] sm:$0xff] %v11564_v45  ;;  %4410 = vmatmul.bf16.gmra.mxu1 %v11447_v8  ;;  %4508 = vmatmul.bf16.gmra.mxu0 %v11447_v8  ;;  %v14063_v45 = vld [vmem:[#allocation32_spill] sm:$0xff] }
 0x94f   : > { %v3623_v10 = vmul.f32 %v14063_v45, %v14099_v19  ;;  %v3627_v63 = vmul.f32 %v14063_v45, %v14101_v1 }
 0x950   : > { %v4430_v11 = vpop.f32.mrf.mxu3 }
 0x953   : > { %v11568_v26 = vpop.f32.mrf.mxu1  ;;  %v11570_v46 = vpop.f32.mrf.mxu0 }
 0x954   : > { %14054 = vst [vmem:[#allocation108_spill] sm:$0xff] %v11568_v26  ;;  %v11586_v36 = vpop.f32.mrf.mxu2 }
 0x955   : > { %14055 = vst [vmem:[#allocation109_spill] sm:$0xff] %v11570_v46 }
 0x958   : > { %v11574_v18 = vpop.f32.mrf.mxu3 }
 0x95b   : > { %v11576_v56 = vpop.f32.mrf.mxu1  ;;  %v4318_v58 = vpop.f32.mrf.mxu0 }
 0x95c   : > { %14056 = vst [vmem:[#allocation110_spill] sm:$0xff] %v11576_v56  ;;  %v11578_v40 = vadd.f32 %v4318_v58, %v4269_v43  ;;  %v4342_v43 = vpop.f32.mrf.mxu2 }
 0x95e   : > { %14057 = vst [vmem:[#allocation111_spill] sm:$0xff] %v11578_v40  ;;  %4415 = vmatmul.bf16.gmra.mxu1 %v11467_v4  ;;  %4513 = vmatmul.bf16.gmra.mxu0 %v11467_v4  ;;  %v14060_v4 = vld [vmem:[#allocation11_spill] sm:$0xff]  ;;  %v14062_v40 = vld [vmem:[#allocation9_spill] sm:$0xff] }
 0x95f   : > { %v3579_v21 = vmul.f32 %v14061_v16, %v14060_v4  ;;  %v3613_v27 = vmul.f32 %v14063_v45, %v14062_v40 }
 0x960   : > { %v4435_v8 = vpop.f32.mrf.mxu3 }
 0x961   : > { %v3645_v3 = vadd.f32 %v3613_v27, %v3579_v21 }
 0x963   : > { %v11582_v51 = vpop.f32.mrf.mxu1  ;;  %v11584_v35 = vpop.f32.mrf.mxu0 }
 0x964   : > { %14058 = vst [vmem:[#allocation112_spill] sm:$0xff] %v11582_v51  ;;  %v14065_v51 = vld [vmem:[#allocation21_spill] sm:$0xff]  ;;  %v11610_v7 = vpop.f32.mrf.mxu2 }
 0x965   : > { %14059 = vst [vmem:[#allocation113_spill] sm:$0xff] %v11584_v35  ;;  %v14064_v35 = vld [vmem:[#allocation17_spill] sm:$0xff]  ;;  %v3679_v56 = vmul.f32 %v14066_v6, %v14065_v51 }
 0x966   : > { %v3617_v17 = vmul.f32 %v14063_v45, %v14064_v35 }
 0x967   : > { %v11606_v13 = vadd.f32 %v3679_v56, %v3645_v3 }
 0x968   : > { %v11588_v31 = vpop.f32.mrf.mxu3 }
 0x969   : > { %14069 = vst [vmem:[#allocation11_spill] sm:$0xff] %v11606_v13 }
 0x96b   : > { %v4381_v57 = vpop.f32.mrf.mxu1  ;;  %v4479_v22 = vpop.f32.mrf.mxu0 }
 0x96c   : > { %v4480_v29 = vadd.f32 %v4479_v22, %v4430_v11  ;;  %v3583_v22 = vmul.f32 %v14061_v16, %v14067_v33  ;;  %v14068_v11 = vld [vmem:[#allocation23_spill] sm:$0xff]  ;;  %v4382_v48 = vadd.f32 %v4381_v57, %v4332_v52  ;;  %v14073_v57 = vld [vmem:[#allocation33_spill] sm:$0xff] }
 0x96d   : > { %v3683_v46 = vmul.f32 %v14066_v6, %v14068_v11  ;;  %v3618_v56 = vmul.f32 %v14073_v57, %v14064_v35  ;;  %v3624_v14 = vmul.f32 %v14073_v57, %v14099_v19  ;;  %v3628_v41 = vmul.f32 %v14073_v57, %v14101_v1  ;;  %v14103_v19 = vld [vmem:[#allocation25_spill] sm:$0xff] }
 0x96e   : > { %v3649_v26 = vadd.f32 %v3617_v17, %v3583_v22  ;;  %v11613_v32 = vadd.f32 %v4382_v48, %v11606_v13  ;;  %v3614_v48 = vmul.f32 %v14073_v57, %v14062_v40  ;;  %v14078_v40 = vld [vmem:[#allocation49_spill] sm:$0xff] }
 0x96f   : > { %v3687_v13 = vmul.f32 %v14066_v6, %v14078_v40 }
 0x970   : > { %v4440_v5 = vpop.f32.mrf.mxu3  ;;  %v11608_v2 = vadd.f32 %v3683_v46, %v3649_v26  ;;  %14071 = vst [vmem:[#allocation9_spill] sm:$0xff] %v11613_v32  ;;  %v14076_v26 = vld [vmem:[#allocation19_spill] sm:$0xff] }
 0x971   : > { %v3621_v46 = vmul.f32 %v14063_v45, %v14076_v26 }
 0x972   : > { %14070 = vst [vmem:[#allocation30_spill] sm:$0xff] %v11608_v2 }
 0x973   : > { %v11590_v9 = vpop.f32.mrf.mxu1  ;;  %v11592_v58 = vpop.f32.mrf.mxu0 }
 0x978   : > { %v11615_v39 = vpop.f32.mrf.mxu3 }
 0x97b   : > { %v4386_v61 = vpop.f32.mrf.mxu1  ;;  %v4484_v23 = vpop.f32.mrf.mxu0 }
 0x97c   : > { %v4387_v20 = vadd.f32 %v4386_v61, %v4337_v42  ;;  %v4485_v54 = vadd.f32 %v4484_v23, %v4435_v8  ;;  %v14074_v23 = vld [vmem:[#allocation31_spill] sm:$0xff]  ;;  %v14075_v61 = vld [vmem:[#allocation44_spill] sm:$0xff]  ;;  %v3622_v8 = vmul.f32 %v14073_v57, %v14076_v26 }
 0x97d   : > { %v3580_v17 = vmul.f32 %v14074_v23, %v14060_v4  ;;  %v3684_v52 = vmul.f32 %v14075_v61, %v14068_v11  ;;  %v3680_v35 = vmul.f32 %v14075_v61, %v14065_v51  ;;  %v14077_v4 = vld [vmem:[#allocation7_spill] sm:$0xff]  ;;  %v3688_v51 = vmul.f32 %v14075_v61, %v14078_v40 }
 0x97e   : > { %v11618_v47 = vadd.f32 %v4387_v20, %v11608_v2  ;;  %v3584_v20 = vmul.f32 %v14074_v23, %v14067_v33  ;;  %v3587_v22 = vmul.f32 %v14061_v16, %v14077_v4  ;;  %v4347_v33 = vpop.f32.mrf.mxu2  ;;  %v3588_v11 = vmul.f32 %v14074_v23, %v14077_v4 }
 0x97f   : > { %v3646_v2 = vadd.f32 %v3614_v48, %v3580_v17  ;;  %v3586_v15 = vmul.f32 %v14074_v23, %v14097_v55  ;;  %v3590_v0 = vmul.f32 %v14074_v23, %v14100_v30  ;;  %v14102_v55 = vld [vmem:[#allocation26_spill] sm:$0xff]  ;;  %v3594_v1 = vmul.f32 %v14074_v23, %v14106_v60 }
 0x980   : > { %14072 = vst [vmem:[#allocation32_spill] sm:$0xff] %v11618_v47  ;;  %v4583_v21 = vmin.f32 %v11613_v32, %v11618_v47  ;;  %v3650_v42 = vadd.f32 %v3618_v56, %v3584_v20  ;;  %v4445_v56 = vpop.f32.mrf.mxu3  ;;  %v3653_v20 = vadd.f32 %v3621_v46, %v3587_v22  ;;  %v3654_v26 = vadd.f32 %v3622_v8, %v3588_v11 }
 0x981   : > { %v11652_v47 = vadd.f32 %v3680_v35, %v3646_v2  ;;  %v3689_v62 = vmul.f32 %v14066_v6, %v14102_v55  ;;  %v3660_v60 = vadd.f32 %v3628_v41, %v3594_v1 }
 0x982   : > { %v11646_v32 = vadd.f32 %v3684_v52, %v3650_v42  ;;  %v11657_v38 = vadd.f32 %v3687_v13, %v3653_v20  ;;  %v11659_v48 = vadd.f32 %v3688_v51, %v3654_v26  ;;  %v14089_v20 = vld [vmem:[#allocation59_spill] sm:$0xff] }
 0x983   : > { %v11624_v3 = vpop.f32.mrf.mxu1  ;;  %v11626_v27 = vpop.f32.mrf.mxu0  ;;  %14080 = vst [vmem:[#allocation21_spill] sm:$0xff] %v11652_v47  ;;  %v11662_v52 = vadd.f32 %v4480_v29, %v11652_v47 }
 0x984   : > { %14079 = vst [vmem:[#allocation17_spill] sm:$0xff] %v11646_v32  ;;  %v11655_v28 = vadd.f32 %v4485_v54, %v11646_v32 }
 0x985   : > { %14082 = vst [vmem:[#allocation10_spill] sm:$0xff] %v11657_v38 }
 0x986   : > { %14081 = vst [vmem:[#allocation41_spill] sm:$0xff] %v11655_v28  ;;  %v4604_v46 = vmin.f32 %v11662_v52, %v11655_v28  ;;  %v11678_v8 = vpop.f32.mrf.mxu2 }
 0x987   : > { %14083 = vst [vmem:[#allocation23_spill] sm:$0xff] %v11659_v48 }
 0x988   : > { %14084 = vst [vmem:[#allocation33_spill] sm:$0xff] %v11662_v52  ;;  %v11680_v29 = vpop.f32.mrf.mxu3 }
 0x98b   : > { %v4391_v59 = vpop.f32.mrf.mxu1  ;;  %v4489_v17 = vpop.f32.mrf.mxu0 }
 0x98c   : > { %v4392_v42 = vadd.f32 %v4391_v59, %v4342_v43  ;;  %v4490_v4 = vadd.f32 %v4489_v17, %v4440_v5  ;;  %v14091_v17 = vld [vmem:[#allocation60_spill] sm:$0xff] }
 0x98e   : > { %v11667_v2 = vadd.f32 %v4392_v42, %v11657_v38  ;;  %v11670_v54 = vadd.f32 %v4490_v4, %v11659_v48  ;;  %v11686_v40 = vpop.f32.mrf.mxu2  ;;  %v14098_v48 = vld [vmem:[#allocation12_spill] sm:$0xff] }
 0x98f   : > { %v3619_v38 = vmul.f32 %v14063_v45, %v14098_v48  ;;  %v3620_v24 = vmul.f32 %v14073_v57, %v14098_v48  ;;  %v3690_v48 = vmul.f32 %v14075_v61, %v14102_v55  ;;  %v3630_v55 = vmul.f32 %v14073_v57, %v14103_v19 }
 0x990   : > { %14085 = vst [vmem:[#allocation31_spill] sm:$0xff] %v11667_v2  ;;  %v11673_v13 = vmin.f32 %v4583_v21, %v11667_v2  ;;  %v11676_v35 = vmin.f32 %v4604_v46, %v11670_v54  ;;  %v11688_v11 = vpop.f32.mrf.mxu3 }
 0x991   : > { %14086 = vst [vmem:[#allocation44_spill] sm:$0xff] %v11670_v54  ;;  %v3651_v50 = vadd.f32 %v3619_v38, %v3585_v25  ;;  %v3629_v25 = vmul.f32 %v14063_v45, %v14103_v19  ;;  %v3652_v30 = vadd.f32 %v3620_v24, %v3586_v15  ;;  %v3659_v24 = vadd.f32 %v3627_v63, %v3593_v53 }
 0x992   : > { %14087 = vst [vmem:[#allocation19_spill] sm:$0xff] %v11673_v13  ;;  %v3656_v13 = vadd.f32 %v3624_v14, %v3590_v0 }
 0x993   : > { %14088 = vst [vmem:[#allocation7_spill] sm:$0xff] %v11676_v35  ;;  %v11682_v5 = vpop.f32.mrf.mxu1  ;;  %v11684_v59 = vpop.f32.mrf.mxu0 }
 0x996   : > { %v11704_v52 = vpop.f32.mrf.mxu2 }
 0x99b   : > { %v4396_v43 = vpop.f32.mrf.mxu1  ;;  %v4494_v22 = vpop.f32.mrf.mxu0 }
 0x99c   : > { %v4397_v51 = vadd.f32 %v4396_v43, %v4347_v33  ;;  %v4495_v21 = vadd.f32 %v4494_v22, %v4445_v56  ;;  %v11706_v33 = vpop.f32.mrf.mxu3 }
 0x99e   : > { %v11691_v26 = vadd.f32 %v4397_v51, %v14089_v20  ;;  %v11694_v42 = vadd.f32 %v4495_v21, %v14091_v17  ;;  %v11712_v22 = vpop.f32.mrf.mxu2 }
 0x9a0   : > { %14090 = vst [vmem:[#allocation49_spill] sm:$0xff] %v11691_v26  ;;  %v3655_v26 = vadd.f32 %v3623_v10, %v3589_v12  ;;  %v11788_v10 = vadd.f32 %v3690_v48, %v3656_v13 }
 0x9a1   : > { %14092 = vst [vmem:[#allocation114_spill] sm:$0xff] %v11694_v42  ;;  %v14107_v42 = vld [vmem:[#allocation29_spill] sm:$0xff] }
 0x9a2   : > { %v3693_v35 = vmul.f32 %v14066_v6, %v14107_v42  ;;  %v3694_v15 = vmul.f32 %v14075_v61, %v14107_v42  ;;  %v11786_v0 = vadd.f32 %v3689_v62, %v3655_v26  ;;  %14112 = vst [vmem:[#allocation20_spill] sm:$0xff] %v11788_v10  ;;  %v14116_v26 = vld [vmem:[#allocation28_spill] sm:$0xff] }
 0x9a3   : > { %v11700_v47 = vpop.f32.mrf.mxu1  ;;  %v11702_v32 = vpop.f32.mrf.mxu0  ;;  %v3635_v13 = vmul.f32 %v14063_v45, %v14116_v26  ;;  %v3636_v41 = vmul.f32 %v14073_v57, %v14116_v26  ;;  %v4384_v57 = vadd.f32 %v11590_v9, %v11572_v44 }
 0x9a4   : > { %v11714_v51 = vpop.f32.mrf.mxu3  ;;  %14111 = vst [vmem:[#allocation8_spill] sm:$0xff] %v11786_v0  ;;  %v11794_v42 = vadd.f32 %v3693_v35, %v3659_v24  ;;  %v11804_v48 = vadd.f32 %v3694_v15, %v3660_v60  ;;  %v4487_v35 = vadd.f32 %v11626_v27, %v11588_v31  ;;  %v4394_v31 = vadd.f32 %v11682_v5, %v11610_v7  ;;  %v14126_v24 = vld [vmem:[#allocation48_spill] sm:$0xff] }
 0x9a5   : > { %v4497_v7 = vadd.f32 %v11702_v32, %v11680_v29  ;;  %v14130_v29 = vld [vmem:[#allocation71_spill] sm:$0xff] }
 0x9a6   : > { %v11720_v46 = vpop.f32.mrf.mxu2  ;;  %14114 = vst [vmem:[#allocation26_spill] sm:$0xff] %v11794_v42  ;;  %v11853_v60 = vadd.f32 %v4394_v31, %v11786_v0 }
 0x9a7   : > { %14117 = vst [vmem:[#allocation25_spill] sm:$0xff] %v11804_v48 }
 0x9ab   : > { %v11708_v56 = vpop.f32.mrf.mxu1  ;;  %v11710_v43 = vpop.f32.mrf.mxu0 }
 0x9ac   : > { %v11722_v28 = vpop.f32.mrf.mxu3  ;;  %v4402_v32 = vadd.f32 %v11708_v56, %v11686_v40 }
 0x9ad   : > { %14093 = vst [vmem:[#allocation115_spill] sm:$0xff] %v11722_v28  ;;  %v14113_v28 = vld [vmem:[#allocation38_spill] sm:$0xff] }
 0x9ae   : > { %v11732_v49 = vpop.f32.mrf.mxu2  ;;  %v3685_v53 = vmul.f32 %v14066_v6, %v14113_v28  ;;  %v3686_v63 = vmul.f32 %v14075_v61, %v14113_v28 }
 0x9af   : > { %14095 = vst [vmem:[#allocation117_spill] sm:$0xff] %v11732_v49 }
 0x9b3   : > { %v11716_v21 = vpop.f32.mrf.mxu1  ;;  %v11718_v4 = vpop.f32.mrf.mxu0 }
 0x9b4   : > { %v11734_v37 = vpop.f32.mrf.mxu3 }
 0x9b5   : > { %14096 = vst [vmem:[#allocation118_spill] sm:$0xff] %v11734_v37  ;;  %v14108_v37 = vld [vmem:[#allocation16_spill] sm:$0xff] }
 0x9b6   : > { %v11776_v49 = vpop.f32.mrf.mxu2 }
 0x9b7   : > { %14109 = vst [vmem:[#allocation14_spill] sm:$0xff] %v11776_v49  ;;  %v14115_v49 = vld [vmem:[#allocation76_spill] sm:$0xff] }
 0x9b8   : > { %v3696_v62 = vmul.f32 %v14075_v61, %v14115_v49 }
 0x9bb   : > { %v11724_v54 = vpop.f32.mrf.mxu1  ;;  %v11726_v2 = vpop.f32.mrf.mxu0 }
 0x9bc   : > { %v11784_v12 = vpop.f32.mrf.mxu3 }
 0x9be   : > { %v14139_v31 = vld [vmem:[#allocation14_spill] sm:$0xff] }
 0x9c3   : > { %v11728_v17 = vpop.f32.mrf.mxu1  ;;  %v11730_v20 = vpop.f32.mrf.mxu0 }
 0x9c4   : > { %14094 = vst [vmem:[#allocation116_spill] sm:$0xff] %v11730_v20  ;;  %v14110_v20 = vld [vmem:[#allocation18_spill] sm:$0xff] }
 0x9c5   : > { %v3601_v19 = vmul.f32 %v14061_v16, %v14110_v20  ;;  %v3602_v28 = vmul.f32 %v14074_v23, %v14110_v20  ;;  %v11820_v20 = vadd.f32 %v3685_v53, %v3651_v50  ;;  %v3709_v53 = vmul.f32 %v14066_v6, %v14130_v29 }
 0x9c7   : > { %14119 = vst [vmem:[#allocation15_spill] sm:$0xff] %v11820_v20  ;;  %v3667_v9 = vadd.f32 %v3635_v13, %v3601_v19  ;;  %v3668_v44 = vadd.f32 %v3636_v41, %v3602_v28  ;;  %v4367_v19 = vpop.f32.mrf.mxu2 }
 0x9cb   : > { %v11762_v38 = vpop.f32.mrf.mxu1  ;;  %v11764_v34 = vpop.f32.mrf.mxu0  ;;  %v14132_v56 = vld [vmem:[#allocation116_spill] sm:$0xff] }
 0x9cc   : > { %14104 = vst [vmem:[#allocation13_spill] sm:$0xff] %v11762_v38  ;;  %v3595_v38 = vmul.f32 %v14061_v16, %v14108_v37  ;;  %v3695_v16 = vmul.f32 %v14066_v6, %v14115_v49 }
 0x9cd   : > { %14105 = vst [vmem:[#allocation12_spill] sm:$0xff] %v11764_v34  ;;  %v3596_v34 = vmul.f32 %v14074_v23, %v14108_v37 }
 0x9ce   : > { %v3661_v14 = vadd.f32 %v3629_v25, %v3595_v38  ;;  %v14118_v25 = vld [vmem:[#allocation80_spill] sm:$0xff]  ;;  %v4482_v38 = vadd.f32 %v11592_v58, %v11574_v18  ;;  %v4399_v58 = vadd.f32 %v11700_v47, %v11678_v8  ;;  %v4500_v47 = vadd.f32 %v11710_v43, %v11688_v11  ;;  %v4465_v8 = vpop.f32.mrf.mxu3 }
 0x9cf   : > { %v3662_v37 = vadd.f32 %v3630_v55, %v3596_v34  ;;  %v4389_v34 = vadd.f32 %v11624_v3, %v11586_v36  ;;  %v3701_v49 = vmul.f32 %v14066_v6, %v14118_v25  ;;  %v3702_v45 = vmul.f32 %v14075_v61, %v14118_v25  ;;  %14128 = vst [vmem:[#allocation80_spill] sm:$0xff] %v11853_v60  ;;  %v14137_v25 = vld [vmem:[#allocation118_spill] sm:$0xff] }
 0x9d0   : > { %v11822_v36 = vadd.f32 %v3686_v63, %v3652_v30  ;;  %v4492_v3 = vadd.f32 %v11684_v59, %v11615_v39  ;;  %v11828_v27 = vadd.f32 %v3695_v16, %v3661_v14  ;;  %v14124_v59 = vld [vmem:[#allocation47_spill] sm:$0xff]  ;;  %v11850_v15 = vadd.f32 %v4482_v38, %v14126_v24 }
 0x9d1   : > { %v11830_v1 = vadd.f32 %v3696_v62, %v3662_v37  ;;  %v11833_v18 = vadd.f32 %v4389_v34, %v11820_v20  ;;  %v11842_v5 = vadd.f32 %v3701_v49, %v3667_v9  ;;  %v11844_v39 = vadd.f32 %v3702_v45, %v3668_v44  ;;  %v14140_v44 = vld [vmem:[#allocation53_spill] sm:$0xff] }
 0x9d2   : > { %14120 = vst [vmem:[#allocation29_spill] sm:$0xff] %v11822_v36  ;;  %v11836_v50 = vadd.f32 %v4487_v35, %v11822_v36  ;;  %v11847_v30 = vadd.f32 %v4384_v57, %v14124_v59  ;;  %v11856_v14 = vadd.f32 %v4492_v3, %v11788_v10  ;;  %v3710_v63 = vmul.f32 %v14075_v61, %v14130_v29  ;;  %v14159_v36 = vld [vmem:[#allocation64_spill] sm:$0xff]  ;;  %v14191_v10 = vld [vmem:[#allocation75_spill] sm:$0xff] }
 0x9d3   : > { %v4413_v55 = vpop.f32.mrf.mxu1  ;;  %v4511_v23 = vpop.f32.mrf.mxu0  ;;  %14121 = vst [vmem:[#allocation16_spill] sm:$0xff] %v11830_v1  ;;  %v4404_v37 = vadd.f32 %v11716_v21, %v11704_v52  ;;  %v4502_v16 = vadd.f32 %v11718_v4, %v11706_v33  ;;  %v11875_v11 = vadd.f32 %v4399_v58, %v11794_v42  ;;  %v11878_v6 = vadd.f32 %v4497_v7, %v11804_v48  ;;  %v14131_v33 = vld [vmem:[#allocation115_spill] sm:$0xff]  ;;  %v14136_v34 = vld [vmem:[#allocation13_spill] sm:$0xff]  ;;  %v14141_v7 = vld [vmem:[#allocation54_spill] sm:$0xff] }
 0x9d4   : > { %14122 = vst [vmem:[#allocation18_spill] sm:$0xff] %v11833_v18  ;;  %v4584_v62 = vmin.f32 %v11847_v30, %v11833_v18  ;;  %v4605_v40 = vmin.f32 %v11850_v15, %v11836_v50  ;;  %v4407_v61 = vadd.f32 %v11724_v54, %v11712_v22  ;;  %v4505_v52 = vadd.f32 %v11726_v2, %v11714_v51  ;;  %v14133_v22 = vld [vmem:[#allocation65_spill] sm:$0xff]  ;;  %v14134_v51 = vld [vmem:[#allocation66_spill] sm:$0xff]  ;;  %v14138_v49 = vld [vmem:[#allocation12_spill] sm:$0xff] }
 0x9d5   : > { %14123 = vst [vmem:[#allocation38_spill] sm:$0xff] %v11836_v50  ;;  %v4409_v4 = vadd.f32 %v11728_v17, %v11720_v46  ;;  %v4507_v43 = vadd.f32 %v14132_v56, %v14131_v33  ;;  %v11891_v28 = vadd.f32 %v4402_v32, %v11828_v27  ;;  %v11894_v54 = vadd.f32 %v4500_v47, %v11830_v1  ;;  %v14135_v46 = vld [vmem:[#allocation117_spill] sm:$0xff]  ;;  %v14202_v48 = vld [vmem:[#allocation106_spill] sm:$0xff] }
 0x9d6   : > { %14125 = vst [vmem:[#allocation76_spill] sm:$0xff] %v11847_v30  ;;  %v4586_v13 = vmin.f32 %v4584_v62, %v11853_v60  ;;  %v4607_v41 = vmin.f32 %v4605_v40, %v11856_v14  ;;  %v11897_v2 = vadd.f32 %v4404_v37, %v14133_v22  ;;  %v11900_v17 = vadd.f32 %v4502_v16, %v14134_v51  ;;  %v14142_v37 = vld [vmem:[#allocation19_spill] sm:$0xff]  ;;  %v14143_v16 = vld [vmem:[#allocation49_spill] sm:$0xff] }
 0x9d7   : > { %14127 = vst [vmem:[#allocation28_spill] sm:$0xff] %v11850_v15  ;;  %v4412_v35 = vadd.f32 %v14136_v34, %v14135_v46  ;;  %v4510_v45 = vadd.f32 %v14138_v49, %v14137_v25  ;;  %v4414_v3 = vadd.f32 %v4413_v55, %v14139_v31  ;;  %v4512_v9 = vadd.f32 %v4511_v23, %v11784_v12  ;;  %v14145_v55 = vld [vmem:[#allocation7_spill] sm:$0xff]  ;;  %v14146_v12 = vld [vmem:[#allocation114_spill] sm:$0xff]  ;;  %v4369_v34 = vpop.f32.mrf.mxu2  ;;  %v14152_v31 = vld [vmem:[#allocation84_spill] sm:$0xff] }
 0x9d8   : > { %14129 = vst [vmem:[#allocation119_spill] sm:$0xff] %v11856_v14  ;;  %v4588_v57 = vmin.f32 %v4586_v13, %v11875_v11  ;;  %v4609_v38 = vmin.f32 %v4607_v41, %v11878_v6  ;;  %v11911_v58 = vadd.f32 %v4407_v61, %v14140_v44  ;;  %v11914_v32 = vadd.f32 %v4505_v52, %v14141_v7  ;;  %v14148_v13 = vld [vmem:[#allocation85_spill] sm:$0xff]  ;;  %v14150_v25 = vld [vmem:[#allocation83_spill] sm:$0xff] }
 0x9d9   : > { %v11917_v47 = vadd.f32 %v4409_v4, %v11842_v5  ;;  %v11920_v29 = vadd.f32 %v4507_v43, %v11844_v39  ;;  %v14144_v62 = vmin.f32 %v14142_v37, %v14143_v16  ;;  %v14147_v23 = vmin.f32 %v14145_v55, %v14146_v12  ;;  %v14149_v43 = vld [vmem:[#allocation86_spill] sm:$0xff] }
 0x9da   : > { %v4590_v52 = vmin.f32 %v4588_v57, %v11897_v2  ;;  %v4611_v4 = vmin.f32 %v4609_v38, %v11900_v17  ;;  %v11933_v41 = vadd.f32 %v4412_v35, %v14148_v13  ;;  %v11936_v46 = vadd.f32 %v4510_v45, %v14149_v43 }
 0x9db   : > { %v4416_v21 = vpop.f32.mrf.mxu1  ;;  %v4514_v26 = vpop.f32.mrf.mxu0  ;;  %v4589_v40 = vmin.f32 %v14144_v62, %v11891_v28  ;;  %v4610_v61 = vmin.f32 %v14147_v23, %v11894_v54  ;;  %v11939_v49 = vadd.f32 %v3709_v53, %v14150_v25  ;;  %v11942_v37 = vadd.f32 %v3710_v63, %v14152_v31  ;;  %v14156_v23 = vld [vmem:[#allocation91_spill] sm:$0xff]  ;;  %v14157_v25 = vld [vmem:[#allocation92_spill] sm:$0xff] }
 0x9dc   : > { %v4417_v33 = vadd.f32 %v4416_v21, %v4367_v19  ;;  %v4515_v56 = vadd.f32 %v4514_v26, %v4465_v8  ;;  %v4467_v62 = vpop.f32.mrf.mxu3  ;;  %v14154_v19 = vld [vmem:[#allocation22_spill] sm:$0xff]  ;;  %v14155_v21 = vld [vmem:[#allocation79_spill] sm:$0xff]  ;;  %v4592_v45 = vmin.f32 %v4590_v52, %v11917_v47  ;;  %v4613_v38 = vmin.f32 %v4611_v4, %v11920_v29 }
 0x9dd   : > { %14151 = vst [vmem:[#allocation71_spill] sm:$0xff] %v11939_v49  ;;  %v11945_v8 = vadd.f32 %v4414_v3, %v14154_v19  ;;  %v11948_v26 = vadd.f32 %v4512_v9, %v14155_v21  ;;  %v4591_v35 = vmin.f32 %v4589_v40, %v11911_v58  ;;  %v4612_v57 = vmin.f32 %v4610_v61, %v11914_v32 }
 0x9de   : > { %14153 = vst [vmem:[#allocation115_spill] sm:$0xff] %v11942_v37  ;;  %v11955_v63 = vadd.f32 %v4417_v33, %v14156_v23  ;;  %v11958_v31 = vadd.f32 %v4515_v56, %v14157_v25  ;;  %v14158_v33 = vld [vmem:[#allocation70_spill] sm:$0xff] }
 0x9df   : > { %v4593_v9 = vmin.f32 %v4591_v35, %v11933_v41  ;;  %v4614_v40 = vmin.f32 %v4612_v57, %v11936_v46  ;;  %v4594_v61 = vmin.f32 %v4592_v45, %v11945_v8  ;;  %v4615_v52 = vmin.f32 %v4613_v38, %v11948_v26  ;;  %v14161_v45 = vld [vmem:[#allocation34_spill] sm:$0xff]  ;;  %v14162_v38 = vld [vmem:[#allocation68_spill] sm:$0xff] }
 0x9e0   : > { %v11972_v56 = vadd.f32 %v14159_v36, %v14158_v33  ;;  %v14167_v36 = vld [vmem:[#allocation88_spill] sm:$0xff]  ;;  %v14168_v33 = vld [vmem:[#allocation57_spill] sm:$0xff] }
 0x9e1   : > { %v11988_v30 = vadd.f32 %v14168_v33, %v14167_v36  ;;  %v14197_v33 = vld [vmem:[#allocation27_spill] sm:$0xff] }
 0x9e2   : > { %14160 = vst [vmem:[#allocation116_spill] sm:$0xff] %v11972_v56 }
 0x9e3   : > { %v4418_v53 = vpop.f32.mrf.mxu1  ;;  %v4516_v55 = vpop.f32.mrf.mxu0  ;;  %14169 = vst [vmem:[#allocation13_spill] sm:$0xff] %v11988_v30  ;;  %v14199_v30 = vld [vmem:[#allocation81_spill] sm:$0xff] }
 0x9e4   : > { %v4419_v3 = vadd.f32 %v4418_v53, %v4369_v34  ;;  %v4517_v24 = vadd.f32 %v4516_v55, %v4467_v62  ;;  %v4595_v34 = vmin.f32 %v4593_v9, %v11955_v63  ;;  %v4616_v62 = vmin.f32 %v4614_v40, %v11958_v31  ;;  %v14164_v55 = vld [vmem:[#allocation74_spill] sm:$0xff]  ;;  %v14170_v9 = vld [vmem:[#allocation87_spill] sm:$0xff]  ;;  %v14171_v40 = vld [vmem:[#allocation24_spill] sm:$0xff] }
 0x9e5   : > { %v11980_v53 = vadd.f32 %v14162_v38, %v14161_v45  ;;  %v11992_v50 = vadd.f32 %v14171_v40, %v14170_v9  ;;  %v14176_v45 = vld [vmem:[#allocation58_spill] sm:$0xff]  ;;  %v14177_v38 = vld [vmem:[#allocation69_spill] sm:$0xff]  ;;  %v14198_v40 = vld [vmem:[#allocation103_spill] sm:$0xff] }
 0x9e6   : > { %v11965_v4 = vadd.f32 %v4419_v3, %v11939_v49  ;;  %v11968_v59 = vadd.f32 %v4517_v24, %v11942_v37  ;;  %v14165_v3 = vld [vmem:[#allocation46_spill] sm:$0xff]  ;;  %v12000_v14 = vadd.f32 %v14177_v38, %v14176_v45  ;;  %v14185_v45 = vld [vmem:[#allocation67_spill] sm:$0xff]  ;;  %v14186_v38 = vld [vmem:[#allocation96_spill] sm:$0xff]  ;;  %v12042_v0 = vadd.f32 %v14198_v40, %v14197_v33 }
 0x9e7   : > { %14163 = vst [vmem:[#allocation65_spill] sm:$0xff] %v11980_v53  ;;  %v11984_v24 = vadd.f32 %v14165_v3, %v14164_v55  ;;  %v14178_v55 = vld [vmem:[#allocation35_spill] sm:$0xff]  ;;  %v14179_v3 = vld [vmem:[#allocation50_spill] sm:$0xff]  ;;  %v14200_v53 = vld [vmem:[#allocation104_spill] sm:$0xff] }
 0x9e8   : > { %v4596_v35 = vmin.f32 %v4594_v61, %v11965_v4  ;;  %v4617_v57 = vmin.f32 %v4615_v52, %v11968_v59  ;;  %14172 = vst [vmem:[#allocation118_spill] sm:$0xff] %v11992_v50  ;;  %v14173_v61 = vld [vmem:[#allocation45_spill] sm:$0xff]  ;;  %v14174_v52 = vld [vmem:[#allocation62_spill] sm:$0xff]  ;;  %v12016_v50 = vadd.f32 %v14186_v38, %v14185_v45 }
 0x9e9   : > { %14166 = vst [vmem:[#allocation117_spill] sm:$0xff] %v11984_v24  ;;  %v11996_v18 = vadd.f32 %v14174_v52, %v14173_v61  ;;  %v14192_v45 = vld [vmem:[#allocation97_spill] sm:$0xff]  ;;  %v14195_v9 = vld [vmem:[#allocation90_spill] sm:$0xff]  ;;  %v14203_v61 = vld [vmem:[#allocation56_spill] sm:$0xff] }
 0x9ea   : > { %v4597_v20 = vmin.f32 %v4595_v34, %v4596_v35  ;;  %v4618_v15 = vmin.f32 %v4616_v62, %v4617_v57  ;;  %v12004_v34 = vadd.f32 %v14179_v3, %v14178_v55  ;;  %v12030_v38 = vadd.f32 %v14192_v45, %v14191_v10  ;;  %v14196_v62 = vld [vmem:[#allocation100_spill] sm:$0xff]  ;;  %v14201_v45 = vld [vmem:[#allocation78_spill] sm:$0xff]  ;;  %v14206_v35 = vld [vmem:[#allocation109_spill] sm:$0xff] }
 0x9eb   : > { %14175 = vst [vmem:[#allocation12_spill] sm:$0xff] %v11996_v18  ;;  %v12046_v10 = vadd.f32 %v14200_v53, %v14199_v30  ;;  %v12050_v52 = vadd.f32 %v14202_v48, %v14201_v45  ;;  %v14207_v40 = vld [vmem:[#allocation98_spill] sm:$0xff]  ;;  %v14210_v48 = vld [vmem:[#allocation112_spill] sm:$0xff]  ;;  %v14211_v24 = vld [vmem:[#allocation105_spill] sm:$0xff] }
 0x9ec   : > { %14180 = vst [vmem:[#allocation14_spill] sm:$0xff] %v12004_v34  ;;  %v4598_v57 = vrot.slane %v4597_v20, 4  ;;  %v4619_v36 = vrot.slane %v4618_v15, 4  ;;  %v14205_v34 = vld [vmem:[#allocation99_spill] sm:$0xff]  ;;  %v14208_v30 = vld [vmem:[#allocation110_spill] sm:$0xff] }
 0x9ed   : > { %14193 = vst [vmem:[#allocation53_spill] sm:$0xff] %v12030_v38  ;;  %v12058_v42 = vadd.f32 %v14206_v35, %v14205_v34  ;;  %v12064_v53 = vadd.f32 %v14208_v30, %v14207_v40  ;;  %v14209_v55 = vld [vmem:[#allocation102_spill] sm:$0xff]  ;;  %v14215_v40 = vld [vmem:[#allocation111_spill] sm:$0xff] }
 0x9ee   : > { %v4599_v56 = vmin.f32 %v4597_v20, %v4598_v57  ;;  %v4620_v60 = vmin.f32 %v4618_v15, %v4619_v36  ;;  %v12036_v20 = vadd.f32 %v14196_v62, %v14195_v9  ;;  %v14204_v62 = vld [vmem:[#allocation108_spill] sm:$0xff]  ;;  %v12068_v45 = vadd.f32 %v14210_v48, %v14209_v55 }
 0x9ef   : > { %v12054_v9 = vadd.f32 %v14204_v62, %v14203_v61  ;;  %v14212_v61 = vld [vmem:[#allocation113_spill] sm:$0xff] }
 0x9f0   : > { %v4600_v15 = vrot.slane %v4599_v56, 2  ;;  %v4621_v57 = vrot.slane %v4620_v60, 2  ;;  %v12072_v62 = vadd.f32 %v14212_v61, %v14211_v24  ;;  %v14214_v24 = vld [vmem:[#allocation107_spill] sm:$0xff]  ;;  %v4581_v55 = vsub.f32 %v12068_v45, %v11939_v49 }
 0x9f2   : > { %v4601_v36 = vmin.f32 %v4599_v56, %v4600_v15  ;;  %v4622_v18 = vmin.f32 %v4620_v60, %v4621_v57  ;;  %v14213_v60 = vld [vmem:[#allocation101_spill] sm:$0xff]  ;;  %v4582_v30 = vsub.f32 %v12072_v62, %v11942_v37 }
 0x9f4   : > { %v4602_v35 = vrot.slane %v4601_v36, 1  ;;  %v4623_v15 = vrot.slane %v4622_v18, 1 }
 0x9f6   : > { %v12090_v33 = vmin.f32 %v4601_v36, %v4602_v35  ;;  %v12092_v56 = vmin.f32 %v4622_v18, %v4623_v15 }
 0x9f8   : > { %v4655_v48 = vsub.f32 %v11965_v4, %v12090_v33  ;;  %v4656_v36 = vsub.f32 %v11968_v59, %v12092_v56  ;;  %v4653_v18 = vsub.f32 %v11955_v63, %v12090_v33  ;;  %v4654_v35 = vsub.f32 %v11958_v31, %v12092_v56 }
 0x9f9   : > { %v4649_v15 = vsub.f32 %v11933_v41, %v12090_v33  ;;  %v4651_v45 = vsub.f32 %v11945_v8, %v12090_v33  ;;  %v4650_v62 = vsub.f32 %v11936_v46, %v12092_v56  ;;  %v4652_v4 = vsub.f32 %v11948_v26, %v12092_v56 }
 0x9fa   : > { %v4687_v61 = vsub.f32 0.0, %v4655_v48  ;;  %v4688_v59 = vsub.f32 0.0, %v4656_v36  ;;  %v4685_v34 = vsub.f32 0.0, %v4653_v18  ;;  %v4686_v57 = vsub.f32 0.0, %v4654_v35 }
 0x9fb   : > { %v4681_v63 = vsub.f32 0.0, %v4649_v15  ;;  %v4683_v49 = vsub.f32 0.0, %v4651_v45  ;;  %v4682_v37 = vsub.f32 0.0, %v4650_v62  ;;  %v4684_v31 = vsub.f32 0.0, %v4652_v4 }
 0x9fc   : > { %v4749_v51 = vmul.f32 1.442695, %v4687_v61  ;;  %v4751_v38 = vmul.f32 1.442695, %v4688_v59  ;;  %v4745_v41 = vmul.f32 1.442695, %v4685_v34  ;;  %v4645_v8 = vsub.f32 %v11911_v58, %v12090_v33 }
 0x9fd   : > { %v4747_v1 = vmul.f32 1.442695, %v4686_v57  ;;  %v4737_v3 = vmul.f32 1.442695, %v4681_v63  ;;  %v4741_v46 = vmul.f32 1.442695, %v4683_v49  ;;  %v4647_v26 = vsub.f32 %v11917_v47, %v12090_v33 }
 0x9fe   : > { %8146 = vpow2.f32 %v4749_v51  ;;  %v4739_v48 = vmul.f32 1.442695, %v4682_v37  ;;  %v4743_v36 = vmul.f32 1.442695, %v4684_v31  ;;  %v4677_v18 = vsub.f32 0.0, %v4645_v8 }
 0x9ff   : > { %8148 = vpow2.f32 %v4751_v38  ;;  %v4679_v35 = vsub.f32 0.0, %v4647_v26  ;;  %v4646_v61 = vsub.f32 %v11914_v32, %v12092_v56  ;;  %v4648_v34 = vsub.f32 %v11920_v29, %v12092_v56 }
 0xa00   : > { %8150 = vpow2.f32 %v4745_v41  ;;  %v4729_v58 = vmul.f32 1.442695, %v4677_v18  ;;  %v4641_v49 = vsub.f32 %v11891_v28, %v12090_v33  ;;  %v4643_v47 = vsub.f32 %v11897_v2, %v12090_v33 }
 0xa01   : > { %8152 = vpow2.f32 %v4747_v1  ;;  %v4733_v51 = vmul.f32 1.442695, %v4679_v35  ;;  %v4678_v37 = vsub.f32 0.0, %v4646_v61  ;;  %v4680_v57 = vsub.f32 0.0, %v4648_v34 }
 0xa02   : > { %8154 = vpow2.f32 %v4737_v3  ;;  %v4673_v38 = vsub.f32 0.0, %v4641_v49  ;;  %v4675_v15 = vsub.f32 0.0, %v4643_v47  ;;  %v4642_v32 = vsub.f32 %v11894_v54, %v12092_v56 }
 0xa03   : > { %8156 = vpow2.f32 %v4741_v46  ;;  %v4731_v29 = vmul.f32 1.442695, %v4678_v37  ;;  %v4735_v45 = vmul.f32 1.442695, %v4680_v57  ;;  %v4644_v62 = vsub.f32 %v11900_v17, %v12092_v56 }
 0xa04   : > { %v8147_v28 = vpop.eup %8146  ;;  %8158 = vpow2.f32 %v4739_v48  ;;  %v4721_v4 = vmul.f32 1.442695, %v4673_v38  ;;  %v4725_v2 = vmul.f32 1.442695, %v4675_v15  ;;  %v4674_v1 = vsub.f32 0.0, %v4642_v32 }
 0xa05   : > { %v8149_v59 = vpop.eup %8148  ;;  %v4783_v63 = vmul.f32 %v8147_v28, %v4581_v55  ;;  %8160 = vpow2.f32 %v4743_v36  ;;  %v4676_v3 = vsub.f32 0.0, %v4644_v62  ;;  %v4637_v31 = vsub.f32 %v14143_v16, %v12090_v33 }
 0xa06   : > { %v8151_v41 = vpop.eup %8150  ;;  %v4784_v54 = vmul.f32 %v8149_v59, %v4582_v30  ;;  %8162 = vpow2.f32 %v4729_v58  ;;  %v4723_v8 = vmul.f32 1.442695, %v4674_v1  ;;  %v4639_v46 = vsub.f32 %v11875_v11, %v12090_v33 }
 0xa07   : > { %v8153_v17 = vpop.eup %8152  ;;  %v4815_v26 = vpack.c.bf16 %v8147_v28, %v8151_v41  ;;  %v14216_v48 = vsub.f32 %v12064_v53, %v14156_v23  ;;  %8164 = vpow2.f32 %v4733_v51  ;;  %v4727_v55 = vmul.f32 1.442695, %v4676_v3 }
 0xa08   : > { %v8155_v36 = vpop.eup %8154  ;;  %v4816_v35 = vpack.c.bf16 %v8149_v59, %v8153_v17  ;;  %v14217_v16 = vsub.f32 %v14215_v40, %v14157_v25  ;;  %8166 = vpow2.f32 %v4731_v29  ;;  %v4669_v30 = vsub.f32 0.0, %v4637_v31 }
 0xa09   : > { %v4781_v18 = vmul.f32 %v8151_v41, %v14216_v48  ;;  %v8157_v34 = vpop.eup %8156  ;;  %4915 = vmatpush.bf16.msra.mxu3 %v4815_v26  ;;  %v14218_v11 = vsub.f32 %v12050_v52, %v14148_v13  ;;  %8168 = vpow2.f32 %v4735_v45  ;;  %v4671_v53 = vsub.f32 0.0, %v4639_v46 }
 0xa0a   : > { %v4782_v61 = vmul.f32 %v8153_v17, %v14217_v16  ;;  %v8159_v47 = vpop.eup %8158  ;;  %4964 = vmatpush.bf16.msra.mxu0 %v4816_v35  ;;  %v4811_v37 = vpack.c.bf16 %v8157_v34, %v8155_v36  ;;  %v14219_v57 = vsub.f32 %v12054_v9, %v14154_v19  ;;  %8170 = vpow2.f32 %v4721_v4 }
 0xa0b   : > { %v4813_v58 = vpack.c.bf16 %v4783_v63, %v4781_v18  ;;  %v4777_v49 = vmul.f32 %v8155_v36, %v14218_v11  ;;  %v8161_v38 = vpop.eup %8160  ;;  %v14220_v15 = vsub.f32 %v14214_v24, %v14149_v43  ;;  %8172 = vpow2.f32 %v4725_v2 }
 0xa0c   : > { %v4814_v51 = vpack.c.bf16 %v4784_v54, %v4782_v61  ;;  %v4779_v40 = vmul.f32 %v8157_v34, %v14219_v57  ;;  %v4713_v52 = vmul.f32 1.442695, %v4669_v30  ;;  %v4717_v29 = vmul.f32 1.442695, %v4671_v53  ;;  %v8163_v45 = vpop.eup %8162  ;;  %v14228_v34 = vld [vmem:[#allocation80_spill] sm:$0xff]  ;;  %v14230_v57 = vld [vmem:[#allocation89_spill] sm:$0xff] }
 0xa0d   : > { %4817 = vmatpush.bf16.msrb.mxu2 %v4813_v58  ;;  %v4778_v32 = vmul.f32 %v8159_v47, %v14220_v15  ;;  %v4812_v62 = vpack.c.bf16 %v8161_v38, %v8159_v47  ;;  %v14221_v1 = vsub.f32 %v12058_v42, %v14155_v21  ;;  %8174 = vpow2.f32 %v4723_v8  ;;  %v8165_v9 = vpop.eup %8164  ;;  %4916 = vmatpush.bf16.msra.mxu3 %v4811_v37 }
 0xa0e   : > { %4866 = vmatpush.bf16.msra.mxu1 %v4814_v51  ;;  %v4809_v28 = vpack.c.bf16 %v4779_v40, %v4777_v49  ;;  %v14222_v4 = vsub.f32 %v12036_v20, %v14140_v44  ;;  %8176 = vpow2.f32 %v4727_v55  ;;  %v4638_v24 = vsub.f32 %v14146_v12, %v12092_v56  ;;  %v8167_v3 = vpop.eup %8166  ;;  %v14231_v40 = vld [vmem:[#allocation16_spill] sm:$0xff] }
 0xa0f   : > { %v4780_v59 = vmul.f32 %v8161_v38, %v14221_v1  ;;  %v4640_v2 = vsub.f32 %v11878_v6, %v12092_v56  ;;  %4965 = vmatpush.bf16.msra.mxu0 %v4812_v62  ;;  %v4807_v41 = vpack.c.bf16 %v8165_v9, %v8163_v45  ;;  %v14223_v42 = vsub.f32 %v12042_v0, %v11842_v5  ;;  %v8169_v8 = vpop.eup %8168  ;;  %v14226_v0 = vld [vmem:[#allocation31_spill] sm:$0xff]  ;;  %v14235_v1 = vld [vmem:[#allocation66_spill] sm:$0xff] }
 0xa10   : > { %v4773_v63 = vmul.f32 %v8163_v45, %v14222_v4  ;;  %8178 = vpow2.f32 %v4713_v52  ;;  %v14224_v20 = vsub.f32 %v14213_v60, %v14141_v7  ;;  %v4670_v12 = vsub.f32 0.0, %v4638_v24  ;;  %v8171_v26 = vpop.eup %8170  ;;  %v14237_v4 = vld [vmem:[#allocation117_spill] sm:$0xff] }
 0xa11   : > { %v4810_v31 = vpack.c.bf16 %v4780_v59, %v4778_v32  ;;  %v4775_v54 = vmul.f32 %v8165_v9, %v14223_v42  ;;  %4818 = vmatpush.bf16.msrb.mxu2 %v4809_v28  ;;  %8180 = vpow2.f32 %v4717_v29  ;;  %v4672_v17 = vsub.f32 0.0, %v4640_v2  ;;  %v8173_v35 = vpop.eup %8172  ;;  %4917 = vmatpush.bf16.msra.mxu3 %v4807_v41  ;;  %v14233_v32 = vld [vmem:[#allocation44_spill] sm:$0xff]  ;;  %v14234_v28 = vld [vmem:[#allocation53_spill] sm:$0xff]  ;;  %v14240_v41 = vld [vmem:[#allocation119_spill] sm:$0xff] }
 0xa12   : > { %v4774_v46 = vmul.f32 %v8167_v3, %v14224_v20  ;;  %v4808_v6 = vpack.c.bf16 %v8169_v8, %v8167_v3  ;;  %v14225_v18 = vsub.f32 %v12046_v10, %v11844_v39  ;;  %v4633_v36 = vsub.f32 %v14226_v0, %v12090_v33  ;;  %v14241_v20 = vld [vmem:[#allocation12_spill] sm:$0xff] }
 0xa13   : > { %4867 = vmatpush.bf16.msra.mxu1 %v4810_v31  ;;  %v4805_v48 = vpack.c.bf16 %v4775_v54, %v4773_v63  ;;  %v14227_v60 = vsub.f32 %v12000_v14, %v11828_v27  ;;  %v4715_v61 = vmul.f32 1.442695, %v4670_v12  ;;  %v4719_v30 = vmul.f32 1.442695, %v4672_v17  ;;  %v8175_v11 = vpop.eup %8174  ;;  %v14238_v63 = vld [vmem:[#allocation59_spill] sm:$0xff] }
 0xa14   : > { %v4776_v55 = vmul.f32 %v8169_v8, %v14225_v18  ;;  %v4635_v58 = vsub.f32 %v14228_v34, %v12090_v33  ;;  %4966 = vmatpush.bf16.msra.mxu0 %v4808_v6  ;;  %v4803_v53 = vpack.c.bf16 %v8173_v35, %v8171_v26  ;;  %v14229_v10 = vsub.f32 %v12016_v50, %v14133_v22  ;;  %v8177_v37 = vpop.eup %8176 }
 0xa15   : > { %v4769_v16 = vmul.f32 %v8171_v26, %v14227_v60  ;;  %v4665_v51 = vsub.f32 0.0, %v4633_v36  ;;  %4819 = vmatpush.bf16.msrb.mxu2 %v4805_v48  ;;  %v14232_v14 = vsub.f32 %v14230_v57, %v14231_v40  ;;  %8182 = vpow2.f32 %v4715_v61  ;;  %v14244_v48 = vld [vmem:[#allocation32_spill] sm:$0xff]  ;;  %v14246_v60 = vld [vmem:[#allocation41_spill] sm:$0xff] }
 0xa16   : > { %v4806_v49 = vpack.c.bf16 %v4776_v55, %v4774_v46  ;;  %v4771_v47 = vmul.f32 %v8173_v35, %v14229_v10  ;;  %v4667_v15 = vsub.f32 0.0, %v4635_v58  ;;  %v4634_v52 = vsub.f32 %v14233_v32, %v12092_v56  ;;  %v8179_v29 = vpop.eup %8178  ;;  %4918 = vmatpush.bf16.msra.mxu3 %v4803_v53  ;;  %v14242_v46 = vld [vmem:[#allocation26_spill] sm:$0xff]  ;;  %v14248_v10 = vld [vmem:[#allocation55_spill] sm:$0xff]  ;;  %v14252_v32 = vld [vmem:[#allocation61_spill] sm:$0xff] }
 0xa17   : > { %v4770_v38 = vmul.f32 %v8175_v11, %v14232_v14  ;;  %v4804_v45 = vpack.c.bf16 %v8177_v37, %v8175_v11  ;;  %v14236_v50 = vsub.f32 %v14234_v28, %v14235_v1  ;;  %8184 = vpow2.f32 %v4719_v30  ;;  %v8181_v9 = vpop.eup %8180  ;;  %v14245_v55 = vld [vmem:[#allocation18_spill] sm:$0xff]  ;;  %v14251_v14 = vld [vmem:[#allocation9_spill] sm:$0xff] }
 0xa18   : > { %4868 = vmatpush.bf16.msra.mxu1 %v4806_v49  ;;  %v4801_v62 = vpack.c.bf16 %v4771_v47, %v4769_v16  ;;  %v14239_v24 = vsub.f32 %v14237_v4, %v14238_v63  ;;  %v4705_v3 = vmul.f32 1.442695, %v4665_v51  ;;  %v4709_v31 = vmul.f32 1.442695, %v4667_v15  ;;  %v14247_v11 = vld [vmem:[#allocation38_spill] sm:$0xff]  ;;  %v14249_v47 = vld [vmem:[#allocation60_spill] sm:$0xff] }
 0xa19   : > { %v4772_v59 = vmul.f32 %v8177_v37, %v14236_v50  ;;  %v4636_v42 = vsub.f32 %v14240_v41, %v12092_v56  ;;  %4967 = vmatpush.bf16.msra.mxu0 %v4804_v45  ;;  %v4799_v8 = vpack.c.bf16 %v8181_v9, %v8179_v29  ;;  %v14243_v12 = vsub.f32 %v14241_v20, %v14242_v46 }
 0xa1a   : > { %v4765_v2 = vmul.f32 %v8179_v29, %v14239_v24  ;;  %v4666_v26 = vsub.f32 0.0, %v4634_v52  ;;  %4820 = vmatpush.bf16.msrb.mxu2 %v4801_v62  ;;  %8186 = vpow2.f32 %v4705_v3  ;;  %v4629_v18 = vsub.f32 %v14244_v48, %v12090_v33  ;;  %v14253_v52 = vld [vmem:[#allocation25_spill] sm:$0xff] }
 0xa1b   : > { %v4802_v54 = vpack.c.bf16 %v4772_v59, %v4770_v38  ;;  %v4767_v17 = vmul.f32 %v8181_v9, %v14243_v12  ;;  %v4668_v6 = vsub.f32 0.0, %v4636_v42  ;;  %v4631_v0 = vsub.f32 %v14245_v55, %v12090_v33  ;;  %v8183_v61 = vpop.eup %8182  ;;  %4919 = vmatpush.bf16.msra.mxu3 %v4799_v8  ;;  %v14255_v9 = vld [vmem:[#allocation76_spill] sm:$0xff]  ;;  %v14258_v8 = vld [vmem:[#allocation10_spill] sm:$0xff]  ;;  %v14260_v48 = vld [vmem:[#allocation65_spill] sm:$0xff] }
 0xa1c   : > { %8188 = vpow2.f32 %v4709_v31  ;;  %v4707_v35 = vmul.f32 1.442695, %v4666_v26  ;;  %v4630_v16 = vsub.f32 %v14246_v60, %v12092_v56  ;;  %v4661_v34 = vsub.f32 0.0, %v4629_v18  ;;  %v14256_v31 = vld [vmem:[#allocation33_spill] sm:$0xff]  ;;  %v14263_v60 = vld [vmem:[#allocation28_spill] sm:$0xff] }
 0xa1d   : > { %4869 = vmatpush.bf16.msra.mxu1 %v4802_v54  ;;  %v4797_v36 = vpack.c.bf16 %v4767_v17, %v4765_v2  ;;  %v4711_v30 = vmul.f32 1.442695, %v4668_v6  ;;  %v4663_v58 = vsub.f32 0.0, %v4631_v0  ;;  %v4632_v49 = vsub.f32 %v14247_v11, %v12092_v56  ;;  %v8185_v53 = vpop.eup %8184  ;;  %v14257_v54 = vld [vmem:[#allocation116_spill] sm:$0xff] }
 0xa1e   : > { %v14250_v51 = vsub.f32 %v14248_v10, %v14249_v47  ;;  %8190 = vpow2.f32 %v4707_v35  ;;  %v4662_v57 = vsub.f32 0.0, %v4630_v16  ;;  %v4625_v38 = vsub.f32 %v14251_v14, %v12090_v33  ;;  %v14267_v10 = vld [vmem:[#allocation23_spill] sm:$0xff]  ;;  %v14269_v14 = vld [vmem:[#allocation72_spill] sm:$0xff] }
 0xa1f   : > { %v4800_v15 = vpack.c.bf16 %v8185_v53, %v8183_v61  ;;  %4821 = vmatpush.bf16.msrb.mxu2 %v4797_v36  ;;  %v14254_v29 = vsub.f32 %v14252_v32, %v14253_v52  ;;  %8192 = vpow2.f32 %v4711_v30  ;;  %v4697_v62 = vmul.f32 1.442695, %v4661_v34  ;;  %v14264_v34 = vld [vmem:[#allocation30_spill] sm:$0xff] }
 0xa20   : > { %v4766_v37 = vmul.f32 %v8183_v61, %v14250_v51  ;;  %v4701_v28 = vmul.f32 1.442695, %v4663_v58  ;;  %v4664_v50 = vsub.f32 0.0, %v4632_v49  ;;  %v4699_v59 = vmul.f32 1.442695, %v4662_v57  ;;  %v8187_v24 = vpop.eup %8186  ;;  %v14265_v58 = vld [vmem:[#allocation118_spill] sm:$0xff] }
 0xa21   : > { %v4768_v45 = vmul.f32 %v8185_v53, %v14254_v29  ;;  %v4627_v4 = vsub.f32 %v14255_v9, %v12090_v33  ;;  %4968 = vmatpush.bf16.msra.mxu0 %v4800_v15  ;;  %8194 = vpow2.f32 %v4697_v62  ;;  %v4657_v3 = vsub.f32 0.0, %v4625_v38  ;;  %v14261_v33 = vld [vmem:[#allocation8_spill] sm:$0xff] }
 0xa22   : > { %v4626_v41 = vsub.f32 %v14256_v31, %v12092_v56  ;;  %v8189_v42 = vpop.eup %8188  ;;  %v14259_v20 = vsub.f32 %v14257_v54, %v14258_v8  ;;  %8196 = vpow2.f32 %v4701_v28  ;;  %v4703_v17 = vmul.f32 1.442695, %v4664_v50  ;;  %v14266_v53 = vld [vmem:[#allocation52_spill] sm:$0xff]  ;;  %v14274_v50 = vld [vmem:[#allocation15_spill] sm:$0xff] }
 0xa23   : > { %v4798_v2 = vpack.c.bf16 %v4768_v45, %v4766_v37  ;;  %v4659_v26 = vsub.f32 0.0, %v4627_v4  ;;  %v4795_v6 = vpack.c.bf16 %v8189_v42, %v8187_v24  ;;  %v14262_v18 = vsub.f32 %v14260_v48, %v14261_v33  ;;  %v14270_v38 = vld [vmem:[#allocation20_spill] sm:$0xff]  ;;  %v14272_v45 = vld [vmem:[#allocation73_spill] sm:$0xff] }
 0xa24   : > { %v4761_v12 = vmul.f32 %v8187_v24, %v14259_v20  ;;  %8198 = vpow2.f32 %v4699_v59  ;;  %v4689_v0 = vmul.f32 1.442695, %v4657_v3  ;;  %v8191_v36 = vpop.eup %8190  ;;  %v4628_v16 = vsub.f32 %v14263_v60, %v12092_v56  ;;  %v14273_v62 = vld [vmem:[#allocation36_spill] sm:$0xff]  ;;  %v14275_v59 = vld [vmem:[#allocation14_spill] sm:$0xff]  ;;  %v14277_v3 = vld [vmem:[#allocation63_spill] sm:$0xff] }
 0xa25   : > { %4870 = vmatpush.bf16.msra.mxu1 %v4798_v2  ;;  %v4763_v55 = vmul.f32 %v8189_v42, %v14262_v18  ;;  %8200 = vpow2.f32 %v4703_v17  ;;  %v4693_v35 = vmul.f32 1.442695, %v4659_v26  ;;  %v4658_v61 = vsub.f32 0.0, %v4626_v41  ;;  %v8193_v30 = vpop.eup %8192  ;;  %4920 = vmatpush.bf16.msra.mxu3 %v4795_v6  ;;  %v14276_v2 = vld [vmem:[#allocation17_spill] sm:$0xff]  ;;  %v14279_v17 = vld [vmem:[#allocation51_spill] sm:$0xff] }
 0xa26   : > { %v4555_v11 = vsub.f32 %v14265_v58, %v14264_v34  ;;  %v14268_v51 = vsub.f32 %v14266_v53, %v14267_v10  ;;  %8202 = vpow2.f32 %v4689_v0  ;;  %v4796_v57 = vpack.c.bf16 %v8193_v30, %v8191_v36  ;;  %v14281_v0 = vld [vmem:[#allocation13_spill] sm:$0xff] }
 0xa27   : > { %v4793_v49 = vpack.c.bf16 %v4763_v55, %v4761_v12  ;;  %v14271_v15 = vsub.f32 %v14269_v14, %v14270_v38  ;;  %8204 = vpow2.f32 %v4693_v35  ;;  %v4660_v29 = vsub.f32 0.0, %v4628_v16  ;;  %v8195_v56 = vpop.eup %8194  ;;  %v14278_v12 = vld [vmem:[#allocation29_spill] sm:$0xff]  ;;  %v14280_v55 = vld [vmem:[#allocation11_spill] sm:$0xff] }
 0xa28   : > { %v4762_v37 = vmul.f32 %v8191_v36, %v14268_v51  ;;  %v4188_v28 = vadd.f32 %v14273_v62, %v14272_v45  ;;  %v4557_v9 = vsub.f32 %v14275_v59, %v14274_v50  ;;  %v4691_v4 = vmul.f32 1.442695, %v4658_v61  ;;  %v8197_v24 = vpop.eup %8196  ;;  %4969 = vmatpush.bf16.msra.mxu0 %v4796_v57  ;;  %v14282_v16 = vld [vmem:[#allocation47_spill] sm:$0xff]  ;;  %v14283_v14 = vld [vmem:[#allocation21_spill] sm:$0xff] }
 0xa29   : > { %v4764_v32 = vmul.f32 %v8193_v30, %v14271_v15  ;;  %4822 = vmatpush.bf16.msrb.mxu2 %v4793_v49  ;;  %v4556_v31 = vsub.f32 %v14277_v3, %v14276_v2  ;;  %v4757_v42 = vmul.f32 %v8195_v56, %v4555_v11  ;;  %v4695_v54 = vmul.f32 1.442695, %v4660_v29  ;;  %v14284_v15 = vld [vmem:[#allocation37_spill] sm:$0xff]  ;;  %v14286_v45 = vld [vmem:[#allocation39_spill] sm:$0xff]  ;;  %v14287_v3 = vld [vmem:[#allocation40_spill] sm:$0xff] }
 0xa2a   : > { %v8199_v20 = vpop.eup %8198  ;;  %v4558_v26 = vsub.f32 %v14279_v17, %v14278_v12  ;;  %v4791_v6 = vpack.c.bf16 %v8197_v24, %v8195_v56  ;;  %v4759_v48 = vmul.f32 %v8197_v24, %v4557_v9  ;;  %8206 = vpow2.f32 %v4691_v4  ;;  %v14285_v56 = vld [vmem:[#allocation48_spill] sm:$0xff]  ;;  %v14292_v17 = vld [vmem:[#allocation93_spill] sm:$0xff] }
 0xa2b   : > { %v4794_v41 = vpack.c.bf16 %v4764_v32, %v4762_v37  ;;  %v8201_v18 = vpop.eup %8200  ;;  %v4551_v36 = vsub.f32 %v14281_v0, %v14280_v55  ;;  %v4758_v35 = vmul.f32 %v8199_v20, %v4556_v31  ;;  %8208 = vpow2.f32 %v4695_v54  ;;  %v14290_v54 = vld [vmem:[#allocation82_spill] sm:$0xff] }
 0xa2c   : > { %v8203_v60 = vpop.eup %8202  ;;  %v4553_v61 = vsub.f32 %v4188_v28, %v14282_v16  ;;  %4921 = vmatpush.bf16.msra.mxu3 %v4791_v6  ;;  %v4792_v30 = vpack.c.bf16 %v8201_v18, %v8199_v20  ;;  %v4789_v58 = vpack.c.bf16 %v4759_v48, %v4757_v42  ;;  %v4760_v11 = vmul.f32 %v8201_v18, %v4558_v26  ;;  %v14289_v42 = vld [vmem:[#allocation43_spill] sm:$0xff]  ;;  %v14291_v20 = vld [vmem:[#allocation77_spill] sm:$0xff]  ;;  %v14293_v26 = vld [vmem:[#allocation94_spill] sm:$0xff] }
 0xa2d   : > { %4871 = vmatpush.bf16.msra.mxu1 %v4794_v41  ;;  %v8205_v49 = vpop.eup %8204  ;;  %v4753_v53 = vmul.f32 %v8203_v60, %v4551_v36  ;;  %v4552_v32 = vsub.f32 %v14284_v15, %v14283_v14  ;;  %v4554_v62 = vsub.f32 %v14286_v45, %v14285_v56  ;;  %v14288_v41 = vld [vmem:[#allocation42_spill] sm:$0xff]  ;;  %v14294_v6 = vld [vmem:[#allocation95_spill] sm:$0xff] }
 0xa2e   : > { %4970 = vmatpush.bf16.msra.mxu0 %v4792_v30  ;;  %4823 = vmatpush.bf16.msrb.mxu2 %v4789_v58  ;;  %v4790_v51 = vpack.c.bf16 %v4760_v11, %v4758_v35  ;;  %v4787_v37 = vpack.c.bf16 %v8205_v49, %v8203_v60  ;;  %v4755_v57 = vmul.f32 %v8205_v49, %v4553_v61  ;;  %v8277_v49 = vld [vmem:[%s13395_s9 + $0x8] sm:$0x3f]  ;;  %v8278_v45 = vld [vmem:[%s13395_s9] sm:$0x3f] }
 0xa30   : > { %v8207_v29 = vpop.eup %8206  ;;  %4922 = vmatpush.bf16.msra.mxu3 %v4787_v37  ;;  %v4785_v28 = vpack.c.bf16 %v4755_v57, %v4753_v53  ;;  %v12284_v53 = vperm.slane %v8277_v49, 3 }
 0xa31   : > { %4872 = vmatpush.bf16.msra.mxu1 %v4790_v51  ;;  %v8209_v59 = vpop.eup %8208  ;;  %v4754_v9 = vmul.f32 %v8207_v29, %v4552_v32 }
 0xa32   : > { %v4788_v4 = vpack.c.bf16 %v8209_v59, %v8207_v29  ;;  %4824 = vmatpush.bf16.msrb.mxu2 %v4785_v28  ;;  %v4756_v24 = vmul.f32 %v8209_v59, %v4554_v62  ;;  %v12290_v62 = vperm.slane %v8278_v45, 3  ;;  %v12292_v59 = vperm.slane %v8277_v49, 4 }
 0xa33   : > { %4923 = vmatmul.bf16.vlgmr.msra.gmra.mxu3 %v14287_v3 }
 0xa34   : > { %4971 = vmatpush.bf16.msra.mxu0 %v4788_v4  ;;  %v4786_v31 = vpack.c.bf16 %v4756_v24, %v4754_v9  ;;  %v12296_v24 = vperm.slane %v8278_v45, 4 }
 0xa35   : > { %4825 = vmatmul.bf16.vlgmr.msrb.gmra.mxu2 %v14287_v3 }
 0xa36   : > { %4873 = vmatpush.bf16.msra.mxu1 %v4786_v31 }
 0xa37   : > { %4972 = vmatmul.bf16.vlgmr.msra.gmra.mxu0 %v14287_v3 }
 0xa39   : > { %4874 = vmatmul.bf16.vlgmr.msra.gmra.mxu1 %v14287_v3 }
 0xa43   : > { %4928 = vmatmul.bf16.gmra.mxu3 %v14288_v41 }
 0xa45   : > { %4830 = vmatmul.bf16.gmra.mxu2 %v14288_v41 }
 0xa47   : > { %4977 = vmatmul.bf16.gmra.mxu0 %v14288_v41 }
 0xa49   : > { %4879 = vmatmul.bf16.gmra.mxu1 %v14288_v41 }
 0xa53   : > { %4933 = vmatmul.bf16.gmra.mxu3 %v14289_v42 }
 0xa55   : > { %4835 = vmatmul.bf16.gmra.mxu2 %v14289_v42 }
 0xa57   : > { %4982 = vmatmul.bf16.gmra.mxu0 %v14289_v42 }
 0xa59   : > { %4884 = vmatmul.bf16.gmra.mxu1 %v14289_v42  ;;  %v12300_v42 = vperm.slane %v8277_v49, 5 }
 0xa63   : > { %4938 = vmatmul.bf16.gmra.mxu3 %v14290_v54 }
 0xa65   : > { %4840 = vmatmul.bf16.gmra.mxu2 %v14290_v54 }
 0xa67   : > { %4987 = vmatmul.bf16.gmra.mxu0 %v14290_v54 }
 0xa69   : > { %4889 = vmatmul.bf16.gmra.mxu1 %v14290_v54 }
 0xa73   : > { %4943 = vmatmul.bf16.gmra.mxu3 %v14291_v20 }
 0xa75   : > { %4845 = vmatmul.bf16.gmra.mxu2 %v14291_v20 }
 0xa77   : > { %4992 = vmatmul.bf16.gmra.mxu0 %v14291_v20 }
 0xa79   : > { %4894 = vmatmul.bf16.gmra.mxu1 %v14291_v20 }
 0xa83   : > { %4948 = vmatmul.bf16.gmra.mxu3 %v14292_v17 }
 0xa85   : > { %4850 = vmatmul.bf16.gmra.mxu2 %v14292_v17 }
 0xa87   : > { %4997 = vmatmul.bf16.gmra.mxu0 %v14292_v17 }
 0xa89   : > { %4899 = vmatmul.bf16.gmra.mxu1 %v14292_v17 }
 0xa93   : > { %4953 = vmatmul.bf16.gmra.mxu3 %v14293_v26 }
 0xa95   : > { %4855 = vmatmul.bf16.gmra.mxu2 %v14293_v26 }
 0xa97   : > { %5002 = vmatmul.bf16.gmra.mxu0 %v14293_v26 }
 0xa99   : > { %4904 = vmatmul.bf16.gmra.mxu1 %v14293_v26 }
 0xaa3   : > { %4958 = vmatmul.bf16.gmra.mxu3 %v14294_v6 }
 0xaa5   : > { %4860 = vmatmul.bf16.gmra.mxu2 %v14294_v6 }
 0xaa7   : > { %5007 = vmatmul.bf16.gmra.mxu0 %v14294_v6 }
 0xaa9   : > { %4909 = vmatmul.bf16.gmra.mxu1 %v14294_v6 }
 0xab4   : > { %v4973_v48 = vpop.f32.mrf.mxu0 }
 0xab5   : > { %v5014_v18 = vadd.f32 1e-30, %v4973_v48 }
 0xab6   : > { %v4924_v0 = vpop.f32.mrf.mxu3  ;;  %v4875_v36 = vpop.f32.mrf.mxu1 }
 0xab7   : > { %8210 = vrcp.f32 %v5014_v18  ;;  %v5013_v35 = vadd.f32 1e-30, %v4924_v0  ;;  %v12303_v18 = vperm.slane %v8278_v45, 5 }
 0xab8   : > { %v4826_v60 = vpop.f32.mrf.mxu2 }
 0xab9   : > { %8212 = vrcp.f32 %v5013_v35 }
 0xabc   : > { %v4975_v61 = vpop.f32.mrf.mxu0 }
 0xabd   : > { %v8211_v30 = vpop.eup %8210  ;;  %v5016_v58 = vadd.f32 1e-30, %v4975_v61 }
 0xabe   : > { %v5078_v11 = vmul.f32 %v8211_v30, %v4875_v36  ;;  %v4926_v51 = vpop.f32.mrf.mxu3  ;;  %v4877_v37 = vpop.f32.mrf.mxu1 }
 0xabf   : > { %v8213_v57 = vpop.eup %8212  ;;  %8214 = vrcp.f32 %v5016_v58  ;;  %v5015_v15 = vadd.f32 1e-30, %v4926_v51 }
 0xac0   : > { %v5110_v32 = vadd.f32 %v5078_v11, %v14283_v14  ;;  %v5077_v29 = vmul.f32 %v8213_v57, %v4826_v60  ;;  %v4828_v28 = vpop.f32.mrf.mxu2 }
 0xac1   : > { %8216 = vrcp.f32 %v5015_v15 }
 0xac2   : > { %v5144_v9 = vadd.f32 %v12284_v53, %v5110_v32  ;;  %v5109_v4 = vadd.f32 %v5077_v29, %v14280_v55 }
 0xac4   : > { %v5143_v3 = vadd.f32 %v12290_v62, %v5109_v4  ;;  %v4978_v14 = vpop.f32.mrf.mxu0  ;;  %v5178_v41 = vmul.f32 %v12292_v59, %v5144_v9 }
 0xac5   : > { %v8215_v31 = vpop.eup %8214  ;;  %v5018_v54 = vadd.f32 1e-30, %v4978_v14 }
 0xac6   : > { %v5080_v20 = vmul.f32 %v8215_v31, %v4877_v37  ;;  %v4929_v17 = vpop.f32.mrf.mxu3  ;;  %v4880_v26 = vpop.f32.mrf.mxu1  ;;  %v5177_v48 = vmul.f32 %v12296_v24, %v5143_v3  ;;  %v5212_v60 = vadd.f32 %v12300_v42, %v5178_v41 }
 0xac7   : > { %v8217_v6 = vpop.eup %8216  ;;  %8218 = vrcp.f32 %v5018_v54  ;;  %v5017_v55 = vadd.f32 1e-30, %v4929_v17 }
 0xac8   : > { %v5112_v0 = vadd.f32 %v5080_v20, %v14285_v56  ;;  %v5079_v36 = vmul.f32 %v8217_v6, %v4828_v28  ;;  %v4831_v35 = vpop.f32.mrf.mxu2  ;;  %v5211_v58 = vadd.f32 %v12303_v18, %v5177_v48  ;;  %v5244_v57 = vmul.f32 0.2, %v5212_v60 }
 0xac9   : > { %8220 = vrcp.f32 %v5017_v55 }
 0xaca   : > { %v5146_v61 = vadd.f32 %v12284_v53, %v5112_v0  ;;  %v5111_v30 = vadd.f32 %v5079_v36, %v14282_v16  ;;  %v5243_v4 = vmul.f32 0.2, %v5211_v58  ;;  %v5276_v20 = vmax.f32 %v5212_v60, %v5244_v57 }
 0xacc   : > { %v5180_v11 = vmul.f32 %v12292_v59, %v5146_v61  ;;  %v5145_v49 = vadd.f32 %v12290_v62, %v5111_v30  ;;  %v4980_v51 = vpop.f32.mrf.mxu0  ;;  %v5275_v55 = vmax.f32 %v5211_v58, %v5243_v4 }
 0xacd   : > { %v8219_v37 = vpop.eup %8218  ;;  %v5020_v15 = vadd.f32 1e-30, %v4980_v51 }
 0xace   : > { %v5214_v56 = vadd.f32 %v12300_v42, %v5180_v11  ;;  %v5179_v32 = vmul.f32 %v12296_v24, %v5145_v49  ;;  %v5082_v29 = vmul.f32 %v8219_v37, %v4880_v26  ;;  %v4931_v45 = vpop.f32.mrf.mxu3  ;;  %v4882_v28 = vpop.f32.mrf.mxu1 }
 0xacf   : > { %v8221_v9 = vpop.eup %8220  ;;  %8222 = vrcp.f32 %v5020_v15  ;;  %v5019_v16 = vadd.f32 1e-30, %v4931_v45 }
 0xad0   : > { %v5246_v3 = vmul.f32 0.2, %v5214_v56  ;;  %v5213_v14 = vadd.f32 %v12303_v18, %v5179_v32  ;;  %v5114_v31 = vadd.f32 %v5082_v29, %v14276_v2  ;;  %v5081_v41 = vmul.f32 %v8221_v9, %v4831_v35  ;;  %v4833_v54 = vpop.f32.mrf.mxu2 }
 0xad1   : > { %8224 = vrcp.f32 %v5019_v16 }
 0xad2   : > { %v5278_v17 = vmax.f32 %v5214_v56, %v5246_v3  ;;  %v5245_v6 = vmul.f32 0.2, %v5213_v14  ;;  %v5148_v48 = vadd.f32 %v12284_v53, %v5114_v31  ;;  %v5113_v26 = vadd.f32 %v5081_v41, %v14264_v34 }
 0xad4   : > { %v5320_v0 = vadd.f32 %v5278_v17, %v5276_v20  ;;  %v5277_v36 = vmax.f32 %v5213_v14, %v5245_v6  ;;  %v5182_v61 = vmul.f32 %v12292_v59, %v5148_v48  ;;  %v5147_v30 = vadd.f32 %v12290_v62, %v5113_v26  ;;  %v4983_v11 = vpop.f32.mrf.mxu0 }
 0xad5   : > { %v8223_v49 = vpop.eup %8222  ;;  %v5022_v2 = vadd.f32 1e-30, %v4983_v11 }
 0xad6   : > { %v5307_v35 = vadd.f32 %v5277_v36, %v5275_v55  ;;  %v5216_v60 = vadd.f32 %v12300_v42, %v5182_v61  ;;  %v5181_v51 = vmul.f32 %v12296_v24, %v5147_v30  ;;  %v5084_v37 = vmul.f32 %v8223_v49, %v4882_v28  ;;  %v4934_v57 = vpop.f32.mrf.mxu3  ;;  %v4885_v15 = vpop.f32.mrf.mxu1 }
 0xad7   : > { %v8225_v56 = vpop.eup %8224  ;;  %8226 = vrcp.f32 %v5022_v2  ;;  %v5021_v34 = vadd.f32 1e-30, %v4934_v57 }
 0xad8   : > { %v5248_v58 = vmul.f32 0.2, %v5216_v60  ;;  %v5215_v32 = vadd.f32 %v12303_v18, %v5181_v51  ;;  %v5116_v29 = vadd.f32 %v5084_v37, %v14278_v12  ;;  %v5083_v45 = vmul.f32 %v8225_v56, %v4833_v54  ;;  %v4836_v9 = vpop.f32.mrf.mxu2 }
 0xad9   : > { %8228 = vrcp.f32 %v5021_v34 }
 0xada   : > { %v5280_v4 = vmax.f32 %v5216_v60, %v5248_v58  ;;  %v5247_v16 = vmul.f32 0.2, %v5215_v32  ;;  %v5150_v3 = vadd.f32 %v12284_v53, %v5116_v29  ;;  %v5115_v14 = vadd.f32 %v5083_v45, %v14274_v50 }
 0xadc   : > { %v5321_v28 = vadd.f32 %v5320_v0, %v5280_v4  ;;  %v5279_v31 = vmax.f32 %v5215_v32, %v5247_v16  ;;  %v5184_v41 = vmul.f32 %v12292_v59, %v5150_v3  ;;  %v5149_v20 = vadd.f32 %v12290_v62, %v5115_v14  ;;  %v4985_v17 = vpop.f32.mrf.mxu0 }
 0xadd   : > { %v8227_v6 = vpop.eup %8226  ;;  %v5024_v48 = vadd.f32 1e-30, %v4985_v17 }
 0xade   : > { %v5308_v26 = vadd.f32 %v5307_v35, %v5279_v31  ;;  %v5218_v12 = vadd.f32 %v12300_v42, %v5184_v41  ;;  %v5183_v54 = vmul.f32 %v12296_v24, %v5149_v20  ;;  %v5086_v55 = vmul.f32 %v8227_v6, %v4885_v15  ;;  %v4936_v36 = vpop.f32.mrf.mxu3  ;;  %v4887_v61 = vpop.f32.mrf.mxu1 }
 0xadf   : > { %v8229_v30 = vpop.eup %8228  ;;  %8230 = vrcp.f32 %v5024_v48  ;;  %v5023_v50 = vadd.f32 1e-30, %v4936_v36 }
 0xae0   : > { %v5250_v0 = vmul.f32 0.2, %v5218_v12  ;;  %v5217_v11 = vadd.f32 %v12303_v18, %v5183_v54  ;;  %v5118_v49 = vadd.f32 %v5086_v55, %v14267_v10  ;;  %v5085_v2 = vmul.f32 %v8229_v30, %v4836_v9  ;;  %v4838_v60 = vpop.f32.mrf.mxu2 }
 0xae1   : > { %8232 = vrcp.f32 %v5023_v50 }
 0xae2   : > { %v5282_v51 = vmax.f32 %v5218_v12, %v5250_v0  ;;  %v5249_v35 = vmul.f32 0.2, %v5217_v11  ;;  %v5152_v37 = vadd.f32 %v12284_v53, %v5118_v49  ;;  %v5117_v57 = vadd.f32 %v5085_v2, %v14258_v8 }
 0xae4   : > { %v5322_v15 = vadd.f32 %v5321_v28, %v5282_v51  ;;  %v5281_v56 = vmax.f32 %v5217_v11, %v5249_v35  ;;  %v5186_v34 = vmul.f32 %v12292_v59, %v5152_v37  ;;  %v5151_v58 = vadd.f32 %v12290_v62, %v5117_v57  ;;  %v4988_v32 = vpop.f32.mrf.mxu0 }
 0xae5   : > { %v8231_v29 = vpop.eup %8230  ;;  %v5026_v45 = vadd.f32 1e-30, %v4988_v32 }
 0xae6   : > { %v5309_v4 = vadd.f32 %v5308_v26, %v5281_v56  ;;  %v5220_v10 = vadd.f32 %v12300_v42, %v5186_v34  ;;  %v5185_v9 = vmul.f32 %v12296_v24, %v5151_v58  ;;  %v5088_v16 = vmul.f32 %v8231_v29, %v4887_v61  ;;  %v4939_v3 = vpop.f32.mrf.mxu3  ;;  %v4890_v14 = vpop.f32.mrf.mxu1 }
 0xae7   : > { %v8233_v31 = vpop.eup %8232  ;;  %8234 = vrcp.f32 %v5026_v45  ;;  %v5025_v8 = vadd.f32 1e-30, %v4939_v3 }
 0xae8   : > { %v5252_v28 = vmul.f32 0.2, %v5220_v10  ;;  %v5219_v41 = vadd.f32 %v12303_v18, %v5185_v9  ;;  %v5120_v20 = vadd.f32 %v5088_v16, %v14270_v38  ;;  %v5087_v17 = vmul.f32 %v8233_v31, %v4838_v60  ;;  %v4841_v6 = vpop.f32.mrf.mxu2 }
 0xae9   : > { %8236 = vrcp.f32 %v5025_v8 }
 0xaea   : > { %v5284_v48 = vmax.f32 %v5220_v10, %v5252_v28  ;;  %v5251_v26 = vmul.f32 0.2, %v5219_v41  ;;  %v5154_v12 = vadd.f32 %v12284_v53, %v5120_v20  ;;  %v5119_v54 = vadd.f32 %v5087_v17, %v14261_v33 }
 0xaec   : > { %v5323_v55 = vadd.f32 %v5322_v15, %v5284_v48  ;;  %v5283_v36 = vmax.f32 %v5219_v41, %v5251_v26  ;;  %v5188_v61 = vmul.f32 %v12292_v59, %v5154_v12  ;;  %v5153_v30 = vadd.f32 %v12290_v62, %v5119_v54  ;;  %v4990_v50 = vpop.f32.mrf.mxu0 }
 0xaed   : > { %v8235_v0 = vpop.eup %8234  ;;  %v5028_v11 = vadd.f32 1e-30, %v4990_v50 }
 0xaee   : > { %v5310_v49 = vadd.f32 %v5309_v4, %v5283_v36  ;;  %v5222_v38 = vadd.f32 %v12300_v42, %v5188_v61  ;;  %v5187_v2 = vmul.f32 %v12296_v24, %v5153_v30  ;;  %v5090_v60 = vmul.f32 %v8235_v0, %v4890_v14  ;;  %v4941_v51 = vpop.f32.mrf.mxu3  ;;  %v4892_v35 = vpop.f32.mrf.mxu1 }
 0xaef   : > { %v8237_v37 = vpop.eup %8236  ;;  %8238 = vrcp.f32 %v5028_v11  ;;  %v5027_v33 = vadd.f32 1e-30, %v4941_v51 }
 0xaf0   : > { %v5254_v57 = vmul.f32 0.2, %v5222_v38  ;;  %v5221_v15 = vadd.f32 %v12303_v18, %v5187_v2  ;;  %v5122_v56 = vadd.f32 %v5090_v60, %v14249_v47  ;;  %v5089_v34 = vmul.f32 %v8237_v37, %v4841_v6  ;;  %v4843_v58 = vpop.f32.mrf.mxu2 }
 0xaf1   : > { %8240 = vrcp.f32 %v5027_v33 }
 0xaf2   : > { %v5286_v32 = vmax.f32 %v5222_v38, %v5254_v57  ;;  %v5253_v29 = vmul.f32 0.2, %v5221_v15  ;;  %v5156_v45 = vadd.f32 %v12284_v53, %v5122_v56  ;;  %v5121_v4 = vadd.f32 %v5089_v34, %v14238_v63 }
 0xaf4   : > { %v5324_v10 = vadd.f32 %v5323_v55, %v5286_v32  ;;  %v5285_v9 = vmax.f32 %v5221_v15, %v5253_v29  ;;  %v5190_v16 = vmul.f32 %v12292_v59, %v5156_v45  ;;  %v5155_v3 = vadd.f32 %v12290_v62, %v5121_v4  ;;  %v4993_v14 = vpop.f32.mrf.mxu0 }
 0xaf5   : > { %v8239_v31 = vpop.eup %8238  ;;  %v5030_v56 = vadd.f32 1e-30, %v4993_v14  ;;  %v7123_v14 = vld [vmem:[%s13396_s10 + $0xe0] sm:$0xf] }
 0xaf6   : > { %v5311_v8 = vadd.f32 %v5310_v49, %v5285_v9  ;;  %v5224_v47 = vadd.f32 %v12300_v42, %v5190_v16  ;;  %v5189_v28 = vmul.f32 %v12296_v24, %v5155_v3  ;;  %v5092_v41 = vmul.f32 %v8239_v31, %v4892_v35  ;;  %v4944_v20 = vpop.f32.mrf.mxu3  ;;  %v4895_v17 = vpop.f32.mrf.mxu1 }
 0xaf7   : > { %v8241_v6 = vpop.eup %8240  ;;  %8242 = vrcp.f32 %v5030_v56 }
 0xaf8   : > { %v5256_v48 = vmul.f32 0.2, %v5224_v47  ;;  %v5223_v63 = vadd.f32 %v12303_v18, %v5189_v28  ;;  %v5124_v26 = vadd.f32 %v5092_v41, %v14253_v52  ;;  %v5091_v12 = vmul.f32 %v8241_v6, %v4843_v58  ;;  %v4846_v54 = vpop.f32.mrf.mxu2  ;;  %v7696_v28 = vld [vmem:[%s13396_s10 + $0xec] sm:$0xf0] }
 0xaf9   : > { %v5029_v58 = vadd.f32 1e-30, %v4944_v20  ;;  %v7124_v6 = vor.u32 %v7696_v28, %v7123_v14 }
 0xafa   : > { %v5288_v55 = vmax.f32 %v5224_v47, %v5256_v48  ;;  %v5255_v36 = vmul.f32 0.2, %v5223_v63  ;;  %v5158_v61 = vadd.f32 %v12284_v53, %v5124_v26  ;;  %v5123_v30 = vadd.f32 %v5091_v12, %v14242_v46 }
 0xafb   : > { %8244 = vrcp.f32 %v5029_v58  ;;  %5750 = vmatpush.bf16.msra.mxu2 %v7124_v6  ;;  %v7684_v6 = vld [vmem:[%s13396_s10 + $0x8c] sm:$0xf0] }
 0xafc   : > { %v5325_v50 = vadd.f32 %v5324_v10, %v5288_v55  ;;  %v5287_v0 = vmax.f32 %v5223_v63, %v5255_v36  ;;  %v5192_v11 = vmul.f32 %v12292_v59, %v5158_v61  ;;  %v5157_v49 = vadd.f32 %v12290_v62, %v5123_v30  ;;  %v4995_v38 = vpop.f32.mrf.mxu0 }
 0xafd   : > { %v5032_v45 = vadd.f32 1e-30, %v4995_v38  ;;  %v8243_v41 = vpop.eup %8242 }
 0xafe   : > { %v5312_v2 = vadd.f32 %v5311_v8, %v5287_v0  ;;  %v5226_v60 = vadd.f32 %v12300_v42, %v5192_v11  ;;  %v5191_v52 = vmul.f32 %v12296_v24, %v5157_v49  ;;  %v4946_v51 = vpop.f32.mrf.mxu3  ;;  %v4897_v35 = vpop.f32.mrf.mxu1  ;;  %v5094_v36 = vmul.f32 %v8243_v41, %v4895_v17  ;;  %v7091_v17 = vld [vmem:[%s13396_s10 + $0xa0] sm:$0xf] }
 0xaff   : > { %v5031_v16 = vadd.f32 1e-30, %v4946_v51  ;;  %8246 = vrcp.f32 %v5032_v45 }
 0xb00   : > { %v5258_v37 = vmul.f32 0.2, %v5226_v60  ;;  %v5225_v33 = vadd.f32 %v12303_v18, %v5191_v52  ;;  %v4848_v57 = vpop.f32.mrf.mxu2  ;;  %v5126_v38 = vadd.f32 %v5094_v36, %v14231_v40  ;;  %v7692_v52 = vld [vmem:[%s13396_s10 + $0xcc] sm:$0xf0] }
 0xb01   : > { %8248 = vrcp.f32 %v5031_v16  ;;  %v8245_v48 = vpop.eup %8244  ;;  %v7688_v40 = vld [vmem:[%s13396_s10 + $0xac] sm:$0xf0] }
 0xb02   : > { %v5290_v15 = vmax.f32 %v5226_v60, %v5258_v37  ;;  %v5257_v46 = vmul.f32 0.2, %v5225_v33  ;;  %v5093_v30 = vmul.f32 %v8245_v48, %v4846_v54  ;;  %v7107_v60 = vld [vmem:[%s13396_s10 + $0xc0] sm:$0xf] }
 0xb03   : > { %v7108_v37 = vor.u32 %v7692_v52, %v7107_v60 }
 0xb04   : > { %v12363_v34 = vadd.f32 %v5325_v50, %v5290_v15  ;;  %v5289_v32 = vmax.f32 %v5225_v33, %v5257_v46  ;;  %v4998_v29 = vpop.f32.mrf.mxu0  ;;  %v5125_v51 = vadd.f32 %v5093_v30, %v11828_v27  ;;  %v5160_v27 = vadd.f32 %v12284_v53, %v5126_v38 }
 0xb05   : > { %v5034_v31 = vadd.f32 1e-30, %v4998_v29  ;;  %v8247_v12 = vpop.eup %8246  ;;  %5751 = vmatpush.bf16.msra.mxu2 %v7108_v37 }
 0xb06   : > { %v12365_v4 = vadd.f32 %v5312_v2, %v5289_v32  ;;  %v4949_v10 = vpop.f32.mrf.mxu3  ;;  %v4900_v9 = vpop.f32.mrf.mxu1  ;;  %v5096_v0 = vmul.f32 %v8247_v12, %v4897_v35  ;;  %v5194_v14 = vmul.f32 %v12292_v59, %v5160_v27 }
 0xb07   : > { %v5033_v8 = vadd.f32 1e-30, %v4949_v10  ;;  %8250 = vrcp.f32 %v5034_v31  ;;  %v8249_v50 = vpop.eup %8248  ;;  %v7092_v10 = vor.u32 %v7688_v40, %v7091_v17  ;;  %v5159_v31 = vadd.f32 %v12290_v62, %v5125_v51 }
 0xb08   : > { %v4851_v3 = vpop.f32.mrf.mxu2  ;;  %v5128_v33 = vadd.f32 %v5096_v0, %v14235_v1  ;;  %v5095_v15 = vmul.f32 %v8249_v50, %v4848_v57  ;;  %v5228_v52 = vadd.f32 %v12300_v42, %v5194_v14 }
 0xb09   : > { %8252 = vrcp.f32 %v5033_v8  ;;  %5752 = vmatpush.bf16.msra.mxu2 %v7092_v10 }
 0xb0a   : > { %v5162_v1 = vadd.f32 %v12284_v53, %v5128_v33  ;;  %v5127_v57 = vadd.f32 %v5095_v15, %v14133_v22  ;;  %v7059_v22 = vld [vmem:[%s13396_s10 + $0x60] sm:$0xf] }
 0xb0c   : > { %v5000_v47 = vpop.f32.mrf.mxu0  ;;  %v5196_v12 = vmul.f32 %v12292_v59, %v5162_v1 }
 0xb0d   : > { %v5036_v20 = vadd.f32 1e-30, %v5000_v47  ;;  %v8251_v11 = vpop.eup %8250 }
 0xb0e   : > { %v4951_v63 = vpop.f32.mrf.mxu3  ;;  %v4902_v26 = vpop.f32.mrf.mxu1  ;;  %v5098_v46 = vmul.f32 %v8251_v11, %v4900_v9  ;;  %v5230_v51 = vadd.f32 %v12300_v42, %v5196_v12 }
 0xb0f   : > { %8254 = vrcp.f32 %v5036_v20  ;;  %v5035_v55 = vadd.f32 1e-30, %v4951_v63  ;;  %v8253_v49 = vpop.eup %8252  ;;  %v7075_v20 = vld [vmem:[%s13396_s10 + $0x80] sm:$0xf] }
 0xb10   : > { %v4853_v61 = vpop.f32.mrf.mxu2  ;;  %v5097_v29 = vmul.f32 %v8253_v49, %v4851_v3  ;;  %v5130_v9 = vadd.f32 %v5098_v46, %v14141_v7 }
 0xb11   : > { %8256 = vrcp.f32 %v5035_v55  ;;  %v5161_v55 = vadd.f32 %v12290_v62, %v5127_v57 }
 0xb12   : > { %v5129_v3 = vadd.f32 %v5097_v29, %v14140_v44  ;;  %v5193_v44 = vmul.f32 %v12296_v24, %v5159_v31  ;;  %v5164_v36 = vadd.f32 %v12284_v53, %v5130_v9  ;;  %v5260_v29 = vmul.f32 0.2, %v5228_v52 }
 0xb14   : > { %v5003_v2 = vpop.f32.mrf.mxu0  ;;  %v5163_v0 = vadd.f32 %v12290_v62, %v5129_v3  ;;  %v12418_v17 = vadd.f32 %v12303_v18, %v5193_v44  ;;  %v5198_v33 = vmul.f32 %v12292_v59, %v5164_v36  ;;  %v5292_v12 = vmax.f32 %v5228_v52, %v5260_v29 }
 0xb15   : > { %v8255_v54 = vpop.eup %8254  ;;  %v5038_v35 = vadd.f32 1e-30, %v5003_v2 }
 0xb16   : > { %v4954_v56 = vpop.f32.mrf.mxu3  ;;  %v4905_v58 = vpop.f32.mrf.mxu1  ;;  %v5100_v16 = vmul.f32 %v8255_v54, %v4902_v26  ;;  %v7680_v26 = vld [vmem:[%s13396_s10 + $0x6c] sm:$0xf0]  ;;  %v12438_v57 = vadd.f32 %v12300_v42, %v5198_v33  ;;  %v7259_v33 = vld [vmem:[%s13396_s10 + $0x1e8] sm:$0xf] }
 0xb17   : > { %v8257_v32 = vpop.eup %8256  ;;  %8258 = vrcp.f32 %v5038_v35  ;;  %v5037_v45 = vadd.f32 1e-30, %v4954_v56  ;;  %v7060_v49 = vor.u32 %v7680_v26, %v7059_v22  ;;  %v5195_v35 = vmul.f32 %v12296_v24, %v5161_v55 }
 0xb18   : > { %v5099_v8 = vmul.f32 %v8257_v32, %v4853_v61  ;;  %v4856_v47 = vpop.f32.mrf.mxu2  ;;  %v5132_v28 = vadd.f32 %v5100_v16, %v11844_v39  ;;  %v7076_v39 = vor.u32 %v7684_v6, %v7075_v20  ;;  %v5262_v16 = vmul.f32 0.2, %v5230_v51 }
 0xb19   : > { %8260 = vrcp.f32 %v5037_v45  ;;  %v12435_v31 = vadd.f32 %v12303_v18, %v5195_v35  ;;  %v5327_v6 = vrot.slane %v12363_v34, 4  ;;  %v5264_v36 = vmul.f32 0.2, %v12438_v57 }
 0xb1a   : > { %v5131_v48 = vadd.f32 %v5099_v8, %v11842_v5  ;;  %5753 = vmatpush.bf16.msra.mxu2 %v7076_v39  ;;  %v5166_v38 = vadd.f32 %v12284_v53, %v5132_v28 }
 0xb1c   : > { %v5005_v41 = vpop.f32.mrf.mxu0  ;;  %v5165_v54 = vadd.f32 %v12290_v62, %v5131_v48  ;;  %v5200_v46 = vmul.f32 %v12292_v59, %v5166_v38  ;;  %v5294_v48 = vmax.f32 %v5230_v51, %v5262_v16  ;;  %v7243_v16 = vld [vmem:[%s13396_s10 + $0x1c8] sm:$0xf] }
 0xb1d   : > { %v8259_v7 = vpop.eup %8258  ;;  %v5040_v63 = vadd.f32 1e-30, %v5005_v41 }
 0xb1e   : > { %v5102_v61 = vmul.f32 %v8259_v7, %v4905_v58  ;;  %v4956_v30 = vpop.f32.mrf.mxu3  ;;  %v4907_v5 = vpop.f32.mrf.mxu1  ;;  %5754 = vmatpush.bf16.msra.mxu2 %v7060_v49  ;;  %v5199_v45 = vmul.f32 %v12296_v24, %v5165_v54  ;;  %v12444_v14 = vadd.f32 %v12300_v42, %v5200_v46  ;;  %v5346_v52 = vadd.f32 %v5294_v48, %v5292_v12  ;;  %v7011_v12 = vld [vmem:[%s13396_s10] sm:$0xf] }
 0xb1f   : > { %v8261_v50 = vpop.eup %8260  ;;  %8262 = vrcp.f32 %v5040_v63  ;;  %v5039_v11 = vadd.f32 1e-30, %v4956_v30  ;;  %v5261_v63 = vmul.f32 0.2, %v12435_v31 }
 0xb20   : > { %v5134_v2 = vadd.f32 %v5102_v61, %v14149_v43  ;;  %v5101_v60 = vmul.f32 %v8261_v50, %v4856_v47  ;;  %v5197_v43 = vmul.f32 %v12296_v24, %v5163_v0  ;;  %v4858_v15 = vpop.f32.mrf.mxu2  ;;  %v12450_v22 = vadd.f32 %v12303_v18, %v5199_v45 }
 0xb21   : > { %8264 = vrcp.f32 %v5039_v11  ;;  %v12464_v30 = vmul.f32 0.2, %v12444_v14 }
 0xb22   : > { %v5168_v37 = vadd.f32 %v12284_v53, %v5134_v2  ;;  %v5133_v40 = vadd.f32 %v5101_v60, %v14148_v13  ;;  %v12432_v13 = vmul.f32 0.2, %v12418_v17  ;;  %v12441_v9 = vadd.f32 %v12303_v18, %v5197_v43 }
 0xb24   : > { %v5167_v56 = vadd.f32 %v12290_v62, %v5133_v40  ;;  %v5008_v58 = vpop.f32.mrf.mxu0  ;;  %v5202_v10 = vmul.f32 %v12292_v59, %v5168_v37  ;;  %v5291_v55 = vmax.f32 %v12418_v17, %v12432_v13  ;;  %v5263_v61 = vmul.f32 0.2, %v12441_v9  ;;  %v7043_v37 = vld [vmem:[%s13396_s10 + $0x40] sm:$0xf]  ;;  %v7676_v40 = vld [vmem:[%s13396_s10 + $0x4c] sm:$0xf0] }
 0xb25   : > { %v8263_v32 = vpop.eup %8262  ;;  %v5042_v27 = vadd.f32 1e-30, %v5008_v58  ;;  %v5293_v17 = vmax.f32 %v12435_v31, %v5261_v63  ;;  %v7729_v58 = vld [vmem:[%s13396_s10 + $0x1f4] sm:$0xf0]  ;;  %v7672_v13 = vld [vmem:[%s13396_s10 + $0x2c] sm:$0xf0] }
 0xb26   : > { %v5104_v8 = vmul.f32 %v8263_v32, %v4907_v5  ;;  %v4959_v47 = vpop.f32.mrf.mxu3  ;;  %v5201_v28 = vmul.f32 %v12296_v24, %v5167_v56  ;;  %v12453_v7 = vadd.f32 %v12300_v42, %v5202_v10  ;;  %v4910_v44 = vpop.f32.mrf.mxu1  ;;  %v12471_v5 = vmul.f32 0.2, %v12450_v22  ;;  %v7027_v32 = vld [vmem:[%s13396_s10 + $0x20] sm:$0xf] }
 0xb27   : > { %v8265_v1 = vpop.eup %8264  ;;  %8266 = vrcp.f32 %v5042_v27  ;;  %v5041_v3 = vadd.f32 1e-30, %v4959_v47  ;;  %v7044_v56 = vor.u32 %v7676_v40, %v7043_v37  ;;  %v5295_v29 = vmax.f32 %v12441_v9, %v5263_v61  ;;  %v7693_v37 = vld [vmem:[%s13396_s10 + $0xd4] sm:$0xf0]  ;;  %v7691_v40 = vld [vmem:[%s13396_s10 + $0xcc] sm:$0xf] }
 0xb28   : > { %v5136_v41 = vadd.f32 %v5104_v8, %v14155_v21  ;;  %v5103_v20 = vmul.f32 %v8265_v1, %v4858_v15  ;;  %v5314_v21 = vrot.slane %v12365_v4, 4  ;;  %v12467_v50 = vadd.f32 %v12303_v18, %v5201_v28  ;;  %v4861_v60 = vpop.f32.mrf.mxu2  ;;  %v7725_v1 = vld [vmem:[%s13396_s10 + $0x1d4] sm:$0xf0] }
 0xb29   : > { %8268 = vrcp.f32 %v5041_v3  ;;  %v12474_v49 = vmul.f32 0.2, %v12453_v7  ;;  %v5296_v15 = vmax.f32 %v12438_v57, %v5264_v36  ;;  %5755 = vmatpush.bf16.msra.mxu2 %v7044_v56  ;;  %v7260_v8 = vor.u32 %v7729_v58, %v7259_v33  ;;  %v7697_v57 = vld [vmem:[%s13396_s10 + $0xf4] sm:$0xf0] }
 0xb2a   : > { %v5170_v39 = vadd.f32 %v12284_v53, %v5136_v41  ;;  %v5135_v26 = vadd.f32 %v5103_v20, %v14154_v19  ;;  %v12499_v45 = vmul.f32 0.2, %v12467_v50  ;;  %v7028_v47 = vor.u32 %v7672_v13, %v7027_v32  ;;  %v7695_v20 = vld [vmem:[%s13396_s10 + $0xec] sm:$0xf]  ;;  %v7724_v13 = vld [vmem:[%s13396_s10 + $0x1cc] sm:$0xf0] }
 0xb2b   : > { %v5333_v9 = vadd.f32 %v5293_v17, %v5291_v55  ;;  %5815 = vmatpush.bf16.msrb.mxu3 %v7260_v8  ;;  %v7244_v63 = vor.u32 %v7725_v1, %v7243_v16  ;;  %v7251_v55 = vld [vmem:[%s13396_s10 + $0x1e0] sm:$0xf]  ;;  %v5347_v36 = vadd.f32 %v5346_v52, %v5296_v15  ;;  %v5298_v52 = vmax.f32 %v12444_v14, %v12464_v30  ;;  %v7117_v15 = vld [vmem:[%s13396_s10 + $0xd8] sm:$0xf0]  ;;  %v7211_v16 = vld [vmem:[%s13396_s10 + $0x188] sm:$0xf] }
 0xb2c   : > { %v5204_v0 = vmul.f32 %v12292_v59, %v5170_v39  ;;  %v5010_v11 = vpop.f32.mrf.mxu0  ;;  %v5169_v38 = vadd.f32 %v12290_v62, %v5135_v26  ;;  %v5297_v58 = vmax.f32 %v12450_v22, %v12471_v5  ;;  %v5300_v22 = vmax.f32 %v12453_v7, %v12474_v49  ;;  %v14295_v8 = vld [vmem:[#allocation115_spill] sm:$0xff] }
 0xb2d   : > { %v8267_v19 = vpop.eup %8266  ;;  %v5044_v2 = vadd.f32 1e-30, %v5010_v11  ;;  %v5334_v61 = vadd.f32 %v5333_v9, %v5295_v29  ;;  %5756 = vmatpush.bf16.msra.mxu2 %v7028_v47  ;;  %v7687_v9 = vld [vmem:[%s13396_s10 + $0xac] sm:$0xf] }
 0xb2e   : > { %v12479_v54 = vadd.f32 %v12300_v42, %v5204_v0  ;;  %v5106_v51 = vmul.f32 %v8267_v19, %v4910_v44  ;;  %v4961_v35 = vpop.f32.mrf.mxu3  ;;  %v5203_v31 = vmul.f32 %v12296_v24, %v5169_v38  ;;  %v7133_v44 = vld [vmem:[%s13396_s10 + $0xf8] sm:$0xf0]  ;;  %v4912_v48 = vpop.f32.mrf.mxu1  ;;  %v7728_v19 = vld [vmem:[%s13396_s10 + $0x1ec] sm:$0xf0]  ;;  %v7227_v38 = vld [vmem:[%s13396_s10 + $0x1a8] sm:$0xf] }
 0xb2f   : > { %v8269_v43 = vpop.eup %8268  ;;  %8270 = vrcp.f32 %v5044_v2  ;;  %v5043_v46 = vadd.f32 1e-30, %v4961_v35  ;;  %v7136_v26 = vor.u32 %v7695_v20, %v7133_v44  ;;  %v7721_v2 = vld [vmem:[%s13396_s10 + $0x1b4] sm:$0xf0]  ;;  %v7115_v35 = vld [vmem:[%s13396_s10 + $0xc8] sm:$0xf]  ;;  %5816 = vmatpush.bf16.msrb.mxu3 %v7244_v63 }
 0xb30   : > { %v5138_v10 = vadd.f32 %v5106_v51, %v14157_v25  ;;  %v5105_v27 = vmul.f32 %v8269_v43, %v4861_v60  ;;  %v7131_v25 = vld [vmem:[%s13396_s10 + $0xe8] sm:$0xf]  ;;  %v12519_v3 = vmul.f32 0.2, %v12479_v54  ;;  %v12552_v17 = vadd.f32 %v12303_v18, %v5203_v31  ;;  %v4863_v32 = vpop.f32.mrf.mxu2  ;;  %v7101_v20 = vld [vmem:[%s13396_s10 + $0xb8] sm:$0xf0] }
 0xb31   : > { %8272 = vrcp.f32 %v5043_v46  ;;  %v7132_v39 = vor.u32 %v7697_v57, %v7131_v25  ;;  %5828 = vmatpush.bf16.msrb.mxu0 %v7136_v26  ;;  %v7252_v43 = vor.u32 %v7728_v19, %v7251_v55  ;;  %v7235_v46 = vld [vmem:[%s13396_s10 + $0x1c0] sm:$0xf]  ;;  %v7228_v29 = vor.u32 %v7721_v2, %v7227_v38  ;;  %v7099_v31 = vld [vmem:[%s13396_s10 + $0xa8] sm:$0xf]  ;;  %v7717_v25 = vld [vmem:[%s13396_s10 + $0x194] sm:$0xf0] }
 0xb32   : > { %v5172_v28 = vadd.f32 %v12284_v53, %v5138_v10  ;;  %v5137_v41 = vadd.f32 %v5105_v27, %v14156_v23  ;;  %v7668_v23 = vld [vmem:[%s13396_s10 + $0xc] sm:$0xf0]  ;;  %v7116_v10 = vor.u32 %v7693_v37, %v7115_v35  ;;  %v7120_v27 = vor.u32 %v7691_v40, %v7117_v15  ;;  %v7689_v57 = vld [vmem:[%s13396_s10 + $0xb4] sm:$0xf0]  ;;  %v14296_v63 = vld [vmem:[#allocation71_spill] sm:$0xff] }
 0xb33   : > { %5802 = vmatpush.bf16.msrb.mxu1 %v7132_v39  ;;  %v7012_v51 = vor.u32 %v7668_v23, %v7011_v12  ;;  %v5269_v7 = vmul.f32 0.2, %v12552_v17  ;;  %v7236_v26 = vor.u32 %v7724_v13, %v7235_v46  ;;  %v7219_v12 = vld [vmem:[%s13396_s10 + $0x1a0] sm:$0xf]  ;;  %v7720_v23 = vld [vmem:[%s13396_s10 + $0x1ac] sm:$0xf0]  ;;  %v5299_v55 = vmax.f32 %v12467_v50, %v12499_v45  ;;  %5817 = vmatpush.bf16.msrb.mxu3 %v7228_v29 }
 0xb34   : > { %v5206_v0 = vmul.f32 %v12292_v59, %v5172_v28  ;;  %v5171_v11 = vadd.f32 %v12290_v62, %v5137_v41  ;;  %v5348_v28 = vadd.f32 %v5347_v36, %v5298_v52  ;;  %v7100_v41 = vor.u32 %v7689_v57, %v7099_v31  ;;  %v7685_v19 = vld [vmem:[%s13396_s10 + $0x94] sm:$0xf0]  ;;  %v7683_v38 = vld [vmem:[%s13396_s10 + $0x8c] sm:$0xf]  ;;  %v7085_v52 = vld [vmem:[%s13396_s10 + $0x98] sm:$0xf0] }
 0xb35   : > { %v8271_v60 = vpop.eup %8270  ;;  %5757 = vmatpush.bf16.msra.mxu2 %v7012_v51  ;;  %5829 = vmatpush.bf16.msrb.mxu0 %v7120_v27  ;;  %v5302_v36 = vmax.f32 %v12479_v54, %v12519_v3  ;;  %v5335_v2 = vadd.f32 %v5334_v61, %v5297_v58  ;;  %v7195_v3 = vld [vmem:[%s13396_s10 + $0x168] sm:$0xf]  ;;  %v5301_v51 = vmax.f32 %v12552_v17, %v5269_v7  ;;  %v7679_v15 = vld [vmem:[%s13396_s10 + $0x6c] sm:$0xf]  ;;  %v7069_v46 = vld [vmem:[%s13396_s10 + $0x78] sm:$0xf0] }
 0xb36   : > { %v12564_v14 = vadd.f32 %v12300_v42, %v5206_v0  ;;  %v5205_v30 = vmul.f32 %v12296_v24, %v5171_v11  ;;  %v5108_v33 = vmul.f32 %v8271_v60, %v4912_v48  ;;  %v7104_v0 = vor.u32 %v7687_v9, %v7101_v20  ;;  %v7083_v11 = vld [vmem:[%s13396_s10 + $0x88] sm:$0xf]  ;;  %v7713_v60 = vld [vmem:[%s13396_s10 + $0x174] sm:$0xf0]  ;;  %v7053_v57 = vld [vmem:[%s13396_s10 + $0x58] sm:$0xf0] }
 0xb37   : > { %v8273_v56 = vpop.eup %8272  ;;  %5803 = vmatpush.bf16.msrb.mxu1 %v7116_v10  ;;  %v5349_v50 = vadd.f32 %v5348_v28, %v5300_v22  ;;  %v7084_v35 = vor.u32 %v7685_v19, %v7083_v11  ;;  %v7088_v40 = vor.u32 %v7683_v38, %v7085_v52  ;;  %v7067_v17 = vld [vmem:[%s13396_s10 + $0x68] sm:$0xf]  ;;  %v7709_v27 = vld [vmem:[%s13396_s10 + $0x154] sm:$0xf0]  ;;  %v5315_v13 = vadd.f32 %v5314_v21, %v12365_v4  ;;  %v7671_v11 = vld [vmem:[%s13396_s10 + $0x2c] sm:$0xf] }
 0xb38   : > { %v12587_v5 = vadd.f32 %v12303_v18, %v5205_v30  ;;  %v5140_v47 = vadd.f32 %v5108_v33, %v14295_v8  ;;  %v5107_v1 = vmul.f32 %v8273_v56, %v4863_v32  ;;  %v5272_v49 = vmul.f32 0.2, %v12564_v14  ;;  %v7203_v30 = vld [vmem:[%s13396_s10 + $0x180] sm:$0xf]  ;;  %v7179_v10 = vld [vmem:[%s13396_s10 + $0x148] sm:$0xf] }
 0xb39   : > { %5763 = vmatpush.bf16.msrb.mxu2 %v7252_v43  ;;  %5830 = vmatpush.bf16.msrb.mxu0 %v7104_v0  ;;  %v5336_v33 = vadd.f32 %v5335_v2, %v5299_v55  ;;  %v5350_v43 = vadd.f32 %v5349_v50, %v5302_v36  ;;  %v5328_v56 = vadd.f32 %v5327_v6, %v12363_v34  ;;  %v7677_v4 = vld [vmem:[%s13396_s10 + $0x54] sm:$0xf0]  ;;  %v7035_v55 = vld [vmem:[%s13396_s10 + $0x28] sm:$0xf]  ;;  %v7708_v0 = vld [vmem:[%s13396_s10 + $0x14c] sm:$0xf0] }
 0xb3a   : > { %v12605_v44 = vmul.f32 0.2, %v12587_v5  ;;  %v5174_v48 = vadd.f32 %v12284_v53, %v5140_v47  ;;  %v5139_v39 = vadd.f32 %v5107_v1, %v14296_v63  ;;  %v7212_v53 = vor.u32 %v7717_v25, %v7211_v16  ;;  %v7051_v47 = vld [vmem:[%s13396_s10 + $0x48] sm:$0xf]  ;;  %v7712_v1 = vld [vmem:[%s13396_s10 + $0x16c] sm:$0xf0] }
 0xb3b   : > { %v5304_v61 = vmax.f32 %v12564_v14, %v5272_v49  ;;  %5804 = vmatpush.bf16.msrb.mxu1 %v7100_v41  ;;  %v7681_v14 = vld [vmem:[%s13396_s10 + $0x74] sm:$0xf0]  ;;  %v5337_v16 = vadd.f32 %v5336_v33, %v5301_v51  ;;  %v7072_v8 = vor.u32 %v7679_v15, %v7069_v46  ;;  %v7180_v21 = vor.u32 %v7709_v27, %v7179_v10  ;;  %v7675_v25 = vld [vmem:[%s13396_s10 + $0x4c] sm:$0xf]  ;;  %v7163_v41 = vld [vmem:[%s13396_s10 + $0x128] sm:$0xf] }
 0xb3c   : > { %v5208_v45 = vmul.f32 %v12292_v59, %v5174_v48  ;;  %v5173_v54 = vadd.f32 %v12290_v62, %v5139_v39  ;;  %v7220_v59 = vor.u32 %v7720_v23, %v7219_v12  ;;  %5818 = vmatpush.bf16.msrb.mxu3 %v7212_v53  ;;  %v5303_v58 = vmax.f32 %v12587_v5, %v12605_v44  ;;  %v7705_v20 = vld [vmem:[%s13396_s10 + $0x134] sm:$0xf0]  ;;  %v7171_v63 = vld [vmem:[%s13396_s10 + $0x140] sm:$0xf]  ;;  %v7037_v19 = vld [vmem:[%s13396_s10 + $0x38] sm:$0xf0] }
 0xb3d   : > { %5764 = vmatpush.bf16.msrb.mxu2 %v7236_v26  ;;  %v5351_v34 = vadd.f32 %v5350_v43, %v5304_v61  ;;  %v7068_v6 = vor.u32 %v7681_v14, %v7067_v17  ;;  %5831 = vmatpush.bf16.msrb.mxu0 %v7088_v40  ;;  %v5329_v9 = vrot.slane %v5328_v56, 2  ;;  %v5316_v44 = vrot.slane %v5315_v13, 2  ;;  %v7673_v36 = vld [vmem:[%s13396_s10 + $0x34] sm:$0xf0]  ;;  %v7155_v52 = vld [vmem:[%s13396_s10 + $0x120] sm:$0xf] }
 0xb3e   : > { %v5242_v62 = vadd.f32 %v12300_v42, %v5208_v45  ;;  %v5207_v37 = vmul.f32 %v12296_v24, %v5173_v54  ;;  %v7196_v42 = vor.u32 %v7713_v60, %v7195_v3  ;;  %v7716_v24 = vld [vmem:[%s13396_s10 + $0x18c] sm:$0xf0]  ;;  %v5338_v28 = vadd.f32 %v5337_v16, %v5303_v58  ;;  %v7147_v45 = vld [vmem:[%s13396_s10 + $0x108] sm:$0xf]  ;;  %v7701_v54 = vld [vmem:[%s13396_s10 + $0x114] sm:$0xf0] }
 0xb3f   : > { %5805 = vmatpush.bf16.msrb.mxu1 %v7084_v35  ;;  %v7204_v5 = vor.u32 %v7716_v24, %v7203_v30  ;;  %v7052_v48 = vor.u32 %v7677_v4, %v7051_v47  ;;  %v7056_v23 = vor.u32 %v7675_v25, %v7053_v57  ;;  %v7164_v53 = vor.u32 %v7705_v20, %v7163_v41  ;;  %v7704_v30 = vld [vmem:[%s13396_s10 + $0x12c] sm:$0xf0]  ;;  %v7667_v17 = vld [vmem:[%s13396_s10 + $0xc] sm:$0xf]  ;;  %v7021_v14 = vld [vmem:[%s13396_s10 + $0x18] sm:$0xf0] }
 0xb40   : > { %v5274_v32 = vmul.f32 0.2, %v5242_v62  ;;  %v5241_v29 = vadd.f32 %v12303_v18, %v5207_v37  ;;  %v7187_v18 = vld [vmem:[%s13396_s10 + $0x160] sm:$0xf]  ;;  %5819 = vmatpush.bf16.msrb.mxu3 %v7196_v42  ;;  %v5330_v38 = vadd.f32 %v5329_v9, %v5328_v56  ;;  %v5317_v3 = vadd.f32 %v5316_v44, %v5315_v13  ;;  %v7669_v37 = vld [vmem:[%s13396_s10 + $0x14] sm:$0xf0] }
 0xb41   : > { %5765 = vmatpush.bf16.msrb.mxu2 %v7220_v59  ;;  %5832 = vmatpush.bf16.msrb.mxu0 %v7072_v8  ;;  %v7188_v12 = vor.u32 %v7712_v1, %v7187_v18  ;;  %v7036_v60 = vor.u32 %v7673_v36, %v7035_v55  ;;  %v7172_v59 = vor.u32 %v7708_v0, %v7171_v63  ;;  %v7700_v10 = vld [vmem:[%s13396_s10 + $0x10c] sm:$0xf0]  ;;  %v7125_v18 = vld [vmem:[%s13396_s10 + $0xf0] sm:$0xf0]  ;;  %v7690_v1 = vld [vmem:[%s13396_s10 + $0xc4] sm:$0xf] }
 0xb42   : > { %v5306_v31 = vmax.f32 %v5242_v62, %v5274_v32  ;;  %v5273_v22 = vmul.f32 0.2, %v5241_v29  ;;  %v7040_v35 = vor.u32 %v7671_v11, %v7037_v19  ;;  %v7019_v62 = vld [vmem:[%s13396_s10 + $0x8] sm:$0xf]  ;;  %v7148_v40 = vor.u32 %v7701_v54, %v7147_v45  ;;  %v7109_v25 = vld [vmem:[%s13396_s10 + $0xd0] sm:$0xf0] }
 0xb43   : > { %5806 = vmatpush.bf16.msrb.mxu1 %v7068_v6  ;;  %v5331_v33 = vrot.slane %v5330_v38, 1  ;;  %v5318_v24 = vrot.slane %v5317_v3, 1  ;;  %v7020_v15 = vor.u32 %v7669_v37, %v7019_v62  ;;  %v7156_v58 = vor.u32 %v7704_v30, %v7155_v52  ;;  %v7694_v6 = vld [vmem:[%s13396_s10 + $0xe4] sm:$0xf]  ;;  %v7077_v41 = vld [vmem:[%s13396_s10 + $0x90] sm:$0xf0] }
 0xb44   : > { %v5352_v7 = vadd.f32 %v5351_v34, %v5306_v31  ;;  %v5305_v49 = vmax.f32 %v5241_v29, %v5273_v22  ;;  %5820 = vmatpush.bf16.msrb.mxu3 %v7180_v21  ;;  %v7024_v32 = vor.u32 %v7667_v17, %v7021_v14  ;;  %v7139_v29 = vld [vmem:[%s13396_s10 + $0x100] sm:$0xf]  ;;  %v7128_v4 = vor.u32 %v7694_v6, %v7125_v18  ;;  %v7686_v9 = vld [vmem:[%s13396_s10 + $0xa4] sm:$0xf]  ;;  %v7029_v55 = vld [vmem:[%s13396_s10 + $0x30] sm:$0xf0] }
 0xb45   : > { %5766 = vmatpush.bf16.msrb.mxu2 %v7204_v5  ;;  %5833 = vmatpush.bf16.msrb.mxu0 %v7056_v23  ;;  %v5332_v13 = vadd.f32 %v5331_v33, %v5330_v38  ;;  %v5319_v34 = vadd.f32 %v5318_v24, %v5317_v3  ;;  %v7140_v22 = vor.u32 %v7700_v10, %v7139_v29  ;;  %v7678_v44 = vld [vmem:[%s13396_s10 + $0x64] sm:$0xf]  ;;  %v7013_v0 = vld [vmem:[%s13396_s10 + $0x10] sm:$0xf0]  ;;  %v7245_v29 = vld [vmem:[%s13396_s10 + $0x1d8] sm:$0xf0] }
 0xb46   : > { %v5353_v39 = vrot.slane %v5352_v7, 4  ;;  %v5339_v26 = vadd.f32 %v5338_v28, %v5305_v49  ;;  %v7112_v57 = vor.u32 %v7690_v1, %v7109_v25  ;;  %v7093_v28 = vld [vmem:[%s13396_s10 + $0xb0] sm:$0xf0]  ;;  %v7682_v49 = vld [vmem:[%s13396_s10 + $0x84] sm:$0xf] }
 0xb47   : > { %5807 = vmatpush.bf16.msrb.mxu1 %v7052_v48  ;;  %v7080_v20 = vor.u32 %v7682_v49, %v7077_v41  ;;  %v7061_v48 = vld [vmem:[%s13396_s10 + $0x70] sm:$0xf0]  ;;  %v7670_v23 = vld [vmem:[%s13396_s10 + $0x24] sm:$0xf]  ;;  %v7451_v10 = vld [vmem:[%s13398_s12 + $0x170] sm:$0xf] }
 0xb48   : > { %v5354_v2 = vadd.f32 %v5353_v39, %v5352_v7  ;;  %v5340_v50 = vrot.slane %v5339_v26, 4  ;;  %5821 = vmatpush.bf16.msrb.mxu3 %v7164_v53  ;;  %v7096_v7 = vor.u32 %v7686_v9, %v7093_v28  ;;  %v7064_v63 = vor.u32 %v7678_v44, %v7061_v48  ;;  %v7674_v39 = vld [vmem:[%s13396_s10 + $0x44] sm:$0xf]  ;;  %v7253_v19 = vld [vmem:[%s13396_s10 + $0x1f0] sm:$0xf0] }
 0xb49   : > { %5767 = vmatpush.bf16.msrb.mxu2 %v7188_v12  ;;  %5834 = vmatpush.bf16.msrb.mxu0 %v7040_v35  ;;  %v7032_v36 = vor.u32 %v7670_v23, %v7029_v55  ;;  %v7666_v53 = vld [vmem:[%s13396_s10 + $0x4] sm:$0xf]  ;;  %v7237_v45 = vld [vmem:[%s13396_s10 + $0x1d0] sm:$0xf0]  ;;  %v7775_v6 = vld [vmem:[%s13398_s12 + $0x164] sm:$0xf0] }
 0xb4a   : > { %v5355_v51 = vrot.slane %v5354_v2, 2  ;;  %v5341_v61 = vadd.f32 %v5340_v50, %v5339_v26  ;;  %v7045_v26 = vld [vmem:[%s13396_s10 + $0x50] sm:$0xf0]  ;;  %v7726_v11 = vld [vmem:[%s13396_s10 + $0x1e4] sm:$0xf]  ;;  %v7016_v38 = vor.u32 %v7666_v53, %v7013_v0 }
 0xb4b   : > { %5808 = vmatpush.bf16.msrb.mxu1 %v7036_v60  ;;  %v7048_v12 = vor.u32 %v7674_v39, %v7045_v26  ;;  %v7722_v50 = vld [vmem:[%s13396_s10 + $0x1c4] sm:$0xf]  ;;  %v7221_v60 = vld [vmem:[%s13396_s10 + $0x1b0] sm:$0xf0]  ;;  %v7719_v18 = vld [vmem:[%s13396_s10 + $0x1ac] sm:$0xf] }
 0xb4c   : > { %v5356_v43 = vadd.f32 %v5355_v51, %v5354_v2  ;;  %v5342_v42 = vrot.slane %v5341_v61, 2  ;;  %5822 = vmatpush.bf16.msrb.mxu3 %v7148_v40  ;;  %v7256_v2 = vor.u32 %v7726_v11, %v7253_v19  ;;  %v7240_v54 = vor.u32 %v7722_v50, %v7237_v45  ;;  %v7718_v3 = vld [vmem:[%s13396_s10 + $0x1a4] sm:$0xf]  ;;  %v7189_v62 = vld [vmem:[%s13396_s10 + $0x170] sm:$0xf0] }
 0xb4d   : > { %5768 = vmatpush.bf16.msrb.mxu2 %v7172_v59  ;;  %5835 = vmatpush.bf16.msrb.mxu0 %v7024_v32  ;;  %v7224_v52 = vor.u32 %v7718_v3, %v7221_v60  ;;  %v7714_v51 = vld [vmem:[%s13396_s10 + $0x184] sm:$0xf]  ;;  %v7173_v30 = vld [vmem:[%s13396_s10 + $0x150] sm:$0xf0]  ;;  %v7723_v32 = vld [vmem:[%s13396_s10 + $0x1cc] sm:$0xf] }
 0xb4e   : > { %v5357_v46 = vrot.slane %v5356_v43, 1  ;;  %v5343_v56 = vadd.f32 %v5342_v42, %v5341_v61  ;;  %v7205_v61 = vld [vmem:[%s13396_s10 + $0x190] sm:$0xf0]  ;;  %v7710_v35 = vld [vmem:[%s13396_s10 + $0x164] sm:$0xf] }
 0xb4f   : > { %5809 = vmatpush.bf16.msrb.mxu1 %v7020_v15  ;;  %v7208_v59 = vor.u32 %v7714_v51, %v7205_v61  ;;  %v7192_v37 = vor.u32 %v7710_v35, %v7189_v62  ;;  %v7706_v40 = vld [vmem:[%s13396_s10 + $0x144] sm:$0xf]  ;;  %v7157_v33 = vld [vmem:[%s13396_s10 + $0x130] sm:$0xf0]  ;;  %v7727_v15 = vld [vmem:[%s13396_s10 + $0x1ec] sm:$0xf] }
 0xb50   : > { %v5344_v27 = vrot.slane %v5343_v56, 1  ;;  %v5358_v16 = vadd.f32 %v5357_v46, %v5356_v43  ;;  %v7176_v17 = vor.u32 %v7706_v40, %v7173_v30  ;;  %v7702_v14 = vld [vmem:[%s13396_s10 + $0x124] sm:$0xf]  ;;  %v7141_v24 = vld [vmem:[%s13396_s10 + $0x110] sm:$0xf0] }
 0xb51   : > { %5769 = vmatpush.bf16.msrb.mxu2 %v7156_v58  ;;  %v7160_v43 = vor.u32 %v7702_v14, %v7157_v33  ;;  %v7698_v42 = vld [vmem:[%s13396_s10 + $0x104] sm:$0xf]  ;;  %v7261_v46 = vld [vmem:[%s13396_s10 + $0x1f8] sm:$0xf0]  ;;  %v7743_v9 = vld [vmem:[%s13398_s12 + $0x64] sm:$0xf0] }
 0xb52   : > { %v5361_v31 = vsel %vm5359_vm12, %v5332_v13, %v5358_v16  ;;  %v5345_v5 = vadd.f32 %v5344_v27, %v5343_v56  ;;  %v7144_v56 = vor.u32 %v7698_v42, %v7141_v24  ;;  %v7264_v58 = vor.u32 %v7727_v15, %v7261_v46  ;;  %v7777_v27 = vld [vmem:[%s13398_s12 + $0x174] sm:$0xf0]  ;;  %v7443_v13 = vld [vmem:[%s13398_s12 + $0x160] sm:$0xf]  ;;  %v7715_v28 = vld [vmem:[%s13396_s10 + $0x18c] sm:$0xf] }
 0xb53   : > { %v12755_v8 = vpack.c.bf16 %v5361_v31, %v5361_v31  ;;  %v7248_v16 = vor.u32 %v7723_v32, %v7245_v29  ;;  %v7229_v31 = vld [vmem:[%s13396_s10 + $0x1b8] sm:$0xf0]  ;;  %v7427_v41 = vld [vmem:[%s13398_s12 + $0x140] sm:$0xf]  ;;  %v7771_v44 = vld [vmem:[%s13398_s12 + $0x144] sm:$0xf0] }
 0xb54   : > { %v5360_v47 = vsel %vm5359_vm12, %v5319_v34, %v5345_v5  ;;  %v7452_v34 = vor.u32 %v7777_v27, %v7451_v10  ;;  %v7435_v5 = vld [vmem:[%s13398_s12 + $0x150] sm:$0xf]  ;;  %v7232_v1 = vor.u32 %v7719_v18, %v7229_v31  ;;  %v7711_v26 = vld [vmem:[%s13396_s10 + $0x16c] sm:$0xf]  ;;  %v7428_v23 = vor.u32 %v7771_v44, %v7427_v41  ;;  %v7769_v53 = vld [vmem:[%s13398_s12 + $0x134] sm:$0xf0] }
 0xb55   : > { %5823 = vmatmul.bf16.vlgmr.msrb.gmra.mxu3 %v12755_v8  ;;  %v5364_v21 = vpack.c.bf16 %v5360_v47, %v5360_v47  ;;  %5770 = vmatpush.bf16.msrb.mxu2 %v7140_v22  ;;  %v7444_v22 = vor.u32 %v7775_v6, %v7443_v13  ;;  %v7773_v47 = vld [vmem:[%s13398_s12 + $0x154] sm:$0xf0]  ;;  %v7307_v48 = vld [vmem:[%s13398_s12 + $0x50] sm:$0xf]  ;;  %v7707_v11 = vld [vmem:[%s13396_s10 + $0x14c] sm:$0xf] }
 0xb56   : > { %6309 = vmatpush.bf16.msra.mxu0 %v7452_v34  ;;  %v7436_v49 = vor.u32 %v7773_v47, %v7435_v5  ;;  %v7181_v19 = vld [vmem:[%s13396_s10 + $0x158] sm:$0xf0]  ;;  %v7767_v50 = vld [vmem:[%s13398_s12 + $0x124] sm:$0xf0]  ;;  %v7765_v51 = vld [vmem:[%s13398_s12 + $0x114] sm:$0xf0] }
 0xb57   : > { %5758 = vmatmul.bf16.vlgmr.msra.gmra.mxu2 %v5364_v21  ;;  %5810 = vmatmul.bf16.vlgmr.msrb.gmra.mxu1 %v5364_v21  ;;  %v7184_v45 = vor.u32 %v7707_v11, %v7181_v19  ;;  %v7165_v3 = vld [vmem:[%s13396_s10 + $0x138] sm:$0xf0]  ;;  %v7763_v40 = vld [vmem:[%s13398_s12 + $0x104] sm:$0xf0]  ;;  %v7774_v42 = vld [vmem:[%s13398_s12 + $0x164] sm:$0xf] }
 0xb58   : > { %5836 = vmatmul.bf16.vlgmr.msrb.gmra.mxu0 %v5364_v21  ;;  %v7149_v35 = vld [vmem:[%s13396_s10 + $0x118] sm:$0xf0]  ;;  %v7445_v24 = vld [vmem:[%s13398_s12 + $0x168] sm:$0xf0]  ;;  %v7299_v15 = vld [vmem:[%s13398_s12 + $0x40] sm:$0xf] }
 0xb59   : > { %5776 = vmatpush.bf16.msra.mxu2 %v7128_v4  ;;  %v7323_v4 = vld [vmem:[%s13398_s12 + $0x70] sm:$0xf]  ;;  %v7453_v14 = vld [vmem:[%s13398_s12 + $0x178] sm:$0xf0]  ;;  %v7448_v46 = vor.u32 %v7774_v42, %v7445_v24  ;;  %v7737_v10 = vld [vmem:[%s13398_s12 + $0x34] sm:$0xf0] }
 0xb5a   : > { %6310 = vmatpush.bf16.msra.mxu0 %v7444_v22  ;;  %v7291_v29 = vld [vmem:[%s13398_s12 + $0x30] sm:$0xf]  ;;  %v7429_v34 = vld [vmem:[%s13398_s12 + $0x148] sm:$0xf0]  ;;  %v7283_v6 = vld [vmem:[%s13398_s12 + $0x20] sm:$0xf] }
 0xb5b   : > { %v7292_v13 = vor.u32 %v7737_v10, %v7291_v29  ;;  %v7735_v18 = vld [vmem:[%s13398_s12 + $0x24] sm:$0xf0]  ;;  %v7768_v5 = vld [vmem:[%s13398_s12 + $0x134] sm:$0xf]  ;;  %v7421_v47 = vld [vmem:[%s13398_s12 + $0x138] sm:$0xf0] }
 0xb5c   : > { %v7284_v22 = vor.u32 %v7735_v18, %v7283_v6  ;;  %v7744_v41 = vld [vmem:[%s13398_s12 + $0x74] sm:$0xf]  ;;  %v7317_v11 = vld [vmem:[%s13398_s12 + $0x68] sm:$0xf0]  ;;  %v7757_v42 = vld [vmem:[%s13398_s12 + $0xd4] sm:$0xf0] }
 0xb5d   : > { %5777 = vmatpush.bf16.msra.mxu2 %v7112_v57  ;;  %v7315_v57 = vld [vmem:[%s13398_s12 + $0x60] sm:$0xf]  ;;  %v7755_v6 = vld [vmem:[%s13398_s12 + $0xc4] sm:$0xf0] }
 0xb5e   : > { %6311 = vmatpush.bf16.msra.mxu0 %v7436_v49  ;;  %v7731_v49 = vld [vmem:[%s13398_s12 + $0x4] sm:$0xf0] }
 0xb61   : > { %5778 = vmatpush.bf16.msra.mxu2 %v7096_v7  ;;  %v7213_v7 = vld [vmem:[%s13396_s10 + $0x198] sm:$0xf0] }
 0xb62   : > { %v7216_v39 = vor.u32 %v7715_v28, %v7213_v7  ;;  %6312 = vmatpush.bf16.msra.mxu0 %v7428_v23  ;;  %v13029_v28 = vld [vmem:[%s13397_s11] sm:$0xff] }
 0xb63   : > { %v7267_v7 = vld [vmem:[%s13398_s12] sm:$0xf] }
 0xb65   : > { %5779 = vmatpush.bf16.msra.mxu2 %v7080_v20  ;;  %v7316_v20 = vor.u32 %v7743_v9, %v7315_v57  ;;  %v7766_v57 = vld [vmem:[%s13398_s12 + $0x124] sm:$0xf]  ;;  %v7413_v9 = vld [vmem:[%s13398_s12 + $0x128] sm:$0xf0] }
 0xb66   : > { %v7416_v44 = vor.u32 %v7766_v57, %v7413_v9  ;;  %v5871_v57 = vperm.slane %v13029_v28, 1 }
 0xb67   : > { %5771 = vmatmul.bf16.vlgmr.msrb.gmra.mxu2 %v12755_v8 }
 0xb69   : > { %5780 = vmatpush.bf16.msra.mxu2 %v7064_v63  ;;  %v7741_v63 = vld [vmem:[%s13398_s12 + $0x54] sm:$0xf0] }
 0xb6a   : > { %v7308_v55 = vor.u32 %v7741_v63, %v7307_v48  ;;  %v5857_v48 = vperm.slane %v13029_v28, 4  ;;  %v7268_v63 = vor.u32 %v7731_v49, %v7267_v7  ;;  %v7732_v49 = vld [vmem:[%s13398_s12 + $0x14] sm:$0xf] }
 0xb6c   : > { %v5865_v19 = vperm.slane %v5857_v48, 0  ;;  %v7515_v48 = vld [vmem:[%s13398_s12 + $0x1f0] sm:$0xf] }
 0xb6d   : > { %5781 = vmatpush.bf16.msra.mxu2 %v7048_v12  ;;  %v7197_v12 = vld [vmem:[%s13396_s10 + $0x178] sm:$0xf0] }
 0xb6e   : > { %v7200_v0 = vor.u32 %v7711_v26, %v7197_v12  ;;  %v5873_v26 = vperm.slane %v13029_v28, 5 }
 0xb71   : > { %5782 = vmatpush.bf16.msra.mxu2 %v7032_v36  ;;  %v7419_v36 = vld [vmem:[%s13398_s12 + $0x130] sm:$0xf] }
 0xb75   : > { %5783 = vmatpush.bf16.msra.mxu2 %v7016_v38  ;;  %v7420_v38 = vor.u32 %v7769_v53, %v7419_v36  ;;  %v7405_v36 = vld [vmem:[%s13398_s12 + $0x118] sm:$0xf0]  ;;  %v7742_v53 = vld [vmem:[%s13398_s12 + $0x64] sm:$0xf] }
 0xb77   : > { %6313 = vmatpush.bf16.msra.mxu0 %v7420_v38  ;;  %v7762_v38 = vld [vmem:[%s13398_s12 + $0x104] sm:$0xf] }
 0xb78   : > { %5784 = vmatmul.bf16.vlgmr.msra.gmra.mxu2 %v5364_v21  ;;  %v7745_v21 = vld [vmem:[%s13398_s12 + $0x74] sm:$0xf0] }
 0xb79   : > { %5789 = vmatpush.bf16.msrb.mxu2 %v7256_v2  ;;  %v7324_v25 = vor.u32 %v7745_v21, %v7323_v4  ;;  %v7411_v2 = vld [vmem:[%s13398_s12 + $0x120] sm:$0xf]  ;;  %v7275_v4 = vld [vmem:[%s13398_s12 + $0x10] sm:$0xf]  ;;  %v7733_v21 = vld [vmem:[%s13398_s12 + $0x14] sm:$0xf0] }
 0xb7a   : > { %v7412_v60 = vor.u32 %v7767_v50, %v7411_v2  ;;  %v7397_v2 = vld [vmem:[%s13398_s12 + $0x108] sm:$0xf0] }
 0xb7b   : > { %6283 = vmatpush.bf16.msra.mxu1 %v7324_v25  ;;  %v7276_v25 = vor.u32 %v7733_v21, %v7275_v4  ;;  %v7753_v4 = vld [vmem:[%s13398_s12 + $0xb4] sm:$0xf0]  ;;  %v7734_v21 = vld [vmem:[%s13398_s12 + $0x24] sm:$0xf] }
 0xb7c   : > { %6314 = vmatpush.bf16.msra.mxu0 %v7412_v60 }
 0xb7d   : > { %5790 = vmatpush.bf16.msrb.mxu2 %v7240_v54  ;;  %v7703_v54 = vld [vmem:[%s13396_s10 + $0x12c] sm:$0xf] }
 0xb7e   : > { %v7168_v61 = vor.u32 %v7703_v54, %v7165_v3  ;;  %v7387_v54 = vld [vmem:[%s13398_s12 + $0xf0] sm:$0xf]  ;;  %v7761_v3 = vld [vmem:[%s13398_s12 + $0xf4] sm:$0xf0] }
 0xb7f   : > { %6284 = vmatpush.bf16.msra.mxu1 %v7316_v20  ;;  %v7325_v20 = vld [vmem:[%s13398_s12 + $0x78] sm:$0xf0] }
 0xb80   : > { %v7328_v12 = vor.u32 %v7744_v41, %v7325_v20  ;;  %v7347_v41 = vld [vmem:[%s13398_s12 + $0xa0] sm:$0xf]  ;;  %v7751_v20 = vld [vmem:[%s13398_s12 + $0xa4] sm:$0xf0] }
 0xb81   : > { %5791 = vmatpush.bf16.msrb.mxu2 %v7224_v52  ;;  %v7403_v52 = vld [vmem:[%s13398_s12 + $0x110] sm:$0xf] }
 0xb82   : > { %v7404_v62 = vor.u32 %v7765_v51, %v7403_v52  ;;  %v5881_v52 = vperm.slane %v5873_v26, 1  ;;  %v7740_v51 = vld [vmem:[%s13398_s12 + $0x54] sm:$0xf] }
 0xb83   : > { %6285 = vmatpush.bf16.msra.mxu1 %v7308_v55  ;;  %v7764_v55 = vld [vmem:[%s13398_s12 + $0x114] sm:$0xf] }
 0xb84   : > { %6315 = vmatpush.bf16.msra.mxu0 %v7404_v62  ;;  %v7400_v62 = vor.u32 %v7762_v38, %v7397_v2  ;;  %v7730_v38 = vld [vmem:[%s13398_s12 + $0x4] sm:$0xf]  ;;  %v7269_v2 = vld [vmem:[%s13398_s12 + $0x8] sm:$0xf0] }
 0xb85   : > { %5792 = vmatpush.bf16.msrb.mxu2 %v7208_v59  ;;  %v7699_v59 = vld [vmem:[%s13396_s10 + $0x10c] sm:$0xf] }
 0xb86   : > { %v7152_v30 = vor.u32 %v7699_v59, %v7149_v35  ;;  %v7388_v59 = vor.u32 %v7761_v3, %v7387_v54  ;;  %v7272_v54 = vor.u32 %v7730_v38, %v7269_v2  ;;  %v7331_v3 = vld [vmem:[%s13398_s12 + $0x80] sm:$0xf]  ;;  %v7517_v38 = vld [vmem:[%s13398_s12 + $0x1f8] sm:$0xf0] }
 0xb88   : > { %6296 = vmatpush.bf16.msra.mxu3 %v7388_v59 }
 0xb89   : > { %5793 = vmatpush.bf16.msrb.mxu2 %v7192_v37  ;;  %v7395_v37 = vld [vmem:[%s13398_s12 + $0x100] sm:$0xf] }
 0xb8a   : > { %v7396_v33 = vor.u32 %v7763_v40, %v7395_v37  ;;  %v7379_v37 = vld [vmem:[%s13398_s12 + $0xe0] sm:$0xf]  ;;  %v7759_v40 = vld [vmem:[%s13398_s12 + $0xe4] sm:$0xf0] }
 0xb8c   : > { %6316 = vmatpush.bf16.msra.mxu0 %v7396_v33 }
 0xb8d   : > { %5794 = vmatpush.bf16.msrb.mxu2 %v7176_v17  ;;  %v7776_v17 = vld [vmem:[%s13398_s12 + $0x174] sm:$0xf] }
 0xb91   : > { %5795 = vmatpush.bf16.msrb.mxu2 %v7160_v43  ;;  %v7456_v43 = vor.u32 %v7776_v17, %v7453_v14  ;;  %v7380_v17 = vor.u32 %v7759_v40, %v7379_v37 }
 0xb93   : > { %6361 = vmatpush.bf16.msrb.mxu0 %v7456_v43  ;;  %v7371_v43 = vld [vmem:[%s13398_s12 + $0xd0] sm:$0xf]  ;;  %6297 = vmatpush.bf16.msra.mxu3 %v7380_v17 }
 0xb95   : > { %5796 = vmatpush.bf16.msrb.mxu2 %v7144_v56  ;;  %v7739_v56 = vld [vmem:[%s13398_s12 + $0x44] sm:$0xf0] }
 0xb96   : > { %v7300_v32 = vor.u32 %v7739_v56, %v7299_v15  ;;  %v7301_v56 = vld [vmem:[%s13398_s12 + $0x48] sm:$0xf0] }
 0xb97   : > { %6362 = vmatpush.bf16.msrb.mxu0 %v7448_v46  ;;  %v7738_v46 = vld [vmem:[%s13398_s12 + $0x44] sm:$0xf] }
 0xb98   : > { %5797 = vmatmul.bf16.vlgmr.msrb.gmra.mxu2 %v12755_v8  ;;  %6286 = vmatpush.bf16.msra.mxu1 %v7300_v32  ;;  %v7304_v29 = vor.u32 %v7738_v46, %v7301_v56  ;;  %v7789_v46 = vld [vmem:[%s13398_s12 + $0x1d4] sm:$0xf0] }
 0xb99   : > { %5841 = vmatpush.bf16.msra.mxu2 %v7264_v58  ;;  %v7437_v58 = vld [vmem:[%s13398_s12 + $0x158] sm:$0xf0] }
 0xb9c   : > { %6287 = vmatpush.bf16.msra.mxu1 %v7292_v13  ;;  %v7293_v13 = vld [vmem:[%s13398_s12 + $0x38] sm:$0xf0] }
 0xb9d   : > { %5842 = vmatpush.bf16.msra.mxu2 %v7248_v16  ;;  %v7770_v16 = vld [vmem:[%s13398_s12 + $0x144] sm:$0xf] }
 0xb9e   : > { %v7432_v31 = vor.u32 %v7770_v16, %v7429_v34  ;;  %v7363_v34 = vld [vmem:[%s13398_s12 + $0xc0] sm:$0xf] }
 0xba0   : > { %6288 = vmatpush.bf16.msra.mxu1 %v7284_v22  ;;  %v7364_v22 = vor.u32 %v7755_v6, %v7363_v34 }
 0xba1   : > { %5843 = vmatpush.bf16.msra.mxu2 %v7232_v1  ;;  %v7424_v1 = vor.u32 %v7768_v5, %v7421_v47  ;;  %v7355_v47 = vld [vmem:[%s13398_s12 + $0xb0] sm:$0xf] }
 0xba2   : > { %v7356_v9 = vor.u32 %v7753_v4, %v7355_v47 }
 0xba4   : > { %6289 = vmatpush.bf16.msra.mxu1 %v7276_v25 }
 0xba5   : > { %5844 = vmatpush.bf16.msra.mxu2 %v7216_v39 }
 0xba8   : > { %6290 = vmatpush.bf16.msra.mxu1 %v7268_v63  ;;  %v7793_v63 = vld [vmem:[%s13398_s12 + $0x1f4] sm:$0xf0] }
 0xba9   : > { %5845 = vmatpush.bf16.msra.mxu2 %v7200_v0  ;;  %v7408_v0 = vor.u32 %v7764_v55, %v7405_v36  ;;  %v7516_v26 = vor.u32 %v7793_v63, %v7515_v48  ;;  %v5879_v55 = vperm.slane %v5871_v57, 1  ;;  %v7348_v36 = vor.u32 %v7751_v20, %v7347_v41  ;;  %v7349_v57 = vld [vmem:[%s13398_s12 + $0xa8] sm:$0xf0]  ;;  %v7467_v41 = vld [vmem:[%s13398_s12 + $0x190] sm:$0xf] }
 0xbaa   : > { %v7781_v20 = vld [vmem:[%s13398_s12 + $0x194] sm:$0xf0]  ;;  %v7341_v48 = vld [vmem:[%s13398_s12 + $0x98] sm:$0xf0]  ;;  %v5872_v63 = vperm.slane %v13029_v28, 3 }
 0xbac   : > { %6335 = vmatpush.bf16.msrb.mxu1 %v7328_v12 }
 0xbad   : > { %5846 = vmatpush.bf16.msra.mxu2 %v7184_v45  ;;  %v7320_v45 = vor.u32 %v7742_v53, %v7317_v11  ;;  %v7749_v11 = vld [vmem:[%s13398_s12 + $0x94] sm:$0xf0] }
 0xbb0   : > { %6336 = vmatpush.bf16.msrb.mxu1 %v7320_v45 }
 0xbb1   : > { %5847 = vmatpush.bf16.msra.mxu2 %v7168_v61  ;;  %v7309_v61 = vld [vmem:[%s13398_s12 + $0x58] sm:$0xf0] }
 0xbb2   : > { %v7312_v33 = vor.u32 %v7740_v51, %v7309_v61  ;;  %v7760_v51 = vld [vmem:[%s13398_s12 + $0xf4] sm:$0xf]  ;;  %v7389_v61 = vld [vmem:[%s13398_s12 + $0xf8] sm:$0xf0] }
 0xbb3   : > { %v7392_v37 = vor.u32 %v7760_v51, %v7389_v61 }
 0xbb4   : > { %6337 = vmatpush.bf16.msrb.mxu1 %v7312_v33  ;;  %v7791_v33 = vld [vmem:[%s13398_s12 + $0x1e4] sm:$0xf0] }
 0xbb5   : > { %5848 = vmatpush.bf16.msra.mxu2 %v7152_v30 }
 0xbb8   : > { %5849 = vmatmul.bf16.vlgmr.msra.gmra.mxu2 %v12755_v8  ;;  %v7772_v8 = vld [vmem:[%s13398_s12 + $0x154] sm:$0xf]  ;;  %6338 = vmatpush.bf16.msrb.mxu1 %v7304_v29 }
 0xbb9   : > { %v7440_v27 = vor.u32 %v7772_v8, %v7437_v58  ;;  %v7372_v58 = vor.u32 %v7757_v42, %v7371_v43  ;;  %6322 = vmatpush.bf16.msrb.mxu2 %v7516_v26  ;;  %v7758_v43 = vld [vmem:[%s13398_s12 + $0xe4] sm:$0xf]  ;;  %v7468_v26 = vor.u32 %v7781_v20, %v7467_v41 }
 0xbbb   : > { %6363 = vmatpush.bf16.msrb.mxu0 %v7440_v27  ;;  %v7736_v27 = vld [vmem:[%s13398_s12 + $0x34] sm:$0xf]  ;;  %6298 = vmatpush.bf16.msra.mxu3 %v7372_v58  ;;  %v7373_v58 = vld [vmem:[%s13398_s12 + $0xd8] sm:$0xf0] }
 0xbbc   : > { %v7296_v5 = vor.u32 %v7736_v27, %v7293_v13  ;;  %v7787_v27 = vld [vmem:[%s13398_s12 + $0x1c4] sm:$0xf0]  ;;  %v7754_v13 = vld [vmem:[%s13398_s12 + $0xc4] sm:$0xf] }
 0xbbe   : > { %6339 = vmatpush.bf16.msrb.mxu1 %v7296_v5  ;;  %v7357_v5 = vld [vmem:[%s13398_s12 + $0xb8] sm:$0xf0] }
 0xbbf   : > { %6364 = vmatpush.bf16.msrb.mxu0 %v7432_v31  ;;  %v5855_v31 = vperm.slane %v13029_v28, 0  ;;  %6299 = vmatpush.bf16.msra.mxu3 %v7364_v22  ;;  %v7752_v22 = vld [vmem:[%s13398_s12 + $0xb4] sm:$0xf] }
 0xbc0   : > { %v7360_v4 = vor.u32 %v7752_v22, %v7357_v5 }
 0xbc1   : > { %v5863_v25 = vperm.slane %v5855_v31, 0  ;;  %v7785_v31 = vld [vmem:[%s13398_s12 + $0x1b4] sm:$0xf0] }
 0xbc3   : > { %6365 = vmatpush.bf16.msrb.mxu0 %v7424_v1  ;;  %v7285_v1 = vld [vmem:[%s13398_s12 + $0x28] sm:$0xf0]  ;;  %6300 = vmatpush.bf16.msra.mxu3 %v7356_v9  ;;  %v5856_v9 = vperm.slane %v13029_v28, 2 }
 0xbc4   : > { %v7288_v7 = vor.u32 %v7734_v21, %v7285_v1  ;;  %v7475_v21 = vld [vmem:[%s13398_s12 + $0x1a0] sm:$0xf]  ;;  %v7783_v1 = vld [vmem:[%s13398_s12 + $0x1a4] sm:$0xf0] }
 0xbc6   : > { %6340 = vmatpush.bf16.msrb.mxu1 %v7288_v7  ;;  %v7476_v7 = vor.u32 %v7783_v1, %v7475_v21 }
 0xbc7   : > { %6366 = vmatpush.bf16.msrb.mxu0 %v7416_v44  ;;  %v7277_v44 = vld [vmem:[%s13398_s12 + $0x18] sm:$0xf0]  ;;  %6301 = vmatpush.bf16.msra.mxu3 %v7348_v36  ;;  %v7779_v36 = vld [vmem:[%s13398_s12 + $0x184] sm:$0xf0] }
 0xbc8   : > { %v7280_v53 = vor.u32 %v7732_v49, %v7277_v44  ;;  %v7748_v44 = vld [vmem:[%s13398_s12 + $0x94] sm:$0xf] }
 0xbca   : > { %6341 = vmatpush.bf16.msrb.mxu1 %v7280_v53  ;;  %v7746_v53 = vld [vmem:[%s13398_s12 + $0x84] sm:$0xf] }
 0xbcb   : > { %6367 = vmatpush.bf16.msrb.mxu0 %v7408_v0  ;;  %v7339_v0 = vld [vmem:[%s13398_s12 + $0x90] sm:$0xf] }
 0xbcc   : > { %v7340_v45 = vor.u32 %v7749_v11, %v7339_v0  ;;  %v7333_v11 = vld [vmem:[%s13398_s12 + $0x88] sm:$0xf0] }
 0xbce   : > { %6302 = vmatpush.bf16.msra.mxu3 %v7340_v45  ;;  %6342 = vmatpush.bf16.msrb.mxu1 %v7272_v54 }
 0xbcf   : > { %6368 = vmatpush.bf16.msrb.mxu0 %v7400_v62 }
 0xbd4   : > { %v5811_v39 = vpop.f32.mrf.mxu1 }
 0xbd5   : > { %v13045_v23 = vpop.f32.mrf.mxu0 }
 0xbd8   : > { %v5824_v50 = vpop.f32.mrf.mxu3 }
 0xbd9   : > { %v5825_v60 = vadd.f32 %v5824_v50, %v5811_v39 }
 0xbda   : > { %v5759_v35 = vpop.f32.mrf.mxu2 }
 0xbdb   : > { %v5869_v30 = vmul.f32 %v5865_v19, %v5825_v60  ;;  %v7747_v60 = vld [vmem:[%s13398_s12 + $0x84] sm:$0xf0] }
 0xbdc   : > { %v5813_v14 = vpop.f32.mrf.mxu1  ;;  %v7332_v62 = vor.u32 %v7747_v60, %v7331_v3  ;;  %v7336_v3 = vor.u32 %v7746_v53, %v7333_v11 }
 0xbdd   : > { %v5885_v24 = vadd.f32 %v5881_v52, %v5869_v30  ;;  %v5839_v15 = vpop.f32.mrf.mxu0  ;;  %v7507_v14 = vld [vmem:[%s13398_s12 + $0x1e0] sm:$0xf] }
 0xbde   : > { %6303 = vmatpush.bf16.msra.mxu3 %v7332_v62  ;;  %v7508_v42 = vor.u32 %v7791_v33, %v7507_v14  ;;  %v7499_v15 = vld [vmem:[%s13398_s12 + $0x1d0] sm:$0xf]  ;;  %v7788_v62 = vld [vmem:[%s13398_s12 + $0x1d4] sm:$0xf]  ;;  %v7786_v33 = vld [vmem:[%s13398_s12 + $0x1c4] sm:$0xf] }
 0xbdf   : > { %v5889_v8 = vmul.f32 0.2, %v5885_v24 }
 0xbe0   : > { %v5826_v32 = vpop.f32.mrf.mxu3  ;;  %6323 = vmatpush.bf16.msrb.mxu2 %v7508_v42 }
 0xbe1   : > { %v5893_v10 = vmax.f32 %v5885_v24, %v5889_v8  ;;  %v7381_v24 = vld [vmem:[%s13398_s12 + $0xe8] sm:$0xf0]  ;;  %v7756_v8 = vld [vmem:[%s13398_s12 + $0xd4] sm:$0xf]  ;;  %v7500_v32 = vor.u32 %v7789_v46, %v7499_v15  ;;  %v7485_v15 = vld [vmem:[%s13398_s12 + $0x1b8] sm:$0xf0] }
 0xbe2   : > { %v5761_v16 = vpop.f32.mrf.mxu2  ;;  %6348 = vmatpush.bf16.msrb.mxu3 %v7392_v37  ;;  %v7384_v56 = vor.u32 %v7758_v43, %v7381_v24  ;;  %v7376_v29 = vor.u32 %v7756_v8, %v7373_v58  ;;  %v7493_v43 = vld [vmem:[%s13398_s12 + $0x1c8] sm:$0xf0]  ;;  %v7784_v24 = vld [vmem:[%s13398_s12 + $0x1b4] sm:$0xf] }
 0xbe3   : > { %v5897_v18 = vpack.c.bf16 %v5893_v10, %v5893_v10  ;;  %v7491_v10 = vld [vmem:[%s13398_s12 + $0x1c0] sm:$0xf]  ;;  %v7365_v16 = vld [vmem:[%s13398_s12 + $0xc8] sm:$0xf0]  ;;  %v7496_v42 = vor.u32 %v7786_v33, %v7493_v43  ;;  %v7488_v46 = vor.u32 %v7784_v24, %v7485_v15 }
 0xbe4   : > { %6324 = vmatpush.bf16.msrb.mxu2 %v7500_v32  ;;  %v7492_v34 = vor.u32 %v7787_v27, %v7491_v10  ;;  %v7368_v6 = vor.u32 %v7754_v13, %v7365_v16  ;;  %v7477_v8 = vld [vmem:[%s13398_s12 + $0x1a8] sm:$0xf0]  ;;  %v5858_v32 = vperm.slane %v13029_v28, 6  ;;  %v7469_v10 = vld [vmem:[%s13398_s12 + $0x198] sm:$0xf0]  ;;  %v5874_v27 = vperm.slane %v13029_v28, 7 }
 0xbe5   : > { %6317 = vmatmul.bf16.vlgmr.msra.gmra.mxu0 %v5897_v18  ;;  %v7802_v43 = vld [vmem:[%s13400_s14 + $0x40] sm:$0xff] }
 0xbe6   : > { %6349 = vmatpush.bf16.msrb.mxu3 %v7384_v56  ;;  %v7782_v56 = vld [vmem:[%s13398_s12 + $0x1a4] sm:$0xf]  ;;  %v5866_v16 = vperm.slane %v5858_v32, 0  ;;  %v5882_v22 = vperm.slane %v5874_v27, 1 }
 0xbe7   : > { %v7480_v58 = vor.u32 %v7782_v56, %v7477_v8 }
 0xbe8   : > { %6325 = vmatpush.bf16.msrb.mxu2 %v7492_v34  ;;  %v7778_v34 = vld [vmem:[%s13398_s12 + $0x184] sm:$0xf] }
 0xbea   : > { %v5772_v39 = vpop.f32.mrf.mxu2  ;;  %6350 = vmatpush.bf16.msrb.mxu3 %v7376_v29  ;;  %v7780_v29 = vld [vmem:[%s13398_s12 + $0x194] sm:$0xf] }
 0xbeb   : > { %v5773_v12 = vadd.f32 %v5772_v39, %v5759_v35  ;;  %v5864_v39 = vperm.slane %v5856_v9, 0  ;;  %v7472_v13 = vor.u32 %v7780_v29, %v7469_v10 }
 0xbed   : > { %v5867_v19 = vmul.f32 %v5863_v25, %v5773_v12  ;;  %v7750_v25 = vld [vmem:[%s13398_s12 + $0xa4] sm:$0xf]  ;;  %v7344_v12 = vor.u32 %v7748_v44, %v7341_v48  ;;  %v7801_v48 = vld [vmem:[%s13400_s14 + $0x38] sm:$0xff] }
 0xbee   : > { %6351 = vmatpush.bf16.msrb.mxu3 %v7368_v6  ;;  %v7352_v49 = vor.u32 %v7750_v25, %v7349_v57  ;;  %v7461_v6 = vld [vmem:[%s13398_s12 + $0x188] sm:$0xf0] }
 0xbef   : > { %v5883_v50 = vadd.f32 %v5879_v55, %v5867_v19  ;;  %v7459_v55 = vld [vmem:[%s13398_s12 + $0x180] sm:$0xf]  ;;  %v7792_v19 = vld [vmem:[%s13398_s12 + $0x1f4] sm:$0xf]  ;;  %v7464_v5 = vor.u32 %v7778_v34, %v7461_v6 }
 0xbf0   : > { %v7460_v45 = vor.u32 %v7779_v36, %v7459_v55  ;;  %v7520_v60 = vor.u32 %v7792_v19, %v7517_v38  ;;  %v7809_v55 = vld [vmem:[%s13400_s14 + $0x78] sm:$0xff]  ;;  %v7796_v19 = vld [vmem:[%s13400_s14 + $0x10] sm:$0xff] }
 0xbf1   : > { %v5887_v52 = vmul.f32 0.2, %v5883_v50  ;;  %v7808_v38 = vld [vmem:[%s13400_s14 + $0x70] sm:$0xff] }
 0xbf2   : > { %v5774_v59 = vpop.f32.mrf.mxu2  ;;  %6352 = vmatpush.bf16.msrb.mxu3 %v7360_v4 }
 0xbf3   : > { %v5891_v35 = vmax.f32 %v5883_v50, %v5887_v52  ;;  %v5880_v50 = vperm.slane %v5872_v63, 1  ;;  %v7790_v59 = vld [vmem:[%s13398_s12 + $0x1e4] sm:$0xf]  ;;  %v7800_v63 = vld [vmem:[%s13400_s14 + $0x30] sm:$0xff] }
 0xbf5   : > { %v5895_v40 = vpack.c.bf16 %v5891_v35, %v5891_v35  ;;  %6369 = vmatmul.bf16.vlgmr.msrb.gmra.mxu0 %v5897_v18  ;;  %v7483_v18 = vld [vmem:[%s13398_s12 + $0x1b0] sm:$0xf]  ;;  %v7509_v35 = vld [vmem:[%s13398_s12 + $0x1e8] sm:$0xf0] }
 0xbf6   : > { %v7484_v47 = vor.u32 %v7785_v31, %v7483_v18  ;;  %6353 = vmatpush.bf16.msrb.mxu3 %v7352_v49 }
 0xbf7   : > { %6291 = vmatmul.bf16.vlgmr.msra.gmra.mxu1 %v5895_v40 }
 0xbf8   : > { %6326 = vmatpush.bf16.msrb.mxu2 %v7484_v47  ;;  %6542 = vmatpush.bf16.msra.mxu1 %v7801_v48 }
 0xbfa   : > { %6354 = vmatpush.bf16.msrb.mxu3 %v7344_v12  ;;  %v7797_v12 = vld [vmem:[%s13400_s14 + $0x18] sm:$0xff] }
 0xbfb   : > { %v5785_v30 = vpop.f32.mrf.mxu2 }
 0xbfc   : > { %6327 = vmatpush.bf16.msrb.mxu2 %v7476_v7  ;;  %6543 = vmatpush.bf16.msra.mxu1 %v7800_v63 }
 0xbfe   : > { %6355 = vmatpush.bf16.msrb.mxu3 %v7336_v3 }
 0xc00   : > { %6328 = vmatpush.bf16.msrb.mxu2 %v7468_v26  ;;  %v7798_v26 = vld [vmem:[%s13400_s14 + $0x20] sm:$0xff] }
 0xc03   : > { %v5787_v17 = vpop.f32.mrf.mxu2 }
 0xc04   : > { %6329 = vmatpush.bf16.msrb.mxu2 %v7460_v45  ;;  %v7794_v45 = vld [vmem:[%s13400_s14] sm:$0xff] }
 0xc07   : > { %6343 = vmatmul.bf16.vlgmr.msrb.gmra.mxu1 %v5895_v40  ;;  %v7512_v40 = vor.u32 %v7790_v59, %v7509_v35 }
 0xc08   : > { %6374 = vmatpush.bf16.msra.mxu2 %v7520_v60 }
 0xc0c   : > { %6375 = vmatpush.bf16.msra.mxu2 %v7512_v40  ;;  %v7803_v40 = vld [vmem:[%s13400_s14 + $0x48] sm:$0xff] }
 0xc1b   : > { %v5798_v0 = vpop.f32.mrf.mxu2 }
 0xc1c   : > { %v5799_v2 = vadd.f32 %v5798_v0, %v5785_v30  ;;  %v7501_v30 = vld [vmem:[%s13398_s12 + $0x1d8] sm:$0xf0] }
 0xc1d   : > { %v7504_v14 = vor.u32 %v7788_v62, %v7501_v30  ;;  %v7804_v62 = vld [vmem:[%s13400_s14 + $0x50] sm:$0xff] }
 0xc1e   : > { %v5868_v54 = vmul.f32 %v5864_v39, %v5799_v2  ;;  %v7799_v39 = vld [vmem:[%s13400_s14 + $0x28] sm:$0xff] }
 0xc1f   : > { %6376 = vmatpush.bf16.msra.mxu2 %v7504_v14  ;;  %6544 = vmatpush.bf16.msra.mxu1 %v7799_v39  ;;  %v7795_v2 = vld [vmem:[%s13400_s14 + $0x8] sm:$0xff] }
 0xc20   : > { %v5884_v52 = vadd.f32 %v5880_v50, %v5868_v54  ;;  %v7807_v50 = vld [vmem:[%s13400_s14 + $0x68] sm:$0xff]  ;;  %v7806_v54 = vld [vmem:[%s13400_s14 + $0x60] sm:$0xff] }
 0xc22   : > { %v5888_v51 = vmul.f32 0.2, %v5884_v52 }
 0xc23   : > { %v5800_v61 = vpop.f32.mrf.mxu2  ;;  %6377 = vmatpush.bf16.msra.mxu2 %v7496_v42  ;;  %6545 = vmatpush.bf16.msra.mxu1 %v7798_v26 }
 0xc24   : > { %v5892_v37 = vmax.f32 %v5884_v52, %v5888_v51  ;;  %v7805_v52 = vld [vmem:[%s13400_s14 + $0x58] sm:$0xff]  ;;  %v5363_v61 = vld [vmem:[%s13399_s13] sm:$0xf] }
 0xc25   : > { %v6388_v35 = vperm.slane %v5363_v61, 0  ;;  %v6397_v32 = vperm.slane %v5363_v61, 3 }
 0xc26   : > { %v5896_v17 = vpack.c.bf16 %v5892_v37, %v5892_v37  ;;  %v6396_v37 = vperm.slane %v5363_v61, 1 }
 0xc27   : > { %6378 = vmatpush.bf16.msra.mxu2 %v7488_v46  ;;  %6546 = vmatpush.bf16.msra.mxu1 %v7797_v12  ;;  %v6392_v30 = vperm.slane %v6388_v35, 0 }
 0xc28   : > { %6304 = vmatmul.bf16.vlgmr.msra.gmra.mxu3 %v5896_v17  ;;  %v6400_v33 = vperm.slane %v6396_v37, 1 }
 0xc29   : > { %6555 = vmatpush.bf16.msra.mxu3 %v7809_v55 }
 0xc2b   : > { %6379 = vmatpush.bf16.msra.mxu2 %v7480_v58  ;;  %6547 = vmatpush.bf16.msra.mxu1 %v7796_v19  ;;  %v6389_v58 = vperm.slane %v5363_v61, 2 }
 0xc2d   : > { %6556 = vmatpush.bf16.msra.mxu3 %v7808_v38  ;;  %v6393_v29 = vperm.slane %v6389_v58, 0 }
 0xc2f   : > { %6380 = vmatpush.bf16.msra.mxu2 %v7472_v13  ;;  %6548 = vmatpush.bf16.msra.mxu1 %v7795_v2  ;;  %v6401_v13 = vperm.slane %v6397_v32, 1 }
 0xc31   : > { %6557 = vmatpush.bf16.msra.mxu3 %v7807_v50 }
 0xc33   : > { %6381 = vmatpush.bf16.msra.mxu2 %v7464_v5  ;;  %6549 = vmatpush.bf16.msra.mxu1 %v7794_v45 }
 0xc35   : > { %6558 = vmatpush.bf16.msra.mxu3 %v7806_v54 }
 0xc38   : > { %6356 = vmatmul.bf16.vlgmr.msrb.gmra.mxu3 %v5896_v17 }
 0xc39   : > { %6559 = vmatpush.bf16.msra.mxu3 %v7805_v52 }
 0xc3b   : > { %v5850_v18 = vpop.f32.mrf.mxu2 }
 0xc3c   : > { %v5851_v31 = vadd.f32 %v5850_v18, %v13045_v23 }
 0xc3d   : > { %6560 = vmatpush.bf16.msra.mxu3 %v7804_v62 }
 0xc3e   : > { %v5870_v47 = vmul.f32 %v5866_v16, %v5851_v31 }
 0xc40   : > { %v5886_v28 = vadd.f32 %v5882_v22, %v5870_v47 }
 0xc41   : > { %6561 = vmatpush.bf16.msra.mxu3 %v7803_v40 }
 0xc42   : > { %v5890_v4 = vmul.f32 0.2, %v5886_v28 }
 0xc43   : > { %v5852_v21 = vpop.f32.mrf.mxu2 }
 0xc44   : > { %v5894_v1 = vmax.f32 %v5886_v28, %v5890_v4  ;;  %v7953_v28 = vld [vmem:[%s13401_s15] ss:$0 sm:$0xff] }
 0xc45   : > { %6562 = vmatpush.bf16.msra.mxu3 %v7802_v43 }
 0xc46   : > { %v5898_v25 = vpack.c.bf16 %v5894_v1, %v5894_v1 }
 0xc48   : > { %6330 = vmatmul.bf16.vlgmr.msrb.gmra.mxu2 %v5898_v25 }
 0xc58   : > { %6382 = vmatmul.bf16.vlgmr.msra.gmra.mxu2 %v5898_v25 }
 0xc62   : > { %v6318_v57 = vpop.f32.mrf.mxu0 }
 0xc6a   : > { %v6320_v9 = vpop.f32.mrf.mxu0 }
 0xc72   : > { %v6370_v7 = vpop.f32.mrf.mxu0 }
 0xc74   : > { %v6292_v49 = vpop.f32.mrf.mxu1 }
 0xc7a   : > { %v6372_v41 = vpop.f32.mrf.mxu0 }
 0xc7c   : > { %v6294_v20 = vpop.f32.mrf.mxu1 }
 0xc84   : > { %v6344_v44 = vpop.f32.mrf.mxu1 }
 0xc8c   : > { %v6346_v23 = vpop.f32.mrf.mxu1 }
 0xcab   : > { %v6305_v36 = vpop.f32.mrf.mxu3 }
 0xcac   : > { %v6306_v53 = vadd.f32 %v6305_v36, %v6292_v49 }
 0xcae   : > { %v6319_v0 = vadd.f32 %v6318_v57, %v6306_v53 }
 0xcb3   : > { %v6307_v11 = vpop.f32.mrf.mxu3 }
 0xcbb   : > { %v6357_v3 = vpop.f32.mrf.mxu3 }
 0xcbc   : > { %v6358_v60 = vadd.f32 %v6357_v3, %v6344_v44 }
 0xcbe   : > { %v6371_v51 = vadd.f32 %v6370_v7, %v6358_v60 }
 0xcc3   : > { %v6359_v59 = vpop.f32.mrf.mxu3 }
 0xccb   : > { %v6331_v17 = vpop.f32.mrf.mxu2 }
 0xccc   : > { %v6332_v14 = vadd.f32 %v6331_v17, %v6319_v0 }
 0xcce   : > { %v6394_v42 = vmul.f32 %v6392_v30, %v6332_v14 }
 0xcd0   : > { %v6402_v24 = vadd.f32 %v6400_v33, %v6394_v42 }
 0xcd2   : > { %v6404_v15 = vmul.f32 0.2, %v6402_v24 }
 0xcd3   : > { %v6333_v46 = vpop.f32.mrf.mxu2 }
 0xcd4   : > { %v6406_v56 = vmax.f32 %v6402_v24, %v6404_v15 }
 0xcd6   : > { %v6408_v8 = vpack.c.bf16 %v6406_v56, %v6406_v56 }
 0xcd8   : > { %6550 = vmatmul.bf16.vlgmr.msra.gmra.mxu1 %v6408_v8 }
 0xcdb   : > { %v6383_v10 = vpop.f32.mrf.mxu2 }
 0xcdc   : > { %v6384_v27 = vadd.f32 %v6383_v10, %v6371_v51 }
 0xcde   : > { %v6395_v16 = vmul.f32 %v6393_v29, %v6384_v27 }
 0xce0   : > { %v6403_v34 = vadd.f32 %v6401_v13, %v6395_v16 }
 0xce2   : > { %v6405_v6 = vmul.f32 0.2, %v6403_v34 }
 0xce3   : > { %v6385_v18 = vpop.f32.mrf.mxu2 }
 0xce4   : > { %v6407_v31 = vmax.f32 %v6403_v34, %v6405_v6 }
 0xce6   : > { %v6409_v22 = vpack.c.bf16 %v6407_v31, %v6407_v31 }
 0xce8   : > { %6563 = vmatmul.bf16.vlgmr.msra.gmra.mxu3 %v6409_v22 }
 0xd55   : > { %v6551_v5 = vpop.f32.mrf.mxu1 }
 0xd56   : > { %v6552_v4 = vadd.f32 %v7953_v28, %v6551_v5 }
 0xd5d   : > { %v6553_v47 = vpop.f32.mrf.mxu1 }
 0xd6b   : > { %v6564_v21 = vpop.f32.mrf.mxu3 }
 0xd6c   : > { %v6565_v1 = vadd.f32 %v6564_v21, %v6552_v4 }
 0xd6e   : > { %6569 = vst.msk [vmem:[%s527_s19] sm:$0x3] %vm6568_vm14, %v6565_v1 }
 0xd6f   : > { %8306 = shalt.err (!%p8303_p3)
}
 0xd70   : > { %7810 = dma.vmem_to_hbm [thread:$0]  (%p8471_p5), %s6584_s18, 32, %s6586_s20, %s6571_s25  }
 0xd73   : > { %v6566_v25 = vpop.f32.mrf.mxu3 }
 0xd74 PF: > { %p7816_p4 = scmp.ge.s32.totalorder %s8341_s24, 2  ;;  %s6597_s2 = sand.u32 1, %s8329_s21  }
 0xd75   : > { %s6598_s23 = scalar_lea.sflag [#allocation3], %s6597_s2 }
 0xd76   : > { %p7813_p7 = pnand %p7816_p4, %p8475_p6 }
 0xd78   : > { %p7814_p8 = pneg %p7813_p7 }
 0xd7a   : > { %8324 = dma.done.wait (%p7814_p8), %s6598_s23, 32  }
 0xd7b   : > { %8326 = vsyncadd (%p7814_p8), %s6598_s23, 4294967264  ;;  %s14297_s19 = sld [smem:[#allocation5_spill]]  ;;  %p26_p9 = scmp.ge.s32.totalorder %s8458_s27, 4  }
 0xd7c   : > { %s14298_s23 = sld [smem:[#allocation6_spill]]  ;;  %s14299_s21 = smov %s8333_s22 }
 0xd7d   : > { %s14301_s24 = smov %s8458_s27  ;;  %28 = sbr.rel (!%p26_p9) target bundleno = 9 (0x9), region = 122 }
 0xd81   : > { %s14300_s22 = smov %s14297_s19 }
 0xd82   :  { %6604 = vsyncpa [#allocation3], 1 }
 0xd83   :  { %6606 = vsyncpa [#allocation3 + $0x1], 1 }

</bundles_post_ra>
